<compile_context>
chip_gen: v5e
topology: v5e:2x2
jax: 0.10.0
libtpu: 0.0.40
codegen_flags: <defaults>
</compile_context>

<pallas_src>
import math

import jax
import jax.numpy as jnp
from jax.experimental import pallas as pl
from jax.experimental.pallas import tpu as pltpu


def _round_up(x, m):
    return (x + m - 1) // m * m


# ---------------------------------------------------------------------------
# Fused CrossAttention Pallas kernel (one (batch, M-tile) block per grid step)
# ---------------------------------------------------------------------------
def _cross_attention_kernel(xyz_ref, feat_ref, wx_ref, bx_ref, wkv_ref,
                            wfc_ref, bfc_ref, out_ref):
    _, tm, K, _ = xyz_ref.shape
    C = feat_ref.shape[-1]

    xyz = xyz_ref[0]            # (tm, K, 3)   relative, ball-normalized coords
    feat = feat_ref[0]          # (tm, K, C)   gathered neighbour features
    wx = wx_ref[...]            # (3, 7, C)    all 7 xyz 1x1-convs (Cin,head,Cout)
    bx = bx_ref[...]            # (7, C)
    # MXU weights as bf16 (tiny once-per-step cast); accumulation stays f32.
    wkv = wkv_ref[...].astype(jnp.bfloat16)     # (C, 2C)  k_mlp | v_mlp fused
    wfc = wfc_ref[...].astype(jnp.bfloat16)     # (3, C, C) [we1, we2, residual]
    bfc = bfc_ref[...]                          # (5, C)   [bk, bv, be1, be2, br]

    # ---- 7 xyz 1x1-convs fused on the VPU (contraction dim is only 3) ------
    # Hoist the three lane-broadcasts (JAX does not CSE broadcast_in_dim),
    # then each head is 3 FMAs; cheaper than 7 narrow (3->8 padded) MXU
    # matmuls.  Lane-dense (7C-wide) evaluation was considered but is only a
    # win if a bundle dump shows VALU saturation (v5e) -- not applied blindly.
    shape = (tm, K, C)
    x0 = jnp.broadcast_to(xyz[:, :, 0:1], shape)
    x1 = jnp.broadcast_to(xyz[:, :, 1:2], shape)
    x2 = jnp.broadcast_to(xyz[:, :, 2:3], shape)

    def xyz_linear(s):          # head order: q, pem_q, pem_k, pem_v, peb_q, peb_k, peb_v
        return x0 * wx[0, s] + x1 * wx[1, s] + x2 * wx[2, s] + bx[s]

    q_xyz = xyz_linear(0)                                            # (tm,K,C)
    # Batch the two positional self-attentions along the leading axis.
    # The 1/sqrt(C) softmax scale is pre-folded into heads 1 and 4 at pack time.
    q2 = jnp.concatenate([xyz_linear(1), xyz_linear(4)], axis=0)     # (2tm,K,C)
    k2 = jnp.concatenate([xyz_linear(2), xyz_linear(5)], axis=0)
    v2 = jnp.concatenate([xyz_linear(3), xyz_linear(6)], axis=0)

    # ---- both SelfAttention positional encodings in one batched pass -------
    s = jnp.einsum('bkc,bjc->bkj', q2, k2, preferred_element_type=jnp.float32)
    s = s - jnp.max(s, axis=-1, keepdims=True)
    e = jnp.exp(s)
    p = e * pl.reciprocal(jnp.sum(e, axis=-1, keepdims=True), approx=True)
    pe = jnp.einsum('bkj,bjc->bkc', p, v2, preferred_element_type=jnp.float32)
    pe = jnp.maximum(pe, 0.0)
    pem = pe[:tm]               # linear_p_multiplier output
    peb = pe[tm:]               # linear_p_bias output

    # ---- k_mlp / v_mlp fused into one (C, 2C) bf16 MXU matmul ---------------
    # Reshape in f32 (sublane-exact when K is a multiple of 8), then cast.
    kv = jnp.dot(feat.reshape(tm * K, C).astype(jnp.bfloat16), wkv,
                 preferred_element_type=jnp.float32)                 # (tm*K,2C)
    k_f = kv[:, :C].reshape(tm, K, C) + bfc[0]
    v_f = kv[:, C:].reshape(tm, K, C) + bfc[1]

    rel = (k_f - q_xyz) * pem + peb        # relation_qk
    val = v_f + peb                        # value + peb

    # ---- weight_encoding: Linear -> ReLU -> Linear (bf16 MXU, f32 acc) ------
    h = jnp.dot(rel.reshape(tm * K, C).astype(jnp.bfloat16), wfc[0],
                preferred_element_type=jnp.float32) + bfc[2]
    h = jnp.maximum(h, 0.0)
    w = jnp.dot(h.astype(jnp.bfloat16), wfc[1],
                preferred_element_type=jnp.float32) + bfc[3]
    w = w.reshape(tm, K, C)

    # ---- softmax over the K (neighbour) axis == PyTorch Softmax(dim=2) ------
    # This softmax scales the output directly, so normalize the POOLED feature
    # with an exact division (one (tm,C) divide) instead of an approximate
    # reciprocal on the full (tm,K,C) score tensor.
    w = w - jnp.max(w, axis=1, keepdims=True)
    e = jnp.exp(w)
    num = jnp.sum(e * val, axis=1)                                   # (tm, C)
    den = jnp.sum(e, axis=1)                                         # (tm, C)
    feature = num / den

    # ---- residual_emb: ReLU -> Linear ---------------------------------------
    out = jnp.dot(jnp.maximum(feature, 0.0).astype(jnp.bfloat16), wfc[2],
                  preferred_element_type=jnp.float32) + bfc[4]
    out_ref[0] = out.astype(out_ref.dtype)


# ---------------------------------------------------------------------------
# VMEM budgeting and M-tile selection
# ---------------------------------------------------------------------------
def _tpu_vmem_limit_bytes():
    """Per-generation scoped-VMEM budget: 64 MiB parts (v7x) -> 48 MiB,
    128 MiB parts (v5e/v6e) -> 96 MiB."""
    phys = 128 * 1024 * 1024
    try:
        phys = int(getattr(pltpu.get_tpu_info(), "vmem_capacity_bytes", phys)) or phys
    except Exception:
        try:
            if "v7" in jax.devices()[0].device_kind.lower():
                phys = 64 * 1024 * 1024
        except Exception:
            pass
    return min(96 * 1024 * 1024, max(16 * 1024 * 1024, phys * 3 // 4))


def _vmem_bytes_per_row(K, C, itemsize=4):
    """Conservative VMEM bytes per unit of tm (one dense point), including the
    (8,128) tile padding Mosaic applies to the minor dims."""
    lane = 128
    kp = max(8, _round_up(K, 8))
    row_kc = kp * _round_up(C, lane) * itemsize   # one (tm,K,C) f32 temp / row
    row_kk = kp * _round_up(K, lane) * itemsize   # one (tm,K,K) score temp / row
    row_x = kp * lane * itemsize                  # the (tm,K,3) xyz block / row
    inputs = 2 * (row_kc + row_x) + 2 * _round_up(C, lane) * itemsize  # 2x buffered
    temps = 18 * row_kc + 6 * row_kk              # generous live-temporary census
    return inputs + temps


def _choose_tm(M, B, K, C, vmem_limit, min_steps=4):
    """Pick tm to (1) minimise padded rows, (2) keep >= min_steps grid steps
    when possible (v7x has 2 TensorCores), (3) otherwise maximise the tile."""
    per_row = _vmem_bytes_per_row(K, C)
    cap = max(8, min(512, int(vmem_limit * 0.8) // per_row // 8 * 8))
    best_key, best_tm = None, 8
    for tm in range(8, cap + 1, 8):
        steps = -(-M // tm)
        key = (steps * tm - M,                      # wasted (padded) rows
               0 if B * steps >= min_steps else 1,  # enough steps for megacore
               -tm)                                 # then: biggest tile
        if best_key is None or key < best_key:
            best_key, best_tm = key, tm
    return best_tm


# ---------------------------------------------------------------------------
# pallas_call wrapper (channels-last grouped tensors in, (B, M, C) out)
# ---------------------------------------------------------------------------
def cross_attention(grouped_xyz, grouped_feature, packed):
    """grouped_xyz: (B, M, K, 3), grouped_feature: (B, M, K, C) (channels-last).
    Returns (B, M, C) -- identical to PyTorch CrossAttention.forward."""
    B, M, K, _ = grouped_xyz.shape
    C = grouped_feature.shape[-1]
    wx, bx, wkv, wfc, bfc = packed

    vmem_limit = _tpu_vmem_limit_bytes()
    tm = _choose_tm(M, B, K, C, vmem_limit)
    m_pad = -(-M // tm) * tm
    if m_pad != M:
        # Rare: only when no 8-aligned tile dividing M fits the VMEM budget.
        # TODO(synk): mask the ragged tail in-kernel instead of padding here.
        pad = ((0, 0), (0, m_pad - M), (0, 0), (0, 0))
        grouped_xyz = jnp.pad(grouped_xyz, pad)
        grouped_feature = jnp.pad(grouped_feature, pad)

    out = pl.pallas_call(
        _cross_attention_kernel,
        out_shape=jax.ShapeDtypeStruct((B, m_pad, C), jnp.float32),
        grid_spec=pltpu.PrefetchScalarGridSpec(
            num_scalar_prefetch=0,
            grid=(B, m_pad // tm),
            in_specs=[
                pl.BlockSpec((1, tm, K, 3), lambda b, m: (b, m, 0, 0)),
                pl.BlockSpec((1, tm, K, C), lambda b, m: (b, m, 0, 0)),
                # Weights/biases: constant index_map -> the pipeline only DMAs
                # them once and keeps them resident across all grid steps.
                pl.BlockSpec((3, 7, C), lambda b, m: (0, 0, 0)),
                pl.BlockSpec((7, C), lambda b, m: (0, 0)),
                pl.BlockSpec((C, 2 * C), lambda b, m: (0, 0)),
                pl.BlockSpec((3, C, C), lambda b, m: (0, 0, 0)),
                pl.BlockSpec((5, C), lambda b, m: (0, 0)),
            ],
            out_specs=pl.BlockSpec((1, tm, C), lambda b, m: (b, m, 0)),
        ),
        compiler_params=pltpu.CompilerParams(
            dimension_semantics=("parallel", "parallel"),
            vmem_limit_bytes=vmem_limit),
    )(grouped_xyz, grouped_feature, wx, bx, wkv, wfc, bfc)
    return out[:, :M, :]


# ---------------------------------------------------------------------------
# Plain-JAX glue for the UpSampling_KNN forward (KNN, gather, embeddings)
# ---------------------------------------------------------------------------
def _knn_indices(query, ref, k):
    # query: (B, M, 3), ref: (B, N, 3) -> (B, M, k) indices, nearest first.
    d2 = jnp.sum((query[:, :, None, :] - ref[:, None, :, :]) ** 2, axis=-1)
    _, idx = jax.lax.top_k(-d2, k)
    return idx


def _knn_gather(x, idx):
    # x: (B, P, D), idx: (B, M, K) -> (B, M, K, D)
    # TODO(synk): fold this gather into the Pallas kernel (scalar-prefetched
    # idx + memory_space=pl.ANY features + coalesced DMA gather) to avoid the
    # XLA-materialized (B,M,K,C) HBM round trip; per-row transfers are only
    # C*4 bytes so the DMAs must be batched per tile to beat the XLA gather.
    return jax.vmap(lambda xb, ib: xb[ib])(x, idx)


def _n_scale_ball(grouped_xyz, eps=1e-8):
    # TODO(synk): exact n_scale_ball definition is not part of the provided
    # spec; implemented as per-neighbourhood normalization into the unit ball.
    r = jnp.max(jnp.sqrt(jnp.sum(grouped_xyz ** 2, axis=-1, keepdims=True)),
                axis=2, keepdims=True)
    return grouped_xyz / jnp.maximum(r, eps)


def upsampling_knn(xyz, feature, xyz_dense, layers, *, kernel_size,
                   use_pallas=True):
    """xyz: (B,3,N), feature: (B,C,N), xyz_dense: (B,3,M)  (PyTorch layouts).
    Returns (xyz_dense (B,3,M), feature (B,C,M)) like the PyTorch module."""
    xyz_t = jnp.transpose(xyz, (0, 2, 1))            # (B, N, 3)
    feat = jnp.transpose(feature, (0, 2, 1))         # (B, N, C)
    dense_t = jnp.transpose(xyz_dense, (0, 2, 1))    # (B, M, 3)

    idx = _knn_indices(dense_t, xyz_t, kernel_size)                  # (B,M,K)
    gxyz = _knn_gather(xyz_t, idx) - dense_t[:, :, None, :]          # (B,M,K,3)
    gxyz = _n_scale_ball(gxyz)
    # Grouped tensors stay channels-last; the Pallas kernel consumes them
    # directly, so the PyTorch [B,C,K,M] <-> [B,M,K,C] HBM relayouts vanish.

    for lp in layers:
        feat = jax.nn.relu(
            jnp.einsum('bnc,oc->bno', feat, lp['wemb']) + lp['bemb'])
        gfeat = _knn_gather(feat, idx)                               # (B,M,K,C)
        if use_pallas:
            feat = cross_attention(gxyz, gfeat, lp['packed'])
        else:
            feat = cross_attention_ref(gxyz, gfeat, lp)
    return xyz_dense, jnp.transpose(feat, (0, 2, 1))


# ---------------------------------------------------------------------------
# Pure-JAX CrossAttention reference (mirrors the PyTorch forward exactly)
# ---------------------------------------------------------------------------
def cross_attention_ref(gxyz, gfeat, lp):
    C = gfeat.shape[-1]
    lin = lambda t, w, b: jnp.einsum('...i,oi->...o', t, w) + b

    def self_attn(wq, bq, wk, bk, wv, bv):
        q, k, v = lin(gxyz, wq, bq), lin(gxyz, wk, bk), lin(gxyz, wv, bv)
        s = jnp.einsum('bmkc,bmjc->bmkj', q, k) / math.sqrt(C)
        p = jax.nn.softmax(s, axis=-1)
        return jax.nn.relu(jnp.einsum('bmkj,bmjc->bmkc', p, v))

    w3, b3 = lp['w3'], lp['b3']
    q = lin(gxyz, w3[0], b3[0])
    k = lin(gfeat, lp['wk'], lp['bk'])
    v = lin(gfeat, lp['wv'], lp['bv'])
    pem = self_attn(w3[1], b3[1], w3[2], b3[2], w3[3], b3[3])
    peb = self_attn(w3[4], b3[4], w3[5], b3[5], w3[6], b3[6])
    rel = (k - q) * pem + peb
    val = v + peb
    h = jax.nn.relu(lin(rel, lp['we1'], lp['be1']))
    w = lin(h, lp['we2'], lp['be2'])
    score = jax.nn.softmax(w, axis=2)
    feature = jnp.sum(score * val, axis=2)
    return lin(jax.nn.relu(feature), lp['wr'], lp['br'])


# ---------------------------------------------------------------------------
# Deterministic parameter construction (shapes follow the PyTorch __init__)
# ---------------------------------------------------------------------------
def init_layer_params(key, C):
    ks = jax.random.split(key, 14)
    rnd = lambda k, shape, s: s * jax.random.normal(k, shape, jnp.float32)
    lp = dict(
        # xyz 1x1 convs, order [q, pem_q, pem_k, pem_v, peb_q, peb_k, peb_v]
        w3=rnd(ks[0], (7, C, 3), 0.3), b3=rnd(ks[1], (7, C), 0.05),
        wk=rnd(ks[2], (C, C), 0.2), bk=rnd(ks[3], (C,), 0.05),
        wv=rnd(ks[4], (C, C), 0.2), bv=rnd(ks[5], (C,), 0.05),
        we1=rnd(ks[6], (C, C), 0.2), be1=rnd(ks[7], (C,), 0.05),
        we2=rnd(ks[8], (C, C), 0.2), be2=rnd(ks[9], (C,), 0.05),
        wr=rnd(ks[10], (C, C), 0.2), br=rnd(ks[11], (C,), 0.05),
        wemb=rnd(ks[12], (C, C), 0.2), bemb=rnd(ks[13], (C,), 0.05),
    )
    # Kernel-side packing: (Cin, Cout) weights, k/v fused, xyz convs stacked.
    # Fold the 1/sqrt(C) softmax scale of both positional SelfAttentions into
    # their q-heads (indices 1 and 4) -- zero cost at pack time, removes a
    # full (2tm,K,K) VPU multiply per grid step.
    scale = 1.0 / math.sqrt(C)
    w3s = lp['w3'].at[1].multiply(scale).at[4].multiply(scale)
    b3s = lp['b3'].at[1].multiply(scale).at[4].multiply(scale)
    wx = jnp.transpose(w3s, (2, 0, 1))                           # (3, 7, C)
    bx = b3s                                                     # (7, C)
    wkv = jnp.concatenate([lp['wk'].T, lp['wv'].T], axis=1)      # (C, 2C)
    wfc = jnp.stack([lp['we1'].T, lp['we2'].T, lp['wr'].T])      # (3, C, C)
    bfc = jnp.stack([lp['bk'], lp['bv'], lp['be1'], lp['be2'], lp['br']])
    lp['packed'] = (wx, bx, wkv, wfc, bfc)
    return lp


if __name__ == "__main__":
    # Small but representative shapes: N sparse points upsampled to M dense
    # points, K neighbours, C channels, 2 stacked CrossAttention layers.
    B, C, N, M, K, NL = 2, 32, 16, 80, 8, 2
    kx, kf, kd, kp = jax.random.split(jax.random.PRNGKey(0), 4)
    xyz = jax.random.normal(kx, (B, 3, N), jnp.float32)
    feature = jax.random.normal(kf, (B, C, N), jnp.float32)
    xyz_dense = jax.random.normal(kd, (B, 3, M), jnp.float32)
    layers = [init_layer_params(k, C) for k in jax.random.split(kp, NL)]

    _, feat_out = upsampling_knn(xyz, feature, xyz_dense, layers,
                                 kernel_size=K, use_pallas=True)
    feat_out = jax.block_until_ready(feat_out)
    assert feat_out.shape == (B, C, M), feat_out.shape

    _, feat_ref = upsampling_knn(xyz, feature, xyz_dense, layers,
                                 kernel_size=K, use_pallas=False)
    err = float(jnp.max(jnp.abs(feat_out - feat_ref)))
    # Tolerance covers the bf16 MXU operands (f32 accumulation) and the single
    # EUP approximate reciprocal, compounded across two CrossAttention layers;
    # the reference runs entirely in f32.
    if not jnp.allclose(feat_out, feat_ref, atol=3e-2, rtol=5e-2):
        raise AssertionError(f"mismatch vs reference, max abs diff = {err}")
    print("KERNEL_OK")
</pallas_src>

<mosaic_0001>
module attributes {stable_mosaic.version = 11 : i64} {
  func.func @_cross_attention_kernel(%arg0: i32, %arg1: i32, %arg2: memref<1x40x8x3xf32, #tpu.memory_space<vmem>>, %arg3: memref<1x40x8x32xf32, #tpu.memory_space<vmem>>, %arg4: memref<3x7x32xf32, #tpu.memory_space<vmem>>, %arg5: memref<7x32xf32, #tpu.memory_space<vmem>>, %arg6: memref<32x64xf32, #tpu.memory_space<vmem>>, %arg7: memref<3x32x32xf32, #tpu.memory_space<vmem>>, %arg8: memref<5x32xf32, #tpu.memory_space<vmem>>, %arg9: memref<1x40x32xf32, #tpu.memory_space<vmem>>) attributes {dimension_semantics = [#tpu.dimension_semantics<parallel>, #tpu.dimension_semantics<parallel>], iteration_bounds = array<i64: 2, 2>, scalar_prefetch = 0 : i64, scratch_operands = 0 : i64, tpu.core_type = #tpu.core_type<tc>, window_params = [{transform_indices = @transform_0, window_bounds = array<i64: 1, 40, 8, 3>}, {transform_indices = @transform_1, window_bounds = array<i64: 1, 40, 8, 32>}, {pipeline_mode = #tpu.pipeline_mode<synchronous>, transform_indices = @transform_2, window_bounds = array<i64: 3, 7, 32>}, {pipeline_mode = #tpu.pipeline_mode<synchronous>, transform_indices = @transform_3, window_bounds = array<i64: 7, 32>}, {pipeline_mode = #tpu.pipeline_mode<synchronous>, transform_indices = @transform_4, window_bounds = array<i64: 32, 64>}, {pipeline_mode = #tpu.pipeline_mode<synchronous>, transform_indices = @transform_5, window_bounds = array<i64: 3, 32, 32>}, {pipeline_mode = #tpu.pipeline_mode<synchronous>, transform_indices = @transform_6, window_bounds = array<i64: 5, 32>}, {transform_indices = @transform_7, window_bounds = array<i64: 1, 40, 32>}]} {
    %c0 = arith.constant 0 : index
    %c0_0 = arith.constant 0 : index
    %c0_1 = arith.constant 0 : index
    %c0_2 = arith.constant 0 : index
    %0 = vector.load %arg2[%c0, %c0_0, %c0_1, %c0_2] : memref<1x40x8x3xf32, #tpu.memory_space<vmem>>, vector<1x40x8x3xf32>
    %1 = vector.shape_cast %0 : vector<1x40x8x3xf32> to vector<40x8x3xf32>
    %c0_3 = arith.constant 0 : index
    %c0_4 = arith.constant 0 : index
    %c0_5 = arith.constant 0 : index
    %c0_6 = arith.constant 0 : index
    %2 = vector.load %arg3[%c0_3, %c0_4, %c0_5, %c0_6] : memref<1x40x8x32xf32, #tpu.memory_space<vmem>>, vector<1x40x8x32xf32>
    %3 = vector.shape_cast %2 : vector<1x40x8x32xf32> to vector<40x8x32xf32>
    %c0_7 = arith.constant 0 : index
    %c0_8 = arith.constant 0 : index
    %c0_9 = arith.constant 0 : index
    %4 = vector.load %arg4[%c0_7, %c0_8, %c0_9] : memref<3x7x32xf32, #tpu.memory_space<vmem>>, vector<3x7x32xf32>
    %c0_10 = arith.constant 0 : index
    %c0_11 = arith.constant 0 : index
    %5 = vector.load %arg5[%c0_10, %c0_11] : memref<7x32xf32, #tpu.memory_space<vmem>>, vector<7x32xf32>
    %c0_12 = arith.constant 0 : index
    %c0_13 = arith.constant 0 : index
    %6 = vector.load %arg6[%c0_12, %c0_13] : memref<32x64xf32, #tpu.memory_space<vmem>>, vector<32x64xf32>
    %7 = arith.truncf %6 : vector<32x64xf32> to vector<32x64xbf16>
    %c0_14 = arith.constant 0 : index
    %c0_15 = arith.constant 0 : index
    %c0_16 = arith.constant 0 : index
    %8 = vector.load %arg7[%c0_14, %c0_15, %c0_16] : memref<3x32x32xf32, #tpu.memory_space<vmem>>, vector<3x32x32xf32>
    %9 = arith.truncf %8 : vector<3x32x32xf32> to vector<3x32x32xbf16>
    %c0_17 = arith.constant 0 : index
    %c0_18 = arith.constant 0 : index
    %10 = vector.load %arg8[%c0_17, %c0_18] : memref<5x32xf32, #tpu.memory_space<vmem>>, vector<5x32xf32>
    %11 = vector.extract_strided_slice %1 {offsets = [0, 0, 0], sizes = [40, 8, 1], strides = [1, 1, 1]} : vector<40x8x3xf32> to vector<40x8x1xf32>
    %12 = vector.shape_cast %11 : vector<40x8x1xf32> to vector<40x8x1xf32>
    %13 = vector.broadcast %12 : vector<40x8x1xf32> to vector<40x8x32xf32>
    %14 = vector.extract_strided_slice %1 {offsets = [0, 0, 1], sizes = [40, 8, 1], strides = [1, 1, 1]} : vector<40x8x3xf32> to vector<40x8x1xf32>
    %15 = vector.shape_cast %14 : vector<40x8x1xf32> to vector<40x8x1xf32>
    %16 = vector.broadcast %15 : vector<40x8x1xf32> to vector<40x8x32xf32>
    %17 = vector.extract_strided_slice %1 {offsets = [0, 0, 2], sizes = [40, 8, 1], strides = [1, 1, 1]} : vector<40x8x3xf32> to vector<40x8x1xf32>
    %18 = vector.shape_cast %17 : vector<40x8x1xf32> to vector<40x8x1xf32>
    %19 = vector.broadcast %18 : vector<40x8x1xf32> to vector<40x8x32xf32>
    %20 = vector.extract_strided_slice %4 {offsets = [0, 0, 0], sizes = [1, 1, 32], strides = [1, 1, 1]} : vector<3x7x32xf32> to vector<1x1x32xf32>
    %21 = vector.shape_cast %20 : vector<1x1x32xf32> to vector<32xf32>
    %22 = vector.shape_cast %21 : vector<32xf32> to vector<1x1x32xf32>
    %23 = vector.broadcast %22 : vector<1x1x32xf32> to vector<40x8x32xf32>
    %24 = arith.mulf %13, %23 : vector<40x8x32xf32>
    %25 = vector.extract_strided_slice %4 {offsets = [1, 0, 0], sizes = [1, 1, 32], strides = [1, 1, 1]} : vector<3x7x32xf32> to vector<1x1x32xf32>
    %26 = vector.shape_cast %25 : vector<1x1x32xf32> to vector<32xf32>
    %27 = vector.shape_cast %26 : vector<32xf32> to vector<1x1x32xf32>
    %28 = vector.broadcast %27 : vector<1x1x32xf32> to vector<40x8x32xf32>
    %29 = arith.mulf %16, %28 : vector<40x8x32xf32>
    %30 = arith.addf %24, %29 : vector<40x8x32xf32>
    %31 = vector.extract_strided_slice %4 {offsets = [2, 0, 0], sizes = [1, 1, 32], strides = [1, 1, 1]} : vector<3x7x32xf32> to vector<1x1x32xf32>
    %32 = vector.shape_cast %31 : vector<1x1x32xf32> to vector<32xf32>
    %33 = vector.shape_cast %32 : vector<32xf32> to vector<1x1x32xf32>
    %34 = vector.broadcast %33 : vector<1x1x32xf32> to vector<40x8x32xf32>
    %35 = arith.mulf %19, %34 : vector<40x8x32xf32>
    %36 = arith.addf %30, %35 : vector<40x8x32xf32>
    %37 = vector.extract_strided_slice %5 {offsets = [0, 0], sizes = [1, 32], strides = [1, 1]} : vector<7x32xf32> to vector<1x32xf32>
    %38 = vector.shape_cast %37 : vector<1x32xf32> to vector<32xf32>
    %39 = vector.shape_cast %38 : vector<32xf32> to vector<1x1x32xf32>
    %40 = vector.broadcast %39 : vector<1x1x32xf32> to vector<40x8x32xf32>
    %41 = arith.addf %36, %40 : vector<40x8x32xf32>
    %42 = vector.extract_strided_slice %4 {offsets = [0, 1, 0], sizes = [1, 1, 32], strides = [1, 1, 1]} : vector<3x7x32xf32> to vector<1x1x32xf32>
    %43 = vector.shape_cast %42 : vector<1x1x32xf32> to vector<32xf32>
    %44 = vector.shape_cast %43 : vector<32xf32> to vector<1x1x32xf32>
    %45 = vector.broadcast %44 : vector<1x1x32xf32> to vector<40x8x32xf32>
    %46 = arith.mulf %13, %45 : vector<40x8x32xf32>
    %47 = vector.extract_strided_slice %4 {offsets = [1, 1, 0], sizes = [1, 1, 32], strides = [1, 1, 1]} : vector<3x7x32xf32> to vector<1x1x32xf32>
    %48 = vector.shape_cast %47 : vector<1x1x32xf32> to vector<32xf32>
    %49 = vector.shape_cast %48 : vector<32xf32> to vector<1x1x32xf32>
    %50 = vector.broadcast %49 : vector<1x1x32xf32> to vector<40x8x32xf32>
    %51 = arith.mulf %16, %50 : vector<40x8x32xf32>
    %52 = arith.addf %46, %51 : vector<40x8x32xf32>
    %53 = vector.extract_strided_slice %4 {offsets = [2, 1, 0], sizes = [1, 1, 32], strides = [1, 1, 1]} : vector<3x7x32xf32> to vector<1x1x32xf32>
    %54 = vector.shape_cast %53 : vector<1x1x32xf32> to vector<32xf32>
    %55 = vector.shape_cast %54 : vector<32xf32> to vector<1x1x32xf32>
    %56 = vector.broadcast %55 : vector<1x1x32xf32> to vector<40x8x32xf32>
    %57 = arith.mulf %19, %56 : vector<40x8x32xf32>
    %58 = arith.addf %52, %57 : vector<40x8x32xf32>
    %59 = vector.extract_strided_slice %5 {offsets = [1, 0], sizes = [1, 32], strides = [1, 1]} : vector<7x32xf32> to vector<1x32xf32>
    %60 = vector.shape_cast %59 : vector<1x32xf32> to vector<32xf32>
    %61 = vector.shape_cast %60 : vector<32xf32> to vector<1x1x32xf32>
    %62 = vector.broadcast %61 : vector<1x1x32xf32> to vector<40x8x32xf32>
    %63 = arith.addf %58, %62 : vector<40x8x32xf32>
    %64 = vector.extract_strided_slice %4 {offsets = [0, 4, 0], sizes = [1, 1, 32], strides = [1, 1, 1]} : vector<3x7x32xf32> to vector<1x1x32xf32>
    %65 = vector.shape_cast %64 : vector<1x1x32xf32> to vector<32xf32>
    %66 = vector.shape_cast %65 : vector<32xf32> to vector<1x1x32xf32>
    %67 = vector.broadcast %66 : vector<1x1x32xf32> to vector<40x8x32xf32>
    %68 = arith.mulf %13, %67 : vector<40x8x32xf32>
    %69 = vector.extract_strided_slice %4 {offsets = [1, 4, 0], sizes = [1, 1, 32], strides = [1, 1, 1]} : vector<3x7x32xf32> to vector<1x1x32xf32>
    %70 = vector.shape_cast %69 : vector<1x1x32xf32> to vector<32xf32>
    %71 = vector.shape_cast %70 : vector<32xf32> to vector<1x1x32xf32>
    %72 = vector.broadcast %71 : vector<1x1x32xf32> to vector<40x8x32xf32>
    %73 = arith.mulf %16, %72 : vector<40x8x32xf32>
    %74 = arith.addf %68, %73 : vector<40x8x32xf32>
    %75 = vector.extract_strided_slice %4 {offsets = [2, 4, 0], sizes = [1, 1, 32], strides = [1, 1, 1]} : vector<3x7x32xf32> to vector<1x1x32xf32>
    %76 = vector.shape_cast %75 : vector<1x1x32xf32> to vector<32xf32>
    %77 = vector.shape_cast %76 : vector<32xf32> to vector<1x1x32xf32>
    %78 = vector.broadcast %77 : vector<1x1x32xf32> to vector<40x8x32xf32>
    %79 = arith.mulf %19, %78 : vector<40x8x32xf32>
    %80 = arith.addf %74, %79 : vector<40x8x32xf32>
    %81 = vector.extract_strided_slice %5 {offsets = [4, 0], sizes = [1, 32], strides = [1, 1]} : vector<7x32xf32> to vector<1x32xf32>
    %82 = vector.shape_cast %81 : vector<1x32xf32> to vector<32xf32>
    %83 = vector.shape_cast %82 : vector<32xf32> to vector<1x1x32xf32>
    %84 = vector.broadcast %83 : vector<1x1x32xf32> to vector<40x8x32xf32>
    %85 = arith.addf %80, %84 : vector<40x8x32xf32>
    %86 = tpu.concatenate %63, %85 in 0 : vector<40x8x32xf32>, vector<40x8x32xf32> -> vector<80x8x32xf32>
    %87 = vector.extract_strided_slice %4 {offsets = [0, 2, 0], sizes = [1, 1, 32], strides = [1, 1, 1]} : vector<3x7x32xf32> to vector<1x1x32xf32>
    %88 = vector.shape_cast %87 : vector<1x1x32xf32> to vector<32xf32>
    %89 = vector.shape_cast %88 : vector<32xf32> to vector<1x1x32xf32>
    %90 = vector.broadcast %89 : vector<1x1x32xf32> to vector<40x8x32xf32>
    %91 = arith.mulf %13, %90 : vector<40x8x32xf32>
    %92 = vector.extract_strided_slice %4 {offsets = [1, 2, 0], sizes = [1, 1, 32], strides = [1, 1, 1]} : vector<3x7x32xf32> to vector<1x1x32xf32>
    %93 = vector.shape_cast %92 : vector<1x1x32xf32> to vector<32xf32>
    %94 = vector.shape_cast %93 : vector<32xf32> to vector<1x1x32xf32>
    %95 = vector.broadcast %94 : vector<1x1x32xf32> to vector<40x8x32xf32>
    %96 = arith.mulf %16, %95 : vector<40x8x32xf32>
    %97 = arith.addf %91, %96 : vector<40x8x32xf32>
    %98 = vector.extract_strided_slice %4 {offsets = [2, 2, 0], sizes = [1, 1, 32], strides = [1, 1, 1]} : vector<3x7x32xf32> to vector<1x1x32xf32>
    %99 = vector.shape_cast %98 : vector<1x1x32xf32> to vector<32xf32>
    %100 = vector.shape_cast %99 : vector<32xf32> to vector<1x1x32xf32>
    %101 = vector.broadcast %100 : vector<1x1x32xf32> to vector<40x8x32xf32>
    %102 = arith.mulf %19, %101 : vector<40x8x32xf32>
    %103 = arith.addf %97, %102 : vector<40x8x32xf32>
    %104 = vector.extract_strided_slice %5 {offsets = [2, 0], sizes = [1, 32], strides = [1, 1]} : vector<7x32xf32> to vector<1x32xf32>
    %105 = vector.shape_cast %104 : vector<1x32xf32> to vector<32xf32>
    %106 = vector.shape_cast %105 : vector<32xf32> to vector<1x1x32xf32>
    %107 = vector.broadcast %106 : vector<1x1x32xf32> to vector<40x8x32xf32>
    %108 = arith.addf %103, %107 : vector<40x8x32xf32>
    %109 = vector.extract_strided_slice %4 {offsets = [0, 5, 0], sizes = [1, 1, 32], strides = [1, 1, 1]} : vector<3x7x32xf32> to vector<1x1x32xf32>
    %110 = vector.shape_cast %109 : vector<1x1x32xf32> to vector<32xf32>
    %111 = vector.shape_cast %110 : vector<32xf32> to vector<1x1x32xf32>
    %112 = vector.broadcast %111 : vector<1x1x32xf32> to vector<40x8x32xf32>
    %113 = arith.mulf %13, %112 : vector<40x8x32xf32>
    %114 = vector.extract_strided_slice %4 {offsets = [1, 5, 0], sizes = [1, 1, 32], strides = [1, 1, 1]} : vector<3x7x32xf32> to vector<1x1x32xf32>
    %115 = vector.shape_cast %114 : vector<1x1x32xf32> to vector<32xf32>
    %116 = vector.shape_cast %115 : vector<32xf32> to vector<1x1x32xf32>
    %117 = vector.broadcast %116 : vector<1x1x32xf32> to vector<40x8x32xf32>
    %118 = arith.mulf %16, %117 : vector<40x8x32xf32>
    %119 = arith.addf %113, %118 : vector<40x8x32xf32>
    %120 = vector.extract_strided_slice %4 {offsets = [2, 5, 0], sizes = [1, 1, 32], strides = [1, 1, 1]} : vector<3x7x32xf32> to vector<1x1x32xf32>
    %121 = vector.shape_cast %120 : vector<1x1x32xf32> to vector<32xf32>
    %122 = vector.shape_cast %121 : vector<32xf32> to vector<1x1x32xf32>
    %123 = vector.broadcast %122 : vector<1x1x32xf32> to vector<40x8x32xf32>
    %124 = arith.mulf %19, %123 : vector<40x8x32xf32>
    %125 = arith.addf %119, %124 : vector<40x8x32xf32>
    %126 = vector.extract_strided_slice %5 {offsets = [5, 0], sizes = [1, 32], strides = [1, 1]} : vector<7x32xf32> to vector<1x32xf32>
    %127 = vector.shape_cast %126 : vector<1x32xf32> to vector<32xf32>
    %128 = vector.shape_cast %127 : vector<32xf32> to vector<1x1x32xf32>
    %129 = vector.broadcast %128 : vector<1x1x32xf32> to vector<40x8x32xf32>
    %130 = arith.addf %125, %129 : vector<40x8x32xf32>
    %131 = tpu.concatenate %108, %130 in 0 : vector<40x8x32xf32>, vector<40x8x32xf32> -> vector<80x8x32xf32>
    %132 = vector.extract_strided_slice %4 {offsets = [0, 3, 0], sizes = [1, 1, 32], strides = [1, 1, 1]} : vector<3x7x32xf32> to vector<1x1x32xf32>
    %133 = vector.shape_cast %132 : vector<1x1x32xf32> to vector<32xf32>
    %134 = vector.shape_cast %133 : vector<32xf32> to vector<1x1x32xf32>
    %135 = vector.broadcast %134 : vector<1x1x32xf32> to vector<40x8x32xf32>
    %136 = arith.mulf %13, %135 : vector<40x8x32xf32>
    %137 = vector.extract_strided_slice %4 {offsets = [1, 3, 0], sizes = [1, 1, 32], strides = [1, 1, 1]} : vector<3x7x32xf32> to vector<1x1x32xf32>
    %138 = vector.shape_cast %137 : vector<1x1x32xf32> to vector<32xf32>
    %139 = vector.shape_cast %138 : vector<32xf32> to vector<1x1x32xf32>
    %140 = vector.broadcast %139 : vector<1x1x32xf32> to vector<40x8x32xf32>
    %141 = arith.mulf %16, %140 : vector<40x8x32xf32>
    %142 = arith.addf %136, %141 : vector<40x8x32xf32>
    %143 = vector.extract_strided_slice %4 {offsets = [2, 3, 0], sizes = [1, 1, 32], strides = [1, 1, 1]} : vector<3x7x32xf32> to vector<1x1x32xf32>
    %144 = vector.shape_cast %143 : vector<1x1x32xf32> to vector<32xf32>
    %145 = vector.shape_cast %144 : vector<32xf32> to vector<1x1x32xf32>
    %146 = vector.broadcast %145 : vector<1x1x32xf32> to vector<40x8x32xf32>
    %147 = arith.mulf %19, %146 : vector<40x8x32xf32>
    %148 = arith.addf %142, %147 : vector<40x8x32xf32>
    %149 = vector.extract_strided_slice %5 {offsets = [3, 0], sizes = [1, 32], strides = [1, 1]} : vector<7x32xf32> to vector<1x32xf32>
    %150 = vector.shape_cast %149 : vector<1x32xf32> to vector<32xf32>
    %151 = vector.shape_cast %150 : vector<32xf32> to vector<1x1x32xf32>
    %152 = vector.broadcast %151 : vector<1x1x32xf32> to vector<40x8x32xf32>
    %153 = arith.addf %148, %152 : vector<40x8x32xf32>
    %154 = vector.extract_strided_slice %4 {offsets = [0, 6, 0], sizes = [1, 1, 32], strides = [1, 1, 1]} : vector<3x7x32xf32> to vector<1x1x32xf32>
    %155 = vector.shape_cast %154 : vector<1x1x32xf32> to vector<32xf32>
    %156 = vector.shape_cast %155 : vector<32xf32> to vector<1x1x32xf32>
    %157 = vector.broadcast %156 : vector<1x1x32xf32> to vector<40x8x32xf32>
    %158 = arith.mulf %13, %157 : vector<40x8x32xf32>
    %159 = vector.extract_strided_slice %4 {offsets = [1, 6, 0], sizes = [1, 1, 32], strides = [1, 1, 1]} : vector<3x7x32xf32> to vector<1x1x32xf32>
    %160 = vector.shape_cast %159 : vector<1x1x32xf32> to vector<32xf32>
    %161 = vector.shape_cast %160 : vector<32xf32> to vector<1x1x32xf32>
    %162 = vector.broadcast %161 : vector<1x1x32xf32> to vector<40x8x32xf32>
    %163 = arith.mulf %16, %162 : vector<40x8x32xf32>
    %164 = arith.addf %158, %163 : vector<40x8x32xf32>
    %165 = vector.extract_strided_slice %4 {offsets = [2, 6, 0], sizes = [1, 1, 32], strides = [1, 1, 1]} : vector<3x7x32xf32> to vector<1x1x32xf32>
    %166 = vector.shape_cast %165 : vector<1x1x32xf32> to vector<32xf32>
    %167 = vector.shape_cast %166 : vector<32xf32> to vector<1x1x32xf32>
    %168 = vector.broadcast %167 : vector<1x1x32xf32> to vector<40x8x32xf32>
    %169 = arith.mulf %19, %168 : vector<40x8x32xf32>
    %170 = arith.addf %164, %169 : vector<40x8x32xf32>
    %171 = vector.extract_strided_slice %5 {offsets = [6, 0], sizes = [1, 32], strides = [1, 1]} : vector<7x32xf32> to vector<1x32xf32>
    %172 = vector.shape_cast %171 : vector<1x32xf32> to vector<32xf32>
    %173 = vector.shape_cast %172 : vector<32xf32> to vector<1x1x32xf32>
    %174 = vector.broadcast %173 : vector<1x1x32xf32> to vector<40x8x32xf32>
    %175 = arith.addf %170, %174 : vector<40x8x32xf32>
    %176 = tpu.concatenate %153, %175 in 0 : vector<40x8x32xf32>, vector<40x8x32xf32> -> vector<80x8x32xf32>
    "tpu.trace_start"() <{level = 10 : i32, message = "bkc,bjc->bkj"}> : () -> ()
    %cst = arith.constant dense<0.000000e+00> : vector<80x8x8xf32>
    %177 = tpu.matmul %86, %131, %cst {dimension_numbers = #tpu.dot_dimension_numbers<[2], [2], [1], [1], [0, 0, 0, 1, 1, 1], [0], [0]>} : vector<80x8x32xf32>, vector<80x8x32xf32>, vector<80x8x8xf32> -> vector<80x8x8xf32>
    "tpu.trace_stop"() : () -> ()
    %cst_19 = arith.constant dense<0xFF800000> : vector<80x8xf32>
    %178 = vector.multi_reduction <maximumf>, %177, %cst_19 [2] : vector<80x8x8xf32> to vector<80x8xf32>
    %179 = vector.shape_cast %178 : vector<80x8xf32> to vector<80x8x1xf32>
    %180 = vector.broadcast %179 : vector<80x8x1xf32> to vector<80x8x8xf32>
    %181 = arith.subf %177, %180 : vector<80x8x8xf32>
    %182 = math.exp %181 : vector<80x8x8xf32>
    %cst_20 = arith.constant dense<0.000000e+00> : vector<80x8xf32>
    %183 = vector.multi_reduction <add>, %182, %cst_20 [2] : vector<80x8x8xf32> to vector<80x8xf32>
    %184 = vector.shape_cast %183 : vector<80x8xf32> to vector<80x8x1xf32>
    %185 = tpu.reciprocal %184 {approx = true} : vector<80x8x1xf32> -> vector<80x8x1xf32>
    %186 = vector.broadcast %185 : vector<80x8x1xf32> to vector<80x8x8xf32>
    %187 = arith.mulf %182, %186 : vector<80x8x8xf32>
    "tpu.trace_start"() <{level = 10 : i32, message = "bkj,bjc->bkc"}> : () -> ()
    %cst_21 = arith.constant dense<0.000000e+00> : vector<80x8x32xf32>
    %188 = tpu.matmul %187, %176, %cst_21 {dimension_numbers = #tpu.dot_dimension_numbers<[2], [1], [1], [2], [0, 0, 0, 1, 1, 2], [0], [0]>} : vector<80x8x8xf32>, vector<80x8x32xf32>, vector<80x8x32xf32> -> vector<80x8x32xf32>
    "tpu.trace_stop"() : () -> ()
    %cst_22 = arith.constant 0.000000e+00 : f32
    %189 = vector.broadcast %cst_22 : f32 to vector<80x8x32xf32>
    %190 = arith.maximumf %188, %189 : vector<80x8x32xf32>
    %191 = vector.extract_strided_slice %190 {offsets = [0, 0, 0], sizes = [40, 8, 32], strides = [1, 1, 1]} : vector<80x8x32xf32> to vector<40x8x32xf32>
    %192 = vector.extract_strided_slice %190 {offsets = [40, 0, 0], sizes = [40, 8, 32], strides = [1, 1, 1]} : vector<80x8x32xf32> to vector<40x8x32xf32>
    %193 = vector.shape_cast %3 : vector<40x8x32xf32> to vector<320x32xf32>
    %194 = arith.truncf %193 : vector<320x32xf32> to vector<320x32xbf16>
    %cst_23 = arith.constant dense<0.000000e+00> : vector<320x64xf32>
    %195 = tpu.matmul %194, %7, %cst_23 {dimension_numbers = #tpu.dot_dimension_numbers<[1], [0], [0], [1], [0, 0, 1, 1], [], []>} : vector<320x32xbf16>, vector<32x64xbf16>, vector<320x64xf32> -> vector<320x64xf32>
    %196 = vector.extract_strided_slice %195 {offsets = [0, 0], sizes = [320, 32], strides = [1, 1]} : vector<320x64xf32> to vector<320x32xf32>
    %197 = vector.shape_cast %196 : vector<320x32xf32> to vector<40x8x32xf32>
    %198 = vector.extract_strided_slice %10 {offsets = [0, 0], sizes = [1, 32], strides = [1, 1]} : vector<5x32xf32> to vector<1x32xf32>
    %199 = vector.shape_cast %198 : vector<1x32xf32> to vector<32xf32>
    %200 = vector.shape_cast %199 : vector<32xf32> to vector<1x1x32xf32>
    %201 = vector.broadcast %200 : vector<1x1x32xf32> to vector<40x8x32xf32>
    %202 = arith.addf %197, %201 : vector<40x8x32xf32>
    %203 = vector.extract_strided_slice %195 {offsets = [0, 32], sizes = [320, 32], strides = [1, 1]} : vector<320x64xf32> to vector<320x32xf32>
    %204 = vector.shape_cast %203 : vector<320x32xf32> to vector<40x8x32xf32>
    %205 = vector.extract_strided_slice %10 {offsets = [1, 0], sizes = [1, 32], strides = [1, 1]} : vector<5x32xf32> to vector<1x32xf32>
    %206 = vector.shape_cast %205 : vector<1x32xf32> to vector<32xf32>
    %207 = vector.shape_cast %206 : vector<32xf32> to vector<1x1x32xf32>
    %208 = vector.broadcast %207 : vector<1x1x32xf32> to vector<40x8x32xf32>
    %209 = arith.addf %204, %208 : vector<40x8x32xf32>
    %210 = arith.subf %202, %41 : vector<40x8x32xf32>
    %211 = arith.mulf %210, %191 : vector<40x8x32xf32>
    %212 = arith.addf %211, %192 : vector<40x8x32xf32>
    %213 = arith.addf %209, %192 : vector<40x8x32xf32>
    %214 = vector.shape_cast %212 : vector<40x8x32xf32> to vector<320x32xf32>
    %215 = arith.truncf %214 : vector<320x32xf32> to vector<320x32xbf16>
    %216 = vector.extract_strided_slice %9 {offsets = [0, 0, 0], sizes = [1, 32, 32], strides = [1, 1, 1]} : vector<3x32x32xbf16> to vector<1x32x32xbf16>
    %217 = vector.shape_cast %216 : vector<1x32x32xbf16> to vector<32x32xbf16>
    %cst_24 = arith.constant dense<0.000000e+00> : vector<320x32xf32>
    %218 = tpu.matmul %215, %217, %cst_24 {dimension_numbers = #tpu.dot_dimension_numbers<[1], [0], [0], [1], [0, 0, 1, 1], [], []>} : vector<320x32xbf16>, vector<32x32xbf16>, vector<320x32xf32> -> vector<320x32xf32>
    %219 = vector.extract_strided_slice %10 {offsets = [2, 0], sizes = [1, 32], strides = [1, 1]} : vector<5x32xf32> to vector<1x32xf32>
    %220 = vector.shape_cast %219 : vector<1x32xf32> to vector<32xf32>
    %221 = vector.shape_cast %220 : vector<32xf32> to vector<1x32xf32>
    %222 = vector.broadcast %221 : vector<1x32xf32> to vector<320x32xf32>
    %223 = arith.addf %218, %222 : vector<320x32xf32>
    %cst_25 = arith.constant 0.000000e+00 : f32
    %224 = vector.broadcast %cst_25 : f32 to vector<320x32xf32>
    %225 = arith.maximumf %223, %224 : vector<320x32xf32>
    %226 = arith.truncf %225 : vector<320x32xf32> to vector<320x32xbf16>
    %227 = vector.extract_strided_slice %9 {offsets = [1, 0, 0], sizes = [1, 32, 32], strides = [1, 1, 1]} : vector<3x32x32xbf16> to vector<1x32x32xbf16>
    %228 = vector.shape_cast %227 : vector<1x32x32xbf16> to vector<32x32xbf16>
    %cst_26 = arith.constant dense<0.000000e+00> : vector<320x32xf32>
    %229 = tpu.matmul %226, %228, %cst_26 {dimension_numbers = #tpu.dot_dimension_numbers<[1], [0], [0], [1], [0, 0, 1, 1], [], []>} : vector<320x32xbf16>, vector<32x32xbf16>, vector<320x32xf32> -> vector<320x32xf32>
    %230 = vector.extract_strided_slice %10 {offsets = [3, 0], sizes = [1, 32], strides = [1, 1]} : vector<5x32xf32> to vector<1x32xf32>
    %231 = vector.shape_cast %230 : vector<1x32xf32> to vector<32xf32>
    %232 = vector.shape_cast %231 : vector<32xf32> to vector<1x32xf32>
    %233 = vector.broadcast %232 : vector<1x32xf32> to vector<320x32xf32>
    %234 = arith.addf %229, %233 : vector<320x32xf32>
    %235 = vector.shape_cast %234 : vector<320x32xf32> to vector<40x8x32xf32>
    %cst_27 = arith.constant dense<0xFF800000> : vector<40x32xf32>
    %236 = vector.multi_reduction <maximumf>, %235, %cst_27 [1] : vector<40x8x32xf32> to vector<40x32xf32>
    %237 = vector.shape_cast %236 : vector<40x32xf32> to vector<40x1x32xf32>
    %238 = vector.broadcast %237 : vector<40x1x32xf32> to vector<40x8x32xf32>
    %239 = arith.subf %235, %238 : vector<40x8x32xf32>
    %240 = math.exp %239 : vector<40x8x32xf32>
    %241 = arith.mulf %240, %213 : vector<40x8x32xf32>
    %cst_28 = arith.constant dense<0.000000e+00> : vector<40x32xf32>
    %242 = vector.multi_reduction <add>, %241, %cst_28 [1] : vector<40x8x32xf32> to vector<40x32xf32>
    %cst_29 = arith.constant dense<0.000000e+00> : vector<40x32xf32>
    %243 = vector.multi_reduction <add>, %240, %cst_29 [1] : vector<40x8x32xf32> to vector<40x32xf32>
    %244 = arith.divf %242, %243 : vector<40x32xf32>
    %cst_30 = arith.constant 0.000000e+00 : f32
    %245 = vector.broadcast %cst_30 : f32 to vector<40x32xf32>
    %246 = arith.maximumf %244, %245 : vector<40x32xf32>
    %247 = arith.truncf %246 : vector<40x32xf32> to vector<40x32xbf16>
    %248 = vector.extract_strided_slice %9 {offsets = [2, 0, 0], sizes = [1, 32, 32], strides = [1, 1, 1]} : vector<3x32x32xbf16> to vector<1x32x32xbf16>
    %249 = vector.shape_cast %248 : vector<1x32x32xbf16> to vector<32x32xbf16>
    %cst_31 = arith.constant dense<0.000000e+00> : vector<40x32xf32>
    %250 = tpu.matmul %247, %249, %cst_31 {dimension_numbers = #tpu.dot_dimension_numbers<[1], [0], [0], [1], [0, 0, 1, 1], [], []>} : vector<40x32xbf16>, vector<32x32xbf16>, vector<40x32xf32> -> vector<40x32xf32>
    %251 = vector.extract_strided_slice %10 {offsets = [4, 0], sizes = [1, 32], strides = [1, 1]} : vector<5x32xf32> to vector<1x32xf32>
    %252 = vector.shape_cast %251 : vector<1x32xf32> to vector<32xf32>
    %253 = vector.shape_cast %252 : vector<32xf32> to vector<1x32xf32>
    %254 = vector.broadcast %253 : vector<1x32xf32> to vector<40x32xf32>
    %255 = arith.addf %250, %254 : vector<40x32xf32>
    %c0_32 = arith.constant 0 : index
    %c0_33 = arith.constant 0 : index
    %c0_34 = arith.constant 0 : index
    %256 = vector.load %arg9[%c0_32, %c0_33, %c0_34] : memref<1x40x32xf32, #tpu.memory_space<vmem>>, vector<1x40x32xf32>
    %257 = vector.shape_cast %256 : vector<1x40x32xf32> to vector<40x32xf32>
    %258 = vector.shape_cast %255 : vector<40x32xf32> to vector<1x40x32xf32>
    tpu.vector_store %arg9[%c0_32, %c0_33, %c0_34], %258 {strides = array<i32>} : memref<1x40x32xf32, #tpu.memory_space<vmem>>, vector<1x40x32xf32>,
    return
  }
  func.func @transform_0(%arg0: i32, %arg1: i32) -> (i32, i32, i32, i32) {
    %c0_i32 = arith.constant 0 : i32
    %c0_i32_0 = arith.constant 0 : i32
    %c0_i32_1 = arith.constant 0 : i32
    return %arg0, %arg1, %c0_i32, %c0_i32_0 : i32, i32, i32, i32
  }
  func.func @transform_1(%arg0: i32, %arg1: i32) -> (i32, i32, i32, i32) {
    %c0_i32 = arith.constant 0 : i32
    %c0_i32_0 = arith.constant 0 : i32
    %c0_i32_1 = arith.constant 0 : i32
    return %arg0, %arg1, %c0_i32, %c0_i32_0 : i32, i32, i32, i32
  }
  func.func @transform_2(%arg0: i32, %arg1: i32) -> (i32, i32, i32) {
    %c0_i32 = arith.constant 0 : i32
    %c0_i32_0 = arith.constant 0 : i32
    %c0_i32_1 = arith.constant 0 : i32
    %c0_i32_2 = arith.constant 0 : i32
    return %c0_i32, %c0_i32_0, %c0_i32_1 : i32, i32, i32
  }
  func.func @transform_3(%arg0: i32, %arg1: i32) -> (i32, i32) {
    %c0_i32 = arith.constant 0 : i32
    %c0_i32_0 = arith.constant 0 : i32
    %c0_i32_1 = arith.constant 0 : i32
    return %c0_i32, %c0_i32_0 : i32, i32
  }
  func.func @transform_4(%arg0: i32, %arg1: i32) -> (i32, i32) {
    %c0_i32 = arith.constant 0 : i32
    %c0_i32_0 = arith.constant 0 : i32
    %c0_i32_1 = arith.constant 0 : i32
    return %c0_i32, %c0_i32_0 : i32, i32
  }
  func.func @transform_5(%arg0: i32, %arg1: i32) -> (i32, i32, i32) {
    %c0_i32 = arith.constant 0 : i32
    %c0_i32_0 = arith.constant 0 : i32
    %c0_i32_1 = arith.constant 0 : i32
    %c0_i32_2 = arith.constant 0 : i32
    return %c0_i32, %c0_i32_0, %c0_i32_1 : i32, i32, i32
  }
  func.func @transform_6(%arg0: i32, %arg1: i32) -> (i32, i32) {
    %c0_i32 = arith.constant 0 : i32
    %c0_i32_0 = arith.constant 0 : i32
    %c0_i32_1 = arith.constant 0 : i32
    return %c0_i32, %c0_i32_0 : i32, i32
  }
  func.func @transform_7(%arg0: i32, %arg1: i32) -> (i32, i32, i32) {
    %c0_i32 = arith.constant 0 : i32
    %c0_i32_0 = arith.constant 0 : i32
    return %arg0, %arg1, %c0_i32 : i32, i32, i32
  }
}

</mosaic_0001>

<bundles_post_ra>
// kernel: tpu_custom_call.1
= control target key start
LH: loop header
LB: loop body
LE: loop exit
PB: predicated region body
PF: predicated region fallthrough
CT: control target
= control target key end

     0   :  { %s11743_s24 = smov 0   ;;  %s11745_s25 = smov 0   ;;  %s18307_s0 = inlined_call_operand.vmem [shape: f32[2,80,8,3], index: 0, kind: input, shape index: {}]   ;;  %s18308_s1 = inlined_call_operand.vmem [shape: f32[2,80,8,32], index: 1, kind: input, shape index: {}]   ;;  %s18309_s2 = inlined_call_operand.vmem [shape: f32[3,7,32], index: 2, kind: input, shape index: {}]   ;;  %s18310_s3 = inlined_call_operand.vmem [shape: f32[7,32], index: 3, kind: input, shape index: {}]   ;;  %s18311_s4 = inlined_call_operand.vmem [shape: f32[32,64], index: 4, kind: input, shape index: {}]   ;;  %s18312_s5 = inlined_call_operand.vmem [shape: f32[3,32,32], index: 5, kind: input, shape index: {}]   ;;  %s18313_s6 = inlined_call_operand.vmem [shape: f32[5,32], index: 6, kind: input, shape index: {}]   ;;  %s18314_s7 = inlined_call_operand.vmem [shape: f32[2,80,32], index: 7, kind: output, shape index: {}]  }
   0x1   :  { %s11747_s26 = smov 0   ;;  %s11749_s27 = smov 0  }
   0x2   :  { %s11751_s28 = smov 0  }
   0x3 LB: > { %s26_s29 = sadd.s32 1, %s11688_s26  ;;  %s29_s30 = sadd.s32 1, %s11692_s27  ;;  %s11696_s28 = sphi %s11751_s28, %s17_s28   ;;  %s11692_s27 = sphi %s11749_s27, %s19772_s27   ;;  %s11688_s26 = sphi %s11747_s26, %s19771_s26   ;;  %s11684_s25 = sphi %s11745_s25, %s19770_s25   ;;  %s11680_s24 = sphi %s11743_s24, %s19769_s24  }
   0x4   : > { %p27_p0 = scmp.ge.s32.totalorder %s26_s29, 2  ;;  %p10746_p1 = scmp.ge.s32.totalorder %s11696_s28, 1 }
   0x5   : > { %p275_p2 = scmp.lt.s32.totalorder %s11696_s28, 5 }
   0x6   : > { %s19774_s29 = smov (%p27_p0, %s26_s29), 0  ;;  %s19776_s30 = smov (!%p27_p0, %s29_s30), %s11692_s27 }
   0x7   : > { %p276_p3 = pnand %p10746_p1, %p275_p2  ;;  %p31_p4 = scmp.ge.s32.totalorder %s19776_s30, 2 }
   0x9   : > { %s19778_s30 = smov (%p31_p4, %s19776_s30), 0  ;;  %279 = sbr.rel (%p276_p3) target bundleno = 2398 (0x95e), region = 48 }
   0xe   : > { %s324_s8 = smul.u32 40, %s11680_s24  ;;  %p325_p5 = scmp.lt.s32.totalorder %s11684_s25, 1  ;;  %v18317_v0 = vmov 2   ;;  %v18315_v1 = vmov 0   ;;  %v18321_v24 = vmov 1   ;;  %vm2698_vm0 = vcmask 261120  }
   0xf   : > { %11114 = vset.pattern.permute.xlu0 %v18317_v0  ;;  %11109 = vset.pattern.permute.xlu2 %v18315_v1  ;;  %v11973_v59 = vld [vmem:[%s18309_s2] sm:$0x7f]  ;;  %v11978_v60 = vld [vmem:[%s18309_s2 + $0x10] sm:$0x7f]  ;;  %v11983_v61 = vld [vmem:[%s18309_s2 + $0x8] sm:$0x7f] }
  0x10   : > { %11108 = vset.pattern.permute.xlu1 %v18315_v1  ;;  %s19780_s25 = smov (!%p325_p5, %s11684_s25), 1  ;;  %p327_p6 = scmp.lt.s32.totalorder %s324_s8, 79  ;;  %18810 = vst [vmem:[#allocation27_spill] sm:$0xff] %v11978_v60  ;;  %v11987_v62 = vperm.slane %v11973_v59, 2  ;;  %v11990_v63 = vperm.slane %v11973_v59, 1  ;;  %vm4779_vm1 = vcmask 64512  }
  0x11   : > { %s11061_s9 = smul.u32 80, %s19780_s25  ;;  %18811 = vst [vmem:[#allocation28_spill] sm:$0xff] %v11983_v61  ;;  %s11702_s19 = smov 96  }
  0x12   : > { %s19782_s8 = smov (!%p327_p6, %s324_s8), 79  ;;  %s11062_s16 = smul.u32 10, %s19780_s25 }
  0x13   : > { %s11782_s10 = sadd.s32 %s11061_s9, %s19782_s8  ;;  %s11701_s9 = smov 32  }
  0x14   : > { %s10747_s11 = sshll.u32 %s11782_s10, 3 }
  0x15   : > { %s11790_s14 = scalar_lea.vmem %s18307_s0, %s10747_s11  ;;  %s14907_s21 = scalar_lea.vmem %s18308_s1, %s10747_s11 }
  0x16   : > { %v367_v2 = vld [vmem:[%s11790_s14 + $0x60] sm:$0xff]  ;;  %v11797_v4 = vld [vmem:[%s11790_s14 + $0x10] sm:$0xff]  ;;  %v11805_v6 = vld [vmem:[%s11790_s14 + $0x28] sm:$0xff] }
  0x17   : > { %v11794_v3 = vld [vmem:[%s11790_s14 + $0x20] sm:$0xff]  ;;  %879 = vperm.xlu0 %11114, %v367_v2   ;;  %482 = vperm.xlu1 %11108, %v11797_v4   ;;  %v11808_v7 = vld [vmem:[%s11790_s14 + $0x18] sm:$0xff]  ;;  %v11814_v8 = vld [vmem:[%s11790_s14 + $0xe8] sm:$0xff] }
  0x18   : > { %492 = vperm.xlu2 %11109, %v11794_v3   ;;  %v11802_v5 = vld [vmem:[%s11790_s14 + $0xe0] sm:$0xff]  ;;  %v11818_v10 = vld [vmem:[%s11790_s14 + $0x38] sm:$0xff]  ;;  %v11823_v11 = vld [vmem:[%s11790_s14 + $0xf0] sm:$0xff] }
  0x19   : > { %v363_v9 = vld [vmem:[%s11790_s14 + $0x40] sm:$0xff]  ;;  %18785 = vst [vmem:[#allocation2_spill] sm:$0xff] %v11823_v11  ;;  %v11826_v12 = vld [vmem:[%s11790_s14 + $0x58] sm:$0xff]  ;;  %v11829_v13 = vld [vmem:[%s11790_s14 + $0x50] sm:$0xff] }
  0x1a   : > { %v11835_v14 = vld [vmem:[%s11790_s14 + $0x70] sm:$0xff]  ;;  %v11838_v15 = vld [vmem:[%s11790_s14 + $0x68] sm:$0xff]  ;;  %v355_v16 = vld [vmem:[%s11790_s14] sm:$0xff] }
  0x1b   : > { %v11845_v17 = vld [vmem:[%s11790_s14 + $0x88] sm:$0xff]  ;;  %v371_v18 = vld [vmem:[%s11790_s14 + $0x80] sm:$0xff]  ;;  %v11855_v21 = vld [vmem:[%s11790_s14 + $0x98] sm:$0xff] }
  0x1c   : > { %v11849_v19 = vld [vmem:[%s11790_s14 + $0x8] sm:$0xff]  ;;  %v375_v20 = vld [vmem:[%s11790_s14 + $0xa0] sm:$0xff]  ;;  %v11858_v22 = vld [vmem:[%s11790_s14 + $0x30] sm:$0xff] }
  0x1d   : > { %v11863_v23 = vld [vmem:[%s11790_s14 + $0x48] sm:$0xff]  ;;  %v11872_v25 = vld [vmem:[%s11790_s14 + $0x78] sm:$0xff]  ;;  %v11876_v26 = vld [vmem:[%s11790_s14 + $0x90] sm:$0xff] }
  0x1e   : > { %v11882_v27 = vld [vmem:[%s11790_s14 + $0xa8] sm:$0xff]  ;;  %v379_v29 = vld [vmem:[%s11790_s14 + $0xc0] sm:$0xff]  ;;  %v11891_v31 = vld [vmem:[%s11790_s14 + $0xb8] sm:$0xff] }
  0x1f   : > { %943 = vperm.xlu0 %11114, %v11802_v5   ;;  %487 = vperm.xlu1 %11108, %v11808_v7   ;;  %v11901_v33 = vld [vmem:[%s11790_s14 + $0xc8] sm:$0xff]  ;;  %v387_v36 = vld [vmem:[%s11790_s14 + $0x100] sm:$0xff]  ;;  %v11912_v38 = vld [vmem:[%s11790_s14 + $0xd0] sm:$0xff] }
  0x20   : > { %497 = vperm.xlu2 %11109, %v11805_v6   ;;  %v391_v42 = vld [vmem:[%s11790_s14 + $0x120] sm:$0xff]  ;;  %v392_v43 = vld [vmem:[%s11790_s14 + $0x128] sm:$0xff] }
  0x27   : > { %947 = vperm.xlu0 %11114, %v11814_v8   ;;  %507 = vperm.xlu1 %11108, %v11818_v10  }
  0x28   : > { %512 = vperm.xlu2 %11109, %v363_v9  }
  0x2f   : > { %951 = vperm.xlu0 %11114, %v11823_v11   ;;  %522 = vperm.xlu1 %11108, %v11829_v13  }
  0x30   : > { %527 = vperm.xlu2 %11109, %v11826_v12  }
  0x37   : > { %11146 = vset.pattern.permute.xlu0 %v18315_v1  ;;  %537 = vperm.xlu1 %11108, %v11838_v15  }
  0x38   : > { %542 = vperm.xlu2 %11109, %v11835_v14   ;;  %472 = vperm.xlu0 %11146, %v355_v16  }
  0x3f   : > { %552 = vperm.xlu1 %11108, %v371_v18  }
  0x40   : > { %557 = vperm.xlu2 %11109, %v11845_v17   ;;  %477 = vperm.xlu0 %11146, %v11849_v19  }
  0x47   : > { %567 = vperm.xlu1 %11108, %v11855_v21  }
  0x48   : > { %572 = vperm.xlu2 %11109, %v375_v20   ;;  %502 = vperm.xlu0 %11146, %v11858_v22  }
  0x4f   : > { %11110 = vset.pattern.permute.xlu1 %v18321_v24 }
  0x50   : > { %11111 = vset.pattern.permute.xlu2 %v18317_v0  ;;  %517 = vperm.xlu0 %11146, %v11863_v23  }
  0x51   : > { %831 = vperm.xlu2 %11111, %v355_v16   ;;  %671 = vperm.xlu1 %11110, %v355_v16   ;;  %v12017_v16 = vperm.slane %v11978_v60, 1 }
  0x58   : > { %532 = vperm.xlu0 %11146, %v367_v2  }
  0x59   : > { %11113 = vset.pattern.permute.xlu2 %v18321_v24  ;;  %11112 = vset.pattern.permute.xlu1 %v18317_v0 }
  0x5a   : > { %703 = vperm.xlu2 %11113, %v363_v9   ;;  %847 = vperm.xlu1 %11112, %v11794_v3  }
  0x60   : > { %547 = vperm.xlu0 %11146, %v11872_v25  }
  0x62   : > { %719 = vperm.xlu2 %11113, %v367_v2   ;;  %863 = vperm.xlu1 %11112, %v363_v9   ;;  %v11995_v2 = vperm.slane %v11978_v60, 2 }
  0x68   : > { %562 = vperm.xlu0 %11146, %v11876_v26  }
  0x6a   : > { %11116 = vset.pattern.permute.xlu2 %v18317_v0  ;;  %11115 = vset.pattern.permute.xlu1 %v18321_v24 }
  0x6b   : > { %895 = vperm.xlu2 %11116, %v371_v18   ;;  %735 = vperm.xlu1 %11115, %v371_v18  }
  0x70   : > { %577 = vperm.xlu0 %11146, %v11882_v27  }
  0x72   : > { %v11885_v28 = vpop.permute.xlu2 %492 }
  0x73   : > { %18786 = vst [vmem:[#allocation3_spill] sm:$0xff] %v11885_v28  ;;  %911 = vperm.xlu2 %11116, %v375_v20   ;;  %751 = vperm.xlu1 %11115, %v375_v20  }
  0x78   : > { %592 = vperm.xlu0 %11146, %v379_v29  }
  0x7a   : > { %v11888_v30 = vpop.permute.xlu2 %497 }
  0x7b   : > { %18787 = vst [vmem:[#allocation4_spill] sm:$0xff] %v11888_v30  ;;  %927 = vperm.xlu2 %11116, %v379_v29   ;;  %767 = vperm.xlu1 %11115, %v379_v29  }
  0x80   : > { %587 = vperm.xlu0 %11146, %v11891_v31  }
  0x82   : > { %v11894_v32 = vpop.permute.xlu2 %512 }
  0x83   : > { %18788 = vst [vmem:[#allocation5_spill] sm:$0xff] %v11894_v32  ;;  %11118 = vset.pattern.permute.xlu2 %v18321_v24  ;;  %11117 = vset.pattern.permute.xlu1 %v18315_v1  ;;  %v1731_v60 = vmul.f32 %v11987_v62, %v11894_v32 }
  0x84   : > { %783 = vperm.xlu2 %11118, %v11802_v5   ;;  %612 = vperm.xlu1 %11117, %v11802_v5   ;;  %v12002_v5 = vperm.slane %v11983_v61, 2 }
  0x88   : > { %597 = vperm.xlu0 %11146, %v11901_v33  }
  0x89   : > { %v11906_v35 = vpop.permute.xlu0 %879  ;;  %v11909_v37 = vpop.permute.xlu1 %482 }
  0x8a   : > { %v11904_v34 = vpop.permute.xlu2 %527  ;;  %18790 = vst [vmem:[#allocation7_spill] sm:$0xff] %v11906_v35 }
  0x8b   : > { %18789 = vst [vmem:[#allocation6_spill] sm:$0xff] %v11904_v34 }
  0x8c   : > { %18791 = vst [vmem:[#allocation8_spill] sm:$0xff] %v11909_v37  ;;  %799 = vperm.xlu2 %11118, %v387_v36   ;;  %632 = vperm.xlu1 %11117, %v387_v36  }
  0x90   : > { %602 = vperm.xlu0 %11146, %v11912_v38  }
  0x91   : > { %v11917_v40 = vpop.permute.xlu0 %943  ;;  %v11919_v41 = vpop.permute.xlu1 %487 }
  0x92   : > { %v11915_v39 = vpop.permute.xlu2 %542  ;;  %18793 = vst [vmem:[#allocation10_spill] sm:$0xff] %v11917_v40  ;;  %v12178_v40 = vld [vmem:[%s11790_s14 + $0x130] sm:$0xff] }
  0x93   : > { %18792 = vst [vmem:[#allocation9_spill] sm:$0xff] %v11915_v39 }
  0x94   : > { %18794 = vst [vmem:[#allocation11_spill] sm:$0xff] %v11919_v41  ;;  %11120 = vset.pattern.permute.xlu2 %v18315_v1  ;;  %11119 = vset.pattern.permute.xlu1 %v18317_v0 }
  0x95   : > { %652 = vperm.xlu2 %11120, %v391_v42   ;;  %959 = vperm.xlu1 %11119, %v387_v36   ;;  %18849 = vst [vmem:[#allocation63_spill] sm:$0xff] %v12178_v40 }
  0x98   : > { %657 = vperm.xlu0 %11146, %v392_v43  }
  0x99   : > { %v11927_v45 = vpop.permute.xlu0 %947  ;;  %v11929_v46 = vpop.permute.xlu1 %507 }
  0x9a   : > { %v11925_v44 = vpop.permute.xlu2 %557  ;;  %18796 = vst [vmem:[#allocation13_spill] sm:$0xff] %v11927_v45 }
  0x9b   : > { %18795 = vst [vmem:[#allocation12_spill] sm:$0xff] %v11925_v44  ;;  %v18838_v44 = vmov 0  }
  0x9c   : > { %18797 = vst [vmem:[#allocation14_spill] sm:$0xff] %v11929_v46 }
  0x9d   : > { %11121 = vset.pattern.permute.xlu2 %v18321_v24  ;;  %975 = vperm.xlu1 %11119, %v391_v42  }
  0x9e   : > { %675 = vperm.xlu2 %11121, %v11849_v19  }
  0xa0   : > { %11153 = vset.pattern.permute.xlu0 %v18321_v24 }
  0xa1   : > { %687 = vperm.xlu0 %11153, %v11794_v3   ;;  %v11937_v48 = vpop.permute.xlu0 %951  ;;  %v11939_v49 = vpop.permute.xlu1 %522 }
  0xa2   : > { %v11934_v47 = vpop.permute.xlu2 %572  ;;  %18799 = vst [vmem:[#allocation16_spill] sm:$0xff] %v11937_v48 }
  0xa3   : > { %18798 = vst [vmem:[#allocation15_spill] sm:$0xff] %v11934_v47 }
  0xa4   : > { %18800 = vst [vmem:[#allocation17_spill] sm:$0xff] %v11939_v49 }
  0xa5   : > { %835 = vperm.xlu1 %11119, %v11849_v19  }
  0xa6   : > { %679 = vperm.xlu2 %11121, %v11797_v4  }
  0xa9   : > { %815 = vperm.xlu0 %11153, %v391_v42   ;;  %v11943_v50 = vpop.permute.xlu1 %537 }
  0xaa   : > { %18801 = vst [vmem:[#allocation18_spill] sm:$0xff] %v11943_v50  ;;  %v11945_v51 = vpop.permute.xlu0 %472  ;;  %v12149_v50 = vperm.slane %v11973_v59, 4 }
  0xab   : > { %18802 = vst [vmem:[#allocation19_spill] sm:$0xff] %v11945_v51  ;;  %v11947_v52 = vpop.permute.xlu2 %831 }
  0xac   : > { %18803 = vst [vmem:[#allocation20_spill] sm:$0xff] %v11947_v52  ;;  %v1845_v29 = vmul.f32 %v11995_v2, %v11947_v52  ;;  %v1357_v43 = vmul.f32 %v12017_v16, %v11947_v52 }
  0xad   : > { %839 = vperm.xlu1 %11119, %v11797_v4   ;;  %v1723_v4 = vmul.f32 %v11987_v62, %v11945_v51 }
  0xae   : > { %11122 = vset.pattern.permute.xlu2 %v18317_v0 }
  0xaf   : > { %843 = vperm.xlu2 %11122, %v11808_v7  }
  0xb1   : > { %683 = vperm.xlu0 %11153, %v11808_v7   ;;  %v11953_v53 = vpop.permute.xlu1 %552  ;;  %v12007_v7 = vperm.slane %v11983_v61, 1 }
  0xb2   : > { %18804 = vst [vmem:[#allocation21_spill] sm:$0xff] %v11953_v53  ;;  %v11955_v54 = vpop.permute.xlu0 %477 }
  0xb3   : > { %18805 = vst [vmem:[#allocation22_spill] sm:$0xff] %v11955_v54 }
  0xb4   : > { %v11957_v55 = vpop.permute.xlu2 %703 }
  0xb5   : > { %18806 = vst [vmem:[#allocation23_spill] sm:$0xff] %v11957_v55  ;;  %851 = vperm.xlu1 %11119, %v11805_v6  }
  0xb7   : > { %11123 = vset.pattern.permute.xlu2 %v18321_v24 }
  0xb8   : > { %695 = vperm.xlu2 %11123, %v11858_v22  }
  0xb9   : > { %691 = vperm.xlu0 %11153, %v11805_v6   ;;  %v11963_v56 = vpop.permute.xlu1 %567  ;;  %v1235_v6 = vmul.f32 %v11990_v63, %v11945_v51  ;;  %v12141_v51 = vperm.slane %v11973_v59, 5 }
  0xba   : > { %18807 = vst [vmem:[#allocation24_spill] sm:$0xff] %v11963_v56  ;;  %v11965_v57 = vpop.permute.xlu0 %502  ;;  %v18836_v56 = vmov 1  }
  0xbb   : > { %18808 = vst [vmem:[#allocation25_spill] sm:$0xff] %v11965_v57  ;;  %v12175_v49 = vmul.f32 %v12141_v51, %v11885_v28 }
  0xbc   : > { %v11967_v58 = vpop.permute.xlu2 %719 }
  0xbd   : > { %18809 = vst [vmem:[#allocation26_spill] sm:$0xff] %v11967_v58  ;;  %855 = vperm.xlu1 %11119, %v11858_v22  }
  0xc0   : > { %11124 = vset.pattern.permute.xlu2 %v18317_v0 }
  0xc1   : > { %859 = vperm.xlu2 %11124, %v11818_v10   ;;  %699 = vperm.xlu0 %11153, %v11818_v10   ;;  %v12014_v10 = vld [vmem:[%s18310_s3] sm:$0x7f] }
  0xc2   : > { %v11997_v3 = vpop.permute.xlu0 %517  ;;  %18814 = vst [vmem:[#allocation31_spill] sm:$0xff] %v12014_v10  ;;  %v12029_v36 = vperm.slane %v12014_v10, 2  ;;  %v12036_v48 = vperm.slane %v12014_v10, 1 }
  0xc3   : > { %18812 = vst [vmem:[#allocation29_spill] sm:$0xff] %v11997_v3  ;;  %v12009_v9 = vpop.permute.xlu1 %671 }
  0xc4   : > { %18813 = vst [vmem:[#allocation30_spill] sm:$0xff] %v12009_v9  ;;  %v1764_v18 = vmul.f32 %v12002_v5, %v12009_v9  ;;  %v1276_v19 = vmul.f32 %v12007_v7, %v12009_v9  ;;  %v12130_v9 = vld [vmem:[%s11790_s14 + $0x118] sm:$0xff] }
  0xc5   : > { %v12023_v20 = vpop.permute.xlu2 %895  ;;  %867 = vperm.xlu1 %11119, %v11863_v23   ;;  %18845 = vst [vmem:[#allocation59_spill] sm:$0xff] %v12130_v9 }
  0xc6   : > { %18815 = vst [vmem:[#allocation32_spill] sm:$0xff] %v12023_v20  ;;  %v1804_v22 = vadd.f32 %v1764_v18, %v1723_v4  ;;  %v1316_v42 = vadd.f32 %v1276_v19, %v1235_v6 }
  0xc8   : > { %v1885_v1 = vadd.f32 %v1845_v29, %v1804_v22  ;;  %v1397_v0 = vadd.f32 %v1357_v43, %v1316_v42  ;;  %v18819_v22 = vmov 2  }
  0xc9   : > { %11125 = vset.pattern.permute.xlu2 %v18321_v24  ;;  %707 = vperm.xlu0 %11153, %v11863_v23  }
  0xca   : > { %711 = vperm.xlu2 %11125, %v11829_v13   ;;  %v12039_v4 = vpop.permute.xlu0 %532  ;;  %v1926_v18 = vadd.f32 %v12029_v36, %v1885_v1  ;;  %v1438_v23 = vadd.f32 %v12036_v48, %v1397_v0 }
  0xcb   : > { %18816 = vst [vmem:[#allocation33_spill] sm:$0xff] %v12039_v4 }
  0xcc   : > { %10750 = vmatpush.xpose.msk.msra.mxu3 %vm2698_vm0, %v1926_v18  ;;  %v12043_v6 = vpop.permute.xlu1 %847 }
  0xcd   : > { %18817 = vst [vmem:[#allocation34_spill] sm:$0xff] %v12043_v6  ;;  %v12045_v19 = vpop.permute.xlu2 %911  ;;  %871 = vperm.xlu1 %11119, %v11829_v13  }
  0xce   : > { %18818 = vst [vmem:[#allocation35_spill] sm:$0xff] %v12045_v19 }
  0xcf   : > { %10751 = vmatmul.msk.f32.vlgmr.msra.gmra.mxu3 %vm2698_vm0, %v1438_v23 }
  0xd1   : > { %715 = vperm.xlu0 %11153, %v11826_v12  }
  0xd2   : > { %11126 = vset.pattern.permute.xlu2 %v18819_v22  ;;  %v12052_v29 = vpop.permute.xlu0 %547 }
  0xd3   : > { %18820 = vst [vmem:[#allocation36_spill] sm:$0xff] %v12052_v29  ;;  %875 = vperm.xlu2 %11126, %v11826_v12  }
  0xd4   : > { %v12055_v1 = vpop.permute.xlu1 %863 }
  0xd5   : > { %18821 = vst [vmem:[#allocation37_spill] sm:$0xff] %v12055_v1  ;;  %v12057_v42 = vpop.permute.xlu2 %927  ;;  %883 = vperm.xlu1 %11119, %v11838_v15  }
  0xd6   : > { %18822 = vst [vmem:[#allocation38_spill] sm:$0xff] %v12057_v42 }
  0xd9   : > { %723 = vperm.xlu0 %11153, %v11838_v15  }
  0xda   : > { %v12061_v13 = vpop.permute.xlu0 %562 }
  0xdb   : > { %18823 = vst [vmem:[#allocation39_spill] sm:$0xff] %v12061_v13  ;;  %11127 = vset.pattern.permute.xlu2 %v18321_v24  ;;  %v12108_v13 = vld [vmem:[%s11790_s14 + $0xd8] sm:$0xff] }
  0xdc   : > { %727 = vperm.xlu2 %11127, %v11835_v14  }
  0xdd   : > { %887 = vperm.xlu1 %11119, %v11835_v14   ;;  %v12066_v0 = vpop.permute.xlu1 %735 }
  0xde   : > { %18824 = vst [vmem:[#allocation40_spill] sm:$0xff] %v12066_v0  ;;  %v12068_v43 = vpop.permute.xlu2 %783 }
  0xdf   : > { %18825 = vst [vmem:[#allocation41_spill] sm:$0xff] %v12068_v43 }
  0xe1   : > { %731 = vperm.xlu0 %11153, %v11872_v25  }
  0xe2   : > { %v12071_v12 = vpop.permute.xlu0 %577 }
  0xe3   : > { %18826 = vst [vmem:[#allocation42_spill] sm:$0xff] %v12071_v12  ;;  %v377_v12 = vld [vmem:[%s11790_s14 + $0xb0] sm:$0xff] }
  0xe4   : > { %11128 = vset.pattern.permute.xlu2 %v18819_v22 }
  0xe5   : > { %891 = vperm.xlu2 %11128, %v11872_v25   ;;  %899 = vperm.xlu1 %11119, %v11845_v17   ;;  %v12076_v15 = vpop.permute.xlu1 %751 }
  0xe6   : > { %18827 = vst [vmem:[#allocation43_spill] sm:$0xff] %v12076_v15  ;;  %v12078_v18 = vpop.permute.xlu2 %799 }
  0xe7   : > { %18828 = vst [vmem:[#allocation44_spill] sm:$0xff] %v12078_v18  ;;  %v1724_v18 = vmul.f32 %v11987_v62, %v11955_v54 }
  0xe9   : > { %739 = vperm.xlu0 %11153, %v11845_v17  }
  0xea   : > { %v12081_v14 = vpop.permute.xlu0 %592 }
  0xeb   : > { %18829 = vst [vmem:[#allocation45_spill] sm:$0xff] %v12081_v14 }
  0xed   : > { %11129 = vset.pattern.permute.xlu2 %v18321_v24  ;;  %903 = vperm.xlu1 %11119, %v11876_v26   ;;  %v12085_v23 = vpop.permute.xlu1 %767 }
  0xee   : > { %18830 = vst [vmem:[#allocation46_spill] sm:$0xff] %v12085_v23  ;;  %743 = vperm.xlu2 %11129, %v11876_v26  }
  0xef   : > { %v12088_v25 = vpop.permute.xlu2 %652 }
  0xf0   : > { %18831 = vst [vmem:[#allocation47_spill] sm:$0xff] %v12088_v25 }
  0xf1   : > { %747 = vperm.xlu0 %11153, %v11855_v21  }
  0xf2   : > { %v12091_v45 = vpop.permute.xlu0 %587 }
  0xf3   : > { %18832 = vst [vmem:[#allocation48_spill] sm:$0xff] %v12091_v45 }
  0xf5   : > { %915 = vperm.xlu1 %11119, %v11882_v27  }
  0xf6   : > { %11130 = vset.pattern.permute.xlu2 %v18819_v22  ;;  %v12095_v17 = vpop.permute.xlu1 %612 }
  0xf7   : > { %18833 = vst [vmem:[#allocation49_spill] sm:$0xff] %v12095_v17  ;;  %907 = vperm.xlu2 %11130, %v11855_v21  }
  0xf8   : > { %v12098_v24 = vpop.permute.xlu2 %675 }
  0xf9   : > { %18834 = vst [vmem:[#allocation50_spill] sm:$0xff] %v12098_v24  ;;  %755 = vperm.xlu0 %11153, %v11882_v27   ;;  %v12118_v27 = vld [vmem:[%s11790_s14 + $0x108] sm:$0xff]  ;;  %v1765_v59 = vmul.f32 %v12002_v5, %v12098_v24  ;;  %v1277_v3 = vmul.f32 %v12007_v7, %v12098_v24  ;;  %v1857_v24 = vmul.f32 %v11995_v2, %v11906_v35 }
  0xfa   : > { %v12101_v26 = vpop.permute.xlu0 %597  ;;  %18841 = vst [vmem:[#allocation55_spill] sm:$0xff] %v12118_v27 }
  0xfb   : > { %18835 = vst [vmem:[#allocation51_spill] sm:$0xff] %v12101_v26 }
  0xfd   : > { %11132 = vset.pattern.permute.xlu1 %v18836_v56 }
  0xfe   : > { %759 = vperm.xlu1 %11132, %v377_v12   ;;  %v12105_v45 = vpop.permute.xlu1 %632 }
  0xff   : > { %18837 = vst [vmem:[#allocation52_spill] sm:$0xff] %v12105_v45  ;;  %11131 = vset.pattern.permute.xlu2 %v18838_v44 }
 0x100   : > { %582 = vperm.xlu2 %11131, %v377_v12   ;;  %v12111_v29 = vpop.permute.xlu2 %679 }
 0x101   : > { %18839 = vst [vmem:[#allocation53_spill] sm:$0xff] %v12111_v29  ;;  %779 = vperm.xlu0 %11153, %v12108_v13  }
 0x102   : > { %v12114_v21 = vpop.permute.xlu0 %602 }
 0x103   : > { %18840 = vst [vmem:[#allocation54_spill] sm:$0xff] %v12114_v21 }
 0x106   : > { %11134 = vset.pattern.permute.xlu1 %v18819_v22 }
 0x107   : > { %919 = vperm.xlu1 %11134, %v377_v12   ;;  %v12120_v26 = vpop.permute.xlu1 %959  ;;  %v1772_v12 = vmul.f32 %v12002_v5, %v11957_v55 }
 0x108   : > { %18842 = vst [vmem:[#allocation56_spill] sm:$0xff] %v12120_v26  ;;  %11133 = vset.pattern.permute.xlu2 %v18836_v56  ;;  %v1776_v26 = vmul.f32 %v12002_v5, %v11967_v58 }
 0x109   : > { %763 = vperm.xlu2 %11133, %v11891_v31   ;;  %v12124_v10 = vpop.permute.xlu2 %843  ;;  %803 = vperm.xlu0 %11153, %v12118_v27   ;;  %v1735_v27 = vmul.f32 %v11987_v62, %v12039_v4  ;;  %v1812_v45 = vadd.f32 %v1772_v12, %v1731_v60  ;;  %v1361_v60 = vmul.f32 %v12017_v16, %v12043_v6 }
 0x10a   : > { %18843 = vst [vmem:[#allocation57_spill] sm:$0xff] %v12124_v10  ;;  %v12127_v52 = vpop.permute.xlu0 %657  ;;  %v1236_v12 = vmul.f32 %v11990_v63, %v11955_v54 }
 0x10b   : > { %18844 = vst [vmem:[#allocation58_spill] sm:$0xff] %v12127_v52  ;;  %v1816_v17 = vadd.f32 %v1776_v26, %v1735_v27  ;;  %v1780_v27 = vmul.f32 %v12002_v5, %v12066_v0 }
 0x10f   : > { %11136 = vset.pattern.permute.xlu1 %v18836_v56  ;;  %v12133_v21 = vpop.permute.xlu1 %975 }
 0x110   : > { %18846 = vst [vmem:[#allocation60_spill] sm:$0xff] %v12133_v21  ;;  %771 = vperm.xlu1 %11136, %v11901_v33   ;;  %v1239_v21 = vmul.f32 %v11990_v63, %v11885_v28 }
 0x111   : > { %11135 = vset.pattern.permute.xlu2 %v18819_v22  ;;  %811 = vperm.xlu0 %11153, %v12130_v9   ;;  %v1727_v9 = vmul.f32 %v11987_v62, %v11885_v28 }
 0x112   : > { %923 = vperm.xlu2 %11135, %v11891_v31   ;;  %v12144_v52 = vpop.permute.xlu2 %695  ;;  %v1853_v31 = vmul.f32 %v11995_v2, %v12055_v1 }
 0x113   : > { %18847 = vst [vmem:[#allocation61_spill] sm:$0xff] %v12144_v52  ;;  %v12151_v61 = vpop.permute.xlu0 %687 }
 0x114   : > { %18848 = vst [vmem:[#allocation62_spill] sm:$0xff] %v12151_v61  ;;  %v1768_v25 = vmul.f32 %v12002_v5, %v12151_v61  ;;  %v1280_v39 = vmul.f32 %v12007_v7, %v12151_v61  ;;  %v1849_v61 = vmul.f32 %v11995_v2, %v12043_v6  ;;  %v1893_v42 = vadd.f32 %v1853_v31, %v1812_v45 }
 0x115   : > { %v12203_v31 = vmul.f32 %v12149_v50, %v11885_v28 }
 0x116   : > { %v1808_v43 = vadd.f32 %v1768_v25, %v1727_v9  ;;  %v1320_v11 = vadd.f32 %v1280_v39, %v1239_v21  ;;  %v1805_v25 = vadd.f32 %v1765_v59, %v1724_v18  ;;  %v1317_v21 = vadd.f32 %v1277_v3, %v1236_v12 }
 0x117   : > { %v12182_v46 = vpop.permute.xlu1 %835  ;;  %v1897_v18 = vadd.f32 %v1857_v24, %v1816_v17  ;;  %18851 = vst [vmem:[#allocation65_spill] sm:$0xff] %v12203_v31  ;;  %v1766_v17 = vmul.f32 %v12002_v5, %v12111_v29  ;;  %v1243_v12 = vmul.f32 %v11990_v63, %v11894_v32 }
 0x118   : > { %18850 = vst [vmem:[#allocation64_spill] sm:$0xff] %v12182_v46  ;;  %11137 = vset.pattern.permute.xlu1 %v18838_v44  ;;  %v1889_v9 = vadd.f32 %v1849_v61, %v1808_v43  ;;  %v1846_v39 = vmul.f32 %v11995_v2, %v12182_v46  ;;  %v1358_v26 = vmul.f32 %v12017_v16, %v12182_v46 }
 0x119   : > { %607 = vperm.xlu1 %11137, %v12108_v13   ;;  %823 = vperm.xlu0 %11153, %v12178_v40   ;;  %v1401_v45 = vadd.f32 %v1361_v60, %v1320_v11  ;;  %v1934_v11 = vadd.f32 %v12029_v36, %v1893_v42  ;;  %v1284_v60 = vmul.f32 %v12007_v7, %v11957_v55 }
 0x11a   : > { %931 = vperm.xlu2 %11135, %v11901_v33   ;;  %v1930_v61 = vadd.f32 %v12029_v36, %v1889_v9  ;;  %v1886_v43 = vadd.f32 %v1846_v39, %v1805_v25  ;;  %v1398_v3 = vadd.f32 %v1358_v26, %v1317_v21  ;;  %v1739_v33 = vmul.f32 %v11987_v62, %v11953_v53 }
 0x11b   : > { %v12205_v59 = vpop.permute.xlu2 %859  ;;  %v12207_v46 = vpop.permute.xlu0 %815  ;;  %v12222_v42 = vmul.f32 %v11987_v62, %v11888_v30  ;;  %v1442_v9 = vadd.f32 %v12036_v48, %v1401_v45  ;;  %v1365_v25 = vmul.f32 %v12017_v16, %v12055_v1  ;;  %v1278_v26 = vmul.f32 %v12007_v7, %v12111_v29 }
 0x11c   : > { %18852 = vst [vmem:[#allocation66_spill] sm:$0xff] %v12205_v59  ;;  %10758 = vmatpush.xpose.msk.msra.mxu0 %vm2698_vm0, %v1930_v61  ;;  %v1927_v24 = vadd.f32 %v12029_v36, %v1886_v43  ;;  %v1820_v39 = vadd.f32 %v1780_v27, %v1739_v33  ;;  %v1938_v21 = vadd.f32 %v12029_v36, %v1897_v18 }
 0x11d   : > { %18853 = vst [vmem:[#allocation67_spill] sm:$0xff] %v12207_v46  ;;  %v1725_v61 = vmul.f32 %v11987_v62, %v11909_v37  ;;  %v12236_v43 = vmul.f32 %v11990_v63, %v11888_v30  ;;  %v12240_v45 = vmul.f32 %v12141_v51, %v11894_v32  ;;  %v1439_v27 = vadd.f32 %v12036_v48, %v1398_v3 }
 0x11e   : > { %10752 = vmatpush.xpose.msk.msra.mxu1 %vm2698_vm0, %v1927_v24  ;;  %v1324_v33 = vadd.f32 %v1284_v60, %v1243_v12  ;;  %v1861_v18 = vmul.f32 %v11995_v2, %v12023_v20  ;;  %v1237_v24 = vmul.f32 %v11990_v63, %v11909_v37  ;;  %v1848_v37 = vmul.f32 %v11995_v2, %v12124_v10 }
 0x11f   : > { %10759 = vmatmul.msk.f32.vlgmr.msra.gmra.mxu0 %vm2698_vm0, %v1442_v9  ;;  %v1806_v29 = vadd.f32 %v1766_v17, %v1725_v61  ;;  %v1247_v9 = vmul.f32 %v11990_v63, %v12039_v4  ;;  %v12265_v61 = vmul.f32 %v11987_v62, %v11904_v34 }
 0x120   : > { %10766 = vmatpush.xpose.msk.msrb.mxu0 %vm2698_vm0, %v1934_v11  ;;  %v12242_v11 = vpop.permute.xlu1 %839  ;;  %v1405_v3 = vadd.f32 %v1365_v25, %v1324_v33  ;;  %v1901_v60 = vadd.f32 %v1861_v18, %v1820_v39  ;;  %v1318_v12 = vadd.f32 %v1278_v26, %v1237_v24  ;;  %v1726_v25 = vmul.f32 %v11987_v62, %v11919_v41 }
 0x121   : > { %18854 = vst [vmem:[#allocation68_spill] sm:$0xff] %v12242_v11  ;;  %v1847_v54 = vmul.f32 %v11995_v2, %v12242_v11  ;;  %v1359_v30 = vmul.f32 %v12017_v16, %v12242_v11  ;;  %11139 = vset.pattern.permute.xlu1 %v18819_v22  ;;  %10753 = vmatmul.msk.f32.vlgmr.msra.gmra.mxu1 %vm2698_vm0, %v1439_v27 }
 0x122   : > { %11138 = vset.pattern.permute.xlu2 %v18836_v56  ;;  %935 = vperm.xlu1 %11139, %v11912_v38   ;;  %v1238_v39 = vmul.f32 %v11990_v63, %v11919_v41  ;;  %v1446_v18 = vadd.f32 %v12036_v48, %v1405_v3  ;;  %v1942_v24 = vadd.f32 %v12029_v36, %v1901_v60 }
 0x123   : > { %v1887_v17 = vadd.f32 %v1847_v54, %v1806_v29  ;;  %775 = vperm.xlu2 %11138, %v11912_v38   ;;  %v12268_v11 = vpop.permute.xlu0 %683  ;;  %v1399_v27 = vadd.f32 %v1359_v30, %v1318_v12  ;;  %v1288_v54 = vmul.f32 %v12007_v7, %v11967_v58  ;;  %v1743_v30 = vmul.f32 %v11987_v62, %v11934_v47 }
 0x124   : > { %10774 = vmatpush.xpose.msk.msra.mxu0 %vm2698_vm0, %v1938_v21  ;;  %v1784_v21 = vmul.f32 %v12002_v5, %v12076_v15  ;;  %18855 = vst [vmem:[#allocation69_spill] sm:$0xff] %v12268_v11  ;;  %v12276_v29 = vpop.permute.xlu2 %711  ;;  %v1767_v33 = vmul.f32 %v12002_v5, %v12268_v11  ;;  %v1279_v38 = vmul.f32 %v12007_v7, %v12268_v11 }
 0x125   : > { %18856 = vst [vmem:[#allocation70_spill] sm:$0xff] %v12276_v29  ;;  %v1928_v26 = vadd.f32 %v12029_v36, %v1887_v17  ;;  %11160 = vset.pattern.permute.xlu0 %v18819_v22  ;;  %v1328_v12 = vadd.f32 %v1288_v54, %v1247_v9  ;;  %v1292_v41 = vmul.f32 %v12007_v7, %v12066_v0 }
 0x126   : > { %v1807_v17 = vadd.f32 %v1767_v33, %v1726_v25  ;;  %v1319_v11 = vadd.f32 %v1279_v38, %v1238_v39  ;;  %v1824_v28 = vadd.f32 %v1784_v21, %v1743_v30  ;;  %v1440_v3 = vadd.f32 %v12036_v48, %v1399_v27 }
 0x127   : > { %10754 = vmatpush.xpose.msk.msra.mxu2 %vm2698_vm0, %v1928_v26  ;;  %10767 = vmatmul.msk.f32.vlgmr.msrb.gmra.mxu0 %vm2698_vm0, %v1446_v18  ;;  %v1360_v9 = vmul.f32 %v12017_v16, %v12124_v10  ;;  %v1369_v60 = vmul.f32 %v12017_v16, %v11906_v35  ;;  %v1255_v25 = vmul.f32 %v11990_v63, %v11934_v47 }
 0x128   : > { %v12293_v40 = vpop.permute.xlu1 %851  ;;  %10782 = vmatpush.xpose.msk.msrb.mxu0 %vm2698_vm0, %v1942_v24  ;;  %v1888_v54 = vadd.f32 %v1848_v37, %v1807_v17  ;;  %v1865_v21 = vmul.f32 %v11995_v2, %v12045_v19  ;;  %v1729_v39 = vmul.f32 %v11987_v62, %v11965_v57  ;;  %v1251_v27 = vmul.f32 %v11990_v63, %v11953_v53 }
 0x129   : > { %18857 = vst [vmem:[#allocation71_spill] sm:$0xff] %v12293_v40  ;;  %v1400_v26 = vadd.f32 %v1360_v9, %v1319_v11  ;;  %v1409_v33 = vadd.f32 %v1369_v60, %v1328_v12  ;;  %v1373_v38 = vmul.f32 %v12017_v16, %v12023_v20  ;;  %v1241_v30 = vmul.f32 %v11990_v63, %v11965_v57 }
 0x12a   : > { %10755 = vmatmul.msk.f32.vlgmr.msra.gmra.mxu2 %vm2698_vm0, %v1440_v3  ;;  %11141 = vset.pattern.permute.xlu1 %v18838_v44  ;;  %v1929_v37 = vadd.f32 %v12029_v36, %v1888_v54  ;;  %v1905_v18 = vadd.f32 %v1865_v21, %v1824_v28  ;;  %v1332_v24 = vadd.f32 %v1292_v41, %v1251_v27 }
 0x12b   : > { %v1788_v17 = vmul.f32 %v12002_v5, %v12085_v23  ;;  %11140 = vset.pattern.permute.xlu2 %v18819_v22  ;;  %617 = vperm.xlu1 %11141, %v11814_v8   ;;  %v12321_v11 = vpop.permute.xlu0 %691  ;;  %v1770_v12 = vmul.f32 %v12002_v5, %v12144_v52  ;;  %v1747_v3 = vmul.f32 %v11987_v62, %v12081_v14 }
 0x12c   : > { %18858 = vst [vmem:[#allocation72_spill] sm:$0xff] %v12321_v11  ;;  %v1296_v9 = vmul.f32 %v12007_v7, %v12076_v15  ;;  %939 = vperm.xlu2 %11140, %v12108_v13   ;;  %10756 = vmatpush.xpose.msk.msrb.mxu3 %vm2698_vm0, %v1929_v37  ;;  %v1769_v28 = vmul.f32 %v12002_v5, %v12321_v11 }
 0x12d   : > { %v1850_v41 = vmul.f32 %v11995_v2, %v12293_v40  ;;  %v1281_v60 = vmul.f32 %v12007_v7, %v12321_v11  ;;  %v12337_v54 = vpop.permute.xlu2 %875  ;;  %v1441_v21 = vadd.f32 %v12036_v48, %v1400_v26  ;;  %v1450_v27 = vadd.f32 %v12036_v48, %v1409_v33  ;;  %v18861_v33 = vld [vmem:[#allocation38_spill] sm:$0xff] }
 0x12e   : > { %18859 = vst [vmem:[#allocation73_spill] sm:$0xff] %v12337_v54  ;;  %v1362_v13 = vmul.f32 %v12017_v16, %v12293_v40  ;;  %v1282_v37 = vmul.f32 %v12007_v7, %v12144_v52  ;;  %v1946_v10 = vadd.f32 %v12029_v36, %v1905_v18  ;;  %v1809_v57 = vadd.f32 %v1769_v28, %v12222_v42  ;;  %v18862_v28 = vld [vmem:[#allocation14_spill] sm:$0xff] }
 0x12f   : > { %v1321_v47 = vadd.f32 %v1281_v60, %v12236_v43  ;;  %v1828_v15 = vadd.f32 %v1788_v17, %v1747_v3  ;;  %10757 = vmatmul.msk.f32.vlgmr.msrb.gmra.mxu3 %vm2698_vm0, %v1441_v21  ;;  %10775 = vmatmul.msk.f32.vlgmr.msra.gmra.mxu0 %vm2698_vm0, %v1450_v27  ;;  %v1413_v26 = vadd.f32 %v1373_v38, %v1332_v24  ;;  %v18866_v21 = vld [vmem:[#allocation41_spill] sm:$0xff] }
 0x130   : > { %v12348_v11 = vpop.permute.xlu1 %855  ;;  %v1869_v40 = vmul.f32 %v11995_v2, %v18861_v33  ;;  %v1336_v20 = vadd.f32 %v1296_v9, %v1255_v25  ;;  %10790 = vmatpush.xpose.msk.msra.mxu0 %vm2698_vm0, %v1946_v10  ;;  %v1890_v52 = vadd.f32 %v1850_v41, %v1809_v57  ;;  %v1810_v18 = vadd.f32 %v1770_v12, %v1729_v39  ;;  %v18863_v57 = vld [vmem:[#allocation49_spill] sm:$0xff]  ;;  %v18864_v12 = vld [vmem:[#allocation2_spill] sm:$0xff] }
 0x131   : > { %18860 = vst [vmem:[#allocation74_spill] sm:$0xff] %v12348_v11  ;;  %v1851_v42 = vmul.f32 %v11995_v2, %v12348_v11  ;;  %v1363_v43 = vmul.f32 %v12017_v16, %v12348_v11  ;;  %v1402_v17 = vadd.f32 %v1362_v13, %v1321_v47  ;;  %v1322_v3 = vadd.f32 %v1282_v37, %v1241_v30 }
 0x132   : > { %v1730_v60 = vmul.f32 %v11987_v62, %v18862_v28  ;;  %v1377_v38 = vmul.f32 %v12017_v16, %v12045_v19  ;;  %v1931_v25 = vadd.f32 %v12029_v36, %v1890_v52  ;;  %v1909_v10 = vadd.f32 %v1869_v40, %v1828_v15 }
 0x133   : > { %v1891_v24 = vadd.f32 %v1851_v42, %v1810_v18  ;;  %v1751_v39 = vmul.f32 %v11987_v62, %v18863_v57  ;;  %622 = vperm.xlu1 %11141, %v18864_v12   ;;  %v12367_v9 = vpop.permute.xlu0 %699  ;;  %v1454_v47 = vadd.f32 %v12036_v48, %v1413_v26  ;;  %v1403_v30 = vadd.f32 %v1363_v43, %v1322_v3 }
 0x134   : > { %18865 = vst [vmem:[#allocation2_spill] sm:$0xff] %v12367_v9  ;;  %v1242_v41 = vmul.f32 %v11990_v63, %v18862_v28  ;;  %v1792_v27 = vmul.f32 %v12002_v5, %v18866_v21  ;;  %11142 = vset.pattern.permute.xlu2 %v18836_v56  ;;  %10760 = vmatpush.xpose.msk.msrb.mxu1 %vm2698_vm0, %v1931_v25  ;;  %v18875_v28 = vld [vmem:[#allocation56_spill] sm:$0xff] }
 0x135   : > { %v1932_v40 = vadd.f32 %v12029_v36, %v1891_v24  ;;  %v1771_v52 = vmul.f32 %v12002_v5, %v12367_v9  ;;  %v1417_v15 = vadd.f32 %v1377_v38, %v1336_v20  ;;  %787 = vperm.xlu2 %11142, %v11814_v8   ;;  %v1443_v13 = vadd.f32 %v12036_v48, %v1402_v17 }
 0x136   : > { %v1283_v37 = vmul.f32 %v12007_v7, %v12367_v9  ;;  %v1259_v26 = vmul.f32 %v11990_v63, %v12081_v14  ;;  %v1300_v18 = vmul.f32 %v12007_v7, %v12085_v23  ;;  %v12387_v42 = vpop.permute.xlu2 %727  ;;  %v1950_v43 = vadd.f32 %v12029_v36, %v1909_v10  ;;  %v18869_v10 = vld [vmem:[#allocation10_spill] sm:$0xff] }
 0x137   : > { %18867 = vst [vmem:[#allocation75_spill] sm:$0xff] %v12387_v42  ;;  %10762 = vmatpush.xpose.msk.msrb.mxu2 %vm2698_vm0, %v1932_v40  ;;  %v1811_v20 = vadd.f32 %v1771_v52, %v1730_v60  ;;  %v1852_v8 = vmul.f32 %v11995_v2, %v12205_v59  ;;  %v1832_v17 = vadd.f32 %v1792_v27, %v1751_v39 }
 0x138   : > { %v12393_v3 = vpop.permute.xlu1 %867  ;;  %10761 = vmatmul.msk.f32.vlgmr.msrb.gmra.mxu1 %vm2698_vm0, %v1443_v13  ;;  %10783 = vmatmul.msk.f32.vlgmr.msrb.gmra.mxu0 %vm2698_vm0, %v1454_v47  ;;  %v1444_v38 = vadd.f32 %v12036_v48, %v1403_v30  ;;  %v1323_v25 = vadd.f32 %v1283_v37, %v1242_v41  ;;  %v1364_v24 = vmul.f32 %v12017_v16, %v12205_v59  ;;  %v18870_v41 = vld [vmem:[#allocation17_spill] sm:$0xff] }
 0x139   : > { %18868 = vst [vmem:[#allocation76_spill] sm:$0xff] %v12393_v3  ;;  %10798 = vmatpush.xpose.msk.msrb.mxu0 %vm2698_vm0, %v1950_v43  ;;  %v1892_v60 = vadd.f32 %v1852_v8, %v1811_v20  ;;  %v1873_v40 = vmul.f32 %v11995_v2, %v18869_v10  ;;  %v12405_v39 = vmul.f32 %v11990_v63, %v11904_v34  ;;  %v18871_v20 = vld [vmem:[#allocation29_spill] sm:$0xff] }
 0x13a   : > { %v12409_v47 = vmul.f32 %v12017_v16, %v18869_v10  ;;  %10763 = vmatmul.msk.f32.vlgmr.msrb.gmra.mxu2 %vm2698_vm0, %v1444_v38  ;;  %v1404_v30 = vadd.f32 %v1364_v24, %v1323_v25  ;;  %v1733_v27 = vmul.f32 %v11987_v62, %v18870_v41  ;;  %v1340_v52 = vadd.f32 %v1300_v18, %v1259_v26  ;;  %v386_v25 = vld [vmem:[%s11790_s14 + $0xf8] sm:$0xff]  ;;  %v18873_v18 = vld [vmem:[#allocation52_spill] sm:$0xff] }
 0x13b   : > { %v1245_v13 = vmul.f32 %v11990_v63, %v18870_v41  ;;  %v1933_v37 = vadd.f32 %v12029_v36, %v1892_v60  ;;  %v1913_v43 = vadd.f32 %v1873_v40, %v1832_v17  ;;  %v1732_v8 = vmul.f32 %v11987_v62, %v18871_v20  ;;  %11144 = vset.pattern.permute.xlu1 %v18836_v56  ;;  %v12422_v38 = vpop.permute.xlu0 %707  ;;  %v18874_v17 = vld [vmem:[#allocation44_spill] sm:$0xff] }
 0x13c   : > { %v1244_v9 = vmul.f32 %v11990_v63, %v18871_v20  ;;  %18872 = vst [vmem:[#allocation77_spill] sm:$0xff] %v12422_v38  ;;  %v1458_v24 = vadd.f32 %v12036_v48, %v1417_v15  ;;  %v1381_v26 = vmul.f32 %v12017_v16, %v18861_v33  ;;  %v1755_v60 = vmul.f32 %v11987_v62, %v18873_v18 }
 0x13d   : > { %v1796_v40 = vmul.f32 %v12002_v5, %v18874_v17  ;;  %791 = vperm.xlu1 %11144, %v18864_v12   ;;  %10764 = vmatpush.xpose.msk.msra.mxu3 %vm2698_vm0, %v1933_v37  ;;  %v1773_v11 = vmul.f32 %v12002_v5, %v12422_v38  ;;  %v1774_v59 = vmul.f32 %v12002_v5, %v12276_v29 }
 0x13e   : > { %v1285_v15 = vmul.f32 %v12007_v7, %v12422_v38  ;;  %11143 = vset.pattern.permute.xlu2 %v18838_v44  ;;  %v1445_v20 = vadd.f32 %v12036_v48, %v1404_v30  ;;  %v1421_v41 = vadd.f32 %v1381_v26, %v1340_v52  ;;  %v1877_v34 = vmul.f32 %v11995_v2, %v18875_v28 }
 0x13f   : > { %v1286_v12 = vmul.f32 %v12007_v7, %v12276_v29  ;;  %627 = vperm.xlu2 %11143, %v386_v25   ;;  %v1954_v37 = vadd.f32 %v12029_v36, %v1913_v43  ;;  %v1813_v10 = vadd.f32 %v1773_v11, %v1732_v8  ;;  %v1854_v33 = vmul.f32 %v11995_v2, %v12393_v3  ;;  %v12449_v38 = vpop.permute.xlu2 %891  ;;  %v18878_v29 = vld [vmem:[#allocation9_spill] sm:$0xff] }
 0x140   : > { %v1325_v14 = vadd.f32 %v1285_v15, %v1244_v9  ;;  %18876 = vst [vmem:[#allocation78_spill] sm:$0xff] %v12449_v38  ;;  %v12451_v23 = vpop.permute.xlu1 %871  ;;  %10765 = vmatmul.msk.f32.vlgmr.msra.gmra.mxu3 %vm2698_vm0, %v1445_v20  ;;  %10791 = vmatmul.msk.f32.vlgmr.msra.gmra.mxu0 %vm2698_vm0, %v1458_v24  ;;  %v1366_v30 = vmul.f32 %v12017_v16, %v12393_v3 }
 0x141   : > { %18877 = vst [vmem:[#allocation79_spill] sm:$0xff] %v12451_v23  ;;  %v1836_v52 = vadd.f32 %v1796_v40, %v1755_v60  ;;  %v1263_v43 = vmul.f32 %v11990_v63, %v18863_v57  ;;  %10806 = vmatpush.xpose.msk.msra.mxu0 %vm2698_vm0, %v1954_v37  ;;  %v1894_v11 = vadd.f32 %v1854_v33, %v1813_v10 }
 0x142   : > { %v1814_v8 = vadd.f32 %v1774_v59, %v1733_v27  ;;  %v1855_v9 = vmul.f32 %v11995_v2, %v12451_v23  ;;  %v1367_v26 = vmul.f32 %v12017_v16, %v12451_v23  ;;  %v1406_v20 = vadd.f32 %v1366_v30, %v1325_v14 }
 0x143   : > { %v1917_v15 = vadd.f32 %v1877_v34, %v1836_v52  ;;  %v1326_v24 = vadd.f32 %v1286_v12, %v1245_v13  ;;  %v12466_v3 = vmul.f32 %v11987_v62, %v18878_v29  ;;  %v1935_v60 = vadd.f32 %v12029_v36, %v1894_v11  ;;  %v12473_v10 = vpop.permute.xlu0 %715  ;;  %v18880_v34 = vld [vmem:[#allocation47_spill] sm:$0xff] }
 0x144   : > { %v1895_v40 = vadd.f32 %v1855_v9, %v1814_v8  ;;  %v1304_v33 = vmul.f32 %v12007_v7, %v18866_v21  ;;  %v1800_v59 = vmul.f32 %v12002_v5, %v12207_v46  ;;  %18879 = vst [vmem:[#allocation80_spill] sm:$0xff] %v12473_v10  ;;  %v1462_v27 = vadd.f32 %v12036_v48, %v1421_v41  ;;  %v18881_v9 = vld [vmem:[#allocation60_spill] sm:$0xff] }
 0x145   : > { %v1407_v14 = vadd.f32 %v1367_v26, %v1326_v24  ;;  %v1759_v13 = vmul.f32 %v11987_v62, %v18880_v34  ;;  %v12480_v12 = vmul.f32 %v11990_v63, %v18878_v29  ;;  %11147 = vset.pattern.permute.xlu1 %v18819_v22  ;;  %10768 = vmatpush.xpose.msk.msra.mxu1 %vm2698_vm0, %v1935_v60  ;;  %v18888_v29 = vld [vmem:[#allocation30_spill] sm:$0xff]  ;;  %v18889_v21 = vld [vmem:[#allocation20_spill] sm:$0xff] }
 0x146   : > { %v1936_v37 = vadd.f32 %v12029_v36, %v1895_v40  ;;  %v1775_v30 = vmul.f32 %v12002_v5, %v12473_v10  ;;  %v1344_v52 = vadd.f32 %v1304_v33, %v1263_v43  ;;  %955 = vperm.xlu1 %11147, %v386_v25   ;;  %v1447_v41 = vadd.f32 %v12036_v48, %v1406_v20  ;;  %v18882_v40 = vld [vmem:[#allocation27_spill] sm:$0xff] }
 0x147   : > { %v1958_v11 = vadd.f32 %v12029_v36, %v1917_v15  ;;  %v1287_v8 = vmul.f32 %v12007_v7, %v12473_v10  ;;  %v1881_v26 = vmul.f32 %v11995_v2, %v18881_v9  ;;  %11145 = vset.pattern.permute.xlu2 %v18836_v56  ;;  %v1856_v43 = vmul.f32 %v11995_v2, %v12337_v54 }
 0x148   : > { %10770 = vmatpush.xpose.msk.msra.mxu2 %vm2698_vm0, %v1936_v37  ;;  %v1815_v24 = vadd.f32 %v1775_v30, %v12265_v61  ;;  %v1840_v60 = vadd.f32 %v1800_v59, %v1759_v13  ;;  %v12499_v20 = vperm.slane %v18882_v40, 5  ;;  %795 = vperm.xlu2 %11145, %v386_v25   ;;  %v12501_v15 = vpop.permute.xlu1 %883  ;;  %v1448_v33 = vadd.f32 %v12036_v48, %v1407_v14  ;;  %v18884_v61 = vld [vmem:[#allocation28_spill] sm:$0xff]  ;;  %v12511_v23 = vpop.permute.xlu2 %743  ;;  %v18886_v25 = vld [vmem:[#allocation18_spill] sm:$0xff]  ;;  %v18887_v14 = vld [vmem:[#allocation19_spill] sm:$0xff] }
 0x149   : > { %18883 = vst [vmem:[#allocation27_spill] sm:$0xff] %v12501_v15  ;;  %10769 = vmatmul.msk.f32.vlgmr.msra.gmra.mxu1 %vm2698_vm0, %v1447_v41  ;;  %v1327_v10 = vadd.f32 %v1287_v8, %v12405_v39  ;;  %v1368_v37 = vmul.f32 %v12017_v16, %v12337_v54  ;;  %v12509_v30 = vperm.slane %v18884_v61, 5  ;;  %10799 = vmatmul.msk.f32.vlgmr.msrb.gmra.mxu0 %vm2698_vm0, %v1462_v27 }
 0x14a   : > { %18885 = vst [vmem:[#allocation28_spill] sm:$0xff] %v12511_v23  ;;  %v1896_v59 = vadd.f32 %v1856_v43, %v1815_v24  ;;  %v1736_v13 = vmul.f32 %v11987_v62, %v18886_v25  ;;  %v1248_v41 = vmul.f32 %v11990_v63, %v18886_v25  ;;  %v1967_v39 = vmul.f32 %v12141_v51, %v18887_v14 }
 0x14b   : > { %10814 = vmatpush.xpose.msk.msrb.mxu0 %vm2698_vm0, %v1958_v11  ;;  %10771 = vmatmul.msk.f32.vlgmr.msra.gmra.mxu2 %vm2698_vm0, %v1448_v33  ;;  %v1408_v8 = vadd.f32 %v1368_v37, %v1327_v10  ;;  %v1267_v54 = vmul.f32 %v11990_v63, %v18873_v18  ;;  %v2008_v27 = vmul.f32 %v12509_v30, %v18888_v29  ;;  %v12527_v24 = vperm.slane %v18884_v61, 4  ;;  %v12535_v10 = vpop.permute.xlu0 %723 }
 0x14c   : > { %v1937_v43 = vadd.f32 %v12029_v36, %v1896_v59  ;;  %v1425_v25 = vadd.f32 %v12409_v47, %v1344_v52  ;;  %v2089_v57 = vmul.f32 %v12499_v20, %v18889_v21  ;;  %v1479_v11 = vmul.f32 %v12149_v50, %v18887_v14  ;;  %18890 = vst [vmem:[#allocation81_spill] sm:$0xff] %v12535_v10  ;;  %v18891_v14 = vld [vmem:[#allocation55_spill] sm:$0xff] }
 0x14d   : > { %v1921_v33 = vadd.f32 %v1881_v26, %v1840_v60  ;;  %v1308_v37 = vmul.f32 %v12007_v7, %v18874_v17  ;;  %v1389_v61 = vmul.f32 %v12017_v16, %v18875_v28  ;;  %v12543_v59 = vmul.f32 %v12509_v30, %v11957_v55 }
 0x14e   : > { %10772 = vmatpush.xpose.msk.msrb.mxu3 %vm2698_vm0, %v1937_v43  ;;  %v1777_v47 = vmul.f32 %v12002_v5, %v12535_v10  ;;  %v1778_v52 = vmul.f32 %v12002_v5, %v12387_v42  ;;  %v1289_v26 = vmul.f32 %v12007_v7, %v12535_v10  ;;  %v1520_v60 = vmul.f32 %v12527_v24, %v18888_v29 }
 0x14f   : > { %963 = vperm.xlu1 %11147, %v18891_v14   ;;  %v1449_v28 = vadd.f32 %v12036_v48, %v1408_v8  ;;  %v1348_v17 = vadd.f32 %v1308_v37, %v1267_v54  ;;  %v2048_v18 = vadd.f32 %v2008_v27, %v1967_v39  ;;  %v1290_v43 = vmul.f32 %v12007_v7, %v12387_v42 }
 0x150   : > { %v1466_v19 = vadd.f32 %v12036_v48, %v1425_v25  ;;  %v1817_v0 = vadd.f32 %v1777_v47, %v1736_v13  ;;  %v1858_v31 = vmul.f32 %v11995_v2, %v12501_v15  ;;  %v1329_v53 = vadd.f32 %v1289_v26, %v1248_v41  ;;  %11148 = vset.pattern.permute.xlu2 %v18838_v44  ;;  %v12562_v10 = vpop.permute.xlu1 %887  ;;  %v18896_v26 = vld [vmem:[#allocation36_spill] sm:$0xff] }
 0x151   : > { %18892 = vst [vmem:[#allocation55_spill] sm:$0xff] %v12562_v10  ;;  %10773 = vmatmul.msk.f32.vlgmr.msrb.gmra.mxu3 %vm2698_vm0, %v1449_v28  ;;  %v1962_v8 = vadd.f32 %v12029_v36, %v1921_v33  ;;  %v1370_v54 = vmul.f32 %v12017_v16, %v12501_v15  ;;  %v1429_v39 = vadd.f32 %v1389_v61, %v1348_v17  ;;  %v12569_v27 = vperm.slane %v18882_v40, 4  ;;  %v18893_v28 = vld [vmem:[#allocation31_spill] sm:$0xff]  ;;  %v12580_v33 = vpop.permute.xlu2 %907 }
 0x152   : > { %637 = vperm.xlu2 %11148, %v18891_v14   ;;  %10807 = vmatmul.msk.f32.vlgmr.msra.gmra.mxu0 %vm2698_vm0, %v1466_v19  ;;  %v1898_v25 = vadd.f32 %v1858_v31, %v1817_v0  ;;  %v1818_v13 = vadd.f32 %v1778_v52, %v12466_v3  ;;  %v1859_v41 = vmul.f32 %v11995_v2, %v12562_v10  ;;  %v12577_v37 = vperm.slane %v18893_v28, 5 }
 0x153   : > { %10822 = vmatpush.xpose.msk.msra.mxu0 %vm2698_vm0, %v1962_v8  ;;  %18894 = vst [vmem:[#allocation31_spill] sm:$0xff] %v12580_v33  ;;  %v1410_v17 = vadd.f32 %v1370_v54, %v1329_v53  ;;  %v1330_v40 = vadd.f32 %v1290_v43, %v12480_v12  ;;  %v1371_v14 = vmul.f32 %v12017_v16, %v12562_v10  ;;  %v12588_v47 = vpop.permute.xlu0 %731  ;;  %v18897_v43 = vld [vmem:[#allocation62_spill] sm:$0xff] }
 0x154   : > { %v1312_v19 = vmul.f32 %v12007_v7, %v12207_v46  ;;  %v1939_v0 = vadd.f32 %v12029_v36, %v1898_v25  ;;  %v1899_v31 = vadd.f32 %v1859_v41, %v1818_v13  ;;  %v2129_v3 = vadd.f32 %v2089_v57, %v2048_v18  ;;  %18895 = vst [vmem:[#allocation82_spill] sm:$0xff] %v12588_v47 }
 0x155   : > { %v1560_v61 = vadd.f32 %v1520_v60, %v1479_v11  ;;  %v1411_v52 = vadd.f32 %v1371_v14, %v1330_v40  ;;  %v1738_v53 = vmul.f32 %v11987_v62, %v18896_v26  ;;  %v1271_v12 = vmul.f32 %v11990_v63, %v18880_v34  ;;  %v389_v60 = vld [vmem:[%s11790_s14 + $0x110] sm:$0xff]  ;;  %v18898_v14 = vld [vmem:[#allocation59_spill] sm:$0xff] }
 0x156   : > { %v2012_v8 = vmul.f32 %v12509_v30, %v18897_v43  ;;  %10776 = vmatpush.xpose.msk.msrb.mxu1 %vm2698_vm0, %v1939_v0  ;;  %v1940_v54 = vadd.f32 %v12029_v36, %v1899_v31  ;;  %v1779_v57 = vmul.f32 %v12002_v5, %v12588_v47  ;;  %v1250_v18 = vmul.f32 %v11990_v63, %v18896_v26 }
 0x157   : > { %v1291_v11 = vmul.f32 %v12007_v7, %v12588_v47  ;;  %11149 = vset.pattern.permute.xlu1 %v18838_v44  ;;  %v1451_v25 = vadd.f32 %v12036_v48, %v1410_v17  ;;  %v1470_v13 = vadd.f32 %v12036_v48, %v1429_v39  ;;  %v1352_v41 = vadd.f32 %v1312_v19, %v1271_v12 }
 0x158   : > { %v1393_v40 = vmul.f32 %v12017_v16, %v18881_v9  ;;  %647 = vperm.xlu1 %11149, %v18898_v14   ;;  %10778 = vmatpush.xpose.msk.msrb.mxu2 %vm2698_vm0, %v1940_v54  ;;  %v1819_v0 = vadd.f32 %v1779_v57, %v1738_v53  ;;  %v1860_v31 = vmul.f32 %v11995_v2, %v12449_v38  ;;  %v12614_v10 = vpop.permute.xlu1 %899 }
 0x159   : > { %v1331_v47 = vadd.f32 %v1291_v11, %v1250_v18  ;;  %18899 = vst [vmem:[#allocation59_spill] sm:$0xff] %v12614_v10  ;;  %10777 = vmatmul.msk.f32.vlgmr.msrb.gmra.mxu1 %vm2698_vm0, %v1451_v25  ;;  %v2170_v17 = vadd.f32 %v12577_v37, %v2129_v3  ;;  %v1452_v39 = vadd.f32 %v12036_v48, %v1411_v52  ;;  %v18901_v11 = vld [vmem:[#allocation12_spill] sm:$0xff] }
 0x15a   : > { %v1372_v19 = vmul.f32 %v12017_v16, %v12449_v38  ;;  %v2052_v12 = vadd.f32 %v2012_v8, %v12175_v49  ;;  %642 = vperm.xlu2 %11148, %v389_v60   ;;  %10815 = vmatmul.msk.f32.vlgmr.msrb.gmra.mxu0 %vm2698_vm0, %v1470_v13  ;;  %v1900_v53 = vadd.f32 %v1860_v31, %v1819_v0  ;;  %v12633_v8 = vpop.permute.xlu2 %582 }
 0x15b   : > { %v1601_v54 = vmul.f32 %v12569_v27, %v18889_v21  ;;  %v12627_v57 = vmul.f32 %v12149_v50, %v11894_v32  ;;  %10830 = vmatpush.xpose.msk.msrb.mxu0 %vm2698_vm0, %v2170_v17  ;;  %10779 = vmatmul.msk.f32.vlgmr.msrb.gmra.mxu2 %vm2698_vm0, %v1452_v39  ;;  %v1433_v52 = vadd.f32 %v1393_v40, %v1352_v41  ;;  %v12642_v31 = vpop.permute.xlu0 %739 }
 0x15c   : > { %v1412_v3 = vadd.f32 %v1372_v19, %v1331_v47  ;;  %v2093_v49 = vmul.f32 %v12499_v20, %v12043_v6  ;;  %18900 = vst [vmem:[#allocation83_spill] sm:$0xff] %v12633_v8  ;;  %v1941_v18 = vadd.f32 %v12029_v36, %v1900_v53  ;;  %v1740_v25 = vmul.f32 %v11987_v62, %v18901_v11 }
 0x15d   : > { %v1252_v13 = vmul.f32 %v11990_v63, %v18901_v11  ;;  %v2101_v0 = vmul.f32 %v12499_v20, %v11906_v35  ;;  %18902 = vst [vmem:[#allocation84_spill] sm:$0xff] %v12642_v31  ;;  %v1641_v41 = vadd.f32 %v1601_v54, %v1560_v61  ;;  %v2056_v40 = vadd.f32 %v12543_v59, %v12240_v45  ;;  %v18903_v59 = vld [vmem:[#allocation39_spill] sm:$0xff] }
 0x15e   : > { %v2133_v47 = vadd.f32 %v2093_v49, %v2052_v12  ;;  %v2020_v17 = vmul.f32 %v12509_v30, %v11967_v58  ;;  %10780 = vmatpush.xpose.msk.msra.mxu3 %vm2698_vm0, %v1941_v18  ;;  %v1781_v39 = vmul.f32 %v12002_v5, %v12642_v31  ;;  %v1782_v19 = vmul.f32 %v12002_v5, %v12511_v23 }
 0x15f   : > { %v1293_v53 = vmul.f32 %v12007_v7, %v12642_v31  ;;  %v1979_v61 = vmul.f32 %v12141_v51, %v12039_v4  ;;  %v1453_v12 = vadd.f32 %v12036_v48, %v1412_v3  ;;  %v1474_v45 = vadd.f32 %v12036_v48, %v1433_v52 }
 0x160   : > { %v1741_v54 = vmul.f32 %v11987_v62, %v18903_v59  ;;  %v2097_v49 = vmul.f32 %v12499_v20, %v12055_v1  ;;  %11151 = vset.pattern.permute.xlu1 %v18819_v22  ;;  %v1821_v18 = vadd.f32 %v1781_v39, %v1740_v25  ;;  %v1862_v32 = vmul.f32 %v11995_v2, %v12614_v10  ;;  %v12668_v3 = vpop.permute.xlu1 %903 }
 0x161   : > { %v1333_v38 = vadd.f32 %v1293_v53, %v1252_v13  ;;  %v1294_v31 = vmul.f32 %v12007_v7, %v12511_v23  ;;  %967 = vperm.xlu1 %11151, %v389_v60   ;;  %18904 = vst [vmem:[#allocation85_spill] sm:$0xff] %v12668_v3  ;;  %10781 = vmatmul.msk.f32.vlgmr.msra.gmra.mxu3 %vm2698_vm0, %v1453_v12 }
 0x162   : > { %v2174_v52 = vadd.f32 %v12577_v37, %v2133_v47  ;;  %v1374_v15 = vmul.f32 %v12017_v16, %v12614_v10  ;;  %v1253_v25 = vmul.f32 %v11990_v63, %v18903_v59  ;;  %11150 = vset.pattern.permute.xlu2 %v18836_v56  ;;  %10823 = vmatmul.msk.f32.vlgmr.msra.gmra.mxu0 %vm2698_vm0, %v1474_v45  ;;  %v12682_v47 = vperm.slane %v18893_v28, 4 }
 0x163   : > { %v1902_v13 = vadd.f32 %v1862_v32, %v1821_v18  ;;  %v1822_v39 = vadd.f32 %v1782_v19, %v1741_v54  ;;  %v1863_v53 = vmul.f32 %v11995_v2, %v12668_v3  ;;  %807 = vperm.xlu2 %11150, %v389_v60   ;;  %v1375_v23 = vmul.f32 %v12017_v16, %v12668_v3  ;;  %v12689_v19 = vpop.permute.xlu2 %763  ;;  %v12691_v54 = vpop.permute.xlu0 %747 }
 0x164   : > { %10838 = vmatpush.xpose.msk.msra.mxu0 %vm2698_vm0, %v2174_v52  ;;  %v1414_v12 = vadd.f32 %v1374_v15, %v1333_v38  ;;  %v2060_v10 = vadd.f32 %v2020_v17, %v1979_v61  ;;  %v1334_v45 = vadd.f32 %v1294_v31, %v1253_v25  ;;  %v1524_v32 = vmul.f32 %v12527_v24, %v18897_v43  ;;  %v18907_v38 = vld [vmem:[#allocation24_spill] sm:$0xff] }
 0x165   : > { %v1943_v42 = vadd.f32 %v12029_v36, %v1902_v13  ;;  %v1903_v59 = vadd.f32 %v1863_v53, %v1822_v39  ;;  %18905 = vst [vmem:[#allocation86_spill] sm:$0xff] %v12689_v19  ;;  %v2137_v60 = vadd.f32 %v2097_v49, %v2056_v40  ;;  %v1742_v15 = vmul.f32 %v11987_v62, %v18907_v38  ;;  %v18908_v13 = vld [vmem:[#allocation21_spill] sm:$0xff] }
 0x166   : > { %18906 = vst [vmem:[#allocation87_spill] sm:$0xff] %v12691_v54  ;;  %v1254_v28 = vmul.f32 %v11990_v63, %v18907_v38  ;;  %v1528_v17 = vmul.f32 %v12527_v24, %v11957_v55  ;;  %v1415_v61 = vadd.f32 %v1375_v23, %v1334_v45  ;;  %v1783_v18 = vmul.f32 %v12002_v5, %v12691_v54  ;;  %v18909_v53 = vld [vmem:[#allocation65_spill] sm:$0xff] }
 0x167   : > { %10784 = vmatpush.xpose.msk.msra.mxu1 %vm2698_vm0, %v1943_v42  ;;  %v1944_v31 = vadd.f32 %v12029_v36, %v1903_v59  ;;  %v1295_v40 = vmul.f32 %v12007_v7, %v12691_v54  ;;  %v1455_v49 = vadd.f32 %v12036_v48, %v1414_v12  ;;  %v1682_v52 = vadd.f32 %v12682_v47, %v1641_v41  ;;  %v11641_v12 = vld [vmem:[%s11790_s14 + $0x128] sm:$0xff] }
 0x168   : > { %v2141_v25 = vadd.f32 %v2101_v0, %v2060_v10  ;;  %v1983_v39 = vmul.f32 %v12141_v51, %v18908_v13  ;;  %v1823_v42 = vadd.f32 %v1783_v18, %v1742_v15  ;;  %v1864_v23 = vmul.f32 %v11995_v2, %v12580_v33  ;;  %v12714_v55 = vpop.permute.xlu1 %915 }
 0x169   : > { %10786 = vmatpush.xpose.msk.msra.mxu2 %vm2698_vm0, %v1944_v31  ;;  %v1335_v59 = vadd.f32 %v1295_v40, %v1254_v28  ;;  %v1564_v45 = vadd.f32 %v1524_v32, %v18909_v53  ;;  %11154 = vset.pattern.permute.xlu1 %v18836_v56  ;;  %18910 = vst [vmem:[#allocation65_spill] sm:$0xff] %v12714_v55 }
 0x16a   : > { %10785 = vmatmul.msk.f32.vlgmr.msra.gmra.mxu1 %vm2698_vm0, %v1455_v49  ;;  %v2178_v10 = vadd.f32 %v12577_v37, %v2137_v60  ;;  %v1376_v0 = vmul.f32 %v12017_v16, %v12580_v33  ;;  %v1568_v41 = vadd.f32 %v1528_v17, %v12627_v57  ;;  %819 = vperm.xlu1 %11154, %v11641_v12   ;;  %v18912_v49 = vld [vmem:[#allocation48_spill] sm:$0xff] }
 0x16b   : > { %10831 = vmatmul.msk.f32.vlgmr.msrb.gmra.mxu0 %vm2698_vm0, %v1682_v52  ;;  %v1456_v15 = vadd.f32 %v12036_v48, %v1415_v61  ;;  %v1904_v32 = vadd.f32 %v1864_v23, %v1823_v42  ;;  %v1605_v28 = vmul.f32 %v12569_v27, %v12043_v6  ;;  %11152 = vset.pattern.permute.xlu2 %v18819_v22  ;;  %v12736_v40 = vpop.permute.xlu0 %755  ;;  %v18913_v42 = vld [vmem:[#allocation42_spill] sm:$0xff] }
 0x16c   : > { %10846 = vmatpush.xpose.msk.msrb.mxu0 %vm2698_vm0, %v2178_v10  ;;  %v1416_v60 = vadd.f32 %v1376_v0, %v1335_v59  ;;  %v2182_v31 = vadd.f32 %v12577_v37, %v2141_v25  ;;  %v1787_v57 = vmul.f32 %v12002_v5, %v12689_v19  ;;  %971 = vperm.xlu2 %11152, %v18898_v14   ;;  %v18914_v59 = vld [vmem:[#allocation40_spill] sm:$0xff]  ;;  %v12746_v53 = vpop.permute.xlu2 %923 }
 0x16d   : > { %10787 = vmatmul.msk.f32.vlgmr.msra.gmra.mxu2 %vm2698_vm0, %v1456_v15  ;;  %v1945_v17 = vadd.f32 %v12029_v36, %v1904_v32  ;;  %v1645_v61 = vadd.f32 %v1605_v28, %v1564_v45  ;;  %v1609_v18 = vmul.f32 %v12569_v27, %v12055_v1  ;;  %18911 = vst [vmem:[#allocation88_spill] sm:$0xff] %v12736_v40 }
 0x16e   : > { %v1746_v52 = vmul.f32 %v11987_v62, %v18912_v49  ;;  %v1744_v25 = vmul.f32 %v11987_v62, %v18913_v42  ;;  %v1299_v23 = vmul.f32 %v12007_v7, %v12689_v19  ;;  %v2024_v14 = vmul.f32 %v12509_v30, %v18914_v59  ;;  %18915 = vst [vmem:[#allocation89_spill] sm:$0xff] %v12746_v53 }
 0x16f   : > { %10788 = vmatpush.xpose.msk.msrb.mxu3 %vm2698_vm0, %v1945_v17  ;;  %v1785_v45 = vmul.f32 %v12002_v5, %v12736_v40  ;;  %v1256_v10 = vmul.f32 %v11990_v63, %v18913_v42  ;;  %v1297_v0 = vmul.f32 %v12007_v7, %v12736_v40  ;;  %v1258_v15 = vmul.f32 %v11990_v63, %v18912_v49 }
 0x170   : > { %v1457_v32 = vadd.f32 %v12036_v48, %v1416_v60  ;;  %v1827_v28 = vadd.f32 %v1787_v57, %v1746_v52  ;;  %v1868_v1 = vmul.f32 %v11995_v2, %v12746_v53  ;;  %v1380_v17 = vmul.f32 %v12017_v16, %v12746_v53  ;;  %v12770_v53 = vpop.permute.xlu1 %759 }
 0x171   : > { %v1686_v19 = vadd.f32 %v12682_v47, %v1645_v61  ;;  %v1825_v33 = vadd.f32 %v1785_v45, %v1744_v25  ;;  %v1866_v54 = vmul.f32 %v11995_v2, %v12714_v55  ;;  %v1337_v3 = vadd.f32 %v1297_v0, %v1256_v10  ;;  %18916 = vst [vmem:[#allocation90_spill] sm:$0xff] %v12770_v53  ;;  %v18917_v25 = vld [vmem:[#allocation32_spill] sm:$0xff] }
 0x172   : > { %10789 = vmatmul.msk.f32.vlgmr.msrb.gmra.mxu3 %vm2698_vm0, %v1457_v32  ;;  %v1908_v40 = vadd.f32 %v1868_v1, %v1827_v28  ;;  %v1378_v60 = vmul.f32 %v12017_v16, %v12714_v55  ;;  %v1339_v57 = vadd.f32 %v1299_v23, %v1258_v15  ;;  %v2064_v52 = vadd.f32 %v2024_v14, %v1983_v39  ;;  %v18918_v1 = vld [vmem:[#allocation63_spill] sm:$0xff] }
 0x173   : > { %11155 = vset.pattern.permute.xlu1 %v18838_v44  ;;  %10839 = vmatmul.msk.f32.vlgmr.msra.gmra.mxu0 %vm2698_vm0, %v1686_v19  ;;  %v1906_v61 = vadd.f32 %v1866_v54, %v1825_v33  ;;  %v2105_v45 = vmul.f32 %v12499_v20, %v18917_v25  ;;  %v1491_v10 = vmul.f32 %v12149_v50, %v12039_v4  ;;  %v18919_v15 = vld [vmem:[#allocation43_spill] sm:$0xff] }
 0x174   : > { %10854 = vmatpush.xpose.msk.msra.mxu0 %vm2698_vm0, %v2182_v31  ;;  %662 = vperm.xlu1 %11155, %v18918_v1   ;;  %v1949_v23 = vadd.f32 %v12029_v36, %v1908_v40  ;;  %v1418_v39 = vadd.f32 %v1378_v60, %v1337_v3  ;;  %v1420_v14 = vadd.f32 %v1380_v17, %v1339_v57  ;;  %v12785_v32 = vpop.permute.xlu2 %931  ;;  %v18922_v1 = vld [vmem:[#allocation35_spill] sm:$0xff] }
 0x175   : > { %979 = vperm.xlu2 %11152, %v11641_v12   ;;  %v1947_v19 = vadd.f32 %v12029_v36, %v1906_v61  ;;  %v1649_v0 = vadd.f32 %v1609_v18, %v1568_v41  ;;  %v1532_v33 = vmul.f32 %v12527_v24, %v11967_v58  ;;  %v2145_v54 = vadd.f32 %v2105_v45, %v2064_v52  ;;  %v18921_v41 = vld [vmem:[#allocation15_spill] sm:$0xff]  ;;  %v394_v52 = vld [vmem:[%s11790_s14 + $0x138] sm:$0xff] }
 0x176   : > { %10796 = vmatpush.xpose.msk.msra.mxu3 %vm2698_vm0, %v1949_v23  ;;  %v2028_v31 = vmul.f32 %v12509_v30, %v18919_v15  ;;  %18920 = vst [vmem:[#allocation63_spill] sm:$0xff] %v12785_v32  ;;  %v1459_v12 = vadd.f32 %v12036_v48, %v1418_v39  ;;  %v1461_v40 = vadd.f32 %v12036_v48, %v1420_v14 }
 0x177   : > { %10792 = vmatpush.xpose.msk.msrb.mxu1 %vm2698_vm0, %v1947_v19  ;;  %v1572_v3 = vadd.f32 %v1532_v33, %v1491_v10  ;;  %v1987_v18 = vmul.f32 %v12141_v51, %v18921_v41  ;;  %v1690_v28 = vadd.f32 %v12682_v47, %v1649_v0  ;;  %v1786_v17 = vmul.f32 %v12002_v5, %v12770_v53  ;;  %v18924_v33 = vld [vmem:[#allocation46_spill] sm:$0xff] }
 0x178   : > { %v1613_v60 = vmul.f32 %v12569_v27, %v11906_v35  ;;  %v2186_v57 = vadd.f32 %v12577_v37, %v2145_v54  ;;  %v1745_v45 = vmul.f32 %v11987_v62, %v12633_v8  ;;  %v2109_v23 = vmul.f32 %v12499_v20, %v18922_v1 }
 0x179   : > { %v2068_v61 = vadd.f32 %v2028_v31, %v1987_v18  ;;  %v1298_v39 = vmul.f32 %v12007_v7, %v12770_v53  ;;  %v12810_v14 = vpop.permute.xlu1 %919  ;;  %v1257_v19 = vmul.f32 %v11990_v63, %v12633_v8  ;;  %v1536_v0 = vmul.f32 %v12527_v24, %v18914_v59 }
 0x17a   : > { %10793 = vmatmul.msk.f32.vlgmr.msrb.gmra.mxu1 %vm2698_vm0, %v1459_v12  ;;  %10797 = vmatmul.msk.f32.vlgmr.msra.gmra.mxu3 %vm2698_vm0, %v1461_v40  ;;  %v1653_v10 = vadd.f32 %v1613_v60, %v1572_v3  ;;  %18923 = vst [vmem:[#allocation91_spill] sm:$0xff] %v12810_v14  ;;  %v2032_v54 = vmul.f32 %v12509_v30, %v18924_v33  ;;  %v18925_v60 = vld [vmem:[#allocation45_spill] sm:$0xff] }
 0x17b   : > { %10847 = vmatmul.msk.f32.vlgmr.msrb.gmra.mxu0 %vm2698_vm0, %v1690_v28  ;;  %v1826_v31 = vadd.f32 %v1786_v17, %v1745_v45  ;;  %v1867_v3 = vmul.f32 %v11995_v2, %v12810_v14  ;;  %v2149_v12 = vadd.f32 %v2109_v23, %v2068_v61  ;;  %v1495_v40 = vmul.f32 %v12149_v50, %v18908_v13  ;;  %v18927_v23 = vld [vmem:[#allocation38_spill] sm:$0xff]  ;;  %v18939_v13 = vld [vmem:[#allocation56_spill] sm:$0xff] }
 0x17c   : > { %10862 = vmatpush.xpose.msk.msrb.mxu0 %vm2698_vm0, %v2186_v57  ;;  %11157 = vset.pattern.permute.xlu1 %v18836_v56  ;;  %v1379_v56 = vmul.f32 %v12017_v16, %v12810_v14  ;;  %v1338_v28 = vadd.f32 %v1298_v39, %v1257_v19  ;;  %v1991_v57 = vmul.f32 %v12141_v51, %v18925_v60 }
 0x17d   : > { %11156 = vset.pattern.permute.xlu2 %v18838_v44  ;;  %827 = vperm.xlu1 %11157, %v394_v52   ;;  %v1907_v18 = vadd.f32 %v1867_v3, %v1826_v31  ;;  %v12827_v59 = vpop.permute.xlu2 %775  ;;  %v1576_v44 = vadd.f32 %v1536_v0, %v1495_v40  ;;  %v1694_v45 = vadd.f32 %v12682_v47, %v1653_v10  ;;  %v18930_v40 = vld [vmem:[#allocation49_spill] sm:$0xff] }
 0x17e   : > { %667 = vperm.xlu2 %11156, %v394_v52   ;;  %18926 = vst [vmem:[#allocation92_spill] sm:$0xff] %v12827_v59  ;;  %v1419_v35 = vadd.f32 %v1379_v56, %v1338_v28  ;;  %v2072_v58 = vadd.f32 %v2032_v54, %v1991_v57  ;;  %v2190_v4 = vadd.f32 %v12577_v37, %v2149_v12  ;;  %v18929_v56 = vld [vmem:[#allocation51_spill] sm:$0xff] }
 0x17f   : > { %v1948_v17 = vadd.f32 %v12029_v36, %v1907_v18  ;;  %v1617_v61 = vmul.f32 %v12569_v27, %v18917_v25  ;;  %v2113_v39 = vmul.f32 %v12499_v20, %v18927_v23  ;;  %v1499_v10 = vmul.f32 %v12149_v50, %v18921_v41 }
 0x180   : > { %v1540_v0 = vmul.f32 %v12527_v24, %v18919_v15  ;;  %v1460_v31 = vadd.f32 %v12036_v48, %v1419_v35  ;;  %v1748_v12 = vmul.f32 %v11987_v62, %v18929_v56  ;;  %v1260_v28 = vmul.f32 %v11990_v63, %v18929_v56  ;;  %v11642_v35 = vld [vmem:[%s11790_s14 + $0x130] sm:$0xff]  ;;  %s344_s14 = smul.u32 5, %s11680_s24 }
 0x181   : > { %10794 = vmatpush.xpose.msk.msrb.mxu2 %vm2698_vm0, %v1948_v17  ;;  %v1657_v19 = vadd.f32 %v1617_v61, %v1576_v44  ;;  %v2153_v3 = vadd.f32 %v2113_v39, %v2072_v58  ;;  %v18931_v58 = vld [vmem:[#allocation41_spill] sm:$0xff]  ;;  %v1382_v41 = vmul.f32 %v12017_v16, %v12785_v32 }
 0x182   : > { %v12844_v54 = vpop.permute.xlu1 %771  ;;  %v2036_v44 = vmul.f32 %v12509_v30, %v18931_v58  ;;  %p18128_p7 = scmp.lt.s32.totalorder %s344_s14, 9 }
 0x183   : > { %10855 = vmatmul.msk.f32.vlgmr.msra.gmra.mxu0 %vm2698_vm0, %v1694_v45  ;;  %18928 = vst [vmem:[#allocation93_spill] sm:$0xff] %v12844_v54  ;;  %v1789_v18 = vmul.f32 %v12002_v5, %v12844_v54  ;;  %v1301_v57 = vmul.f32 %v12007_v7, %v12844_v54  ;;  %v1580_v45 = vadd.f32 %v1540_v0, %v1499_v10  ;;  %v18934_v0 = vld [vmem:[#allocation10_spill] sm:$0xff]  ;;  %v18990_v54 = vld [vmem:[#allocation25_spill] sm:$0xff] }
 0x184   : > { %10870 = vmatpush.xpose.msk.msra.mxu0 %vm2698_vm0, %v2190_v4  ;;  %v1995_v4 = vmul.f32 %v12141_v51, %v18930_v40  ;;  %10795 = vmatmul.msk.f32.vlgmr.msrb.gmra.mxu2 %vm2698_vm0, %v1460_v31  ;;  %v1698_v39 = vadd.f32 %v12682_v47, %v1657_v19  ;;  %v2194_v31 = vadd.f32 %v12577_v37, %v2153_v3  ;;  %s19784_s14 = smov (!%p18128_p7, %s344_s14), 9 }
 0x185   : > { %11159 = vset.pattern.permute.xlu1 %v18819_v22  ;;  %v1829_v17 = vadd.f32 %v1789_v18, %v1748_v12  ;;  %v12872_v12 = vpop.permute.xlu0 %779  ;;  %v1544_v3 = vmul.f32 %v12527_v24, %v18924_v33  ;;  %v13232_v55 = vmul.f32 %v12141_v51, %v18990_v54  ;;  %s18176_s24 = sadd.s32 %s11062_s16, %s19784_s14 }
 0x186   : > { %11158 = vset.pattern.permute.xlu2 %v18819_v22  ;;  %987 = vperm.xlu1 %11159, %v394_v52   ;;  %v1870_v22 = vmul.f32 %v11995_v2, %v12785_v32  ;;  %v1341_v52 = vadd.f32 %v1301_v57, %v1260_v28  ;;  %v12864_v61 = vpop.permute.xlu2 %939  ;;  %v2076_v25 = vadd.f32 %v2036_v44, %v1995_v4  ;;  %s10749_s25 = sshll.u32 %s18176_s24, 3 }
 0x187   : > { %983 = vperm.xlu2 %11158, %v11642_v35   ;;  %18932 = vst [vmem:[#allocation94_spill] sm:$0xff] %v12864_v61  ;;  %v1621_v35 = vmul.f32 %v12569_v27, %v18922_v1  ;;  %v2117_v28 = vmul.f32 %v12499_v20, %v18934_v0  ;;  %v1791_v44 = vmul.f32 %v12002_v5, %v12872_v12  ;;  %v18938_v1 = vld [vmem:[#allocation44_spill] sm:$0xff]  ;;  %s18211_s10 = scalar_lea.vmem %s18314_s7, %s10749_s25 }
 0x188   : > { %v1910_v15 = vadd.f32 %v1870_v22, %v1829_v17  ;;  %18933 = vst [vmem:[#allocation95_spill] sm:$0xff] %v12872_v12  ;;  %v1422_v18 = vadd.f32 %v1382_v41, %v1341_v52  ;;  %v1503_v41 = vmul.f32 %v12149_v50, %v18925_v60  ;;  %v1303_v52 = vmul.f32 %v12007_v7, %v12872_v12 }
 0x189   : > { %v1661_v19 = vadd.f32 %v1621_v35, %v1580_v45  ;;  %v2157_v4 = vadd.f32 %v2117_v28, %v2076_v25  ;;  %v18936_v25 = vld [vmem:[#allocation52_spill] sm:$0xff]  ;;  %v1872_v35 = vmul.f32 %v11995_v2, %v12864_v61  ;;  %v1384_v33 = vmul.f32 %v12017_v16, %v12864_v61 }
 0x18a   : > { %v1951_v10 = vadd.f32 %v12029_v36, %v1910_v15  ;;  %v1463_v15 = vadd.f32 %v12036_v48, %v1422_v18 }
 0x18b   : > { %10863 = vmatmul.msk.f32.vlgmr.msrb.gmra.mxu0 %vm2698_vm0, %v1698_v39  ;;  %v12882_v57 = vpop.permute.xlu1 %607  ;;  %v1702_v45 = vadd.f32 %v12682_v47, %v1661_v19  ;;  %v1999_v39 = vmul.f32 %v12141_v51, %v18936_v25  ;;  %v2198_v60 = vadd.f32 %v12577_v37, %v2157_v4  ;;  %v2040_v19 = vmul.f32 %v12509_v30, %v18938_v1 }
 0x18c   : > { %10878 = vmatpush.xpose.msk.msrb.mxu0 %vm2698_vm0, %v2194_v31  ;;  %10800 = vmatpush.xpose.msk.msra.mxu1 %vm2698_vm0, %v1951_v10  ;;  %18935 = vst [vmem:[#allocation96_spill] sm:$0xff] %v12882_v57  ;;  %v1750_v17 = vmul.f32 %v11987_v62, %v12882_v57  ;;  %v1262_v22 = vmul.f32 %v11990_v63, %v12882_v57 }
 0x18d   : > { %v1584_v10 = vadd.f32 %v1544_v3, %v1503_v41  ;;  %v2121_v57 = vmul.f32 %v12499_v20, %v18939_v13  ;;  %v1507_v3 = vmul.f32 %v12149_v50, %v18930_v40  ;;  %v2080_v41 = vadd.f32 %v2040_v19, %v1999_v39 }
 0x18e   : > { %v1831_v31 = vadd.f32 %v1791_v44, %v1750_v17  ;;  %v1343_v18 = vadd.f32 %v1303_v52, %v1262_v22  ;;  %v1790_v17 = vmul.f32 %v12002_v5, %v12827_v59 }
 0x18f   : > { %10801 = vmatmul.msk.f32.vlgmr.msra.gmra.mxu1 %vm2698_vm0, %v1463_v15  ;;  %v12901_v28 = vpop.permute.xlu2 %787  ;;  %v1625_v15 = vmul.f32 %v12569_v27, %v18927_v23  ;;  %v18940_v23 = vld [vmem:[#allocation54_spill] sm:$0xff] }
 0x190   : > { %18937 = vst [vmem:[#allocation97_spill] sm:$0xff] %v12901_v28  ;;  %v1912_v44 = vadd.f32 %v1872_v35, %v1831_v31  ;;  %v1424_v4 = vadd.f32 %v1384_v33, %v1343_v18  ;;  %v1548_v31 = vmul.f32 %v12527_v24, %v18931_v58  ;;  %v2161_v35 = vadd.f32 %v2121_v57, %v2080_v41 }
 0x191   : > { %v1665_v52 = vadd.f32 %v1625_v15, %v1584_v10  ;;  %v1749_v40 = vmul.f32 %v11987_v62, %v18940_v23  ;;  %v2044_v33 = vmul.f32 %v12509_v30, %v12207_v46  ;;  %v1261_v39 = vmul.f32 %v11990_v63, %v18940_v23 }
 0x192   : > { %v1953_v22 = vadd.f32 %v12029_v36, %v1912_v44  ;;  %v1588_v18 = vadd.f32 %v1548_v31, %v1507_v3  ;;  %v2003_v10 = vmul.f32 %v12141_v51, %v18880_v34  ;;  %v1465_v19 = vadd.f32 %v12036_v48, %v1424_v4 }
 0x193   : > { %10871 = vmatmul.msk.f32.vlgmr.msra.gmra.mxu0 %vm2698_vm0, %v1702_v45  ;;  %v1302_v45 = vmul.f32 %v12007_v7, %v12827_v59  ;;  %v1830_v57 = vadd.f32 %v1790_v17, %v1749_v40  ;;  %v1706_v41 = vadd.f32 %v12682_v47, %v1665_v52  ;;  %v1629_v58 = vmul.f32 %v12569_v27, %v18934_v0  ;;  %v18984_v59 = vld [vmem:[#allocation18_spill] sm:$0xff] }
 0x194   : > { %10886 = vmatpush.xpose.msk.msra.mxu0 %vm2698_vm0, %v2198_v60  ;;  %10804 = vmatpush.xpose.msk.msrb.mxu3 %vm2698_vm0, %v1953_v22  ;;  %v12928_v60 = vpop.permute.xlu1 %935  ;;  %v2202_v3 = vadd.f32 %v12577_v37, %v2161_v35  ;;  %v2084_v61 = vadd.f32 %v2044_v33, %v2003_v10  ;;  %v2125_v40 = vmul.f32 %v12499_v20, %v18881_v9  ;;  %v11644_v33 = vld [vmem:[%s18309_s2 + $0x8] sm:$0x7f] }
 0x195   : > { %18941 = vst [vmem:[#allocation98_spill] sm:$0xff] %v12928_v60  ;;  %v1871_v44 = vmul.f32 %v11995_v2, %v12928_v60  ;;  %v1383_v15 = vmul.f32 %v12017_v16, %v12928_v60  ;;  %v1342_v22 = vadd.f32 %v1302_v45, %v1261_v39  ;;  %v1669_v45 = vadd.f32 %v1629_v58, %v1588_v18  ;;  %v11643_v39 = vld [vmem:[%s18309_s2] sm:$0x7f]  ;;  %v11645_v18 = vld [vmem:[%s18309_s2 + $0x10] sm:$0x7f] }
 0x196   : > { %v12954_v35 = vperm.slane %v11643_v39, 3  ;;  %v12959_v10 = vperm.slane %v11644_v33, 3  ;;  %v1793_v39 = vmul.f32 %v12002_v5, %v12901_v28 }
 0x197   : > { %10805 = vmatmul.msk.f32.vlgmr.msrb.gmra.mxu3 %vm2698_vm0, %v1465_v19  ;;  %v1911_v31 = vadd.f32 %v1871_v44, %v1830_v57  ;;  %v1423_v17 = vadd.f32 %v1383_v15, %v1342_v22  ;;  %v2165_v19 = vadd.f32 %v2125_v40, %v2084_v61  ;;  %v18945_v57 = vld [vmem:[#allocation19_spill] sm:$0xff]  ;;  %v12969_v15 = vperm.slane %v11645_v18, 3 }
 0x198   : > { %18943 = vst [vmem:[#allocation100_spill] sm:$0xff] %v12954_v35  ;;  %v2211_v44 = vmul.f32 %v12954_v35, %v18945_v57  ;;  %v2252_v58 = vmul.f32 %v12959_v10, %v18888_v29  ;;  %v1511_v61 = vmul.f32 %v12149_v50, %v18936_v25  ;;  %v1305_v29 = vmul.f32 %v12007_v7, %v12901_v28  ;;  %v18949_v25 = vld [vmem:[#allocation13_spill] sm:$0xff] }
 0x199   : > { %v12946_v4 = vpop.permute.xlu2 %627  ;;  %v1952_v52 = vadd.f32 %v12029_v36, %v1911_v31  ;;  %18944 = vst [vmem:[#allocation101_spill] sm:$0xff] %v12959_v10  ;;  %v1464_v22 = vadd.f32 %v12036_v48, %v1423_v17  ;;  %v1633_v17 = vmul.f32 %v12569_v27, %v18939_v13  ;;  %v1874_v13 = vmul.f32 %v11995_v2, %v18949_v25 }
 0x19a   : > { %18942 = vst [vmem:[#allocation99_spill] sm:$0xff] %v12946_v4  ;;  %v2292_v57 = vadd.f32 %v2252_v58, %v2211_v44  ;;  %v1386_v12 = vmul.f32 %v12017_v16, %v18949_v25  ;;  %v1556_v58 = vmul.f32 %v12527_v24, %v12207_v46  ;;  %v13187_v28 = vmul.f32 %v12141_v51, %v18984_v59 }
 0x19b   : > { %10879 = vmatmul.msk.f32.vlgmr.msrb.gmra.mxu0 %vm2698_vm0, %v1706_v41  ;;  %10802 = vmatpush.xpose.msk.msra.mxu2 %vm2698_vm0, %v1952_v52  ;;  %18946 = vst [vmem:[#allocation102_spill] sm:$0xff] %v12969_v15  ;;  %v1710_v52 = vadd.f32 %v12682_v47, %v1669_v45  ;;  %v2206_v45 = vadd.f32 %v12577_v37, %v2165_v19 }
 0x19c   : > { %10894 = vmatpush.xpose.msk.msrb.mxu0 %vm2698_vm0, %v2202_v3  ;;  %v12971_v41 = vpop.f32.mrf.mxu0  ;;  %v1552_v3 = vmul.f32 %v12527_v24, %v18938_v1  ;;  %v13220_v53 = vmul.f32 %v12569_v27, %v18949_v25 }
 0x19d   : > { %18947 = vst [vmem:[#allocation103_spill] sm:$0xff] %v12971_v41  ;;  %v12978_v31 = vpop.permute.xlu1 %617  ;;  %v4792_v40 = vsel %vm4779_vm1, %v12971_v41, -inf  ;;  %v2333_v41 = vmul.f32 %v12969_v15, %v18889_v21 }
 0x19e   : > { %18948 = vst [vmem:[#allocation104_spill] sm:$0xff] %v12978_v31  ;;  %10803 = vmatmul.msk.f32.vlgmr.msra.gmra.mxu2 %vm2698_vm0, %v1464_v22  ;;  %4793 = vmax.xlane.f32.xlu0 %v4792_v40  ;;  %v1752_v33 = vmul.f32 %v11987_v62, %v12978_v31  ;;  %v1264_v18 = vmul.f32 %v11990_v63, %v12978_v31 }
 0x19f   : > { %v1592_v22 = vadd.f32 %v1552_v3, %v1511_v61  ;;  %18988 = vst [vmem:[#allocation132_spill] sm:$0xff] %v13220_v53 }
 0x1a0   : > { %v1833_v1 = vadd.f32 %v1793_v39, %v1752_v33  ;;  %v1345_v40 = vadd.f32 %v1305_v29, %v1264_v18  ;;  %v11646_v29 = vld [vmem:[%s18310_s3] sm:$0x7f]  ;;  %v2256_v39 = vmul.f32 %v12959_v10, %v18897_v43 }
 0x1a1   : > { %v1673_v44 = vadd.f32 %v1633_v17, %v1592_v22  ;;  %v13010_v61 = vperm.slane %v11646_v29, 3  ;;  %v13030_v29 = vpop.f32.mrf.mxu3 }
 0x1a2   : > { %v12999_v0 = vpop.permute.xlu2 %795  ;;  %v1914_v19 = vadd.f32 %v1874_v13, %v1833_v1  ;;  %v1426_v3 = vadd.f32 %v1386_v12, %v1345_v40  ;;  %v1515_v13 = vmul.f32 %v12149_v50, %v18880_v34  ;;  %18955 = vst [vmem:[#allocation109_spill] sm:$0xff] %v13030_v29  ;;  %v13084_v34 = vpop.permute.xlu0 %803 }
 0x1a3   : > { %10887 = vmatmul.msk.f32.vlgmr.msra.gmra.mxu0 %vm2698_vm0, %v1710_v52  ;;  %18950 = vst [vmem:[#allocation105_spill] sm:$0xff] %v12999_v0  ;;  %v2373_v52 = vadd.f32 %v2333_v41, %v2292_v57  ;;  %v18954_v57 = vld [vmem:[#allocation3_spill] sm:$0xff]  ;;  %v1714_v17 = vadd.f32 %v12682_v47, %v1673_v44 }
 0x1a4   : > { %10902 = vmatpush.xpose.msk.msra.mxu0 %vm2698_vm0, %v2206_v45  ;;  %18951 = vst [vmem:[#allocation106_spill] sm:$0xff] %v13010_v61  ;;  %v13014_v33 = vpop.f32.mrf.mxu0  ;;  %v1955_v18 = vadd.f32 %v12029_v36, %v1914_v19  ;;  %v2215_v41 = vmul.f32 %v12954_v35, %v18954_v57  ;;  %v1596_v12 = vadd.f32 %v1556_v58, %v1515_v13 }
 0x1a5   : > { %18952 = vst [vmem:[#allocation107_spill] sm:$0xff] %v13014_v33  ;;  %v13019_v1 = vpop.permute.xlu1 %622  ;;  %v1637_v45 = vmul.f32 %v12569_v27, %v18881_v9  ;;  %v2414_v22 = vadd.f32 %v13010_v61, %v2373_v52  ;;  %v1467_v40 = vadd.f32 %v12036_v48, %v1426_v3  ;;  %v4780_v52 = vsel %vm4779_vm1, %v13030_v29, -inf }
 0x1a6   : > { %18953 = vst [vmem:[#allocation108_spill] sm:$0xff] %v13019_v1  ;;  %10808 = vmatpush.xpose.msk.msrb.mxu1 %vm2698_vm0, %v1955_v18  ;;  %v2296_v19 = vadd.f32 %v2256_v39, %v2215_v41  ;;  %v2337_v18 = vmul.f32 %v12969_v15, %v12043_v6  ;;  %v4804_v3 = vsel %vm4779_vm1, %v13014_v33, -inf  ;;  %v1753_v41 = vmul.f32 %v11987_v62, %v13019_v1 }
 0x1a7   : > { %v1677_v58 = vadd.f32 %v1637_v45, %v1596_v12  ;;  %18963 = vst [vmem:[#allocation116_spill] sm:$0xff] %v13084_v34 }
 0x1a8   : > { %v2377_v13 = vadd.f32 %v2337_v18, %v2296_v19 }
 0x1a9   : > { %10809 = vmatmul.msk.f32.vlgmr.msrb.gmra.mxu1 %vm2698_vm0, %v1467_v40  ;;  %v1718_v12 = vadd.f32 %v12682_v47, %v1677_v58 }
 0x1aa   : > { %v2418_v45 = vadd.f32 %v13010_v61, %v2377_v13  ;;  %v13153_v33 = vpop.permute.xlu0 %811 }
 0x1ab   : > { %10895 = vmatmul.msk.f32.vlgmr.msrb.gmra.mxu0 %vm2698_vm0, %v1714_v17  ;;  %v1265_v17 = vmul.f32 %v11990_v63, %v13019_v1  ;;  %18978 = vst [vmem:[#allocation127_spill] sm:$0xff] %v13153_v33  ;;  %v1799_v31 = vmul.f32 %v12002_v5, %v13153_v33  ;;  %v1311_v14 = vmul.f32 %v12007_v7, %v13153_v33 }
 0x1ac   : > { %5678 = vmatpush.msrb.mxu0 %v2414_v22  ;;  %v13035_v44 = vpop.permute.xlu2 %637  ;;  %v13041_v39 = vpop.f32.mrf.mxu0  ;;  %v13226_v33 = vmul.f32 %v12141_v51, %v18907_v38 }
 0x1ad   : > { %18956 = vst [vmem:[#allocation110_spill] sm:$0xff] %v13035_v44  ;;  %v4816_v43 = vsel %vm4779_vm1, %v13041_v39, -inf }
 0x1ae   : > { %18957 = vst [vmem:[#allocation111_spill] sm:$0xff] %v13041_v39 }
 0x1af   : > { %v13047_v22 = vpop.permute.xlu1 %791  ;;  %18989 = vst [vmem:[#allocation133_spill] sm:$0xff] %v13226_v33 }
 0x1b0   : > { %4781 = vmax.xlane.f32.xlu2 %v4780_v52  ;;  %4805 = vmax.xlane.f32.xlu1 %v4804_v3  ;;  %18958 = vst [vmem:[#allocation112_spill] sm:$0xff] %v13047_v22  ;;  %v1794_v40 = vmul.f32 %v12002_v5, %v13047_v22  ;;  %v1306_v19 = vmul.f32 %v12007_v7, %v13047_v22  ;;  %v18959_v52 = vld [vmem:[#allocation16_spill] sm:$0xff] }
 0x1b1   : > { %v1875_v3 = vmul.f32 %v11995_v2, %v18959_v52  ;;  %v1387_v58 = vmul.f32 %v12017_v16, %v18959_v52 }
 0x1b2   : > { %v1834_v18 = vadd.f32 %v1794_v40, %v1753_v41  ;;  %v1346_v6 = vadd.f32 %v1306_v19, %v1265_v17  ;;  %v1307_v17 = vmul.f32 %v12007_v7, %v12999_v0  ;;  %v1266_v19 = vmul.f32 %v11990_v63, %v12946_v4 }
 0x1b3   : > { %10903 = vmatmul.msk.f32.vlgmr.msra.gmra.mxu0 %vm2698_vm0, %v1718_v12  ;;  %v1795_v12 = vmul.f32 %v12002_v5, %v12999_v0  ;;  %v18969_v0 = vld [vmem:[#allocation6_spill] sm:$0xff] }
 0x1b4   : > { %5770 = vmatpush.msra.mxu0 %v2418_v45  ;;  %v13058_v57 = vpop.permute.xlu2 %642  ;;  %v1915_v13 = vadd.f32 %v1875_v3, %v1834_v18  ;;  %v1427_v9 = vadd.f32 %v1387_v58, %v1346_v6  ;;  %v1754_v45 = vmul.f32 %v11987_v62, %v12946_v4  ;;  %v1347_v58 = vadd.f32 %v1307_v17, %v1266_v19 }
 0x1b5   : > { %18960 = vst [vmem:[#allocation113_spill] sm:$0xff] %v13058_v57  ;;  %v13064_v21 = vpop.f32.mrf.mxu0  ;;  %v1268_v19 = vmul.f32 %v11990_v63, %v13035_v44 }
 0x1b6   : > { %18961 = vst [vmem:[#allocation114_spill] sm:$0xff] %v13064_v21  ;;  %v1956_v41 = vadd.f32 %v12029_v36, %v1915_v13  ;;  %v1468_v6 = vadd.f32 %v12036_v48, %v1427_v9  ;;  %v1835_v18 = vadd.f32 %v1795_v12, %v1754_v45  ;;  %v4828_v39 = vsel %vm4779_vm1, %v13064_v21, -inf  ;;  %v18967_v21 = vld [vmem:[#allocation4_spill] sm:$0xff] }
 0x1b7   : > { %v1756_v45 = vmul.f32 %v11987_v62, %v13035_v44  ;;  %v18981_v44 = vld [vmem:[#allocation17_spill] sm:$0xff] }
 0x1b8   : > { %4817 = vmax.xlane.f32.xlu2 %v4816_v43  ;;  %10810 = vmatpush.xpose.msk.msrb.mxu2 %vm2698_vm0, %v1956_v41  ;;  %v13074_v40 = vpop.permute.xlu1 %955 }
 0x1b9   : > { %18962 = vst [vmem:[#allocation115_spill] sm:$0xff] %v13074_v40  ;;  %v1876_v43 = vmul.f32 %v11995_v2, %v13074_v40  ;;  %v1388_v3 = vmul.f32 %v12017_v16, %v13074_v40  ;;  %v13114_v40 = vmul.f32 %v12141_v51, %v18967_v21 }
 0x1bb   : > { %10811 = vmatmul.msk.f32.vlgmr.msrb.gmra.mxu2 %vm2698_vm0, %v1468_v6  ;;  %v1916_v13 = vadd.f32 %v1876_v43, %v1835_v18  ;;  %v1428_v46 = vadd.f32 %v1388_v3, %v1347_v58  ;;  %v1797_v6 = vmul.f32 %v12002_v5, %v13084_v34  ;;  %v1309_v3 = vmul.f32 %v12007_v7, %v13084_v34 }
 0x1bc   : > { %v13181_v34 = vmul.f32 %v12499_v20, %v18949_v25  ;;  %v13236_v25 = vmul.f32 %v12149_v50, %v18990_v54 }
 0x1bd   : > { %v13086_v41 = vpop.permute.xlu2 %807  ;;  %v13090_v9 = vpop.f32.mrf.mxu0  ;;  %v1957_v12 = vadd.f32 %v12029_v36, %v1916_v13  ;;  %v1469_v43 = vadd.f32 %v12036_v48, %v1428_v46  ;;  %v13118_v46 = vmul.f32 %v12149_v50, %v18967_v21 }
 0x1be   : > { %18964 = vst [vmem:[#allocation117_spill] sm:$0xff] %v13086_v41  ;;  %v4840_v17 = vsel %vm4779_vm1, %v13090_v9, -inf  ;;  %v1310_v33 = vmul.f32 %v12007_v7, %v13086_v41 }
 0x1bf   : > { %18965 = vst [vmem:[#allocation118_spill] sm:$0xff] %v13090_v9  ;;  %10812 = vmatpush.xpose.msk.msra.mxu3 %vm2698_vm0, %v1957_v12  ;;  %4841 = vmax.xlane.f32.xlu0 %v4840_v17  ;;  %v1349_v12 = vadd.f32 %v1309_v3, %v1268_v19  ;;  %v13131_v19 = vmul.f32 %v12149_v50, %v18969_v0 }
 0x1c0   : > { %4829 = vmax.xlane.f32.xlu2 %v4828_v39  ;;  %v1837_v39 = vadd.f32 %v1797_v6, %v1756_v45  ;;  %v18968_v6 = vld [vmem:[#allocation9_spill] sm:$0xff]  ;;  %18982 = vst [vmem:[#allocation128_spill] sm:$0xff] %v13181_v34 }
 0x1c1   : > { %v13102_v18 = vpop.permute.xlu1 %963  ;;  %v13123_v4 = vmul.f32 %v12141_v51, %v18968_v6  ;;  %18971 = vst [vmem:[#allocation121_spill] sm:$0xff] %v13131_v19 }
 0x1c2   : > { %18966 = vst [vmem:[#allocation119_spill] sm:$0xff] %v13102_v18  ;;  %v1878_v58 = vmul.f32 %v11995_v2, %v13102_v18  ;;  %v1390_v13 = vmul.f32 %v12017_v16, %v13102_v18  ;;  %10813 = vmatmul.msk.f32.vlgmr.msra.gmra.mxu3 %vm2698_vm0, %v1469_v43  ;;  %v13127_v43 = vmul.f32 %v12141_v51, %v18969_v0  ;;  %v18979_v18 = vld [vmem:[#allocation11_spill] sm:$0xff] }
 0x1c3   : > { %v13151_v0 = vmul.f32 %v12149_v50, %v18968_v6  ;;  %v13164_v22 = vmul.f32 %v12141_v51, %v18979_v18 }
 0x1c4   : > { %v1918_v17 = vadd.f32 %v1878_v58, %v1837_v39  ;;  %v1430_v9 = vadd.f32 %v1390_v13, %v1349_v12  ;;  %18970 = vst [vmem:[#allocation120_spill] sm:$0xff] %v13127_v43  ;;  %v18974_v58 = vld [vmem:[#allocation8_spill] sm:$0xff]  ;;  %v13143_v12 = vmul.f32 %v12141_v51, %v18901_v11 }
 0x1c5   : > { %v13139_v13 = vmul.f32 %v12141_v51, %v18974_v58  ;;  %18977 = vst [vmem:[#allocation126_spill] sm:$0xff] %v13151_v0  ;;  %v13160_v61 = vmul.f32 %v12149_v50, %v18974_v58 }
 0x1c6   : > { %v1959_v45 = vadd.f32 %v12029_v36, %v1918_v17  ;;  %v13133_v3 = vpop.permute.xlu2 %971  ;;  %v13135_v39 = vpop.f32.mrf.mxu0  ;;  %18975 = vst [vmem:[#allocation124_spill] sm:$0xff] %v13143_v12  ;;  %v13147_v17 = vmul.f32 %v12149_v50, %v18901_v11  ;;  %v18980_v11 = vld [vmem:[#allocation14_spill] sm:$0xff]  ;;  %v1471_v6 = vadd.f32 %v12036_v48, %v1430_v9  ;;  %v13195_v9 = vmul.f32 %v12149_v50, %v18981_v44 }
 0x1c7   : > { %18972 = vst [vmem:[#allocation122_spill] sm:$0xff] %v13133_v3  ;;  %v4852_v29 = vsel %vm4779_vm1, %v13135_v39, -inf  ;;  %v13168_v1 = vmul.f32 %v12141_v51, %v18980_v11 }
 0x1c8   : > { %18973 = vst [vmem:[#allocation123_spill] sm:$0xff] %v13135_v39  ;;  %10816 = vmatpush.xpose.msk.msra.mxu1 %vm2698_vm0, %v1959_v45  ;;  %4853 = vmax.xlane.f32.xlu1 %v4852_v29  ;;  %v13173_v45 = vmul.f32 %v12141_v51, %v18981_v44  ;;  %v13177_v39 = vmul.f32 %v12149_v50, %v18979_v18  ;;  %v18986_v44 = vld [vmem:[#allocation22_spill] sm:$0xff] }
 0x1c9   : > { %18976 = vst [vmem:[#allocation125_spill] sm:$0xff] %v13147_v17  ;;  %v13191_v29 = vmul.f32 %v12149_v50, %v18984_v59  ;;  %v13199_v18 = vmul.f32 %v12149_v50, %v18980_v11  ;;  %v1968_v32 = vmul.f32 %v12141_v51, %v18986_v44  ;;  %v1480_v11 = vmul.f32 %v12149_v50, %v18986_v44 }
 0x1ca   : > { %v13183_v60 = vpop.permute.xlu1 %647  ;;  %v1392_v17 = vmul.f32 %v12017_v16, %v13133_v3 }
 0x1cb   : > { %18983 = vst [vmem:[#allocation129_spill] sm:$0xff] %v13183_v60  ;;  %10817 = vmatmul.msk.f32.vlgmr.msra.gmra.mxu1 %vm2698_vm0, %v1471_v6  ;;  %v1758_v34 = vmul.f32 %v11987_v62, %v13183_v60  ;;  %v1270_v59 = vmul.f32 %v11990_v63, %v13183_v60  ;;  %v13216_v6 = vmul.f32 %v12499_v20, %v18959_v52 }
 0x1cc   : > { %18985 = vst [vmem:[#allocation130_spill] sm:$0xff] %v13191_v29  ;;  %v1880_v60 = vmul.f32 %v11995_v2, %v13133_v3  ;;  %v13294_v29 = vmul.f32 %v12141_v51, %v18913_v42 }
 0x1cd   : > { %18987 = vst [vmem:[#allocation131_spill] sm:$0xff] %v13216_v6  ;;  %v1839_v15 = vadd.f32 %v1799_v31, %v1758_v34  ;;  %v1351_v8 = vadd.f32 %v1311_v14, %v1270_v59  ;;  %v13240_v34 = vmul.f32 %v12149_v50, %v18907_v38  ;;  %v18993_v31 = vld [vmem:[#allocation29_spill] sm:$0xff]  ;;  %v13254_v6 = vmul.f32 %v12954_v35, %v18967_v21 }
 0x1ce   : > { %v13246_v53 = vmul.f32 %v12141_v51, %v18993_v31  ;;  %v13250_v3 = vmul.f32 %v12149_v50, %v18993_v31  ;;  %v13269_v21 = vmul.f32 %v12141_v51, %v18896_v26  ;;  %19003 = vst [vmem:[#allocation142_spill] sm:$0xff] %v13294_v29  ;;  %v13309_v29 = vmul.f32 %v12149_v50, %v18913_v42 }
 0x1cf   : > { %18991 = vst [vmem:[#allocation134_spill] sm:$0xff] %v13240_v34  ;;  %v13242_v59 = vpop.f32.mrf.mxu0  ;;  %v1920_v14 = vadd.f32 %v1880_v60, %v1839_v15  ;;  %v1432_v38 = vadd.f32 %v1392_v17, %v1351_v8  ;;  %v1798_v34 = vmul.f32 %v12002_v5, %v13086_v41  ;;  %v2212_v60 = vmul.f32 %v12954_v35, %v18986_v44  ;;  %v13262_v15 = vpop.permute.xlu2 %979  ;;  %v18998_v44 = vld [vmem:[#allocation50_spill] sm:$0xff] }
 0x1d0   : > { %18992 = vst [vmem:[#allocation135_spill] sm:$0xff] %v13242_v59  ;;  %v4864_v54 = vsel %vm4779_vm1, %v13242_v59, -inf  ;;  %v13273_v8 = vmul.f32 %v12149_v50, %v18896_v26  ;;  %v1757_v17 = vmul.f32 %v11987_v62, %v13058_v57  ;;  %v2009_v59 = vmul.f32 %v12509_v30, %v18998_v44 }
 0x1d1   : > { %18994 = vst [vmem:[#allocation136_spill] sm:$0xff] %v13254_v6  ;;  %4865 = vmax.xlane.f32.xlu0 %v4864_v54  ;;  %v1961_v31 = vadd.f32 %v12029_v36, %v1920_v14  ;;  %v1521_v54 = vmul.f32 %v12527_v24, %v18998_v44  ;;  %v18999_v14 = vld [vmem:[#allocation39_spill] sm:$0xff]  ;;  %v1269_v26 = vmul.f32 %v11990_v63, %v13058_v57 }
 0x1d2   : > { %18995 = vst [vmem:[#allocation137_spill] sm:$0xff] %v13262_v15  ;;  %v13283_v41 = vmul.f32 %v12141_v51, %v18999_v14  ;;  %v13298_v12 = vmul.f32 %v12149_v50, %v18999_v14  ;;  %v1838_v19 = vadd.f32 %v1798_v34, %v1757_v17  ;;  %v13313_v14 = vmul.f32 %v12141_v51, %v18912_v49 }
 0x1d3   : > { %18996 = vst [vmem:[#allocation138_spill] sm:$0xff] %v13269_v21  ;;  %10820 = vmatpush.xpose.msk.msrb.mxu3 %vm2698_vm0, %v1961_v31  ;;  %v13286_v6 = vpop.permute.xlu1 %967  ;;  %v1350_v43 = vadd.f32 %v1310_v33, %v1269_v26  ;;  %v2049_v34 = vadd.f32 %v2009_v59, %v1968_v32  ;;  %v1561_v17 = vadd.f32 %v1521_v54, %v1480_v11  ;;  %v19009_v32 = vld [vmem:[#allocation61_spill] sm:$0xff] }
 0x1d4   : > { %18997 = vst [vmem:[#allocation139_spill] sm:$0xff] %v13273_v8  ;;  %v19002_v8 = vld [vmem:[#allocation53_spill] sm:$0xff]  ;;  %v1879_v31 = vmul.f32 %v11995_v2, %v13286_v6  ;;  %v1391_v57 = vmul.f32 %v12017_v16, %v13286_v6  ;;  %v13320_v33 = vmul.f32 %v12141_v51, %v18929_v56  ;;  %v13324_v42 = vmul.f32 %v12149_v50, %v18929_v56  ;;  %v19017_v56 = vld [vmem:[#allocation58_spill] sm:$0xff] }
 0x1d5   : > { %19000 = vst [vmem:[#allocation140_spill] sm:$0xff] %v13283_v41  ;;  %v2010_v21 = vmul.f32 %v12509_v30, %v19002_v8  ;;  %v1473_v41 = vadd.f32 %v12036_v48, %v1432_v38  ;;  %v1522_v0 = vmul.f32 %v12527_v24, %v19002_v8  ;;  %v13328_v8 = vmul.f32 %v12569_v27, %v18959_v52 }
 0x1d6   : > { %19001 = vst [vmem:[#allocation141_spill] sm:$0xff] %v13286_v6  ;;  %v1919_v38 = vadd.f32 %v1879_v31, %v1838_v19  ;;  %v2253_v6 = vmul.f32 %v12959_v10, %v18998_v44  ;;  %v1431_v26 = vadd.f32 %v1391_v57, %v1350_v43  ;;  %v2014_v19 = vmul.f32 %v12509_v30, %v19009_v32  ;;  %v19011_v43 = vld [vmem:[#allocation64_spill] sm:$0xff]  ;;  %v19022_v10 = vld [vmem:[#allocation71_spill] sm:$0xff] }
 0x1d7   : > { %19004 = vst [vmem:[#allocation143_spill] sm:$0xff] %v13309_v29  ;;  %10821 = vmatmul.msk.f32.vlgmr.msrb.gmra.mxu3 %vm2698_vm0, %v1473_v41  ;;  %v2050_v11 = vadd.f32 %v2010_v21, %v13139_v13  ;;  %v13336_v57 = vmul.f32 %v12954_v35, %v18974_v58  ;;  %v2090_v59 = vmul.f32 %v12499_v20, %v19011_v43  ;;  %v19013_v21 = vld [vmem:[#allocation68_spill] sm:$0xff] }
 0x1d8   : > { %19005 = vst [vmem:[#allocation144_spill] sm:$0xff] %v13313_v14  ;;  %v1960_v41 = vadd.f32 %v12029_v36, %v1919_v38  ;;  %v1562_v54 = vadd.f32 %v1522_v0, %v13160_v61  ;;  %v1526_v31 = vmul.f32 %v12527_v24, %v19009_v32  ;;  %v13345_v38 = vmul.f32 %v12141_v51, %v18940_v23  ;;  %v13358_v61 = vpop.permute.xlu2 %667  ;;  %v19023_v14 = vld [vmem:[#allocation69_spill] sm:$0xff] }
 0x1d9   : > { %19006 = vst [vmem:[#allocation145_spill] sm:$0xff] %v13320_v33  ;;  %v2091_v13 = vmul.f32 %v12499_v20, %v19013_v21  ;;  %v1602_v58 = vmul.f32 %v12569_v27, %v19011_v43  ;;  %v13354_v44 = vmul.f32 %v12149_v50, %v18940_v23  ;;  %v13356_v0 = vadd.f32 %v2253_v6, %v2212_v60 }
 0x1da   : > { %19007 = vst [vmem:[#allocation146_spill] sm:$0xff] %v13324_v42  ;;  %10818 = vmatpush.xpose.msk.msra.mxu2 %vm2698_vm0, %v1960_v41  ;;  %v1472_v52 = vadd.f32 %v12036_v48, %v1431_v26  ;;  %v1760_v32 = vmul.f32 %v11987_v62, %v19017_v56  ;;  %v1272_v41 = vmul.f32 %v11990_v63, %v19017_v56 }
 0x1db   : > { %19008 = vst [vmem:[#allocation147_spill] sm:$0xff] %v13328_v8  ;;  %v19018_v8 = vld [vmem:[#allocation72_spill] sm:$0xff]  ;;  %v2054_v23 = vadd.f32 %v2014_v19, %v13232_v55  ;;  %v13378_v26 = vmul.f32 %v12141_v51, %v19017_v56  ;;  %v1566_v19 = vadd.f32 %v1526_v31, %v13236_v25  ;;  %v1642_v49 = vadd.f32 %v1602_v58, %v1561_v17  ;;  %v19024_v31 = vld [vmem:[#allocation70_spill] sm:$0xff] }
 0x1dc   : > { %19010 = vst [vmem:[#allocation148_spill] sm:$0xff] %v13336_v57  ;;  %v2013_v57 = vmul.f32 %v12509_v30, %v19018_v8  ;;  %v13367_v35 = vpop.permute.xlu1 %819  ;;  %v2011_v56 = vmul.f32 %v12509_v30, %v19023_v14  ;;  %v1603_v25 = vmul.f32 %v12569_v27, %v19013_v21  ;;  %v19025_v58 = vld [vmem:[#allocation66_spill] sm:$0xff] }
 0x1dd   : > { %19012 = vst [vmem:[#allocation149_spill] sm:$0xff] %v13345_v38  ;;  %10819 = vmatmul.msk.f32.vlgmr.msra.gmra.mxu2 %vm2698_vm0, %v1472_v52  ;;  %v1801_v42 = vmul.f32 %v12002_v5, %v13367_v35  ;;  %v2130_v38 = vadd.f32 %v2090_v59, %v2049_v34  ;;  %v1313_v55 = vmul.f32 %v12007_v7, %v13367_v35 }
 0x1de   : > { %19014 = vst [vmem:[#allocation150_spill] sm:$0xff] %v13354_v44  ;;  %v19020_v44 = vld [vmem:[#allocation57_spill] sm:$0xff]  ;;  %v1882_v52 = vmul.f32 %v11995_v2, %v13262_v15  ;;  %v2053_v34 = vadd.f32 %v2013_v57, %v13114_v40  ;;  %v1394_v59 = vmul.f32 %v12017_v16, %v13262_v15  ;;  %v13401_v17 = vmul.f32 %v12499_v20, %v19025_v58  ;;  %v13410_v57 = vpop.permute.xlu0 %823 }
 0x1df   : > { %19015 = vst [vmem:[#allocation151_spill] sm:$0xff] %v13356_v0  ;;  %v2092_v6 = vmul.f32 %v12499_v20, %v19020_v44  ;;  %v13374_v60 = vmul.f32 %v12569_v27, %v19020_v44  ;;  %v2094_v0 = vmul.f32 %v12499_v20, %v19022_v10  ;;  %v2131_v44 = vadd.f32 %v2091_v13, %v2050_v11  ;;  %v19027_v15 = vld [vmem:[#allocation77_spill] sm:$0xff] }
 0x1e0   : > { %19016 = vst [vmem:[#allocation152_spill] sm:$0xff] %v13358_v61  ;;  %v1353_v29 = vadd.f32 %v1313_v55, %v1272_v41  ;;  %v2018_v11 = vmul.f32 %v12509_v30, %v19024_v31  ;;  %v1525_v13 = vmul.f32 %v12527_v24, %v19018_v8  ;;  %v13408_v40 = vmul.f32 %v12569_v27, %v19025_v58 }
 0x1e1   : > { %19019 = vst [vmem:[#allocation153_spill] sm:$0xff] %v13367_v35  ;;  %v2172_v55 = vadd.f32 %v12577_v37, %v2131_v44  ;;  %v13414_v21 = vadd.f32 %v12682_v47, %v1642_v49  ;;  %v2017_v35 = vmul.f32 %v12509_v30, %v19027_v15  ;;  %v2051_v58 = vadd.f32 %v2011_v56, %v13164_v22  ;;  %v19030_v56 = vld [vmem:[#allocation74_spill] sm:$0xff] }
 0x1e2   : > { %19021 = vst [vmem:[#allocation154_spill] sm:$0xff] %v13378_v26  ;;  %v1841_v26 = vadd.f32 %v1801_v42, %v1760_v32  ;;  %v2171_v32 = vadd.f32 %v12577_v37, %v2130_v38  ;;  %v1434_v41 = vadd.f32 %v1394_v59, %v1353_v29  ;;  %v1643_v8 = vadd.f32 %v1603_v25, %v1562_v54  ;;  %v13429_v29 = vpop.permute.xlu2 %983 }
 0x1e3   : > { %19026 = vst [vmem:[#allocation155_spill] sm:$0xff] %v13410_v57  ;;  %v13423_v33 = vadd.f32 %v2018_v11, %v13173_v45  ;;  %v1523_v44 = vmul.f32 %v12527_v24, %v19023_v14  ;;  %v1530_v49 = vmul.f32 %v12527_v24, %v19024_v31  ;;  %v2095_v22 = vmul.f32 %v12499_v20, %v19030_v56  ;;  %v19031_v31 = vld [vmem:[#allocation2_spill] sm:$0xff] }
 0x1e4   : > { %v1922_v42 = vadd.f32 %v1882_v52, %v1841_v26  ;;  %v1606_v26 = vmul.f32 %v12569_v27, %v19022_v10  ;;  %v2134_v52 = vadd.f32 %v2094_v0, %v2053_v34  ;;  %19028 = vst [vmem:[#allocation156_spill] sm:$0xff] %v13429_v29  ;;  %v1802_v34 = vmul.f32 %v12002_v5, %v13410_v57 }
 0x1e5   : > { %v1565_v45 = vadd.f32 %v1525_v13, %v13118_v46  ;;  %v1607_v54 = vmul.f32 %v12569_v27, %v19030_v56  ;;  %v1475_v59 = vadd.f32 %v12036_v48, %v1434_v41  ;;  %v2057_v46 = vadd.f32 %v2017_v35, %v13246_v53 }
 0x1e6   : > { %v1963_v38 = vadd.f32 %v12029_v36, %v1922_v42  ;;  %v13432_v0 = vpop.permute.xlu1 %662  ;;  %v1314_v42 = vmul.f32 %v12007_v7, %v13410_v57  ;;  %v2132_v13 = vadd.f32 %v2092_v6, %v2051_v58  ;;  %v2015_v14 = vmul.f32 %v12509_v30, %v19031_v31  ;;  %v19032_v57 = vld [vmem:[#allocation76_spill] sm:$0xff] }
 0x1e7   : > { %19029 = vst [vmem:[#allocation157_spill] sm:$0xff] %v13432_v0  ;;  %v1761_v25 = vmul.f32 %v11987_v62, %v13432_v0  ;;  %v1273_v11 = vmul.f32 %v11990_v63, %v13432_v0  ;;  %v1883_v41 = vmul.f32 %v11995_v2, %v13429_v29  ;;  %v1527_v0 = vmul.f32 %v12527_v24, %v19031_v31  ;;  %v19033_v31 = vld [vmem:[#allocation81_spill] sm:$0xff] }
 0x1e8   : > { %10824 = vmatpush.xpose.msk.msrb.mxu1 %vm2698_vm0, %v1963_v38  ;;  %v2175_v38 = vadd.f32 %v12577_v37, %v2134_v52  ;;  %v2098_v52 = vmul.f32 %v12499_v20, %v19032_v57  ;;  %v1395_v53 = vmul.f32 %v12017_v16, %v13429_v29  ;;  %v2135_v35 = vadd.f32 %v2095_v22, %v2054_v23 }
 0x1e9   : > { %v1354_v56 = vadd.f32 %v1314_v42, %v1273_v11  ;;  %v1646_v6 = vadd.f32 %v1606_v26, %v1565_v45  ;;  %v1570_v10 = vadd.f32 %v1530_v49, %v13195_v9  ;;  %v1529_v23 = vmul.f32 %v12527_v24, %v19027_v15 }
 0x1ea   : > { %v2138_v11 = vadd.f32 %v2098_v52, %v2057_v46  ;;  %v2055_v26 = vadd.f32 %v2015_v14, %v13168_v1  ;;  %v13480_v22 = vadd.f32 %v12577_v37, %v2132_v13  ;;  %v1610_v49 = vmul.f32 %v12569_v27, %v19032_v57  ;;  %v19036_v14 = vld [vmem:[#allocation73_spill] sm:$0xff]  ;;  %v19037_v46 = vld [vmem:[#allocation75_spill] sm:$0xff] }
 0x1eb   : > { %10825 = vmatmul.msk.f32.vlgmr.msrb.gmra.mxu1 %vm2698_vm0, %v1475_v59  ;;  %v1647_v59 = vadd.f32 %v1607_v54, %v1566_v19  ;;  %v1435_v42 = vadd.f32 %v1395_v53, %v1354_v56  ;;  %v2176_v19 = vadd.f32 %v12577_v37, %v2135_v35  ;;  %v2022_v13 = vmul.f32 %v12509_v30, %v19037_v46 }
 0x1ec   : > { %10832 = vmatpush.xpose.msk.msra.mxu1 %vm2698_vm0, %v2171_v32  ;;  %v1842_v32 = vadd.f32 %v1802_v34, %v1761_v25  ;;  %v13464_v34 = vadd.f32 %v12682_v47, %v1643_v8  ;;  %v1563_v25 = vadd.f32 %v1523_v44, %v13177_v39  ;;  %v1567_v8 = vadd.f32 %v1527_v0, %v13199_v18  ;;  %v19034_v44 = vld [vmem:[#allocation79_spill] sm:$0xff] }
 0x1ed   : > { %v1687_v39 = vadd.f32 %v12682_v47, %v1646_v6  ;;  %v2099_v56 = vmul.f32 %v12499_v20, %v19034_v44  ;;  %v13488_v1 = vadd.f32 %v12682_v47, %v1647_v59  ;;  %v2100_v0 = vmul.f32 %v12499_v20, %v19036_v14  ;;  %v19040_v59 = vld [vmem:[#allocation84_spill] sm:$0xff] }
 0x1ee   : > { %v1923_v58 = vadd.f32 %v1883_v41, %v1842_v32  ;;  %v1644_v18 = vadd.f32 %v13374_v60, %v1563_v25  ;;  %v2179_v45 = vadd.f32 %v12577_v37, %v2138_v11  ;;  %v1476_v54 = vadd.f32 %v12036_v48, %v1435_v42 }
 0x1ef   : > { %v13483_v9 = vpop.permute.xlu1 %827  ;;  %v1569_v32 = vadd.f32 %v1529_v23, %v13250_v3  ;;  %v2136_v60 = vadd.f32 %v13401_v17, %v2055_v26  ;;  %v1648_v41 = vadd.f32 %v13408_v40, %v1567_v8  ;;  %v2139_v53 = vadd.f32 %v2099_v56, %v13423_v33  ;;  %v19039_v17 = vld [vmem:[#allocation80_spill] sm:$0xff]  ;;  %v19041_v26 = vld [vmem:[#allocation126_spill] sm:$0xff] }
 0x1f0   : > { %10840 = vmatpush.xpose.msk.msrb.mxu1 %vm2698_vm0, %v2175_v38  ;;  %v2021_v38 = vmul.f32 %v12509_v30, %v19033_v31  ;;  %v1964_v43 = vadd.f32 %v12029_v36, %v1923_v58  ;;  %19035 = vst [vmem:[#allocation158_spill] sm:$0xff] %v13483_v9  ;;  %v13515_v3 = vadd.f32 %v12682_v47, %v1644_v18 }
 0x1f1   : > { %v2019_v40 = vmul.f32 %v12509_v30, %v19039_v17  ;;  %v1531_v35 = vmul.f32 %v12527_v24, %v19039_v17  ;;  %v1612_v6 = vmul.f32 %v12569_v27, %v19036_v14  ;;  %v2025_v33 = vmul.f32 %v12509_v30, %v19040_v59  ;;  %v19091_v14 = vld [vmem:[#allocation71_spill] sm:$0xff] }
 0x1f2   : > { %10826 = vmatpush.xpose.msk.msrb.mxu2 %vm2698_vm0, %v1964_v43  ;;  %v2061_v43 = vadd.f32 %v2021_v38, %v13187_v28  ;;  %v19038_v28 = vld [vmem:[#allocation27_spill] sm:$0xff]  ;;  %v2062_v25 = vadd.f32 %v2022_v13, %v13123_v4  ;;  %v1533_v11 = vmul.f32 %v12527_v24, %v19033_v31  ;;  %v1803_v42 = vmul.f32 %v12002_v5, %v13483_v9  ;;  %v19043_v13 = vld [vmem:[#allocation121_spill] sm:$0xff] }
 0x1f3   : > { %10833 = vmatmul.msk.f32.vlgmr.msra.gmra.mxu1 %vm2698_vm0, %v13414_v21  ;;  %v2102_v52 = vmul.f32 %v12499_v20, %v19038_v28  ;;  %v1611_v21 = vmul.f32 %v12569_v27, %v19034_v44  ;;  %v13531_v38 = vadd.f32 %v12577_v37, %v2136_v60  ;;  %v13534_v23 = vadd.f32 %v12682_v47, %v1648_v41  ;;  %v19097_v44 = vld [vmem:[#allocation150_spill] sm:$0xff] }
 0x1f4   : > { %10848 = vmatpush.xpose.msk.msra.mxu1 %vm2698_vm0, %v2179_v45  ;;  %v1650_v56 = vadd.f32 %v1610_v49, %v1569_v32  ;;  %v1315_v4 = vmul.f32 %v12007_v7, %v13483_v9  ;;  %v1762_v45 = vmul.f32 %v11987_v62, %v13358_v61  ;;  %v1614_v5 = vmul.f32 %v12569_v27, %v19038_v28 }
 0x1f5   : > { %10827 = vmatmul.msk.f32.vlgmr.msrb.gmra.mxu2 %vm2698_vm0, %v1476_v54  ;;  %v2142_v58 = vadd.f32 %v2102_v52, %v2061_v43  ;;  %v1651_v18 = vadd.f32 %v1611_v21, %v1570_v10  ;;  %v19042_v54 = vld [vmem:[#allocation120_spill] sm:$0xff]  ;;  %v1571_v60 = vadd.f32 %v1531_v35, %v19043_v13  ;;  %v1274_v7 = vmul.f32 %v11990_v63, %v13358_v61  ;;  %v19046_v10 = vld [vmem:[#allocation130_spill] sm:$0xff]  ;;  %v19048_v63 = vld [vmem:[#allocation59_spill] sm:$0xff] }
 0x1f6   : > { %10834 = vmatpush.xpose.msk.msra.mxu2 %vm2698_vm0, %v2172_v55  ;;  %v1534_v55 = vmul.f32 %v12527_v24, %v19037_v46  ;;  %v2059_v43 = vadd.f32 %v2019_v40, %v19042_v54  ;;  %v19045_v52 = vld [vmem:[#allocation124_spill] sm:$0xff]  ;;  %v1573_v32 = vadd.f32 %v1533_v11, %v19046_v10  ;;  %v1843_v62 = vadd.f32 %v1803_v42, %v1762_v45  ;;  %v19047_v40 = vld [vmem:[#allocation55_spill] sm:$0xff] }
 0x1f7   : > { %v2065_v49 = vadd.f32 %v2025_v33, %v19045_v52  ;;  %v2103_v35 = vmul.f32 %v12499_v20, %v19047_v40  ;;  %v1355_v33 = vadd.f32 %v1315_v4, %v1274_v7  ;;  %v1652_v45 = vadd.f32 %v1612_v6, %v1571_v60  ;;  %v19052_v6 = vld [vmem:[#allocation138_spill] sm:$0xff]  ;;  %v19070_v46 = vld [vmem:[#allocation143_spill] sm:$0xff] }
 0x1f8   : > { %v1574_v8 = vadd.f32 %v1534_v55, %v19041_v26  ;;  %v13546_v41 = vpop.permute.xlu1 %987  ;;  %v2183_v55 = vadd.f32 %v12577_v37, %v2142_v58  ;;  %v2106_v58 = vmul.f32 %v12499_v20, %v19048_v63  ;;  %v2140_v42 = vadd.f32 %v2100_v0, %v2059_v43 }
 0x1f9   : > { %19044 = vst [vmem:[#allocation126_spill] sm:$0xff] %v13546_v41  ;;  %v1396_v21 = vmul.f32 %v12017_v16, %v13546_v41  ;;  %v19050_v16 = vld [vmem:[#allocation28_spill] sm:$0xff]  ;;  %v1691_v7 = vadd.f32 %v12682_v47, %v1650_v56  ;;  %v2143_v10 = vadd.f32 %v2103_v35, %v2062_v25  ;;  %v1692_v0 = vadd.f32 %v12682_v47, %v1651_v18 }
 0x1fa   : > { %10842 = vmatpush.xpose.msk.msrb.mxu2 %vm2698_vm0, %v2176_v19  ;;  %v2180_v19 = vadd.f32 %v12577_v37, %v2139_v53  ;;  %v1884_v53 = vmul.f32 %v11995_v2, %v13546_v41  ;;  %v2026_v26 = vmul.f32 %v12509_v30, %v19050_v16  ;;  %v2146_v54 = vadd.f32 %v2106_v58, %v2065_v49  ;;  %v19053_v49 = vld [vmem:[#allocation78_spill] sm:$0xff] }
 0x1fb   : > { %10841 = vmatmul.msk.f32.vlgmr.msrb.gmra.mxu1 %vm2698_vm0, %v1687_v39  ;;  %v19049_v39 = vld [vmem:[#allocation82_spill] sm:$0xff]  ;;  %v1436_v13 = vadd.f32 %v1396_v21, %v1355_v33  ;;  %v1538_v52 = vmul.f32 %v12527_v24, %v19050_v16  ;;  %v1615_v43 = vmul.f32 %v12569_v27, %v19047_v40  ;;  %v19054_v21 = vld [vmem:[#allocation140_spill] sm:$0xff]  ;;  %v13586_v56 = vadd.f32 %v12682_v47, %v1652_v45 }
 0x1fc   : > { %10856 = vmatpush.xpose.msk.msrb.mxu1 %vm2698_vm0, %v2183_v55  ;;  %v2023_v11 = vmul.f32 %v12509_v30, %v19049_v39  ;;  %v1924_v2 = vadd.f32 %v1884_v53, %v1843_v62  ;;  %v19051_v55 = vld [vmem:[#allocation88_spill] sm:$0xff]  ;;  %v2104_v62 = vmul.f32 %v12499_v20, %v19053_v49  ;;  %v2181_v53 = vadd.f32 %v12577_v37, %v2140_v42 }
 0x1fd   : > { %10835 = vmatmul.msk.f32.vlgmr.msra.gmra.mxu2 %vm2698_vm0, %v13464_v34  ;;  %v2029_v34 = vmul.f32 %v12509_v30, %v19051_v55  ;;  %v1535_v25 = vmul.f32 %v12527_v24, %v19049_v39  ;;  %v2187_v18 = vadd.f32 %v12577_v37, %v2146_v54  ;;  %v1578_v58 = vadd.f32 %v1538_v52, %v13298_v12  ;;  %v19058_v54 = vld [vmem:[#allocation87_spill] sm:$0xff] }
 0x1fe   : > { %10850 = vmatpush.xpose.msk.msra.mxu2 %vm2698_vm0, %v2180_v19  ;;  %v1965_v4 = vadd.f32 %v12029_v36, %v1924_v2  ;;  %v1654_v19 = vadd.f32 %v1614_v5, %v1573_v32  ;;  %v2063_v60 = vadd.f32 %v2023_v11, %v19052_v6  ;;  %v2066_v36 = vadd.f32 %v2026_v26, %v19054_v21  ;;  %v19055_v32 = vld [vmem:[#allocation142_spill] sm:$0xff]  ;;  %v19056_v2 = vld [vmem:[#allocation85_spill] sm:$0xff] }
 0x1ff   : > { %v1477_v5 = vadd.f32 %v12036_v48, %v1436_v13  ;;  %v2069_v35 = vadd.f32 %v2029_v34, %v19055_v32  ;;  %v2184_v33 = vadd.f32 %v12577_v37, %v2143_v10  ;;  %v2107_v42 = vmul.f32 %v12499_v20, %v19056_v2  ;;  %v19057_v48 = vld [vmem:[#allocation65_spill] sm:$0xff]  ;;  %v19059_v34 = vld [vmem:[#allocation31_spill] sm:$0xff] }
 0x200   : > { %10828 = vmatpush.xpose.msk.msra.mxu3 %vm2698_vm0, %v1965_v4  ;;  %v1695_v11 = vadd.f32 %v12682_v47, %v1654_v19  ;;  %v2110_v26 = vmul.f32 %v12499_v20, %v19057_v48  ;;  %v1655_v12 = vadd.f32 %v1615_v43, %v1574_v8  ;;  %v2144_v45 = vadd.f32 %v2104_v62, %v2063_v60  ;;  %v19060_v4 = vld [vmem:[#allocation139_spill] sm:$0xff]  ;;  %v19061_v19 = vld [vmem:[#allocation93_spill] sm:$0xff] }
 0x201   : > { %v2027_v13 = vmul.f32 %v12509_v30, %v19058_v54  ;;  %v2108_v52 = vmul.f32 %v12499_v20, %v19059_v34  ;;  %v1618_v8 = vmul.f32 %v12569_v27, %v19048_v63  ;;  %v2147_v43 = vadd.f32 %v2107_v42, %v2066_v36  ;;  %v19062_v6 = vld [vmem:[#allocation125_spill] sm:$0xff] }
 0x202   : > { %v2150_v10 = vadd.f32 %v2110_v26, %v2069_v35  ;;  %v1619_v62 = vmul.f32 %v12569_v27, %v19056_v2  ;;  %v1616_v21 = vmul.f32 %v12569_v27, %v19053_v49 }
 0x203   : > { %10849 = vmatmul.msk.f32.vlgmr.msra.gmra.mxu1 %vm2698_vm0, %v1691_v7  ;;  %10829 = vmatmul.msk.f32.vlgmr.msra.gmra.mxu3 %vm2698_vm0, %v1477_v5  ;;  %v1575_v7 = vadd.f32 %v1535_v25, %v19060_v4  ;;  %v1696_v25 = vadd.f32 %v12682_v47, %v1655_v12  ;;  %v19063_v5 = vld [vmem:[#allocation83_spill] sm:$0xff]  ;;  %v19066_v4 = vld [vmem:[#allocation64_spill] sm:$0xff]  ;;  %v19068_v12 = vld [vmem:[#allocation145_spill] sm:$0xff] }
 0x204   : > { %10836 = vmatpush.xpose.msk.msrb.mxu3 %vm2698_vm0, %v13480_v22  ;;  %v1537_v22 = vmul.f32 %v12527_v24, %v19040_v59  ;;  %10864 = vmatpush.xpose.msk.msra.mxu1 %vm2698_vm0, %v2187_v18  ;;  %v2185_v18 = vadd.f32 %v12577_v37, %v2144_v45  ;;  %v1989_v32 = vmul.f32 %v12141_v51, %v19063_v5  ;;  %v19069_v45 = vld [vmem:[#allocation90_spill] sm:$0xff] }
 0x205   : > { %10843 = vmatmul.msk.f32.vlgmr.msrb.gmra.mxu2 %vm2698_vm0, %v13488_v1  ;;  %v2033_v1 = vmul.f32 %v12509_v30, %v19061_v19  ;;  %v1501_v35 = vmul.f32 %v12149_v50, %v19063_v5  ;;  %v1656_v42 = vadd.f32 %v1616_v21, %v1575_v7  ;;  %v2191_v2 = vadd.f32 %v12577_v37, %v2150_v10  ;;  %v19072_v10 = vld [vmem:[#allocation63_spill] sm:$0xff] }
 0x206   : > { %10858 = vmatpush.xpose.msk.msrb.mxu2 %vm2698_vm0, %v2184_v33  ;;  %v1577_v60 = vadd.f32 %v1537_v22, %v19062_v6  ;;  %v19064_v33 = vld [vmem:[#allocation133_spill] sm:$0xff]  ;;  %v19065_v22 = vld [vmem:[#allocation86_spill] sm:$0xff]  ;;  %v2030_v40 = vmul.f32 %v12509_v30, %v19069_v45  ;;  %v1659_v21 = vadd.f32 %v1619_v62, %v1578_v58  ;;  %v19075_v62 = vld [vmem:[#allocation104_spill] sm:$0xff] }
 0x207   : > { %v2067_v36 = vadd.f32 %v2027_v13, %v19064_v33  ;;  %v2031_v26 = vmul.f32 %v12509_v30, %v19065_v22  ;;  %v19067_v6 = vld [vmem:[#allocation102_spill] sm:$0xff]  ;;  %v2073_v16 = vadd.f32 %v2033_v1, %v19068_v12  ;;  %v2188_v13 = vadd.f32 %v12577_v37, %v2147_v43  ;;  %v19071_v33 = vld [vmem:[#allocation89_spill] sm:$0xff]  ;;  %v19073_v12 = vld [vmem:[#allocation91_spill] sm:$0xff] }
 0x208   : > { %10844 = vmatpush.xpose.msk.msra.mxu3 %vm2698_vm0, %v13531_v38  ;;  %v1541_v38 = vmul.f32 %v12527_v24, %v19051_v55  ;;  %v2334_v55 = vmul.f32 %v19067_v6, %v19066_v4  ;;  %v1658_v7 = vadd.f32 %v1618_v8, %v1577_v60  ;;  %v2112_v5 = vmul.f32 %v12499_v20, %v19071_v33  ;;  %v19074_v8 = vld [vmem:[#allocation144_spill] sm:$0xff] }
 0x209   : > { %v2114_v1 = vmul.f32 %v12499_v20, %v19072_v10  ;;  %v2148_v58 = vadd.f32 %v2108_v52, %v2067_v36  ;;  %v2070_v43 = vadd.f32 %v2030_v40, %v1989_v32  ;;  %v1996_v4 = vmul.f32 %v12141_v51, %v19075_v62  ;;  %v19076_v52 = vld [vmem:[#allocation48_spill] sm:$0xff] }
 0x20a   : > { %v1581_v49 = vadd.f32 %v1541_v38, %v19070_v46  ;;  %v2111_v46 = vmul.f32 %v12499_v20, %v19073_v12  ;;  %v2071_v38 = vadd.f32 %v2031_v26, %v19074_v8  ;;  %v13671_v36 = vmul.f32 %v12149_v50, %v19076_v52  ;;  %v19079_v8 = vld [vmem:[#allocation151_spill] sm:$0xff] }
 0x20b   : > { %10857 = vmatmul.msk.f32.vlgmr.msrb.gmra.mxu1 %vm2698_vm0, %v1695_v11  ;;  %10837 = vmatmul.msk.f32.vlgmr.msrb.gmra.mxu3 %vm2698_vm0, %v13515_v3  ;;  %v1622_v11 = vmul.f32 %v12569_v27, %v19057_v48  ;;  %v2154_v3 = vadd.f32 %v2114_v1, %v2073_v16  ;;  %v1542_v48 = vmul.f32 %v12527_v24, %v19069_v45  ;;  %v19077_v16 = vld [vmem:[#allocation97_spill] sm:$0xff]  ;;  %v19078_v1 = vld [vmem:[#allocation134_spill] sm:$0xff] }
 0x20c   : > { %10872 = vmatpush.xpose.msk.msrb.mxu1 %vm2698_vm0, %v2191_v2  ;;  %10852 = vmatpush.xpose.msk.msrb.mxu3 %vm2698_vm0, %v2181_v53  ;;  %v1539_v2 = vmul.f32 %v12527_v24, %v19058_v54  ;;  %v1620_v53 = vmul.f32 %v12569_v27, %v19059_v34  ;;  %v1699_v26 = vadd.f32 %v12682_v47, %v1658_v7 }
 0x20d   : > { %10851 = vmatmul.msk.f32.vlgmr.msra.gmra.mxu2 %vm2698_vm0, %v1692_v0  ;;  %v1662_v60 = vadd.f32 %v1622_v11, %v1581_v49  ;;  %v2152_v0 = vadd.f32 %v2112_v5, %v2071_v38  ;;  %v2037_v40 = vmul.f32 %v12509_v30, %v19077_v16  ;;  %v13677_v49 = vadd.f32 %v12682_v47, %v1656_v42 }
 0x20e   : > { %10866 = vmatpush.xpose.msk.msra.mxu2 %vm2698_vm0, %v2188_v13  ;;  %v2151_v13 = vadd.f32 %v2111_v46, %v2070_v43  ;;  %v1700_v32 = vadd.f32 %v12682_v47, %v1659_v21  ;;  %v2189_v5 = vadd.f32 %v12577_v37, %v2148_v58  ;;  %v1579_v11 = vadd.f32 %v1539_v2, %v19078_v1  ;;  %v19080_v46 = vld [vmem:[#allocation92_spill] sm:$0xff]  ;;  %v19082_v1 = vld [vmem:[#allocation101_spill] sm:$0xff] }
 0x20f   : > { %v2374_v38 = vadd.f32 %v2334_v55, %v19079_v8  ;;  %v2195_v45 = vadd.f32 %v12577_v37, %v2154_v3  ;;  %v1703_v52 = vadd.f32 %v12682_v47, %v1662_v60  ;;  %v2077_v7 = vadd.f32 %v2037_v40, %v1996_v4  ;;  %v19081_v2 = vld [vmem:[#allocation72_spill] sm:$0xff]  ;;  %v19083_v3 = vld [vmem:[#allocation98_spill] sm:$0xff] }
 0x210   : > { %v2034_v43 = vmul.f32 %v12509_v30, %v19080_v46  ;;  %v1626_v42 = vmul.f32 %v12569_v27, %v19072_v10  ;;  %v1582_v21 = vadd.f32 %v1542_v48, %v1501_v35  ;;  %v13691_v58 = vadd.f32 %v12577_v37, %v2152_v0 }
 0x211   : > { %v2257_v55 = vmul.f32 %v19082_v1, %v19081_v2  ;;  %v2192_v4 = vadd.f32 %v12577_v37, %v2151_v13  ;;  %v2115_v60 = vmul.f32 %v12499_v20, %v19083_v3  ;;  %v1545_v48 = vmul.f32 %v12527_v24, %v19061_v19  ;;  %v19086_v13 = vld [vmem:[#allocation128_spill] sm:$0xff]  ;;  %v19087_v2 = vld [vmem:[#allocation149_spill] sm:$0xff] }
 0x212   : > { %v1660_v35 = vadd.f32 %v1620_v53, %v1579_v11  ;;  %v2158_v8 = vadd.f32 %v19086_v13, %v2077_v7  ;;  %v2074_v10 = vadd.f32 %v2034_v43, %v19087_v2  ;;  %v1623_v34 = vmul.f32 %v12569_v27, %v19073_v12  ;;  %v19089_v19 = vld [vmem:[#allocation116_spill] sm:$0xff]  ;;  %v19092_v7 = vld [vmem:[#allocation110_spill] sm:$0xff] }
 0x213   : > { %10865 = vmatmul.msk.f32.vlgmr.msra.gmra.mxu1 %vm2698_vm0, %v1699_v26  ;;  %10845 = vmatmul.msk.f32.vlgmr.msra.gmra.mxu3 %vm2698_vm0, %v13534_v23  ;;  %v19084_v26 = vld [vmem:[#allocation95_spill] sm:$0xff]  ;;  %v4794_v23 = vpop.xlane.xlu0 %4793  ;;  %v2041_v53 = vmul.f32 %v12509_v30, %v19089_v19  ;;  %v19090_v11 = vld [vmem:[#allocation136_spill] sm:$0xff]  ;;  %v2000_v43 = vmul.f32 %v12141_v51, %v19092_v7  ;;  %v1508_v59 = vmul.f32 %v12149_v50, %v19075_v62 }
 0x214   : > { %10880 = vmatpush.xpose.msk.msra.mxu1 %vm2698_vm0, %v2195_v45  ;;  %v2035_v40 = vmul.f32 %v12509_v30, %v19084_v26  ;;  %10860 = vmatpush.xpose.msk.msra.mxu3 %vm2698_vm0, %v2185_v18  ;;  %v19085_v45 = vld [vmem:[#allocation96_spill] sm:$0xff]  ;;  %v19088_v18 = vld [vmem:[#allocation103_spill] sm:$0xff]  ;;  %v2297_v39 = vadd.f32 %v2257_v55, %v19090_v11  ;;  %v2155_v17 = vadd.f32 %v2115_v60, %v2074_v10 }
 0x215   : > { %10859 = vmatmul.msk.f32.vlgmr.msrb.gmra.mxu2 %vm2698_vm0, %v1696_v25  ;;  %v1994_v0 = vmul.f32 %v12141_v51, %v19085_v45  ;;  %v1546_v25 = vmul.f32 %v12527_v24, %v19080_v46  ;;  %v5024_v54 = vsub.f32 %v19088_v18, %v4794_v23  ;;  %v19093_v2 = vld [vmem:[#allocation108_spill] sm:$0xff]  ;;  %v19095_v23 = vld [vmem:[#allocation146_spill] sm:$0xff]  ;;  %v2199_v11 = vadd.f32 %v12577_v37, %v2158_v8 }
 0x216   : > { %10874 = vmatpush.xpose.msk.msrb.mxu2 %vm2698_vm0, %v2192_v4  ;;  %v2338_v4 = vmul.f32 %v19067_v6, %v19091_v14  ;;  %v1997_v13 = vmul.f32 %v12141_v51, %v19093_v2  ;;  %v19094_v12 = vld [vmem:[#allocation112_spill] sm:$0xff]  ;;  %v1585_v18 = vadd.f32 %v1545_v48, %v19095_v23  ;;  %v19096_v14 = vld [vmem:[#allocation119_spill] sm:$0xff]  ;;  %v1663_v60 = vadd.f32 %v1623_v34, %v1582_v21  ;;  %v19098_v23 = vld [vmem:[#allocation94_spill] sm:$0xff]  ;;  %v13746_v21 = vpop.f32.mrf.mxu0 }
 0x217   : > { %v2038_v46 = vmul.f32 %v12509_v30, %v19094_v12  ;;  %v5108_v63 = vmul.f32 1.442695, %v5024_v54  ;;  %v2075_v55 = vadd.f32 %v2035_v40, %v1994_v0  ;;  %v2122_v10 = vmul.f32 %v12499_v20, %v19096_v14 }
 0x218   : > { %v1586_v28 = vadd.f32 %v1546_v25, %v19097_v44  ;;  %v1549_v54 = vmul.f32 %v12527_v24, %v19077_v16  ;;  %v1627_v48 = vmul.f32 %v12569_v27, %v19083_v3  ;;  %v2116_v40 = vmul.f32 %v12499_v20, %v19098_v23 }
 0x219   : > { %11161 = vpow2.f32 %v5108_v63  ;;  %v2196_v34 = vadd.f32 %v12577_v37, %v2155_v17  ;;  %v2081_v44 = vadd.f32 %v2041_v53, %v2000_v43  ;;  %v2078_v63 = vadd.f32 %v2038_v46, %v1997_v13  ;;  %v19101_v17 = vld [vmem:[#allocation58_spill] sm:$0xff]  ;;  %v19103_v53 = vld [vmem:[#allocation25_spill] sm:$0xff]  ;;  %v19104_v43 = vld [vmem:[#allocation100_spill] sm:$0xff] }
 0x21a   : > { %v1589_v0 = vadd.f32 %v1549_v54, %v1508_v59  ;;  %v2156_v8 = vadd.f32 %v2116_v40, %v2075_v55  ;;  %v13758_v46 = vmul.f32 %v12149_v50, %v19101_v17  ;;  %v13769_v13 = vmul.f32 %v19104_v43, %v19103_v53 }
 0x21b   : > { %10873 = vmatmul.msk.f32.vlgmr.msrb.gmra.mxu1 %vm2698_vm0, %v1703_v52  ;;  %10853 = vmatmul.msk.f32.vlgmr.msrb.gmra.mxu3 %vm2698_vm0, %v13586_v56  ;;  %v1666_v52 = vadd.f32 %v1626_v42, %v1585_v18  ;;  %v2162_v25 = vadd.f32 %v2122_v10, %v2081_v44  ;;  %v19100_v56 = vld [vmem:[#allocation106_spill] sm:$0xff]  ;;  %v19102_v42 = vld [vmem:[#allocation53_spill] sm:$0xff]  ;;  %v1704_v18 = vadd.f32 %v12682_v47, %v1663_v60 }
 0x21c   : > { %10888 = vmatpush.xpose.msk.msrb.mxu1 %vm2698_vm0, %v2199_v11  ;;  %10868 = vmatpush.xpose.msk.msrb.mxu3 %vm2698_vm0, %v2189_v5  ;;  %v19099_v11 = vld [vmem:[#allocation153_spill] sm:$0xff]  ;;  %v13754_v16 = vadd.f32 %v19100_v56, %v2374_v38  ;;  %v1667_v5 = vadd.f32 %v1627_v48, %v1586_v28  ;;  %v13765_v59 = vmul.f32 %v19082_v1, %v19102_v42  ;;  %v19105_v38 = vld [vmem:[#allocation131_spill] sm:$0xff]  ;;  %v19106_v48 = vld [vmem:[#allocation132_spill] sm:$0xff] }
 0x21d   : > { %10867 = vmatmul.msk.f32.vlgmr.msra.gmra.mxu2 %vm2698_vm0, %v1700_v32  ;;  %v2045_v3 = vmul.f32 %v12509_v30, %v19099_v11  ;;  %v13761_v32 = vadd.f32 %v12682_v47, %v1660_v35  ;;  %v2159_v55 = vadd.f32 %v19105_v38, %v2078_v63  ;;  %v1553_v10 = vmul.f32 %v12527_v24, %v19089_v19  ;;  %v19107_v38 = vld [vmem:[#allocation154_spill] sm:$0xff] }
 0x21e   : > { %10882 = vmatpush.xpose.msk.msra.mxu2 %vm2698_vm0, %v2196_v34  ;;  %v13775_v54 = vadd.f32 %v2338_v4, %v2297_v39  ;;  %v1707_v28 = vadd.f32 %v12682_v47, %v1666_v52  ;;  %v1670_v40 = vadd.f32 %v19106_v48, %v1589_v0  ;;  %v2197_v34 = vadd.f32 %v12577_v37, %v2156_v8  ;;  %v19108_v39 = vld [vmem:[#allocation117_spill] sm:$0xff] }
 0x21f   : > { %v13777_v35 = vpop.eup %11161  ;;  %v1512_v44 = vmul.f32 %v12149_v50, %v19092_v7  ;;  %v2203_v60 = vadd.f32 %v12577_v37, %v2162_v25  ;;  %v2085_v53 = vadd.f32 %v2045_v3, %v19107_v38  ;;  %v2042_v4 = vmul.f32 %v12509_v30, %v19108_v39  ;;  %v19109_v0 = vld [vmem:[#allocation113_spill] sm:$0xff]  ;;  %v19113_v7 = vld [vmem:[#allocation107_spill] sm:$0xff] }
 0x220   : > { %v5272_v63 = vsel %vm4779_vm1, %v13777_v35, 0.0  ;;  %v1708_v52 = vadd.f32 %v12682_v47, %v1667_v5  ;;  %v2001_v8 = vmul.f32 %v12141_v51, %v19109_v0  ;;  %v1543_v48 = vmul.f32 %v12527_v24, %v19065_v22  ;;  %v19110_v25 = vld [vmem:[#allocation137_spill] sm:$0xff] }
 0x221   : > { %5273 = vadd.xlane.f32.xlu1 %v5272_v63  ;;  %v2200_v3 = vadd.f32 %v12577_v37, %v2159_v55  ;;  %v2126_v38 = vmul.f32 %v12499_v20, %v19110_v25  ;;  %v1593_v17 = vadd.f32 %v1553_v10, %v1512_v44  ;;  %v19112_v55 = vld [vmem:[#allocation109_spill] sm:$0xff]  ;;  %v1509_v10 = vmul.f32 %v12149_v50, %v19093_v2 }
 0x222   : > { %v2082_v31 = vadd.f32 %v2042_v4, %v2001_v8  ;;  %v1583_v57 = vadd.f32 %v1543_v48, %v13671_v36  ;;  %v1506_v8 = vmul.f32 %v12149_v50, %v19085_v45  ;;  %v1547_v36 = vmul.f32 %v12527_v24, %v19084_v26 }
 0x223   : > { %10881 = vmatmul.msk.f32.vlgmr.msra.gmra.mxu1 %vm2698_vm0, %v1707_v28  ;;  %10861 = vmatmul.msk.f32.vlgmr.msra.gmra.mxu3 %vm2698_vm0, %v13677_v49  ;;  %v19111_v28 = vld [vmem:[#allocation141_spill] sm:$0xff]  ;;  %v4782_v5 = vpop.xlane.xlu2 %4781  ;;  %v4806_v42 = vpop.xlane.xlu1 %4805  ;;  %v1624_v49 = vmul.f32 %v12569_v27, %v19071_v33  ;;  %v2166_v22 = vadd.f32 %v2126_v38, %v2085_v53  ;;  %v19117_v38 = vld [vmem:[#allocation99_spill] sm:$0xff]  ;;  %v1554_v2 = vmul.f32 %v12527_v24, %v19108_v39 }
 0x224   : > { %10896 = vmatpush.xpose.msk.msra.mxu1 %vm2698_vm0, %v2203_v60  ;;  %v2123_v63 = vmul.f32 %v12499_v20, %v19111_v28  ;;  %10876 = vmatpush.xpose.msk.msra.mxu3 %vm2698_vm0, %v13691_v58  ;;  %v1711_v60 = vadd.f32 %v12682_v47, %v1670_v40  ;;  %v5020_v19 = vsub.f32 %v19112_v55, %v4782_v5  ;;  %v19114_v55 = vld [vmem:[#allocation157_spill] sm:$0xff] }
 0x225   : > { %10875 = vmatmul.msk.f32.vlgmr.msrb.gmra.mxu2 %vm2698_vm0, %v1704_v18  ;;  %v5028_v62 = vsub.f32 %v19113_v7, %v4806_v42  ;;  %v13813_v18 = vpop.f32.mrf.mxu0  ;;  %v1634_v58 = vmul.f32 %v12569_v27, %v19096_v14  ;;  %v1550_v40 = vmul.f32 %v12527_v24, %v19094_v12  ;;  %v2005_v7 = vmul.f32 %v12141_v51, %v19114_v55  ;;  %v19115_v53 = vld [vmem:[#allocation105_spill] sm:$0xff] }
 0x226   : > { %10890 = vmatpush.xpose.msk.msrb.mxu2 %vm2698_vm0, %v2200_v3  ;;  %v5100_v44 = vmul.f32 1.442695, %v5020_v19  ;;  %v2163_v5 = vadd.f32 %v2123_v63, %v2082_v31  ;;  %v1664_v42 = vadd.f32 %v1624_v49, %v1583_v57  ;;  %v2039_v4 = vmul.f32 %v12509_v30, %v19115_v53  ;;  %v19116_v31 = vld [vmem:[#allocation155_spill] sm:$0xff] }
 0x227   : > { %v5116_v3 = vmul.f32 1.442695, %v5028_v62  ;;  %v2207_v48 = vadd.f32 %v12577_v37, %v2166_v22  ;;  %v4888_v19 = vsel %vm4779_vm1, %v13813_v18, -inf  ;;  %v2046_v62 = vmul.f32 %v12509_v30, %v19116_v31  ;;  %v19118_v49 = vld [vmem:[#allocation115_spill] sm:$0xff] }
 0x228   : > { %11163 = vpow2.f32 %v5100_v44  ;;  %v1590_v57 = vadd.f32 %v1550_v40, %v1509_v10  ;;  %v1998_v63 = vmul.f32 %v12141_v51, %v19117_v38  ;;  %v2120_v14 = vmul.f32 %v12499_v20, %v19118_v49 }
 0x229   : > { %11165 = vpow2.f32 %v5116_v3  ;;  %4889 = vmax.xlane.f32.xlu1 %v4888_v19  ;;  %v2204_v22 = vadd.f32 %v12577_v37, %v2163_v5  ;;  %v1674_v44 = vadd.f32 %v1634_v58, %v1593_v17  ;;  %v2086_v12 = vadd.f32 %v2046_v62, %v2005_v7  ;;  %v19120_v17 = vld [vmem:[#allocation148_spill] sm:$0xff] }
 0x22a   : > { %v2079_v10 = vadd.f32 %v2039_v4, %v1998_v63  ;;  %v1557_v40 = vmul.f32 %v12527_v24, %v19099_v11  ;;  %v1587_v3 = vadd.f32 %v1547_v36, %v1506_v8  ;;  %v2294_v58 = vadd.f32 %v13765_v59, %v19120_v17  ;;  %v19122_v4 = vld [vmem:[#allocation147_spill] sm:$0xff] }
 0x22b   : > { %10889 = vmatmul.msk.f32.vlgmr.msrb.gmra.mxu1 %vm2698_vm0, %v1711_v60  ;;  %10869 = vmatmul.msk.f32.vlgmr.msrb.gmra.mxu3 %vm2698_vm0, %v13761_v32  ;;  %v4818_v60 = vpop.xlane.xlu2 %4817  ;;  %v19119_v32 = vld [vmem:[#allocation129_spill] sm:$0xff]  ;;  %v1705_v7 = vadd.f32 %v12682_v47, %v1664_v42  ;;  %v1671_v19 = vadd.f32 %v19122_v4, %v1590_v57  ;;  %v1628_v8 = vmul.f32 %v12569_v27, %v19098_v23  ;;  %v19123_v63 = vld [vmem:[#allocation111_spill] sm:$0xff] }
 0x22c   : > { %10904 = vmatpush.xpose.msk.msrb.mxu1 %vm2698_vm0, %v2207_v48  ;;  %10884 = vmatpush.xpose.msk.msrb.mxu3 %vm2698_vm0, %v2197_v34  ;;  %v2127_v48 = vmul.f32 %v12499_v20, %v13429_v29  ;;  %v2002_v5 = vmul.f32 %v12141_v51, %v19119_v32  ;;  %v2160_v62 = vadd.f32 %v2120_v14, %v2079_v10  ;;  %v19124_v59 = vld [vmem:[#allocation127_spill] sm:$0xff] }
 0x22d   : > { %10883 = vmatmul.msk.f32.vlgmr.msra.gmra.mxu2 %vm2698_vm0, %v1708_v52  ;;  %v19121_v52 = vld [vmem:[#allocation68_spill] sm:$0xff]  ;;  %v2043_v17 = vmul.f32 %v12509_v30, %v19124_v59  ;;  %v1715_v14 = vadd.f32 %v12682_v47, %v1674_v44  ;;  %v1597_v57 = vadd.f32 %v1557_v40, %v13758_v46  ;;  %v1668_v10 = vadd.f32 %v1628_v8, %v1587_v3 }
 0x22e   : > { %10898 = vmatpush.xpose.msk.msra.mxu2 %vm2698_vm0, %v2204_v22  ;;  %v2335_v34 = vmul.f32 %v19067_v6, %v19121_v52  ;;  %v13861_v36 = vpop.eup %11163  ;;  %v5032_v22 = vsub.f32 %v19123_v63, %v4818_v60  ;;  %v2167_v11 = vadd.f32 %v2127_v48, %v2086_v12  ;;  %v1513_v60 = vmul.f32 %v12149_v50, %v19109_v0 }
 0x22f   : > { %v13868_v52 = vpop.eup %11165  ;;  %v5260_v42 = vsel %vm4779_vm1, %v13861_v36, 0.0  ;;  %v1635_v48 = vmul.f32 %v12569_v27, %v19111_v28  ;;  %v2083_v4 = vadd.f32 %v2043_v17, %v2002_v5  ;;  %v1712_v63 = vadd.f32 %v12682_v47, %v1671_v19 }
 0x230   : > { %5261 = vadd.xlane.f32.xlu2 %v5260_v42  ;;  %v5284_v12 = vsel %vm4779_vm1, %v13868_v52, 0.0  ;;  %v2201_v44 = vadd.f32 %v12577_v37, %v2160_v62  ;;  %v1638_v46 = vmul.f32 %v12569_v27, %v19110_v25  ;;  %v5124_v40 = vmul.f32 1.442695, %v5032_v22  ;;  %v19125_v42 = vld [vmem:[#allocation122_spill] sm:$0xff]  ;;  %v19148_v25 = vld [vmem:[#allocation15_spill] sm:$0xff] }
 0x231   : > { %5285 = vadd.xlane.f32.xlu0 %v5284_v12  ;;  %v2208_v3 = vadd.f32 %v12577_v37, %v2167_v11  ;;  %v1594_v8 = vadd.f32 %v1554_v2, %v1513_v60  ;;  %v2124_v5 = vmul.f32 %v12499_v20, %v19125_v42  ;;  %v2419_v17 = vadd.f32 %v19100_v56, %v13775_v54  ;;  %v19127_v60 = vld [vmem:[#allocation61_spill] sm:$0xff] }
 0x232   : > { %v1678_v62 = vadd.f32 %v1638_v46, %v1597_v57  ;;  %v2375_v22 = vadd.f32 %v2335_v34, %v2294_v58  ;;  %v4842_v2 = vpop.xlane.xlu0 %4841  ;;  %v1510_v57 = vmul.f32 %v12149_v50, %v19117_v38  ;;  %v1517_v54 = vmul.f32 %v12149_v50, %v19114_v55  ;;  %v19128_v46 = vld [vmem:[#allocation118_spill] sm:$0xff] }
 0x233   : > { %10897 = vmatmul.msk.f32.vlgmr.msra.gmra.mxu1 %vm2698_vm0, %v1715_v14  ;;  %10877 = vmatmul.msk.f32.vlgmr.msra.gmra.mxu3 %vm2698_vm0, %v1705_v7  ;;  %v4830_v19 = vpop.xlane.xlu2 %4829  ;;  %v13894_v14 = vpop.f32.mrf.mxu0  ;;  %v1675_v7 = vadd.f32 %v1635_v48, %v1594_v8  ;;  %v2164_v12 = vadd.f32 %v2124_v5, %v2083_v4  ;;  %v1558_v58 = vmul.f32 %v12527_v24, %v19116_v31  ;;  %11167 = vpow2.f32 %v5124_v40 }
 0x234   : > { %5701 = vmatpush.msra.mxu1 %v13754_v16  ;;  %10892 = vmatpush.xpose.msk.msra.mxu3 %vm2698_vm0, %v2201_v44  ;;  %v19126_v16 = vld [vmem:[#allocation114_spill] sm:$0xff]  ;;  %v1709_v44 = vadd.f32 %v12682_v47, %v1668_v10  ;;  %v1551_v48 = vmul.f32 %v12527_v24, %v19115_v53  ;;  %v4876_v4 = vsel %vm4779_vm1, %v13746_v21, -inf  ;;  %v4900_v10 = vsel %vm4779_vm1, %v13894_v14, -inf }
 0x235   : > { %10891 = vmatmul.msk.f32.vlgmr.msrb.gmra.mxu2 %vm2698_vm0, %v1712_v63  ;;  %v5036_v11 = vsub.f32 %v19126_v16, %v4830_v19  ;;  %v2258_v63 = vmul.f32 %v19082_v1, %v19127_v60  ;;  %v1719_v8 = vadd.f32 %v12682_v47, %v1678_v62  ;;  %v2047_v5 = vmul.f32 %v12509_v30, %v13483_v9 }
 0x236   : > { %10906 = vmatpush.xpose.msk.msrb.mxu2 %vm2698_vm0, %v2208_v3  ;;  %v5040_v3 = vsub.f32 %v19128_v46, %v4842_v2  ;;  %v1716_v40 = vadd.f32 %v12682_v47, %v1675_v7  ;;  %v2205_v19 = vadd.f32 %v12577_v37, %v2164_v12  ;;  %v1632_v16 = vmul.f32 %v12569_v27, %v19118_v49 }
 0x237   : > { %v5132_v34 = vmul.f32 1.442695, %v5036_v11  ;;  %v1598_v11 = vadd.f32 %v1558_v58, %v1517_v54  ;;  %v2006_v2 = vmul.f32 %v12141_v51, %v13358_v61  ;;  %v2128_v62 = vmul.f32 %v12499_v20, %v13546_v41 }
 0x238   : > { %4877 = vmax.xlane.f32.xlu2 %v4876_v4  ;;  %v5140_v30 = vmul.f32 1.442695, %v5040_v3  ;;  %v2416_v7 = vadd.f32 %v19100_v56, %v2375_v22  ;;  %v1591_v12 = vadd.f32 %v1551_v48, %v1510_v57  ;;  %v1639_v51 = vmul.f32 %v12569_v27, %v13429_v29  ;;  %v19130_v4 = vld [vmem:[#allocation69_spill] sm:$0xff] }
 0x239   : > { %11169 = vpow2.f32 %v5132_v34  ;;  %4901 = vmax.xlane.f32.xlu0 %v4900_v10  ;;  %v19129_v34 = vld [vmem:[#allocation74_spill] sm:$0xff]  ;;  %v2087_v54 = vadd.f32 %v2047_v5, %v2006_v2  ;;  %v13934_v58 = vpop.eup %11167  ;;  %v1514_v22 = vmul.f32 %v12149_v50, %v19119_v32  ;;  %v2255_v10 = vmul.f32 %v19082_v1, %v19130_v4  ;;  %v19131_v5 = vld [vmem:[#allocation123_spill] sm:$0xff]  ;;  %v19140_v29 = vld [vmem:[#allocation37_spill] sm:$0xff] }
 0x23a   : > { %v2339_v46 = vmul.f32 %v19067_v6, %v19129_v34  ;;  %v1672_v20 = vadd.f32 %v1632_v16, %v1591_v12  ;;  %v1679_v3 = vadd.f32 %v1639_v51, %v1598_v11  ;;  %11171 = vpow2.f32 %v5140_v30  ;;  %v19132_v2 = vld [vmem:[#allocation11_spill] sm:$0xff] }
 0x23b   : > { %10905 = vmatmul.msk.f32.vlgmr.msrb.gmra.mxu1 %vm2698_vm0, %v1719_v8  ;;  %10885 = vmatmul.msk.f32.vlgmr.msrb.gmra.mxu3 %vm2698_vm0, %v1709_v44  ;;  %v13939_v44 = vpop.f32.mrf.mxu1  ;;  %v4854_v57 = vpop.xlane.xlu1 %4853  ;;  %v2168_v48 = vadd.f32 %v2128_v62, %v2087_v54  ;;  %v5296_v16 = vsel %vm4779_vm1, %v13934_v58, 0.0  ;;  %v2214_v62 = vmul.f32 %v19104_v43, %v19132_v2  ;;  %v2231_v49 = vmul.f32 %v19104_v43, %v19148_v25 }
 0x23c   : > { %5793 = vmatpush.msrb.mxu1 %v2419_v17  ;;  %10900 = vmatpush.xpose.msk.msrb.mxu3 %vm2698_vm0, %v2205_v19  ;;  %v2298_v17 = vadd.f32 %v2258_v63, %v13769_v13  ;;  %v1555_v13 = vmul.f32 %v12527_v24, %v19124_v59  ;;  %v13948_v63 = vpop.f32.mrf.mxu0  ;;  %v4783_v30 = vsel %vm4779_vm1, %v13939_v44, -inf }
 0x23d   : > { %10899 = vmatmul.msk.f32.vlgmr.msra.gmra.mxu2 %vm2698_vm0, %v1716_v40  ;;  %v5044_v40 = vsub.f32 %v19131_v5, %v4854_v57  ;;  %v2209_v51 = vadd.f32 %v12577_v37, %v2168_v48  ;;  %v2295_v54 = vadd.f32 %v2255_v10, %v2214_v62  ;;  %v1636_v5 = vmul.f32 %v12569_v27, %v19125_v42 }
 0x23e   : > { %5724 = vmatpush.msra.mxu2 %v2416_v7  ;;  %v2379_v19 = vadd.f32 %v2339_v46, %v2298_v17  ;;  %v1713_v7 = vadd.f32 %v12682_v47, %v1672_v20  ;;  %v1595_v12 = vadd.f32 %v1555_v13, %v1514_v22  ;;  %v1720_v46 = vadd.f32 %v12682_v47, %v1679_v3  ;;  %v19133_v20 = vld [vmem:[#allocation57_spill] sm:$0xff] }
 0x23f   : > { %v13943_v8 = vpop.eup %11169  ;;  %v5148_v17 = vmul.f32 1.442695, %v5044_v40  ;;  %v2336_v22 = vmul.f32 %v19067_v6, %v19133_v20  ;;  %v19134_v40 = vld [vmem:[#allocation2_spill] sm:$0xff]  ;;  %v19138_v20 = vld [vmem:[#allocation23_spill] sm:$0xff] }
 0x240   : > { %v5308_v11 = vsel %vm4779_vm1, %v13943_v8, 0.0  ;;  %5297 = vadd.xlane.f32.xlu2 %v5296_v16  ;;  %v2420_v57 = vadd.f32 %v19100_v56, %v2379_v19  ;;  %v13969_v13 = vpop.eup %11171  ;;  %v1676_v37 = vadd.f32 %v1636_v5, %v1595_v12  ;;  %v2259_v19 = vmul.f32 %v19082_v1, %v19134_v40  ;;  %v19136_v12 = vld [vmem:[#allocation14_spill] sm:$0xff] }
 0x241   : > { %5309 = vadd.xlane.f32.xlu1 %v5308_v11  ;;  %4784 = vmax.xlane.f32.xlu0 %v4783_v30  ;;  %v2376_v10 = vadd.f32 %v2336_v22, %v2295_v54  ;;  %11173 = vpow2.f32 %v5148_v17  ;;  %v1559_v16 = vmul.f32 %v12527_v24, %v13483_v9  ;;  %v19135_v11 = vld [vmem:[#allocation135_spill] sm:$0xff]  ;;  %v5320_v30 = vsel %vm4779_vm1, %v13969_v13, 0.0 }
 0x242   : > { %v1717_v54 = vadd.f32 %v12682_v47, %v1676_v37  ;;  %v1518_v24 = vmul.f32 %v12149_v50, %v13358_v61  ;;  %v1640_v17 = vmul.f32 %v12569_v27, %v13546_v41  ;;  %v2260_v34 = vmul.f32 %v19082_v1, %v19138_v20 }
 0x243   : > { %10893 = vmatmul.msk.f32.vlgmr.msra.gmra.mxu3 %vm2698_vm0, %v1713_v7  ;;  %v13971_v3 = vpop.f32.mrf.mxu1  ;;  %v4912_v7 = vsel %vm4779_vm1, %v13948_v63, -inf  ;;  %v2417_v5 = vadd.f32 %v19100_v56, %v2376_v10 }
 0x244   : > { %10908 = vmatpush.xpose.msk.msra.mxu3 %vm2698_vm0, %v2209_v51  ;;  %v4866_v48 = vpop.xlane.xlu0 %4865  ;;  %v4795_v51 = vsel %vm4779_vm1, %v13971_v3, -inf }
 0x245   : > { %10907 = vmatmul.msk.f32.vlgmr.msrb.gmra.mxu2 %vm2698_vm0, %v1720_v46  ;;  %v5048_v62 = vsub.f32 %v19135_v11, %v4866_v48  ;;  %v2218_v46 = vmul.f32 %v19104_v43, %v19136_v12  ;;  %v1599_v48 = vadd.f32 %v1559_v16, %v1518_v24  ;;  %v13999_v12 = vpop.f32.mrf.mxu3 }
 0x246   : > { %5816 = vmatpush.msrb.mxu2 %v2420_v57  ;;  %v13991_v57 = vpop.f32.mrf.mxu0 }
 0x247   : > { %v2299_v22 = vadd.f32 %v2259_v19, %v2218_v46  ;;  %v5156_v11 = vmul.f32 1.442695, %v5048_v62  ;;  %v1680_v50 = vadd.f32 %v1640_v17, %v1599_v48  ;;  %v4789_v19 = vsel %vm4779_vm1, %v13999_v12, -inf }
 0x248   : > { %4913 = vmax.xlane.f32.xlu2 %v4912_v7  ;;  %v13997_v7 = vpop.eup %11173 }
 0x249   : > { %5321 = vadd.xlane.f32.xlu1 %v5320_v30  ;;  %4796 = vmax.xlane.f32.xlu0 %v4795_v51  ;;  %v19137_v30 = vld [vmem:[#allocation66_spill] sm:$0xff]  ;;  %11175 = vpow2.f32 %v5156_v11  ;;  %v4924_v51 = vsel %vm4779_vm1, %v13991_v57, -inf  ;;  %v5332_v10 = vsel %vm4779_vm1, %v13997_v7, 0.0  ;;  %v1721_v16 = vadd.f32 %v12682_v47, %v1680_v50 }
 0x24a   : > { %v2340_v37 = vmul.f32 %v19067_v6, %v19137_v30 }
 0x24b   : > { %10901 = vmatmul.msk.f32.vlgmr.msrb.gmra.mxu3 %vm2698_vm0, %v1717_v54  ;;  %v14012_v54 = vpop.f32.mrf.mxu2  ;;  %v14024_v48 = vpop.f32.mrf.mxu1 }
 0x24c   : > { %5747 = vmatpush.msrb.mxu3 %v2417_v5  ;;  %v2380_v27 = vadd.f32 %v2340_v37, %v2299_v22  ;;  %v4786_v17 = vsel %vm4779_vm1, %v14012_v54, -inf  ;;  %v4807_v37 = vsel %vm4779_vm1, %v14024_v48, -inf }
 0x24e   : > { %v2421_v62 = vadd.f32 %v19100_v56, %v2380_v27  ;;  %v14010_v46 = vpop.f32.mrf.mxu0 }
 0x24f   : > { %v14014_v24 = vpop.eup %11175  ;;  %v4936_v5 = vsel %vm4779_vm1, %v14010_v46, -inf }
 0x250   : > { %4925 = vmax.xlane.f32.xlu2 %v4924_v51  ;;  %v5344_v47 = vsel %vm4779_vm1, %v14014_v24, 0.0  ;;  %v14034_v51 = vpop.f32.mrf.mxu3 }
 0x251   : > { %5333 = vadd.xlane.f32.xlu1 %v5332_v10  ;;  %4790 = vmax.xlane.f32.xlu0 %v4789_v19 }
 0x253   : > { %10909 = vmatmul.msk.f32.vlgmr.msra.gmra.mxu3 %vm2698_vm0, %v1721_v16  ;;  %v14022_v22 = vpop.f32.mrf.mxu2  ;;  %v14036_v10 = vpop.f32.mrf.mxu1  ;;  %v4801_v16 = vsel %vm4779_vm1, %v14034_v51, -inf }
 0x254   : > { %5839 = vmatpush.msra.mxu3 %v2421_v62  ;;  %v4798_v50 = vsel %vm4779_vm1, %v14022_v22, -inf  ;;  %v4819_v62 = vsel %vm4779_vm1, %v14036_v10, -inf }
 0x256   : > { %v14026_v11 = vpop.f32.mrf.mxu0 }
 0x257   : > { %v4948_v27 = vsel %vm4779_vm1, %v14026_v11, -inf }
 0x258   : > { %4787 = vmax.xlane.f32.xlu2 %v4786_v17 }
 0x259   : > { %4937 = vmax.xlane.f32.xlu1 %v4936_v5  ;;  %5345 = vadd.xlane.f32.xlu0 %v5344_v47  ;;  %v14046_v5 = vpop.f32.mrf.mxu3 }
 0x25b   : > { %v14038_v19 = vpop.f32.mrf.mxu2  ;;  %v14048_v47 = vpop.f32.mrf.mxu1 }
 0x25c   : > { %v4810_v17 = vsel %vm4779_vm1, %v14038_v19, -inf }
 0x25e   : > { %v14061_v60 = vpop.f32.mrf.mxu0 }
 0x260   : > { %4808 = vmax.xlane.f32.xlu2 %v4807_v37  ;;  %v4813_v37 = vsel %vm4779_vm1, %v14046_v5, -inf }
 0x261   : > { %4799 = vmax.xlane.f32.xlu1 %v4798_v50  ;;  %4949 = vmax.xlane.f32.xlu0 %v4948_v27  ;;  %v4831_v50 = vsel %vm4779_vm1, %v14048_v47, -inf  ;;  %v14054_v27 = vpop.f32.mrf.mxu3 }
 0x263   : > { %v14078_v59 = vpop.f32.mrf.mxu2 }
 0x268   : > { %4802 = vmax.xlane.f32.xlu2 %v4801_v16  ;;  %v4825_v16 = vsel %vm4779_vm1, %v14054_v27, -inf }
 0x269   : > { %4820 = vmax.xlane.f32.xlu1 %v4819_v62  ;;  %4811 = vmax.xlane.f32.xlu0 %v4810_v17  ;;  %v14115_v38 = vpop.f32.mrf.mxu3 }
 0x271   : > { %4814 = vmax.xlane.f32.xlu1 %v4813_v37  ;;  %4832 = vmax.xlane.f32.xlu0 %v4831_v50  ;;  %v19139_v50 = vld [vmem:[#allocation5_spill] sm:$0xff] }
 0x272   : > { %v2219_v4 = vmul.f32 %v19104_v43, %v19139_v50 }
 0x274   : > { %v2300_v31 = vadd.f32 %v2260_v34, %v2219_v4 }
 0x279   : > { %4826 = vmax.xlane.f32.xlu0 %v4825_v16  ;;  %v2341_v16 = vmul.f32 %v19067_v6, %v19140_v29 }
 0x294   : > { %v5274_v62 = vpop.xlane.xlu1 %5273 }
 0x29c   : > { %v4890_v17 = vpop.xlane.xlu1 %4889 }
 0x29d   : > { %v5056_v30 = vsub.f32 %v13813_v18, %v4890_v17 }
 0x29f   : > { %v5172_v40 = vmul.f32 1.442695, %v5056_v30  ;;  %v19141_v30 = vld [vmem:[#allocation33_spill] sm:$0xff] }
 0x2a0   : > { %v2223_v17 = vmul.f32 %v19104_v43, %v19141_v30 }
 0x2a1   : > { %11177 = vpow2.f32 %v5172_v40  ;;  %v2381_v40 = vadd.f32 %v2341_v16, %v2300_v31  ;;  %v14080_v31 = vpop.f32.mrf.mxu0 }
 0x2a3   : > { %v5262_v2 = vpop.xlane.xlu2 %5261  ;;  %v2422_v28 = vadd.f32 %v19100_v56, %v2381_v40 }
 0x2a4   : > { %11179 = vrcp.f32 %v5262_v2  ;;  %v5286_v37 = vpop.xlane.xlu0 %5285  ;;  %v19142_v2 = vld [vmem:[#allocation26_spill] sm:$0xff] }
 0x2a5   : > { %11181 = vrcp.f32 %v5274_v62  ;;  %v2264_v61 = vmul.f32 %v19082_v1, %v19142_v2 }
 0x2a7   : > { %v14067_v55 = vpop.eup %11177  ;;  %v2304_v0 = vadd.f32 %v2264_v61, %v2223_v17 }
 0x2a8   : > { %v5368_v18 = vsel %vm4779_vm1, %v14067_v55, 0.0 }
 0x2a9   : > { %5369 = vadd.xlane.f32.xlu1 %v5368_v18  ;;  %v19143_v18 = vld [vmem:[#allocation7_spill] sm:$0xff] }
 0x2aa   : > { %v11180_v41 = vpop.eup %11179 }
 0x2ab   : > { %v5580_v9 = vmul.f32 %v11180_v41, %v13861_v36  ;;  %v4878_v42 = vpop.xlane.xlu2 %4877  ;;  %v2345_v41 = vmul.f32 %v19067_v6, %v19143_v18  ;;  %v11182_v39 = vpop.eup %11181 }
 0x2ac   : > { %v5052_v34 = vsub.f32 %v13746_v21, %v4878_v42  ;;  %v4902_v4 = vpop.xlane.xlu0 %4901  ;;  %v4972_v21 = vsel %vm4779_vm1, %v14080_v31, -inf  ;;  %v19144_v42 = vld [vmem:[#allocation40_spill] sm:$0xff] }
 0x2ad   : > { %v5060_v16 = vsub.f32 %v13894_v14, %v4902_v4  ;;  %10910 = vmatmul.msk.f32.vlgmr.msrb.gmra.mxu0 %vm4779_vm1, %v5580_v9  ;;  %v2385_v61 = vadd.f32 %v2345_v41, %v2304_v0  ;;  %v2268_v40 = vmul.f32 %v19082_v1, %v19144_v42  ;;  %v19145_v14 = vld [vmem:[#allocation21_spill] sm:$0xff] }
 0x2ae   : > { %v5164_v62 = vmul.f32 1.442695, %v5052_v34  ;;  %5862 = vmatpush.msrb.mxu0 %v2422_v28  ;;  %v2227_v9 = vmul.f32 %v19104_v43, %v19145_v14  ;;  %v5584_v28 = vmul.f32 %v11182_v39, %v13777_v35  ;;  %v14143_v14 = vpop.f32.mrf.mxu3 }
 0x2af   : > { %v5180_v36 = vmul.f32 1.442695, %v5060_v16  ;;  %v2426_v34 = vadd.f32 %v19100_v56, %v2385_v61  ;;  %v14094_v16 = vpop.f32.mrf.mxu2 }
 0x2b0   : > { %11183 = vpow2.f32 %v5164_v62  ;;  %v2308_v4 = vadd.f32 %v2268_v40, %v2227_v9  ;;  %v14096_v62 = vpop.f32.mrf.mxu1  ;;  %v4834_v40 = vsel %vm4779_vm1, %v14094_v16, -inf }
 0x2b1   : > { %11185 = vpow2.f32 %v5180_v36  ;;  %4973 = vmax.xlane.f32.xlu1 %v4972_v21 }
 0x2b2   : > { %11187 = vrcp.f32 %v5286_v37  ;;  %v19146_v37 = vld [vmem:[#allocation32_spill] sm:$0xff] }
 0x2b3   : > { %v5298_v17 = vpop.xlane.xlu2 %5297  ;;  %v2349_v36 = vmul.f32 %v19067_v6, %v19146_v37 }
 0x2b4   : > { %v5310_v41 = vpop.xlane.xlu1 %5309  ;;  %v4785_v32 = vpop.xlane.xlu0 %4784  ;;  %11189 = vrcp.f32 %v5298_v17  ;;  %v19149_v17 = vld [vmem:[#allocation35_spill] sm:$0xff] }
 0x2b5   : > { %10914 = vmatmul.msk.f32.vlgmr.msra.gmra.mxu0 %vm4779_vm1, %v5584_v28  ;;  %v2389_v9 = vadd.f32 %v2349_v36, %v2308_v4  ;;  %v19147_v28 = vld [vmem:[#allocation43_spill] sm:$0xff]  ;;  %v14123_v36 = vpop.f32.mrf.mxu0  ;;  %11191 = vrcp.f32 %v5310_v41  ;;  %v19152_v41 = vld [vmem:[#allocation38_spill] sm:$0xff] }
 0x2b6   : > { %v14099_v0 = vpop.eup %11183  ;;  %5954 = vmatpush.msra.mxu0 %v2426_v34  ;;  %v2272_v34 = vmul.f32 %v19082_v1, %v19147_v28 }
 0x2b7   : > { %v14103_v21 = vpop.eup %11185  ;;  %v5356_v35 = vsel %vm4779_vm1, %v14099_v0, 0.0  ;;  %v2430_v23 = vadd.f32 %v19100_v56, %v2389_v9 }
 0x2b8   : > { %v11188_v39 = vpop.eup %11187  ;;  %5357 = vadd.xlane.f32.xlu2 %v5356_v35  ;;  %v5380_v61 = vsel %vm4779_vm1, %v14103_v21, 0.0  ;;  %v2312_v26 = vadd.f32 %v2272_v34, %v2231_v49  ;;  %v14121_v4 = vpop.f32.mrf.mxu1  ;;  %v4984_v49 = vsel %vm4779_vm1, %v14123_v36, -inf }
 0x2b9   : > { %5381 = vadd.xlane.f32.xlu0 %v5380_v61  ;;  %4835 = vmax.xlane.f32.xlu1 %v4834_v40  ;;  %v5588_v35 = vmul.f32 %v11188_v39, %v13868_v52  ;;  %v2353_v61 = vmul.f32 %v19067_v6, %v19149_v17  ;;  %v5021_v40 = vsub.f32 %v13939_v44, %v4785_v32  ;;  %v4960_v52 = vsel %vm4779_vm1, %v14061_v60, -inf  ;;  %v19151_v32 = vld [vmem:[#allocation45_spill] sm:$0xff] }
 0x2ba   : > { %v11190_v39 = vpop.eup %11189  ;;  %v4855_v9 = vsel %vm4779_vm1, %v14121_v4, -inf  ;;  %v2235_v44 = vmul.f32 %v19104_v43, %v19151_v32 }
 0x2bb   : > { %v14118_v53 = vpop.xlane.xlu2 %4913  ;;  %v2393_v34 = vadd.f32 %v2353_v61, %v2312_v26  ;;  %v5592_v33 = vmul.f32 %v11190_v39, %v13934_v58  ;;  %v5102_v17 = vmul.f32 1.442695, %v5021_v40  ;;  %v14145_v26 = vpop.f32.mrf.mxu2  ;;  %v2357_v61 = vmul.f32 %v19067_v6, %v19152_v41 }
 0x2bc   : > { %v5322_v45 = vpop.xlane.xlu1 %5321  ;;  %v4822_v58 = vsel %vm4779_vm1, %v14078_v59, -inf  ;;  %v11192_v40 = vpop.eup %11191  ;;  %v4846_v39 = vsel %vm4779_vm1, %v14145_v26, -inf }
 0x2bd   : > { %10918 = vmatmul.msk.f32.vlgmr.msrb.gmra.mxu0 %vm4779_vm1, %v5588_v35  ;;  %v19150_v35 = vld [vmem:[#allocation46_spill] sm:$0xff]  ;;  %v2434_v28 = vadd.f32 %v19100_v56, %v2393_v34  ;;  %11193 = vpow2.f32 %v5102_v17  ;;  %v19153_v34 = vld [vmem:[#allocation49_spill] sm:$0xff] }
 0x2be   : > { %6046 = vmatpush.msrb.mxu0 %v2430_v23  ;;  %v2276_v23 = vmul.f32 %v19082_v1, %v19150_v35  ;;  %11195 = vrcp.f32 %v5322_v45  ;;  %v19154_v17 = vld [vmem:[#allocation41_spill] sm:$0xff] }
 0x2c0   : > { %4961 = vmax.xlane.f32.xlu2 %v4960_v52  ;;  %v4797_v52 = vpop.xlane.xlu0 %4796  ;;  %v2316_v37 = vadd.f32 %v2276_v23, %v2235_v44  ;;  %v2280_v23 = vmul.f32 %v19082_v1, %v19154_v17  ;;  %v5596_v44 = vmul.f32 %v11192_v40, %v13943_v8  ;;  %v14164_v42 = vpop.f32.mrf.mxu1 }
 0x2c1   : > { %4985 = vmax.xlane.f32.xlu0 %v4984_v49  ;;  %4856 = vmax.xlane.f32.xlu1 %v4855_v9  ;;  %v4849_v49 = vsel %vm4779_vm1, %v14143_v14, -inf  ;;  %v5025_v45 = vsub.f32 %v13971_v3, %v4797_v52  ;;  %v19156_v52 = vld [vmem:[#allocation52_spill] sm:$0xff] }
 0x2c2   : > { %v2397_v9 = vadd.f32 %v2357_v61, %v2316_v37  ;;  %v5064_v37 = vsub.f32 %v13948_v63, %v14118_v53  ;;  %v4867_v63 = vsel %vm4779_vm1, %v14164_v42, -inf }
 0x2c3   : > { %v14140_v25 = vpop.xlane.xlu2 %4925  ;;  %v14162_v35 = vpop.eup %11193  ;;  %v5110_v3 = vmul.f32 1.442695, %v5025_v45 }
 0x2c4   : > { %v2438_v41 = vadd.f32 %v19100_v56, %v2397_v9  ;;  %v11196_v9 = vpop.eup %11195  ;;  %v5263_v53 = vsel %vm4779_vm1, %v14162_v35, 0.0 }
 0x2c5   : > { %10922 = vmatmul.msk.f32.vlgmr.msra.gmra.mxu0 %vm4779_vm1, %v5592_v33  ;;  %v2239_v33 = vmul.f32 %v19104_v43, %v19153_v34  ;;  %v19158_v34 = vld [vmem:[#allocation56_spill] sm:$0xff] }
 0x2c6   : > { %6138 = vmatpush.msra.mxu0 %v2434_v28  ;;  %v5334_v28 = vpop.xlane.xlu1 %5333 }
 0x2c7   : > { %v2320_v32 = vadd.f32 %v2280_v23, %v2239_v33  ;;  %v5188_v23 = vmul.f32 1.442695, %v5064_v37  ;;  %11197 = vrcp.f32 %v5334_v28  ;;  %v14189_v37 = vpop.f32.mrf.mxu3 }
 0x2c8   : > { %4823 = vmax.xlane.f32.xlu2 %v4822_v58  ;;  %v14168_v61 = vpop.xlane.xlu0 %4790 }
 0x2c9   : > { %4847 = vmax.xlane.f32.xlu0 %v4846_v39  ;;  %4850 = vmax.xlane.f32.xlu1 %v4849_v49  ;;  %v19155_v39 = vld [vmem:[#allocation10_spill] sm:$0xff]  ;;  %v4843_v49 = vsel %vm4779_vm1, %v14096_v62, -inf  ;;  %11199 = vpow2.f32 %v5188_v23  ;;  %v19159_v23 = vld [vmem:[#allocation67_spill] sm:$0xff] }
 0x2ca   : > { %v2361_v8 = vmul.f32 %v19067_v6, %v19155_v39  ;;  %v19157_v39 = vld [vmem:[#allocation44_spill] sm:$0xff]  ;;  %11201 = vpow2.f32 %v5110_v3  ;;  %v2288_v3 = vmul.f32 %v19082_v1, %v19159_v23 }
 0x2cb   : > { %v4788_v58 = vpop.xlane.xlu2 %4787  ;;  %v2284_v17 = vmul.f32 %v19082_v1, %v19157_v39 }
 0x2cc   : > { %v5022_v40 = vsub.f32 %v14012_v54, %v4788_v58  ;;  %v2401_v33 = vadd.f32 %v2361_v8, %v2320_v32  ;;  %v2243_v54 = vmul.f32 %v19104_v43, %v19156_v52  ;;  %v2365_v32 = vmul.f32 %v19067_v6, %v19158_v34  ;;  %v14191_v8 = vpop.f32.mrf.mxu2  ;;  %v19173_v52 = vld [vmem:[#allocation19_spill] sm:$0xff] }
 0x2cd   : > { %10926 = vmatmul.msk.f32.vlgmr.msrb.gmra.mxu0 %vm4779_vm1, %v5596_v44 }
 0x2ce   : > { %6230 = vmatpush.msrb.mxu0 %v2438_v41  ;;  %v5600_v41 = vmul.f32 %v11196_v9, %v13969_v13  ;;  %v5104_v44 = vmul.f32 1.442695, %v5022_v40  ;;  %v4938_v58 = vpop.xlane.xlu1 %4937  ;;  %v2324_v13 = vadd.f32 %v2284_v17, %v2243_v54  ;;  %v4837_v40 = vsel %vm4779_vm1, %v14115_v38, -inf  ;;  %v11198_v9 = vpop.eup %11197 }
 0x2cf   : > { %v5072_v45 = vsub.f32 %v14010_v46, %v4938_v58  ;;  %v19160_v46 = vld [vmem:[#allocation47_spill] sm:$0xff] }
 0x2d0   : > { %4844 = vmax.xlane.f32.xlu2 %v4843_v49  ;;  %v2442_v49 = vadd.f32 %v19100_v56, %v2401_v33  ;;  %11203 = vpow2.f32 %v5104_v44  ;;  %v5346_v28 = vpop.xlane.xlu0 %5345  ;;  %v2405_v33 = vadd.f32 %v2365_v32, %v2324_v13  ;;  %v2247_v54 = vmul.f32 %v19104_v43, %v19160_v46  ;;  %v19161_v13 = vld [vmem:[#allocation60_spill] sm:$0xff] }
 0x2d1   : > { %5264 = vadd.xlane.f32.xlu0 %v5263_v53  ;;  %4868 = vmax.xlane.f32.xlu1 %v4867_v63  ;;  %v4858_v53 = vsel %vm4779_vm1, %v14191_v8, -inf  ;;  %v4861_v63 = vsel %vm4779_vm1, %v14189_v37, -inf  ;;  %11205 = vrcp.f32 %v5346_v28  ;;  %v5604_v44 = vmul.f32 %v11198_v9, %v13997_v7 }
 0x2d2   : > { %v5204_v58 = vmul.f32 1.442695, %v5072_v45  ;;  %v2328_v32 = vadd.f32 %v2288_v3, %v2247_v54  ;;  %v2369_v23 = vmul.f32 %v19067_v6, %v19161_v13  ;;  %v5068_v28 = vsub.f32 %v13991_v57, %v14140_v25 }
 0x2d3   : > { %v4809_v17 = vpop.xlane.xlu2 %4808 }
 0x2d4   : > { %11207 = vpow2.f32 %v5204_v58  ;;  %v5029_v7 = vsub.f32 %v14024_v48, %v4809_v17  ;;  %v2409_v54 = vadd.f32 %v2369_v23, %v2328_v32  ;;  %v5196_v25 = vmul.f32 1.442695, %v5068_v28  ;;  %v14228_v17 = vpop.f32.mrf.mxu0 }
 0x2d5   : > { %10930 = vmatmul.msk.f32.vlgmr.msra.gmra.mxu0 %vm4779_vm1, %v5600_v41  ;;  %v14205_v41 = vpop.eup %11199 }
 0x2d6   : > { %6322 = vmatpush.msra.mxu0 %v2442_v49  ;;  %v14208_v49 = vpop.eup %11201  ;;  %v5392_v45 = vsel %vm4779_vm1, %v14205_v41, 0.0  ;;  %v5118_v48 = vmul.f32 1.442695, %v5029_v7  ;;  %v2450_v58 = vadd.f32 %v19100_v56, %v2409_v54  ;;  %11209 = vpow2.f32 %v5196_v25 }
 0x2d7   : > { %v5023_v25 = vsub.f32 %v13999_v12, %v14168_v61  ;;  %v14263_v12 = vpop.f32.mrf.mxu2 }
 0x2d8   : > { %4838 = vmax.xlane.f32.xlu2 %v4837_v40  ;;  %v2446_v40 = vadd.f32 %v19100_v56, %v2405_v33  ;;  %v5275_v33 = vsel %vm4779_vm1, %v14208_v49, 0.0  ;;  %11211 = vpow2.f32 %v5118_v48  ;;  %v4950_v7 = vpop.xlane.xlu0 %4949  ;;  %19163 = vst [vmem:[#allocation121_spill] sm:$0xff] %v14263_v12 }
 0x2d9   : > { %4859 = vmax.xlane.f32.xlu0 %v4858_v53  ;;  %4862 = vmax.xlane.f32.xlu1 %v4861_v63  ;;  %v14213_v53 = vpop.eup %11203  ;;  %v14221_v63 = vpop.xlane.xlu1 %4799 }
 0x2da   : > { %v11206_v9 = vpop.eup %11205  ;;  %v5266_v3 = vsel %vm4779_vm1, %v14213_v53, 0.0 }
 0x2db   : > { %v5608_v57 = vmul.f32 %v11206_v9, %v14014_v24  ;;  %v4996_v24 = vsel %vm4779_vm1, %v14228_v17, -inf }
 0x2dd   : > { %10934 = vmatmul.msk.f32.vlgmr.msrb.gmra.mxu0 %vm4779_vm1, %v5604_v44  ;;  %v4803_v44 = vpop.xlane.xlu2 %4802 }
 0x2de   : > { %6414 = vmatpush.msrb.mxu0 %v2446_v40  ;;  %v14231_v40 = vpop.eup %11207  ;;  %v5027_v23 = vsub.f32 %v14034_v51, %v4803_v44  ;;  %v14249_v51 = vpop.f32.mrf.mxu3 }
 0x2df   : > { %v5416_v28 = vsel %vm4779_vm1, %v14231_v40, 0.0  ;;  %v4873_v48 = vsel %vm4779_vm1, %v14249_v51, -inf }
 0x2e0   : > { %5393 = vadd.xlane.f32.xlu2 %v5392_v45  ;;  %v14233_v45 = vpop.f32.mrf.mxu1 }
 0x2e1   : > { %5276 = vadd.xlane.f32.xlu0 %v5275_v33  ;;  %5267 = vadd.xlane.f32.xlu1 %v5266_v3  ;;  %v4879_v32 = vsel %vm4779_vm1, %v14233_v45, -inf  ;;  %v14243_v9 = vpop.xlane.xlu1 %4820  ;;  %v5114_v33 = vmul.f32 1.442695, %v5027_v23  ;;  %v14245_v3 = vpop.eup %11209 }
 0x2e2   : > { %v14247_v54 = vpop.eup %11211  ;;  %v4812_v23 = vpop.xlane.xlu0 %4811 }
 0x2e3   : > { %11213 = vpow2.f32 %v5114_v33  ;;  %v5287_v44 = vsel %vm4779_vm1, %v14247_v54, 0.0  ;;  %v5030_v33 = vsub.f32 %v14038_v19, %v4812_v23  ;;  %v14279_v19 = vpop.f32.mrf.mxu2 }
 0x2e5   : > { %10938 = vmatmul.msk.f32.vlgmr.msra.gmra.mxu0 %vm4779_vm1, %v5608_v57  ;;  %v5404_v57 = vsel %vm4779_vm1, %v14245_v3, 0.0  ;;  %v5120_v13 = vmul.f32 1.442695, %v5030_v33 }
 0x2e6   : > { %6506 = vmatpush.msra.mxu0 %v2450_v58  ;;  %v5106_v58 = vmul.f32 1.442695, %v5023_v25 }
 0x2e8   : > { %4997 = vmax.xlane.f32.xlu2 %v4996_v24  ;;  %v14259_v24 = vpop.f32.mrf.mxu0  ;;  %v14265_v61 = vpop.f32.mrf.mxu1  ;;  %11215 = vpow2.f32 %v5106_v58 }
 0x2e9   : > { %4880 = vmax.xlane.f32.xlu0 %v4879_v32  ;;  %5417 = vadd.xlane.f32.xlu1 %v5416_v28  ;;  %v4815_v32 = vpop.xlane.xlu1 %4814  ;;  %v14261_v28 = vpop.eup %11213  ;;  %11217 = vpow2.f32 %v5120_v13 }
 0x2ea   : > { %19162 = vst [vmem:[#allocation120_spill] sm:$0xff] %v14261_v28  ;;  %v5281_v25 = vsel %vm4779_vm1, %v14261_v28, 0.0  ;;  %v14277_v58 = vpop.f32.mrf.mxu3 }
 0x2eb   : > { %19165 = vst [vmem:[#allocation130_spill] sm:$0xff] %v14277_v58  ;;  %v4885_v33 = vsel %vm4779_vm1, %v14277_v58, -inf }
 0x2ee   : > { %v14275_v34 = vpop.eup %11215 }
 0x2ef   : > { %19164 = vst [vmem:[#allocation124_spill] sm:$0xff] %v14275_v34  ;;  %v5269_v23 = vsel %vm4779_vm1, %v14275_v34, 0.0 }
 0x2f0   : > { %5405 = vadd.xlane.f32.xlu2 %v5404_v57  ;;  %v5031_v57 = vsub.f32 %v14046_v5, %v4815_v32  ;;  %v5026_v5 = vsub.f32 %v14022_v22, %v14221_v63  ;;  %v4882_v32 = vsel %vm4779_vm1, %v14279_v19, -inf  ;;  %v5076_v22 = vsub.f32 %v14026_v11, %v4950_v7 }
 0x2f1   : > { %4874 = vmax.xlane.f32.xlu0 %v4873_v48  ;;  %5288 = vadd.xlane.f32.xlu1 %v5287_v44  ;;  %v5008_v48 = vsel %vm4779_vm1, %v14259_v24, -inf  ;;  %v4891_v44 = vsel %vm4779_vm1, %v14265_v61, -inf  ;;  %v5033_v11 = vsub.f32 %v14036_v10, %v14243_v9 }
 0x2f2   : > { %v5122_v46 = vmul.f32 1.442695, %v5031_v57  ;;  %v5112_v57 = vmul.f32 1.442695, %v5026_v5 }
 0x2f4   : > { %11219 = vpow2.f32 %v5122_v46  ;;  %v4870_v46 = vsel %vm4779_vm1, %v14263_v12, -inf }
 0x2f5   : > { %11221 = vpow2.f32 %v5112_v57 }
 0x2f8   : > { %5009 = vmax.xlane.f32.xlu2 %v5008_v48  ;;  %v14289_v48 = vpop.eup %11217 }
 0x2f9   : > { %5282 = vadd.xlane.f32.xlu0 %v5281_v25  ;;  %4892 = vmax.xlane.f32.xlu1 %v4891_v44  ;;  %19166 = vst [vmem:[#allocation138_spill] sm:$0xff] %v14289_v48  ;;  %v5290_v13 = vsel %vm4779_vm1, %v14289_v48, 0.0  ;;  %v5212_v44 = vmul.f32 1.442695, %v5076_v22 }
 0x2fa   : > { %v14291_v25 = vpop.eup %11219 }
 0x2fb   : > { %19167 = vst [vmem:[#allocation140_spill] sm:$0xff] %v14291_v25  ;;  %v5293_v63 = vsel %vm4779_vm1, %v14291_v25, 0.0  ;;  %v14300_v5 = vpop.eup %11221  ;;  %11223 = vpow2.f32 %v5212_v44  ;;  %v14318_v44 = vpop.f32.mrf.mxu1 }
 0x2fc   : > { %19168 = vst [vmem:[#allocation142_spill] sm:$0xff] %v14300_v5  ;;  %v5278_v7 = vsel %vm4779_vm1, %v14300_v5, 0.0  ;;  %v14344_v5 = vpop.f32.mrf.mxu3 }
 0x2fd   : > { %19172 = vst [vmem:[#allocation102_spill] sm:$0xff] %v14318_v44 }
 0x2fe   : > { %19175 = vst [vmem:[#allocation145_spill] sm:$0xff] %v14344_v5 }
 0x300   : > { %5270 = vadd.xlane.f32.xlu2 %v5269_v23  ;;  %v14302_v23 = vpop.f32.mrf.mxu2 }
 0x301   : > { %4883 = vmax.xlane.f32.xlu0 %v4882_v32  ;;  %4886 = vmax.xlane.f32.xlu1 %v4885_v33  ;;  %19169 = vst [vmem:[#allocation139_spill] sm:$0xff] %v14302_v23  ;;  %v4894_v32 = vsel %vm4779_vm1, %v14302_v23, -inf  ;;  %v5126_v33 = vmul.f32 1.442695, %v5033_v11  ;;  %v14310_v57 = vpop.eup %11223 }
 0x302   : > { %19170 = vst [vmem:[#allocation125_spill] sm:$0xff] %v14310_v57  ;;  %v5428_v22 = vsel %vm4779_vm1, %v14310_v57, 0.0 }
 0x303   : > { %11225 = vpow2.f32 %v5126_v33 }
 0x308   : > { %4871 = vmax.xlane.f32.xlu2 %v4870_v46  ;;  %v4833_v46 = vpop.xlane.xlu0 %4832 }
 0x309   : > { %5291 = vadd.xlane.f32.xlu0 %v5290_v13  ;;  %5294 = vadd.xlane.f32.xlu1 %v5293_v63  ;;  %v14314_v13 = vpop.eup %11225 }
 0x30a   : > { %19171 = vst [vmem:[#allocation133_spill] sm:$0xff] %v14314_v13  ;;  %v5299_v9 = vsel %vm4779_vm1, %v14314_v13, 0.0 }
 0x310   : > { %5279 = vadd.xlane.f32.xlu2 %v5278_v7  ;;  %v4827_v63 = vpop.xlane.xlu0 %4826 }
 0x311   : > { %4895 = vmax.xlane.f32.xlu1 %v4894_v32  ;;  %v5035_v11 = vsub.f32 %v14054_v27, %v4827_v63  ;;  %v11647_v32 = vld [vmem:[%s18309_s2] sm:$0x7f] }
 0x312   : > { %v14326_v33 = vperm.slane %v11647_v32, 6  ;;  %v19174_v27 = vld [vmem:[#allocation30_spill] sm:$0xff]  ;;  %v11649_v32 = vld [vmem:[%s18309_s2 + $0x10] sm:$0x7f] }
 0x313   : > { %v5130_v57 = vmul.f32 1.442695, %v5035_v11  ;;  %v14342_v48 = vperm.slane %v11649_v32, 6  ;;  %v4897_v11 = vsel %vm4779_vm1, %v14344_v5, -inf  ;;  %v11650_v32 = vld [vmem:[%s18310_s3] sm:$0x7f] }
 0x314   : > { %v2455_v13 = vmul.f32 %v14326_v33, %v19173_v52  ;;  %v19176_v52 = vld [vmem:[#allocation20_spill] sm:$0xff]  ;;  %v14355_v23 = vperm.slane %v11650_v32, 6 }
 0x315   : > { %v2577_v58 = vmul.f32 %v14342_v48, %v19176_v52 }
 0x318   : > { %5429 = vadd.xlane.f32.xlu2 %v5428_v22  ;;  %v11648_v22 = vld [vmem:[%s18309_s2 + $0x8] sm:$0x7f] }
 0x319   : > { %v14331_v39 = vperm.slane %v11648_v22, 6 }
 0x31b   : > { %v2496_v63 = vmul.f32 %v14331_v39, %v19174_v27 }
 0x31c   : > { %v5370_v10 = vpop.xlane.xlu1 %5369 }
 0x320   : > { %5300 = vadd.xlane.f32.xlu2 %v5299_v9  ;;  %v4903_v9 = vsel %vm4779_vm1, %v14318_v44, -inf }
 0x324   : > { %v14320_v7 = vpop.xlane.xlu1 %4973 }
 0x328   : > { %4904 = vmax.xlane.f32.xlu2 %v4903_v9  ;;  %v2536_v9 = vadd.f32 %v2496_v63, %v2455_v13 }
 0x32a   : > { %v2617_v27 = vadd.f32 %v2577_v58, %v2536_v9 }
 0x32b   : > { %v5358_v22 = vpop.xlane.xlu2 %5357 }
 0x32c   : > { %11227 = vrcp.f32 %v5358_v22  ;;  %v5382_v25 = vpop.xlane.xlu0 %5381  ;;  %v14346_v44 = vpop.xlane.xlu1 %4835  ;;  %v19177_v22 = vld [vmem:[#allocation62_spill] sm:$0xff] }
 0x32d   : > { %11229 = vpow2.f32 %v5130_v57  ;;  %v2500_v28 = vmul.f32 %v14331_v39, %v19177_v22  ;;  %v19178_v57 = vld [vmem:[#allocation3_spill] sm:$0xff] }
 0x32e   : > { %11231 = vrcp.f32 %v5370_v10  ;;  %v2459_v13 = vmul.f32 %v14326_v33, %v19178_v57  ;;  %v5037_v10 = vsub.f32 %v14048_v47, %v4833_v46  ;;  %v19179_v57 = vld [vmem:[#allocation34_spill] sm:$0xff] }
 0x330   : > { %4898 = vmax.xlane.f32.xlu2 %v4897_v11  ;;  %v2658_v11 = vadd.f32 %v14355_v23, %v2617_v27  ;;  %v2540_v34 = vadd.f32 %v2500_v28, %v2459_v13  ;;  %v5134_v27 = vmul.f32 1.442695, %v5037_v10  ;;  %v2504_v28 = vmul.f32 %v14331_v39, %v19138_v20  ;;  %v14378_v13 = vpop.f32.mrf.mxu3 }
 0x332   : > { %v11228_v12 = vpop.eup %11227 }
 0x333   : > { %v5612_v63 = vmul.f32 %v11228_v12, %v14099_v0  ;;  %v4962_v52 = vpop.xlane.xlu2 %4961  ;;  %v14362_v5 = vpop.eup %11229  ;;  %v2581_v0 = vmul.f32 %v14342_v48, %v19179_v57 }
 0x334   : > { %v5080_v58 = vsub.f32 %v14061_v60, %v4962_v52  ;;  %v14365_v9 = vpop.xlane.xlu0 %4985  ;;  %v14368_v32 = vpop.xlane.xlu1 %4856  ;;  %v5305_v12 = vsel %vm4779_vm1, %v14362_v5, 0.0 }
 0x335   : > { %10942 = vmatmul.msk.f32.vlgmr.msrb.gmra.mxu0 %vm4779_vm1, %v5612_v63  ;;  %v11232_v60 = vpop.eup %11231  ;;  %v2621_v52 = vadd.f32 %v2581_v0, %v2540_v34  ;;  %v2463_v34 = vmul.f32 %v14326_v33, %v19139_v50 }
 0x336   : > { %v5220_v22 = vmul.f32 1.442695, %v5080_v58  ;;  %6598 = vmatpush.msrb.mxu0 %v2658_v11  ;;  %v5616_v47 = vmul.f32 %v11232_v60, %v14067_v55  ;;  %v5084_v55 = vsub.f32 %v14080_v31, %v14320_v7 }
 0x337   : > { %v2662_v11 = vadd.f32 %v14355_v23, %v2621_v52  ;;  %v2544_v10 = vadd.f32 %v2504_v28, %v2463_v34 }
 0x338   : > { %11233 = vpow2.f32 %v5220_v22  ;;  %5306 = vadd.xlane.f32.xlu2 %v5305_v12  ;;  %v4909_v12 = vsel %vm4779_vm1, %v14378_v13, -inf }
 0x339   : > { %11235 = vrcp.f32 %v5382_v25  ;;  %v2585_v25 = vmul.f32 %v14342_v48, %v19140_v29 }
 0x33a   : > { %11237 = vpow2.f32 %v5134_v27  ;;  %v2261_v27 = vmul.f32 %v19082_v1, %v19027_v15 }
 0x33b   : > { %v4824_v46 = vpop.xlane.xlu2 %4823  ;;  %v2625_v52 = vadd.f32 %v2585_v25, %v2544_v10  ;;  %v5038_v25 = vsub.f32 %v14094_v16, %v14346_v44 }
 0x33c   : > { %v5034_v63 = vsub.f32 %v14078_v59, %v4824_v46  ;;  %v4848_v58 = vpop.xlane.xlu0 %4847  ;;  %v14383_v57 = vpop.xlane.xlu1 %4850  ;;  %v19180_v46 = vld [vmem:[#allocation29_spill] sm:$0xff] }
 0x33d   : > { %10946 = vmatmul.msk.f32.vlgmr.msra.gmra.mxu0 %vm4779_vm1, %v5616_v47  ;;  %v5228_v47 = vmul.f32 1.442695, %v5084_v55  ;;  %v2220_v28 = vmul.f32 %v19104_v43, %v19180_v46  ;;  %v2666_v34 = vadd.f32 %v14355_v23, %v2625_v52  ;;  %v5136_v16 = vmul.f32 1.442695, %v5038_v25 }
 0x33e   : > { %v14390_v22 = vpop.eup %11233  ;;  %v5128_v59 = vmul.f32 1.442695, %v5034_v63  ;;  %6690 = vmatpush.msra.mxu0 %v2662_v11  ;;  %v5088_v52 = vsub.f32 %v14123_v36, %v14365_v9 }
 0x33f   : > { %v5440_v0 = vsel %vm4779_vm1, %v14390_v22, 0.0  ;;  %v11236_v60 = vpop.eup %11235  ;;  %v2301_v55 = vadd.f32 %v2261_v27, %v2220_v28 }
 0x340   : > { %11239 = vpow2.f32 %v5128_v59  ;;  %5441 = vadd.xlane.f32.xlu0 %v5440_v0  ;;  %4910 = vmax.xlane.f32.xlu2 %v4909_v12  ;;  %v5620_v31 = vmul.f32 %v11236_v60, %v14103_v21  ;;  %v14403_v63 = vpop.eup %11237  ;;  %v19181_v12 = vld [vmem:[#allocation76_spill] sm:$0xff]  ;;  %v5236_v9 = vmul.f32 1.442695, %v5088_v52  ;;  %v19183_v52 = vld [vmem:[#allocation18_spill] sm:$0xff] }
 0x341   : > { %v5311_v10 = vsel %vm4779_vm1, %v14403_v63, 0.0  ;;  %v2342_v60 = vmul.f32 %v19067_v6, %v19181_v12 }
 0x343   : > { %v4845_v7 = vpop.xlane.xlu2 %4844  ;;  %v2382_v44 = vadd.f32 %v2342_v60, %v2301_v55 }
 0x344   : > { %v5265_v11 = vpop.xlane.xlu0 %5264  ;;  %v14406_v29 = vpop.xlane.xlu1 %4868  ;;  %v5041_v21 = vsub.f32 %v14096_v62, %v4845_v7 }
 0x345   : > { %11241 = vrcp.f32 %v5265_v11  ;;  %10950 = vmatmul.msk.f32.vlgmr.msrb.gmra.mxu0 %vm4779_vm1, %v5620_v31  ;;  %v14422_v62 = vpop.f32.mrf.mxu2  ;;  %v5042_v31 = vsub.f32 %v14145_v26, %v4848_v58  ;;  %v2423_v36 = vadd.f32 %v19100_v56, %v2382_v44  ;;  %v5045_v26 = vsub.f32 %v14121_v4, %v14368_v32 }
 0x346   : > { %v14411_v59 = vpop.eup %11239  ;;  %11243 = vpow2.f32 %v5228_v47  ;;  %6782 = vmatpush.msrb.mxu0 %v2666_v34  ;;  %v5142_v27 = vmul.f32 1.442695, %v5041_v21  ;;  %v2467_v21 = vmul.f32 %v14326_v33, %v19141_v30  ;;  %v2508_v4 = vmul.f32 %v14331_v39, %v19142_v2 }
 0x347   : > { %v5302_v0 = vsel %vm4779_vm1, %v14411_v59, 0.0  ;;  %11245 = vpow2.f32 %v5136_v16  ;;  %v5144_v58 = vmul.f32 1.442695, %v5042_v31  ;;  %v5150_v16 = vmul.f32 1.442695, %v5045_v26  ;;  %v19185_v26 = vld [vmem:[#allocation17_spill] sm:$0xff] }
 0x348   : > { %5312 = vadd.xlane.f32.xlu0 %v5311_v10  ;;  %5303 = vadd.xlane.f32.xlu1 %v5302_v0  ;;  %11247 = vpow2.f32 %v5142_v27  ;;  %v19182_v0 = vld [vmem:[#allocation81_spill] sm:$0xff]  ;;  %v2224_v27 = vmul.f32 %v19104_v43, %v19183_v52 }
 0x349   : > { %v2265_v60 = vmul.f32 %v19082_v1, %v19182_v0 }
 0x34b   : > { %v11242_v47 = vpop.eup %11241  ;;  %v4839_v7 = vpop.xlane.xlu2 %4838 }
 0x34c   : > { %v14425_v28 = vpop.eup %11243  ;;  %v5581_v11 = vmul.f32 %v11242_v47, %v14162_v35  ;;  %v5039_v34 = vsub.f32 %v14115_v38, %v4839_v7  ;;  %v14429_v10 = vpop.xlane.xlu0 %4859  ;;  %v4906_v38 = vsel %vm4779_vm1, %v14422_v62, -inf }
 0x34d   : > { %v14431_v25 = vpop.xlane.xlu1 %4862  ;;  %v5452_v35 = vsel %vm4779_vm1, %v14425_v28, 0.0  ;;  %v14447_v32 = vpop.eup %11245 }
 0x34e   : > { %v5138_v55 = vmul.f32 1.442695, %v5039_v34  ;;  %10911 = vmatmul.msk.f32.vlgmr.msra.gmra.mxu1 %vm4779_vm1, %v5581_v11  ;;  %v14451_v47 = vpop.eup %11247  ;;  %v2548_v11 = vadd.f32 %v2508_v4, %v2467_v21  ;;  %v19184_v34 = vld [vmem:[#allocation70_spill] sm:$0xff]  ;;  %v19187_v4 = vld [vmem:[#allocation79_spill] sm:$0xff] }
 0x34f   : > { %5885 = vmatpush.msra.mxu1 %v2423_v36  ;;  %v2262_v36 = vmul.f32 %v19082_v1, %v19184_v34  ;;  %v2343_v2 = vmul.f32 %v19067_v6, %v19187_v4 }
 0x350   : > { %11249 = vpow2.f32 %v5138_v55  ;;  %4907 = vmax.xlane.f32.xlu1 %v4906_v38  ;;  %5453 = vadd.xlane.f32.xlu0 %v5452_v35  ;;  %v2589_v55 = vmul.f32 %v14342_v48, %v19143_v18  ;;  %v5049_v35 = vsub.f32 %v14164_v42, %v14406_v29  ;;  %v5314_v29 = vsel %vm4779_vm1, %v14447_v32, 0.0 }
 0x351   : > { %11251 = vpow2.f32 %v5236_v9  ;;  %v2305_v9 = vadd.f32 %v2265_v60, %v2224_v27  ;;  %v5043_v60 = vsub.f32 %v14143_v14, %v14383_v57 }
 0x352   : > { %11253 = vpow2.f32 %v5144_v58  ;;  %v2221_v58 = vmul.f32 %v19104_v43, %v19185_v26  ;;  %v2629_v42 = vadd.f32 %v2589_v55, %v2548_v11  ;;  %v5158_v57 = vmul.f32 1.442695, %v5049_v35 }
 0x353   : > { %v5394_v44 = vpop.xlane.xlu2 %5393 }
 0x354   : > { %11255 = vrcp.f32 %v5394_v44  ;;  %v5277_v31 = vpop.xlane.xlu0 %5276  ;;  %v19186_v44 = vld [vmem:[#allocation27_spill] sm:$0xff]  ;;  %v2670_v11 = vadd.f32 %v14355_v23, %v2629_v42 }
 0x355   : > { %v5268_v7 = vpop.xlane.xlu1 %5267  ;;  %11257 = vrcp.f32 %v5277_v31  ;;  %v2346_v21 = vmul.f32 %v19067_v6, %v19186_v44  ;;  %v5323_v31 = vsel %vm4779_vm1, %v14451_v47, 0.0  ;;  %v5146_v44 = vmul.f32 1.442695, %v5043_v60 }
 0x356   : > { %v14459_v38 = vpop.eup %11249  ;;  %11259 = vrcp.f32 %v5268_v7  ;;  %v2302_v7 = vadd.f32 %v2262_v36, %v2221_v58 }
 0x357   : > { %11261 = vpow2.f32 %v5150_v16  ;;  %v5317_v27 = vsel %vm4779_vm1, %v14459_v38, 0.0  ;;  %v14473_v18 = vpop.eup %11251  ;;  %v2386_v16 = vadd.f32 %v2346_v21, %v2305_v9 }
 0x358   : > { %5318 = vadd.xlane.f32.xlu2 %v5317_v27  ;;  %5324 = vadd.xlane.f32.xlu0 %v5323_v31  ;;  %v14477_v30 = vpop.eup %11253  ;;  %v2383_v50 = vadd.f32 %v2343_v2, %v2302_v7  ;;  %11263 = vpow2.f32 %v5158_v57 }
 0x359   : > { %5315 = vadd.xlane.f32.xlu1 %v5314_v29  ;;  %v2427_v2 = vadd.f32 %v19100_v56, %v2386_v16  ;;  %11265 = vpow2.f32 %v5146_v44 }
 0x35a   : > { %v11256_v14 = vpop.eup %11255 }
 0x35b   : > { %v11258_v20 = vpop.eup %11257  ;;  %v5624_v52 = vmul.f32 %v11256_v14, %v14205_v41  ;;  %v4998_v0 = vpop.xlane.xlu2 %4997  ;;  %v5046_v41 = vsub.f32 %v14191_v8, %v14429_v10  ;;  %v5464_v8 = vsel %vm4779_vm1, %v14473_v18, 0.0 }
 0x35c   : > { %v11260_v4 = vpop.eup %11259  ;;  %v5585_v27 = vmul.f32 %v11258_v20, %v14208_v49  ;;  %v5092_v31 = vsub.f32 %v14228_v17, %v4998_v0  ;;  %v4881_v26 = vpop.xlane.xlu0 %4880  ;;  %v2424_v20 = vadd.f32 %v19100_v56, %v2383_v50  ;;  %v5047_v49 = vsub.f32 %v14189_v37, %v14431_v25  ;;  %v19188_v50 = vld [vmem:[#allocation40_spill] sm:$0xff] }
 0x35d   : > { %v5418_v36 = vpop.xlane.xlu1 %5417  ;;  %v14483_v55 = vpop.eup %11261  ;;  %v5582_v9 = vmul.f32 %v11260_v4, %v14213_v53  ;;  %10954 = vmatmul.msk.f32.vlgmr.msra.gmra.mxu0 %vm4779_vm1, %v5624_v52  ;;  %v5326_v53 = vsel %vm4779_vm1, %v14477_v30, 0.0  ;;  %v2512_v10 = vmul.f32 %v14331_v39, %v19188_v50  ;;  %v19189_v37 = vld [vmem:[#allocation84_spill] sm:$0xff]  ;;  %v5152_v0 = vmul.f32 1.442695, %v5046_v41  ;;  %v19190_v52 = vld [vmem:[#allocation21_spill] sm:$0xff]  ;;  %v19194_v41 = vld [vmem:[#allocation43_spill] sm:$0xff] }
 0x35e   : > { %v5244_v58 = vmul.f32 1.442695, %v5092_v31  ;;  %10915 = vmatmul.msk.f32.vlgmr.msrb.gmra.mxu1 %vm4779_vm1, %v5585_v27  ;;  %6874 = vmatpush.msra.mxu0 %v2670_v11  ;;  %v5335_v17 = vsel %vm4779_vm1, %v14483_v55, 0.0  ;;  %v2269_v25 = vmul.f32 %v19082_v1, %v19189_v37  ;;  %v2471_v35 = vmul.f32 %v14326_v33, %v19190_v52  ;;  %v19191_v4 = vld [vmem:[#allocation12_spill] sm:$0xff]  ;;  %v14509_v29 = vpop.eup %11263  ;;  %v19213_v37 = vld [vmem:[#allocation31_spill] sm:$0xff] }
 0x35f   : > { %5977 = vmatpush.msrb.mxu1 %v2427_v2  ;;  %10912 = vmatmul.msk.f32.vlgmr.msra.gmra.mxu2 %vm4779_vm1, %v5582_v9  ;;  %v5154_v44 = vmul.f32 1.442695, %v5047_v49  ;;  %v2228_v60 = vmul.f32 %v19104_v43, %v19191_v4  ;;  %v14511_v14 = vpop.eup %11265  ;;  %v19192_v31 = vld [vmem:[#allocation32_spill] sm:$0xff]  ;;  %v19193_v9 = vld [vmem:[#allocation59_spill] sm:$0xff] }
 0x360   : > { %11267 = vpow2.f32 %v5244_v58  ;;  %5908 = vmatpush.msra.mxu2 %v2424_v20  ;;  %5327 = vadd.xlane.f32.xlu2 %v5326_v53  ;;  %v2552_v16 = vadd.f32 %v2512_v10, %v2471_v35  ;;  %v2593_v11 = vmul.f32 %v14342_v48, %v19192_v31  ;;  %v2350_v2 = vmul.f32 %v19067_v6, %v19193_v9  ;;  %v19212_v9 = vld [vmem:[#allocation130_spill] sm:$0xff] }
 0x361   : > { %5465 = vadd.xlane.f32.xlu0 %v5464_v8  ;;  %5336 = vadd.xlane.f32.xlu1 %v5335_v17  ;;  %v2309_v57 = vadd.f32 %v2269_v25, %v2228_v60  ;;  %v2516_v58 = vmul.f32 %v14331_v39, %v19194_v41  ;;  %v5053_v20 = vsub.f32 %v14233_v45, %v4881_v26  ;;  %v5347_v53 = vsel %vm4779_vm1, %v14509_v29, 0.0  ;;  %v19195_v25 = vld [vmem:[#allocation15_spill] sm:$0xff]  ;;  %v14530_v26 = vpop.f32.mrf.mxu1 }
 0x362   : > { %v5329_v8 = vsel %vm4779_vm1, %v14511_v14, 0.0  ;;  %v2633_v17 = vadd.f32 %v2593_v11, %v2552_v16 }
 0x363   : > { %v5406_v21 = vpop.xlane.xlu2 %5405  ;;  %v2390_v10 = vadd.f32 %v2350_v2, %v2309_v57 }
 0x364   : > { %11269 = vrcp.f32 %v5406_v21  ;;  %v4875_v42 = vpop.xlane.xlu0 %4874  ;;  %v2674_v2 = vadd.f32 %v14355_v23, %v2633_v17 }
 0x365   : > { %v5289_v7 = vpop.xlane.xlu1 %5288 }
 0x366   : > { %11271 = vrcp.f32 %v5289_v7  ;;  %v14513_v27 = vpop.eup %11267 }
 0x367   : > { %11273 = vpow2.f32 %v5152_v0  ;;  %v5476_v49 = vsel %vm4779_vm1, %v14513_v27, 0.0  ;;  %v2475_v0 = vmul.f32 %v14326_v33, %v19195_v25 }
 0x368   : > { %11275 = vpow2.f32 %v5154_v44  ;;  %5348 = vadd.xlane.f32.xlu2 %v5347_v53  ;;  %v5166_v44 = vmul.f32 1.442695, %v5053_v20  ;;  %v19196_v20 = vld [vmem:[#allocation35_spill] sm:$0xff] }
 0x369   : > { %5477 = vadd.xlane.f32.xlu1 %v5476_v49  ;;  %5330 = vadd.xlane.f32.xlu0 %v5329_v8  ;;  %11277 = vrcp.f32 %v5418_v36  ;;  %v2556_v7 = vadd.f32 %v2516_v58, %v2475_v0  ;;  %v2431_v36 = vadd.f32 %v19100_v56, %v2390_v10 }
 0x36a   : > { %v11270_v35 = vpop.eup %11269  ;;  %11279 = vpow2.f32 %v5166_v44 }
 0x36b   : > { %v5628_v21 = vmul.f32 %v11270_v35, %v14245_v3  ;;  %v5010_v60 = vpop.xlane.xlu2 %5009  ;;  %v2597_v3 = vmul.f32 %v14342_v48, %v19196_v20  ;;  %v19197_v35 = vld [vmem:[#allocation80_spill] sm:$0xff]  ;;  %v19203_v20 = vld [vmem:[#allocation121_spill] sm:$0xff] }
 0x36c   : > { %v11272_v45 = vpop.eup %11271  ;;  %v5096_v11 = vsub.f32 %v14259_v24, %v5010_v60  ;;  %v5283_v57 = vpop.xlane.xlu0 %5282  ;;  %v4915_v24 = vsel %vm4779_vm1, %v14530_v26, -inf }
 0x36d   : > { %v14533_v41 = vpop.eup %11273  ;;  %v5589_v16 = vmul.f32 %v11272_v45, %v14247_v54  ;;  %v4893_v49 = vpop.xlane.xlu1 %4892  ;;  %10958 = vmatmul.msk.f32.vlgmr.msrb.gmra.mxu0 %vm4779_vm1, %v5628_v21  ;;  %v5051_v54 = vsub.f32 %v14249_v51, %v4875_v42  ;;  %v2637_v8 = vadd.f32 %v2597_v3, %v2556_v7  ;;  %v2263_v45 = vmul.f32 %v19082_v1, %v19197_v35  ;;  %v19198_v51 = vld [vmem:[#allocation6_spill] sm:$0xff]  ;;  %v19247_v35 = vld [vmem:[#allocation56_spill] sm:$0xff] }
 0x36e   : > { %v14538_v53 = vpop.eup %11275  ;;  %v5252_v58 = vmul.f32 1.442695, %v5096_v11  ;;  %6966 = vmatpush.msrb.mxu0 %v2674_v2  ;;  %v5338_v10 = vsel %vm4779_vm1, %v14533_v41, 0.0  ;;  %v2222_v42 = vmul.f32 %v19104_v43, %v19198_v51  ;;  %v19246_v51 = vld [vmem:[#allocation44_spill] sm:$0xff] }
 0x36f   : > { %10919 = vmatmul.msk.f32.vlgmr.msra.gmra.mxu1 %vm4779_vm1, %v5589_v16  ;;  %v11278_v17 = vpop.eup %11277  ;;  %v5341_v0 = vsel %vm4779_vm1, %v14538_v53, 0.0  ;;  %v5162_v21 = vmul.f32 1.442695, %v5051_v54  ;;  %v2678_v16 = vadd.f32 %v14355_v23, %v2637_v8 }
 0x370   : > { %6069 = vmatpush.msra.mxu1 %v2431_v36  ;;  %11281 = vpow2.f32 %v5252_v58  ;;  %4916 = vmax.xlane.f32.xlu2 %v4915_v24  ;;  %v5632_v44 = vmul.f32 %v11278_v17, %v14231_v40  ;;  %v2303_v2 = vadd.f32 %v2263_v45, %v2222_v42  ;;  %v14560_v36 = vpop.eup %11279  ;;  %v5057_v58 = vsub.f32 %v14265_v61, %v4893_v49  ;;  %v19199_v24 = vld [vmem:[#allocation73_spill] sm:$0xff]  ;;  %v19200_v17 = vld [vmem:[#allocation82_spill] sm:$0xff]  ;;  %v19201_v61 = vld [vmem:[#allocation36_spill] sm:$0xff] }
 0x371   : > { %5339 = vadd.xlane.f32.xlu0 %v5338_v10  ;;  %5342 = vadd.xlane.f32.xlu1 %v5341_v0  ;;  %v2344_v40 = vmul.f32 %v19067_v6, %v19199_v24  ;;  %v2267_v10 = vmul.f32 %v19082_v1, %v19200_v17  ;;  %v5359_v0 = vsel %vm4779_vm1, %v14560_v36, 0.0  ;;  %v2226_v49 = vmul.f32 %v19104_v43, %v19201_v61  ;;  %v19219_v24 = vld [vmem:[#allocation39_spill] sm:$0xff] }
 0x373   : > { %v5271_v60 = vpop.xlane.xlu2 %5270  ;;  %v2384_v45 = vadd.f32 %v2344_v40, %v2303_v2  ;;  %v14582_v2 = vpop.f32.mrf.mxu2  ;;  %v19204_v40 = vld [vmem:[#allocation78_spill] sm:$0xff] }
 0x374   : > { %11283 = vrcp.f32 %v5271_v60  ;;  %v4884_v7 = vpop.xlane.xlu0 %4883 }
 0x375   : > { %v14558_v11 = vpop.xlane.xlu1 %4886  ;;  %10962 = vmatmul.msk.f32.vlgmr.msra.gmra.mxu0 %vm4779_vm1, %v5632_v44  ;;  %11285 = vpow2.f32 %v5162_v21  ;;  %v5054_v54 = vsub.f32 %v14279_v19, %v4884_v7  ;;  %v5174_v44 = vmul.f32 1.442695, %v5057_v58  ;;  %v19202_v21 = vld [vmem:[#allocation124_spill] sm:$0xff]  ;;  %v2425_v31 = vadd.f32 %v19100_v56, %v2384_v45 }
 0x376   : > { %v14563_v3 = vpop.eup %11281  ;;  %7058 = vmatpush.msra.mxu0 %v2678_v16  ;;  %11287 = vrcp.f32 %v5283_v57  ;;  %v2307_v16 = vadd.f32 %v2267_v10, %v2226_v49  ;;  %v2348_v57 = vmul.f32 %v19067_v6, %v19204_v40  ;;  %v4918_v10 = vsel %vm4779_vm1, %v14582_v2, -inf  ;;  %v19206_v49 = vld [vmem:[#allocation75_spill] sm:$0xff] }
 0x377   : > { %v5488_v8 = vsel %vm4779_vm1, %v14563_v3, 0.0  ;;  %v5168_v60 = vmul.f32 1.442695, %v5054_v54  ;;  %11289 = vpow2.f32 %v5174_v44  ;;  %v19208_v44 = vld [vmem:[#allocation120_spill] sm:$0xff]  ;;  %v5055_v4 = vsub.f32 %v19212_v9, %v14558_v11 }
 0x378   : > { %v2388_v54 = vadd.f32 %v2348_v57, %v2307_v16 }
 0x379   : > { %5489 = vadd.xlane.f32.xlu0 %v5488_v8  ;;  %5360 = vadd.xlane.f32.xlu1 %v5359_v0  ;;  %11291 = vpow2.f32 %v5168_v60  ;;  %v19205_v0 = vld [vmem:[#allocation87_spill] sm:$0xff]  ;;  %v19209_v60 = vld [vmem:[#allocation9_spill] sm:$0xff] }
 0x37a   : > { %v11284_v42 = vpop.eup %11283  ;;  %v2271_v45 = vmul.f32 %v19082_v1, %v19205_v0  ;;  %v2429_v57 = vadd.f32 %v19100_v56, %v2388_v54  ;;  %v2352_v54 = vmul.f32 %v19067_v6, %v19213_v37  ;;  %v19217_v37 = vld [vmem:[#allocation140_spill] sm:$0xff] }
 0x37b   : > { %v5583_v19 = vmul.f32 %v11284_v42, %v19202_v21  ;;  %v4872_v7 = vpop.xlane.xlu2 %4871  ;;  %v14580_v50 = vpop.eup %11285 }
 0x37c   : > { %v5050_v25 = vsub.f32 %v19203_v20, %v4872_v7  ;;  %v11288_v8 = vpop.eup %11287  ;;  %v5353_v20 = vsel %vm4779_vm1, %v14580_v50, 0.0  ;;  %v2225_v7 = vmul.f32 %v19104_v43, %v19209_v60  ;;  %v5292_v40 = vpop.xlane.xlu0 %5291  ;;  %v19218_v60 = vld [vmem:[#allocation142_spill] sm:$0xff] }
 0x37d   : > { %v5295_v52 = vpop.xlane.xlu1 %5294  ;;  %10913 = vmatmul.msk.f32.vlgmr.msrb.gmra.mxu3 %vm4779_vm1, %v5583_v19  ;;  %v5587_v21 = vmul.f32 %v11288_v8, %v19208_v44  ;;  %v14600_v16 = vpop.eup %11289 }
 0x37e   : > { %v5160_v58 = vmul.f32 1.442695, %v5050_v25  ;;  %5931 = vmatpush.msrb.mxu3 %v2425_v31  ;;  %v2266_v25 = vmul.f32 %v19082_v1, %v19206_v49  ;;  %v19207_v31 = vld [vmem:[#allocation24_spill] sm:$0xff]  ;;  %v5371_v9 = vsel %vm4779_vm1, %v14600_v16, 0.0 }
 0x37f   : > { %v2230_v42 = vmul.f32 %v19104_v43, %v19207_v31  ;;  %v14605_v0 = vpop.eup %11291  ;;  %v19211_v31 = vld [vmem:[#allocation139_spill] sm:$0xff] }
 0x380   : > { %11293 = vpow2.f32 %v5160_v58 }
 0x381   : > { %5354 = vadd.xlane.f32.xlu0 %v5353_v20  ;;  %4919 = vmax.xlane.f32.xlu1 %v4918_v10  ;;  %11295 = vrcp.f32 %v5295_v52  ;;  %v19210_v20 = vld [vmem:[#allocation55_spill] sm:$0xff]  ;;  %v2311_v10 = vadd.f32 %v2271_v45, %v2230_v42  ;;  %v19214_v42 = vld [vmem:[#allocation46_spill] sm:$0xff] }
 0x382   : > { %v2347_v52 = vmul.f32 %v19067_v6, %v19210_v20 }
 0x383   : > { %v5280_v19 = vpop.xlane.xlu2 %5279 }
 0x384   : > { %11297 = vrcp.f32 %v5280_v19  ;;  %v2306_v19 = vadd.f32 %v2266_v25, %v2225_v7  ;;  %v2392_v25 = vadd.f32 %v2352_v54, %v2311_v10  ;;  %v19215_v7 = vld [vmem:[#allocation45_spill] sm:$0xff]  ;;  %v14631_v10 = vpop.f32.mrf.mxu3 }
 0x385   : > { %v4896_v58 = vpop.xlane.xlu1 %4895  ;;  %10917 = vmatmul.msk.f32.vlgmr.msra.gmra.mxu3 %vm4779_vm1, %v5587_v21  ;;  %v2520_v21 = vmul.f32 %v14331_v39, %v19214_v42  ;;  %v19216_v42 = vld [vmem:[#allocation28_spill] sm:$0xff] }
 0x386   : > { %v5058_v8 = vsub.f32 %v19211_v31, %v4896_v58  ;;  %v14609_v44 = vpop.eup %11293  ;;  %6023 = vmatpush.msra.mxu3 %v2429_v57  ;;  %v5362_v31 = vsel %vm4779_vm1, %v14605_v0, 0.0  ;;  %v2387_v11 = vadd.f32 %v2347_v52, %v2306_v19  ;;  %v2479_v57 = vmul.f32 %v14326_v33, %v19215_v7 }
 0x387   : > { %v5350_v45 = vsel %vm4779_vm1, %v14609_v44, 0.0  ;;  %v11296_v17 = vpop.eup %11295  ;;  %v2229_v52 = vmul.f32 %v19104_v43, %v19219_v24  ;;  %v19235_v24 = vld [vmem:[#allocation41_spill] sm:$0xff] }
 0x388   : > { %v5176_v61 = vmul.f32 1.442695, %v5058_v8  ;;  %5351 = vadd.xlane.f32.xlu2 %v5350_v45  ;;  %v5170_v8 = vmul.f32 1.442695, %v5055_v4  ;;  %v2270_v45 = vmul.f32 %v19082_v1, %v19216_v42  ;;  %v5591_v20 = vmul.f32 %v11296_v17, %v19217_v37  ;;  %v19221_v17 = vld [vmem:[#allocation38_spill] sm:$0xff] }
 0x389   : > { %5363 = vadd.xlane.f32.xlu1 %v5362_v31  ;;  %5372 = vadd.xlane.f32.xlu0 %v5371_v9  ;;  %v2428_v19 = vadd.f32 %v19100_v56, %v2387_v11  ;;  %v2433_v4 = vadd.f32 %v19100_v56, %v2392_v25 }
 0x38a   : > { %11299 = vpow2.f32 %v5176_v61  ;;  %v11298_v58 = vpop.eup %11297  ;;  %v2560_v61 = vadd.f32 %v2520_v21, %v2479_v57  ;;  %v2310_v37 = vadd.f32 %v2270_v45, %v2229_v52  ;;  %v19224_v45 = vld [vmem:[#allocation138_spill] sm:$0xff] }
 0x38b   : > { %11301 = vrcp.f32 %v5292_v40  ;;  %v5586_v49 = vmul.f32 %v11298_v58, %v19218_v60  ;;  %v5430_v34 = vpop.xlane.xlu2 %5429  ;;  %v19220_v40 = vld [vmem:[#allocation85_spill] sm:$0xff]  ;;  %v2601_v60 = vmul.f32 %v14342_v48, %v19221_v17  ;;  %v19223_v58 = vld [vmem:[#allocation42_spill] sm:$0xff] }
 0x38c   : > { %11303 = vrcp.f32 %v5430_v34  ;;  %v2351_v54 = vmul.f32 %v19067_v6, %v19220_v40  ;;  %v4921_v34 = vsel %vm4779_vm1, %v14631_v10, -inf }
 0x38d   : > { %10916 = vmatmul.msk.f32.vlgmr.msrb.gmra.mxu2 %vm4779_vm1, %v5586_v49  ;;  %10921 = vmatmul.msk.f32.vlgmr.msrb.gmra.mxu3 %vm4779_vm1, %v5591_v20  ;;  %11305 = vpow2.f32 %v5170_v8  ;;  %v2641_v11 = vadd.f32 %v2601_v60, %v2560_v61  ;;  %v19222_v20 = vld [vmem:[#allocation88_spill] sm:$0xff]  ;;  %v2232_v8 = vmul.f32 %v19104_v43, %v19223_v58 }
 0x38e   : > { %6000 = vmatpush.msrb.mxu2 %v2428_v19  ;;  %6115 = vmatpush.msrb.mxu3 %v2433_v4  ;;  %v2391_v49 = vadd.f32 %v2351_v54, %v2310_v37  ;;  %v2273_v25 = vmul.f32 %v19082_v1, %v19222_v20  ;;  %v19225_v19 = vld [vmem:[#allocation125_spill] sm:$0xff] }
 0x38f   : > { %v2682_v61 = vadd.f32 %v14355_v23, %v2641_v11  ;;  %v19226_v37 = vld [vmem:[#allocation65_spill] sm:$0xff] }
 0x390   : > { %v14641_v21 = vpop.eup %11299  ;;  %4922 = vmax.xlane.f32.xlu2 %v4921_v34  ;;  %v2432_v34 = vadd.f32 %v19100_v56, %v2391_v49  ;;  %v2313_v54 = vadd.f32 %v2273_v25, %v2232_v8  ;;  %v2354_v60 = vmul.f32 %v19067_v6, %v19226_v37  ;;  %v19228_v8 = vld [vmem:[#allocation102_spill] sm:$0xff] }
 0x391   : > { %v11302_v31 = vpop.eup %11301  ;;  %v5374_v9 = vsel %vm4779_vm1, %v14641_v21, 0.0 }
 0x392   : > { %5375 = vadd.xlane.f32.xlu1 %v5374_v9  ;;  %v11304_v57 = vpop.eup %11303  ;;  %v5590_v52 = vmul.f32 %v11302_v31, %v19224_v45  ;;  %v14661_v31 = vpop.f32.mrf.mxu1 }
 0x393   : > { %v5636_v4 = vmul.f32 %v11304_v57, %v19225_v19  ;;  %v5301_v17 = vpop.xlane.xlu2 %5300  ;;  %v14653_v7 = vpop.eup %11305  ;;  %v19227_v57 = vld [vmem:[#allocation133_spill] sm:$0xff] }
 0x394   : > { %11307 = vrcp.f32 %v5301_v17  ;;  %v5365_v9 = vsel %vm4779_vm1, %v14653_v7, 0.0  ;;  %v2394_v17 = vadd.f32 %v2354_v60, %v2313_v54 }
 0x395   : > { %10920 = vmatmul.msk.f32.vlgmr.msra.gmra.mxu2 %vm4779_vm1, %v5590_v52  ;;  %10966 = vmatmul.msk.f32.vlgmr.msrb.gmra.mxu0 %vm4779_vm1, %v5636_v4 }
 0x396   : > { %6092 = vmatpush.msra.mxu2 %v2432_v34  ;;  %7150 = vmatpush.msrb.mxu0 %v2682_v61  ;;  %v2435_v52 = vadd.f32 %v19100_v56, %v2394_v17  ;;  %v19230_v61 = vld [vmem:[#allocation145_spill] sm:$0xff] }
 0x398   : > { %5366 = vadd.xlane.f32.xlu2 %v5365_v9 }
 0x39a   : > { %v11308_v49 = vpop.eup %11307  ;;  %v14669_v4 = vpop.f32.mrf.mxu1 }
 0x39b   : > { %v5593_v11 = vmul.f32 %v11308_v49, %v19227_v57  ;;  %v4905_v25 = vpop.xlane.xlu2 %4904  ;;  %19229 = vst [vmem:[#allocation143_spill] sm:$0xff] %v14669_v4  ;;  %v19231_v49 = vld [vmem:[#allocation86_spill] sm:$0xff] }
 0x39c   : > { %v5061_v45 = vsub.f32 %v19228_v8, %v4905_v25  ;;  %v2275_v17 = vmul.f32 %v19082_v1, %v19231_v49  ;;  %v19232_v25 = vld [vmem:[#allocation48_spill] sm:$0xff] }
 0x39d   : > { %10923 = vmatmul.msk.f32.vlgmr.msrb.gmra.mxu1 %vm4779_vm1, %v5593_v11  ;;  %v2234_v8 = vmul.f32 %v19104_v43, %v19232_v25 }
 0x39e   : > { %v5182_v19 = vmul.f32 1.442695, %v5061_v45  ;;  %6161 = vmatpush.msrb.mxu1 %v2435_v52  ;;  %v19233_v45 = vld [vmem:[#allocation89_spill] sm:$0xff] }
 0x39f   : > { %v2356_v52 = vmul.f32 %v19067_v6, %v19233_v45 }
 0x3a0   : > { %11309 = vpow2.f32 %v5182_v19 }
 0x3a2   : > { %v14678_v57 = vpop.f32.mrf.mxu1 }
 0x3a3   : > { %v4899_v34 = vpop.xlane.xlu2 %4898 }
 0x3a4   : > { %v5059_v40 = vsub.f32 %v19230_v61, %v4899_v34 }
 0x3a6   : > { %v14672_v9 = vpop.eup %11309  ;;  %v5178_v54 = vmul.f32 1.442695, %v5059_v40  ;;  %v2315_v40 = vadd.f32 %v2275_v17, %v2234_v8 }
 0x3a7   : > { %v5383_v60 = vsel %vm4779_vm1, %v14672_v9, 0.0 }
 0x3a8   : > { %11311 = vpow2.f32 %v5178_v54  ;;  %5384 = vadd.xlane.f32.xlu0 %v5383_v60  ;;  %v2396_v61 = vadd.f32 %v2356_v52, %v2315_v40  ;;  %v19234_v54 = vld [vmem:[#allocation49_spill] sm:$0xff]  ;;  %v19236_v40 = vld [vmem:[#allocation10_spill] sm:$0xff] }
 0x3a9   : > { %v2483_v60 = vmul.f32 %v14326_v33, %v19234_v54 }
 0x3aa   : > { %v2437_v17 = vadd.f32 %v19100_v56, %v2396_v61  ;;  %v14695_v58 = vpop.f32.mrf.mxu1  ;;  %v19238_v61 = vld [vmem:[#allocation51_spill] sm:$0xff] }
 0x3ab   : > { %v5307_v11 = vpop.xlane.xlu2 %5306 }
 0x3ac   : > { %11313 = vrcp.f32 %v5307_v11  ;;  %v2524_v11 = vmul.f32 %v14331_v39, %v19235_v24 }
 0x3ae   : > { %v14684_v19 = vpop.eup %11311  ;;  %v2564_v8 = vadd.f32 %v2524_v11, %v2483_v60  ;;  %v2236_v60 = vmul.f32 %v19104_v43, %v19238_v61 }
 0x3af   : > { %v5377_v34 = vsel %vm4779_vm1, %v14684_v19, 0.0 }
 0x3b0   : > { %5378 = vadd.xlane.f32.xlu2 %v5377_v34  ;;  %v2605_v34 = vmul.f32 %v14342_v48, %v19236_v40 }
 0x3b2   : > { %v11314_v49 = vpop.eup %11313 }
 0x3b3   : > { %v5595_v25 = vmul.f32 %v11314_v49, %v14362_v5  ;;  %v5442_v42 = vpop.xlane.xlu0 %5441  ;;  %v4911_v37 = vpop.xlane.xlu2 %4910  ;;  %v4927_v5 = vsel %vm4779_vm1, %v14661_v31, -inf  ;;  %v19237_v49 = vld [vmem:[#allocation93_spill] sm:$0xff] }
 0x3b4   : > { %11315 = vrcp.f32 %v5442_v42  ;;  %v5063_v45 = vsub.f32 %v14378_v13, %v4911_v37  ;;  %v2645_v42 = vadd.f32 %v2605_v34, %v2564_v8  ;;  %v2277_v13 = vmul.f32 %v19082_v1, %v19237_v49  ;;  %v19240_v8 = vld [vmem:[#allocation83_spill] sm:$0xff] }
 0x3b5   : > { %10925 = vmatmul.msk.f32.vlgmr.msra.gmra.mxu3 %vm4779_vm1, %v5595_v25  ;;  %v2233_v34 = vmul.f32 %v19104_v43, %v19240_v8 }
 0x3b6   : > { %v5186_v52 = vmul.f32 1.442695, %v5063_v45  ;;  %6207 = vmatpush.msra.mxu3 %v2437_v17  ;;  %v19239_v17 = vld [vmem:[#allocation90_spill] sm:$0xff]  ;;  %v2686_v24 = vadd.f32 %v14355_v23, %v2645_v42  ;;  %v4939_v42 = vsel %vm4779_vm1, %v14669_v4, -inf  ;;  %v2528_v4 = vmul.f32 %v14331_v39, %v19246_v51 }
 0x3b7   : > { %v2274_v40 = vmul.f32 %v19082_v1, %v19239_v17  ;;  %v14719_v17 = vpop.f32.mrf.mxu1 }
 0x3b8   : > { %11317 = vpow2.f32 %v5186_v52  ;;  %4928 = vmax.xlane.f32.xlu2 %v4927_v5  ;;  %v2317_v52 = vadd.f32 %v2277_v13, %v2236_v60  ;;  %v19241_v5 = vld [vmem:[#allocation91_spill] sm:$0xff]  ;;  %19244 = vst [vmem:[#allocation134_spill] sm:$0xff] %v14719_v17 }
 0x3b9   : > { %v2355_v54 = vmul.f32 %v19067_v6, %v19241_v5  ;;  %v2314_v60 = vadd.f32 %v2274_v40, %v2233_v34  ;;  %v19245_v5 = vld [vmem:[#allocation52_spill] sm:$0xff]  ;;  %v14732_v40 = vpop.f32.mrf.mxu3 }
 0x3ba   : > { %v11316_v37 = vpop.eup %11315 }
 0x3bb   : > { %v5640_v25 = vmul.f32 %v11316_v37, %v14390_v22  ;;  %v5313_v45 = vpop.xlane.xlu0 %5312  ;;  %v5304_v11 = vpop.xlane.xlu1 %5303  ;;  %v19243_v22 = vld [vmem:[#allocation63_spill] sm:$0xff] }
 0x3bc   : > { %11319 = vrcp.f32 %v5313_v45  ;;  %v2358_v37 = vmul.f32 %v19067_v6, %v19243_v22  ;;  %v2395_v45 = vadd.f32 %v2355_v54, %v2314_v60  ;;  %v19250_v60 = vld [vmem:[#allocation104_spill] sm:$0xff] }
 0x3bd   : > { %11321 = vrcp.f32 %v5304_v11  ;;  %10970 = vmatmul.msk.f32.vlgmr.msra.gmra.mxu0 %vm4779_vm1, %v5640_v25 }
 0x3be   : > { %v14715_v61 = vpop.eup %11317  ;;  %7242 = vmatpush.msra.mxu0 %v2686_v24  ;;  %v2398_v25 = vadd.f32 %v2358_v37, %v2317_v52  ;;  %v2487_v24 = vmul.f32 %v14326_v33, %v19245_v5  ;;  %v14737_v37 = vpop.f32.mrf.mxu0 }
 0x3bf   : > { %19242 = vst [vmem:[#allocation144_spill] sm:$0xff] %v14715_v61  ;;  %v5389_v13 = vsel %vm4779_vm1, %v14715_v61, 0.0  ;;  %v2609_v61 = vmul.f32 %v14342_v48, %v19247_v35 }
 0x3c0   : > { %4940 = vmax.xlane.f32.xlu2 %v4939_v42  ;;  %5390 = vadd.xlane.f32.xlu1 %v5389_v13  ;;  %v2439_v34 = vadd.f32 %v19100_v56, %v2398_v25  ;;  %19248 = vst [vmem:[#allocation151_spill] sm:$0xff] %v14737_v37  ;;  %v2568_v13 = vadd.f32 %v2528_v4, %v2487_v24 }
 0x3c1   : > { %v2240_v25 = vmul.f32 %v19104_v43, %v19250_v60 }
 0x3c2   : > { %v11320_v11 = vpop.eup %11319 }
 0x3c3   : > { %v11322_v8 = vpop.eup %11321  ;;  %v5597_v22 = vmul.f32 %v11320_v11, %v14403_v63  ;;  %v5454_v49 = vpop.xlane.xlu0 %5453  ;;  %v2436_v63 = vadd.f32 %v19100_v56, %v2395_v45  ;;  %v19251_v45 = vld [vmem:[#allocation95_spill] sm:$0xff] }
 0x3c4   : > { %v4908_v20 = vpop.xlane.xlu1 %4907  ;;  %v5594_v52 = vmul.f32 %v11322_v8, %v14411_v59  ;;  %11323 = vrcp.f32 %v5454_v49  ;;  %v4963_v59 = vsel %vm4779_vm1, %v14695_v58, -inf  ;;  %v19249_v49 = vld [vmem:[#allocation96_spill] sm:$0xff]  ;;  %v2279_v11 = vmul.f32 %v19082_v1, %v19251_v45  ;;  %v19256_v45 = vld [vmem:[#allocation94_spill] sm:$0xff] }
 0x3c5   : > { %v5062_v54 = vsub.f32 %v14422_v62, %v4908_v20  ;;  %10927 = vmatmul.msk.f32.vlgmr.msra.gmra.mxu1 %vm4779_vm1, %v5597_v22  ;;  %v4933_v62 = vsel %vm4779_vm1, %v14732_v40, -inf  ;;  %v2649_v20 = vadd.f32 %v2609_v61, %v2568_v13  ;;  %v2238_v8 = vmul.f32 %v19104_v43, %v19249_v49  ;;  %v14748_v22 = vpop.f32.mrf.mxu1  ;;  %v19253_v13 = vld [vmem:[#allocation92_spill] sm:$0xff] }
 0x3c6   : > { %10924 = vmatmul.msk.f32.vlgmr.msrb.gmra.mxu2 %vm4779_vm1, %v5594_v52  ;;  %6253 = vmatpush.msra.mxu1 %v2439_v34  ;;  %v14769_v49 = vpop.f32.mrf.mxu0 }
 0x3c7   : > { %v5184_v42 = vmul.f32 1.442695, %v5062_v54  ;;  %6184 = vmatpush.msrb.mxu2 %v2436_v63  ;;  %v19252_v54 = vld [vmem:[#allocation97_spill] sm:$0xff]  ;;  %19257 = vst [vmem:[#allocation101_spill] sm:$0xff] %v14769_v49  ;;  %v19260_v49 = vld [vmem:[#allocation112_spill] sm:$0xff] }
 0x3c8   : > { %4964 = vmax.xlane.f32.xlu2 %v4963_v59  ;;  %4934 = vmax.xlane.f32.xlu1 %v4933_v62  ;;  %v2281_v34 = vmul.f32 %v19082_v1, %v19252_v54  ;;  %v2278_v59 = vmul.f32 %v19082_v1, %v19253_v13  ;;  %v2319_v62 = vadd.f32 %v2279_v11, %v2238_v8  ;;  %v4975_v8 = vsel %vm4779_vm1, %v14719_v17, -inf  ;;  %v19258_v11 = vld [vmem:[#allocation13_spill] sm:$0xff] }
 0x3c9   : > { %11325 = vpow2.f32 %v5184_v42  ;;  %v2690_v42 = vadd.f32 %v14355_v23, %v2649_v20  ;;  %v2360_v20 = vmul.f32 %v19067_v6, %v19256_v45  ;;  %v2282_v13 = vmul.f32 %v19082_v1, %v19260_v49  ;;  %v14792_v49 = vpop.f32.mrf.mxu2 }
 0x3ca   : > { %v11324_v4 = vpop.eup %11323  ;;  %v2321_v35 = vadd.f32 %v2281_v34, %v2240_v25 }
 0x3cb   : > { %v5644_v24 = vmul.f32 %v11324_v4, %v14425_v28  ;;  %v5319_v52 = vpop.xlane.xlu2 %5318  ;;  %v5325_v61 = vpop.xlane.xlu0 %5324  ;;  %v19254_v28 = vld [vmem:[#allocation54_spill] sm:$0xff] }
 0x3cc   : > { %11327 = vrcp.f32 %v5319_v52  ;;  %v5316_v63 = vpop.xlane.xlu1 %5315  ;;  %v2237_v4 = vmul.f32 %v19104_v43, %v19254_v28  ;;  %v19255_v52 = vld [vmem:[#allocation98_spill] sm:$0xff]  ;;  %v19259_v28 = vld [vmem:[#allocation108_spill] sm:$0xff] }
 0x3cd   : > { %11329 = vrcp.f32 %v5325_v61  ;;  %10974 = vmatmul.msk.f32.vlgmr.msrb.gmra.mxu0 %vm4779_vm1, %v5644_v24  ;;  %v2359_v5 = vmul.f32 %v19067_v6, %v19255_v52  ;;  %v2362_v24 = vmul.f32 %v19067_v6, %v19258_v11  ;;  %v2400_v61 = vadd.f32 %v2360_v20, %v2319_v62  ;;  %v14781_v60 = vpop.f32.mrf.mxu1  ;;  %v19261_v11 = vld [vmem:[#allocation47_spill] sm:$0xff] }
 0x3ce   : > { %11331 = vrcp.f32 %v5316_v63  ;;  %7334 = vmatpush.msrb.mxu0 %v2690_v42  ;;  %v2318_v34 = vadd.f32 %v2278_v59, %v2237_v4  ;;  %v2241_v45 = vmul.f32 %v19104_v43, %v19259_v28  ;;  %v19262_v59 = vld [vmem:[#allocation67_spill] sm:$0xff] }
 0x3cf   : > { %v14761_v51 = vpop.eup %11325  ;;  %v2402_v63 = vadd.f32 %v2362_v24, %v2321_v35  ;;  %v2532_v35 = vmul.f32 %v14331_v39, %v19262_v59  ;;  %v19263_v24 = vld [vmem:[#allocation110_spill] sm:$0xff] }
 0x3d0   : > { %v5386_v25 = vsel %vm4779_vm1, %v14761_v51, 0.0  ;;  %4976 = vmax.xlane.f32.xlu2 %v4975_v8  ;;  %v2399_v52 = vadd.f32 %v2359_v5, %v2318_v34  ;;  %v2491_v8 = vmul.f32 %v14326_v33, %v19261_v11  ;;  %v2244_v34 = vmul.f32 %v19104_v43, %v19263_v24  ;;  %v19264_v11 = vld [vmem:[#allocation116_spill] sm:$0xff] }
 0x3d1   : > { %5387 = vadd.xlane.f32.xlu0 %v5386_v25  ;;  %v2441_v25 = vadd.f32 %v19100_v56, %v2400_v61  ;;  %v19265_v61 = vld [vmem:[#allocation119_spill] sm:$0xff] }
 0x3d2   : > { %v11328_v42 = vpop.eup %11327  ;;  %v2366_v59 = vmul.f32 %v19067_v6, %v19265_v61 }
 0x3d3   : > { %v11330_v54 = vpop.eup %11329  ;;  %v5599_v37 = vmul.f32 %v11328_v42, %v14459_v38  ;;  %v5328_v17 = vpop.xlane.xlu2 %5327  ;;  %v2443_v42 = vadd.f32 %v19100_v56, %v2402_v63  ;;  %v19266_v63 = vld [vmem:[#allocation60_spill] sm:$0xff] }
 0x3d4   : > { %v11332_v62 = vpop.eup %11331  ;;  %v5601_v5 = vmul.f32 %v11330_v54, %v14451_v47  ;;  %11333 = vrcp.f32 %v5328_v17  ;;  %v5466_v4 = vpop.xlane.xlu0 %5465  ;;  %v2285_v47 = vmul.f32 %v19082_v1, %v19264_v11  ;;  %v2440_v17 = vadd.f32 %v19100_v56, %v2399_v52  ;;  %v19271_v11 = vld [vmem:[#allocation99_spill] sm:$0xff] }
 0x3d5   : > { %v5337_v20 = vpop.xlane.xlu1 %5336  ;;  %v5598_v38 = vmul.f32 %v11332_v62, %v14447_v32  ;;  %11335 = vrcp.f32 %v5466_v4  ;;  %10929 = vmatmul.msk.f32.vlgmr.msrb.gmra.mxu3 %vm4779_vm1, %v5599_v37  ;;  %v2322_v54 = vadd.f32 %v2282_v13, %v2241_v45  ;;  %v4987_v32 = vsel %vm4779_vm1, %v14748_v22, -inf  ;;  %v14812_v4 = vpop.f32.mrf.mxu0 }
 0x3d6   : > { %11337 = vrcp.f32 %v5337_v20  ;;  %10931 = vmatmul.msk.f32.vlgmr.msrb.gmra.mxu1 %vm4779_vm1, %v5601_v5  ;;  %6299 = vmatpush.msrb.mxu3 %v2441_v25  ;;  %v2572_v37 = vadd.f32 %v2532_v35, %v2491_v8  ;;  %v2613_v62 = vmul.f32 %v14342_v48, %v19266_v63  ;;  %v4930_v52 = vsel %vm4779_vm1, %v14792_v49, -inf  ;;  %v19267_v5 = vld [vmem:[#allocation16_spill] sm:$0xff]  ;;  %19268 = vst [vmem:[#allocation128_spill] sm:$0xff] %v14812_v4  ;;  %v19269_v20 = vld [vmem:[#allocation105_spill] sm:$0xff]  ;;  %v19272_v4 = vld [vmem:[#allocation115_spill] sm:$0xff] }
 0x3d7   : > { %10928 = vmatmul.msk.f32.vlgmr.msra.gmra.mxu2 %vm4779_vm1, %v5598_v38  ;;  %6345 = vmatpush.msrb.mxu1 %v2443_v42  ;;  %v2363_v45 = vmul.f32 %v19067_v6, %v19267_v5  ;;  %v2325_v13 = vadd.f32 %v2285_v47, %v2244_v34  ;;  %v2283_v25 = vmul.f32 %v19082_v1, %v19269_v20  ;;  %v19270_v42 = vld [vmem:[#allocation153_spill] sm:$0xff] }
 0x3d8   : > { %6276 = vmatpush.msra.mxu2 %v2440_v17  ;;  %4988 = vmax.xlane.f32.xlu2 %v4987_v32  ;;  %v2289_v17 = vmul.f32 %v19082_v1, %v19270_v42  ;;  %v2653_v61 = vadd.f32 %v2613_v62, %v2572_v37  ;;  %v2242_v34 = vmul.f32 %v19104_v43, %v19271_v11 }
 0x3d9   : > { %4931 = vmax.xlane.f32.xlu0 %v4930_v52  ;;  %v2403_v8 = vadd.f32 %v2363_v45, %v2322_v54  ;;  %v2406_v35 = vadd.f32 %v2366_v59, %v2325_v13  ;;  %v2364_v59 = vmul.f32 %v19067_v6, %v19272_v4  ;;  %v19273_v54 = vld [vmem:[#allocation58_spill] sm:$0xff]  ;;  %v14826_v13 = vpop.f32.mrf.mxu1  ;;  %v19279_v4 = vld [vmem:[#allocation113_spill] sm:$0xff] }
 0x3da   : > { %v11334_v38 = vpop.eup %11333  ;;  %v2248_v45 = vmul.f32 %v19104_v43, %v19273_v54  ;;  %v2323_v37 = vadd.f32 %v2283_v25, %v2242_v34  ;;  %v442_v34 = vld [vmem:[%s18311_s4 + $0x18] sm:$0xff] }
 0x3db   : > { %v11336_v32 = vpop.eup %11335  ;;  %v5602_v63 = vmul.f32 %v11334_v38, %v14477_v30  ;;  %v5349_v28 = vpop.xlane.xlu2 %5348  ;;  %v2444_v62 = vadd.f32 %v19100_v56, %v2403_v8  ;;  %v2694_v38 = vadd.f32 %v14355_v23, %v2653_v61  ;;  %v4951_v8 = vsel %vm4779_vm1, %v14678_v57, -inf }
 0x3dc   : > { %v11338_v47 = vpop.eup %11337  ;;  %v5648_v52 = vmul.f32 %v11336_v32, %v14473_v18  ;;  %v5331_v5 = vpop.xlane.xlu0 %5330  ;;  %11339 = vrcp.f32 %v5349_v28  ;;  %v2447_v18 = vadd.f32 %v19100_v56, %v2406_v35  ;;  %v2329_v28 = vadd.f32 %v2289_v17, %v2248_v45  ;;  %v19275_v17 = vld [vmem:[#allocation129_spill] sm:$0xff]  ;;  %v441_v32 = vld [vmem:[%s18311_s4 + $0x10] sm:$0xff] }
 0x3dd   : > { %v5478_v20 = vpop.xlane.xlu1 %5477  ;;  %v5605_v30 = vmul.f32 %v11338_v47, %v14483_v55  ;;  %11341 = vrcp.f32 %v5331_v5  ;;  %v5011_v55 = vsel %vm4779_vm1, %v14826_v13, -inf  ;;  %v2404_v5 = vadd.f32 %v2364_v59, %v2323_v37 }
 0x3de   : > { %11343 = vrcp.f32 %v5478_v20  ;;  %10978 = vmatmul.msk.f32.vlgmr.msra.gmra.mxu0 %vm4779_vm1, %v5648_v52  ;;  %v19274_v20 = vld [vmem:[#allocation137_spill] sm:$0xff]  ;;  %v2246_v61 = vmul.f32 %v19104_v43, %v19275_v17  ;;  %v14849_v52 = vpop.f32.mrf.mxu0  ;;  %v14864_v11 = vpack.c.bf16 %v442_v34, %v441_v32  ;;  %v19282_v34 = vld [vmem:[#allocation122_spill] sm:$0xff] }
 0x3df   : > { %10932 = vmatmul.msk.f32.vlgmr.msrb.gmra.mxu2 %vm4779_vm1, %v5602_v63  ;;  %10935 = vmatmul.msk.f32.vlgmr.msra.gmra.mxu1 %vm4779_vm1, %v5605_v30  ;;  %v2370_v25 = vmul.f32 %v19067_v6, %v19274_v20  ;;  %19276 = vst [vmem:[#allocation149_spill] sm:$0xff] %v14849_v52  ;;  %v19277_v30 = vld [vmem:[#allocation117_spill] sm:$0xff]  ;;  %v2445_v17 = vadd.f32 %v19100_v56, %v2404_v5  ;;  %v439_v5 = vld [vmem:[%s18311_s4] sm:$0xff] }
 0x3e0   : > { %6368 = vmatpush.msrb.mxu2 %v2444_v62  ;;  %6437 = vmatpush.msra.mxu1 %v2447_v18  ;;  %v2286_v37 = vmul.f32 %v19082_v1, %v19277_v30  ;;  %v19278_v62 = vld [vmem:[#allocation127_spill] sm:$0xff]  ;;  %v2245_v52 = vmul.f32 %v19104_v43, %v19279_v4  ;;  %19281 = vst [vmem:[#allocation103_spill] sm:$0xff] %v14864_v11 }
 0x3e1   : > { %7426 = vmatpush.msra.mxu0 %v2694_v38  ;;  %5012 = vmax.xlane.f32.xlu2 %v5011_v55  ;;  %v2410_v63 = vadd.f32 %v2370_v25, %v2329_v28  ;;  %v2287_v18 = vmul.f32 %v19082_v1, %v19278_v62 }
 0x3e2   : > { %v11340_v35 = vpop.eup %11339  ;;  %4952 = vmax.xlane.f32.xlu0 %v4951_v8  ;;  %v2326_v32 = vadd.f32 %v2286_v37, %v2245_v52  ;;  %v19284_v52 = vld [vmem:[#allocation50_spill] sm:$0xff] }
 0x3e3   : > { %v11342_v47 = vpop.eup %11341  ;;  %v5609_v59 = vmul.f32 %v11340_v35, %v14509_v29  ;;  %v4917_v45 = vpop.xlane.xlu2 %4916  ;;  %v19280_v35 = vld [vmem:[#allocation141_spill] sm:$0xff]  ;;  %v2497_v37 = vmul.f32 %v14331_v39, %v19284_v52 }
 0x3e4   : > { %v11344_v28 = vpop.eup %11343  ;;  %v5603_v38 = vmul.f32 %v11342_v47, %v14511_v14  ;;  %v5340_v55 = vpop.xlane.xlu0 %5339  ;;  %v5065_v25 = vsub.f32 %v14530_v26, %v4917_v45  ;;  %v2367_v30 = vmul.f32 %v19067_v6, %v19280_v35  ;;  %v2451_v14 = vadd.f32 %v19100_v56, %v2410_v63 }
 0x3e5   : > { %v5343_v8 = vpop.xlane.xlu1 %5342  ;;  %v5652_v29 = vmul.f32 %v11344_v28, %v14513_v27  ;;  %11345 = vrcp.f32 %v5340_v55  ;;  %v2327_v26 = vadd.f32 %v2287_v18, %v2246_v61  ;;  %v440_v27 = vld [vmem:[%s18311_s4 + $0x8] sm:$0xff]  ;;  %v2368_v63 = vmul.f32 %v19067_v6, %v19282_v34 }
 0x3e6   : > { %v5190_v62 = vmul.f32 1.442695, %v5065_v25  ;;  %11347 = vrcp.f32 %v5343_v8  ;;  %10933 = vmatmul.msk.f32.vlgmr.msra.gmra.mxu3 %vm4779_vm1, %v5603_v38  ;;  %v2407_v61 = vadd.f32 %v2367_v30, %v2326_v32  ;;  %v14879_v47 = vpack.c.bf16 %v440_v27, %v439_v5  ;;  %v19286_v8 = vld [vmem:[#allocation22_spill] sm:$0xff] }
 0x3e7   : > { %10939 = vmatmul.msk.f32.vlgmr.msrb.gmra.mxu1 %vm4779_vm1, %v5609_v59  ;;  %6391 = vmatpush.msra.mxu3 %v2445_v17  ;;  %v2408_v45 = vadd.f32 %v2368_v63, %v2327_v26  ;;  %v19288_v63 = vld [vmem:[#allocation158_spill] sm:$0xff] }
 0x3e8   : > { %11349 = vpow2.f32 %v5190_v62  ;;  %6529 = vmatpush.msrb.mxu1 %v2451_v14  ;;  %10982 = vmatmul.msk.f32.vlgmr.msrb.gmra.mxu0 %vm4779_vm1, %v5652_v29  ;;  %19283 = vst [vmem:[#allocation136_spill] sm:$0xff] %v14879_v47  ;;  %v14884_v62 = vpop.f32.mrf.mxu0  ;;  %v2448_v30 = vadd.f32 %v19100_v56, %v2407_v61  ;;  %v2456_v29 = vmul.f32 %v14326_v33, %v19286_v8  ;;  %v19287_v14 = vld [vmem:[#allocation64_spill] sm:$0xff] }
 0x3e9   : > { %7666 = vmatpush.bf16.msrb.mxu0 %v14864_v11  ;;  %19285 = vst [vmem:[#allocation146_spill] sm:$0xff] %v14884_v62  ;;  %v2578_v26 = vmul.f32 %v14342_v48, %v19287_v14  ;;  %v2291_v61 = vmul.f32 %v19082_v1, %v19288_v63  ;;  %v19295_v11 = vld [vmem:[#allocation4_spill] sm:$0xff]  ;;  %v404_v63 = vld [vmem:[%s14907_s21 + $0x48] sm:$0xff]  ;;  %v410_v62 = vld [vmem:[%s14907_s21 + $0x78] sm:$0xff] }
 0x3ea   : > { %v2537_v5 = vadd.f32 %v2497_v37, %v2456_v29 }
 0x3eb   : > { %v11346_v18 = vpop.eup %11345 }
 0x3ec   : > { %v11348_v28 = vpop.eup %11347  ;;  %v5606_v38 = vmul.f32 %v11346_v18, %v14533_v41  ;;  %v5490_v59 = vpop.xlane.xlu0 %5489  ;;  %v2449_v41 = vadd.f32 %v19100_v56, %v2408_v45  ;;  %v2618_v27 = vadd.f32 %v2578_v26, %v2537_v5  ;;  %v395_v5 = vld [vmem:[%s14907_s21] sm:$0xff] }
 0x3ed   : > { %v5361_v17 = vpop.xlane.xlu1 %5360  ;;  %v5607_v55 = vmul.f32 %v11348_v28, %v14538_v53  ;;  %11351 = vrcp.f32 %v5490_v59  ;;  %7667 = vmatpush.bf16.msrb.mxu0 %v14879_v47  ;;  %v19289_v59 = vld [vmem:[#allocation152_spill] sm:$0xff]  ;;  %v19294_v47 = vld [vmem:[#allocation155_spill] sm:$0xff] }
 0x3ee   : > { %v14889_v25 = vpop.eup %11349  ;;  %11353 = vrcp.f32 %v5361_v17  ;;  %10936 = vmatmul.msk.f32.vlgmr.msra.gmra.mxu2 %vm4779_vm1, %v5606_v38  ;;  %v2250_v17 = vmul.f32 %v19104_v43, %v19289_v59  ;;  %v2659_v29 = vadd.f32 %v14355_v23, %v2618_v27 }
 0x3ef   : > { %10937 = vmatmul.msk.f32.vlgmr.msrb.gmra.mxu3 %vm4779_vm1, %v5607_v55  ;;  %6460 = vmatpush.msra.mxu2 %v2448_v30  ;;  %v5395_v53 = vsel %vm4779_vm1, %v14889_v25, 0.0  ;;  %v19290_v30 = vld [vmem:[#allocation126_spill] sm:$0xff] }
 0x3f0   : > { %6483 = vmatpush.msrb.mxu3 %v2449_v41  ;;  %5396 = vadd.xlane.f32.xlu1 %v5395_v53  ;;  %v2372_v41 = vmul.f32 %v19067_v6, %v19290_v30  ;;  %v14918_v26 = vpop.f32.mrf.mxu0  ;;  %v2331_v53 = vadd.f32 %v2291_v61, %v2250_v17  ;;  %v2460_v61 = vmul.f32 %v14326_v33, %v19295_v11 }
 0x3f1   : > { %19291 = vst [vmem:[#allocation150_spill] sm:$0xff] %v14918_v26 }
 0x3f3   : > { %v11352_v32 = vpop.eup %11351 }
 0x3f4   : > { %v11354_v45 = vpop.eup %11353  ;;  %v5656_v18 = vmul.f32 %v11352_v32, %v14563_v3  ;;  %v5355_v28 = vpop.xlane.xlu0 %5354  ;;  %v396_v32 = vld [vmem:[%s14907_s21 + $0x8] sm:$0xff] }
 0x3f5   : > { %v4920_v38 = vpop.xlane.xlu1 %4919  ;;  %v5613_v37 = vmul.f32 %v11354_v45, %v14560_v36  ;;  %11355 = vrcp.f32 %v5355_v28  ;;  %v19292_v36 = vld [vmem:[#allocation157_spill] sm:$0xff]  ;;  %v19293_v28 = vld [vmem:[#allocation72_spill] sm:$0xff]  ;;  %v7580_v27 = vpack.c.bf16 %v396_v32, %v395_v5 }
 0x3f6   : > { %v5066_v55 = vsub.f32 %v14582_v2, %v4920_v38  ;;  %10986 = vmatmul.msk.f32.vlgmr.msra.gmra.mxu0 %vm4779_vm1, %v5656_v18  ;;  %v2249_v45 = vmul.f32 %v19104_v43, %v19292_v36  ;;  %v2412_v2 = vadd.f32 %v2372_v41, %v2331_v53  ;;  %v2501_v38 = vmul.f32 %v14331_v39, %v19293_v28  ;;  %v19306_v36 = vld [vmem:[#allocation25_spill] sm:$0xff] }
 0x3f7   : > { %10943 = vmatmul.msk.f32.vlgmr.msra.gmra.mxu1 %vm4779_vm1, %v5613_v37  ;;  %v2290_v18 = vmul.f32 %v19082_v1, %v19294_v47  ;;  %v19297_v1 = vld [vmem:[#allocation156_spill] sm:$0xff]  ;;  %v19302_v47 = vld [vmem:[#allocation69_spill] sm:$0xff] }
 0x3f8   : > { %v5192_v3 = vmul.f32 1.442695, %v5066_v55  ;;  %6621 = vmatpush.msra.mxu1 %v2659_v29  ;;  %v2453_v43 = vadd.f32 %v19100_v56, %v2412_v2  ;;  %v2541_v41 = vadd.f32 %v2501_v38, %v2460_v61  ;;  %v2371_v5 = vmul.f32 %v19067_v6, %v19297_v1  ;;  %v14943_v2 = vpop.f32.mrf.mxu0 }
 0x3f9   : > { %v2330_v29 = vadd.f32 %v2290_v18, %v2249_v45  ;;  %19298 = vst [vmem:[#allocation106_spill] sm:$0xff] %v14943_v2 }
 0x3fa   : > { %11357 = vpow2.f32 %v5192_v3  ;;  %v19296_v3 = vld [vmem:[#allocation71_spill] sm:$0xff] }
 0x3fb   : > { %v11356_v26 = vpop.eup %11355  ;;  %v5352_v55 = vpop.xlane.xlu2 %5351  ;;  %v2582_v53 = vmul.f32 %v14342_v48, %v19296_v3  ;;  %v2411_v45 = vadd.f32 %v2371_v5, %v2330_v29 }
 0x3fc   : > { %v5611_v17 = vmul.f32 %v11356_v26, %v14580_v50  ;;  %11359 = vrcp.f32 %v5352_v55  ;;  %v5373_v37 = vpop.xlane.xlu0 %5372  ;;  %v19299_v55 = vld [vmem:[#allocation53_spill] sm:$0xff] }
 0x3fd   : > { %11361 = vrcp.f32 %v5373_v37  ;;  %v5364_v50 = vpop.xlane.xlu1 %5363  ;;  %v2622_v38 = vadd.f32 %v2582_v53, %v2541_v41  ;;  %v19300_v37 = vld [vmem:[#allocation8_spill] sm:$0xff]  ;;  %v2452_v41 = vadd.f32 %v19100_v56, %v2411_v45 }
 0x3fe   : > { %10941 = vmatmul.msk.f32.vlgmr.msra.gmra.mxu3 %vm4779_vm1, %v5611_v17  ;;  %10990 = vmatmul.msk.bf16.vlgmr.msrb.gmra.mxu0 %vm2698_vm0, %v7580_v27  ;;  %11363 = vrcp.f32 %v5364_v50  ;;  %v2498_v27 = vmul.f32 %v14331_v39, %v19299_v55  ;;  %v19301_v53 = vld [vmem:[#allocation68_spill] sm:$0xff] }
 0x3ff   : > { %6575 = vmatpush.msra.mxu3 %v2453_v43  ;;  %v2457_v43 = vmul.f32 %v14326_v33, %v19300_v37  ;;  %v2579_v50 = vmul.f32 %v14342_v48, %v19301_v53 }
 0x400   : > { %v14939_v32 = vpop.eup %11357 }
 0x401   : > { %v5398_v26 = vsel %vm4779_vm1, %v14939_v32, 0.0  ;;  %v2538_v1 = vadd.f32 %v2498_v27, %v2457_v43  ;;  %v19304_v27 = vld [vmem:[#allocation61_spill] sm:$0xff] }
 0x402   : > { %5399 = vadd.xlane.f32.xlu0 %v5398_v26  ;;  %v11360_v18 = vpop.eup %11359  ;;  %v14955_v26 = vpop.f32.mrf.mxu2  ;;  %v2502_v43 = vmul.f32 %v14331_v39, %v19304_v27 }
 0x403   : > { %v11362_v61 = vpop.eup %11361  ;;  %v5610_v6 = vmul.f32 %v11360_v18, %v14609_v44  ;;  %v4923_v17 = vpop.xlane.xlu2 %4922  ;;  %v2663_v44 = vadd.f32 %v14355_v23, %v2622_v38  ;;  %v4942_v56 = vsel %vm4779_vm1, %v14955_v26, -inf  ;;  %v2619_v45 = vadd.f32 %v2579_v50, %v2538_v1 }
 0x404   : > { %v5617_v29 = vmul.f32 %v11362_v61, %v14600_v16  ;;  %v5067_v5 = vsub.f32 %v14631_v10, %v4923_v17  ;;  %v397_v61 = vld [vmem:[%s14907_s21 + $0x10] sm:$0xff]  ;;  %v398_v10 = vld [vmem:[%s14907_s21 + $0x18] sm:$0xff]  ;;  %v11364_v17 = vpop.eup %11363  ;;  %v2461_v1 = vmul.f32 %v14326_v33, %v19306_v36 }
 0x405   : > { %10940 = vmatmul.msk.f32.vlgmr.msrb.gmra.mxu2 %vm4779_vm1, %v5610_v6  ;;  %v5376_v16 = vpop.xlane.xlu1 %5375  ;;  %v2499_v6 = vmul.f32 %v14331_v39, %v19302_v47  ;;  %v7581_v38 = vpack.c.bf16 %v398_v10, %v397_v61  ;;  %v2660_v50 = vadd.f32 %v14355_v23, %v2619_v45  ;;  %v4999_v45 = vsel %vm4779_vm1, %v14781_v60, -inf }
 0x406   : > { %v5194_v18 = vmul.f32 1.442695, %v5067_v5  ;;  %10947 = vmatmul.msk.f32.vlgmr.msrb.gmra.mxu1 %vm4779_vm1, %v5617_v29  ;;  %6552 = vmatpush.msrb.mxu2 %v2452_v41  ;;  %v19303_v5 = vld [vmem:[#allocation11_spill] sm:$0xff]  ;;  %v14970_v41 = vpop.f32.mrf.mxu0 }
 0x407   : > { %6713 = vmatpush.msrb.mxu1 %v2663_v44  ;;  %v2458_v29 = vmul.f32 %v14326_v33, %v19303_v5  ;;  %19305 = vst [vmem:[#allocation100_spill] sm:$0xff] %v14970_v41  ;;  %v5614_v44 = vmul.f32 %v11364_v17, %v14605_v0  ;;  %v19308_v41 = vld [vmem:[#allocation57_spill] sm:$0xff]  ;;  %v2542_v17 = vadd.f32 %v2502_v43, %v2461_v1  ;;  %v14992_v1 = vpop.f32.mrf.mxu3 }
 0x408   : > { %11365 = vpow2.f32 %v5194_v18  ;;  %v2580_v0 = vmul.f32 %v14342_v48, %v19308_v41 }
 0x409   : > { %11367 = vrcp.f32 %v5376_v16  ;;  %v19307_v16 = vld [vmem:[#allocation74_spill] sm:$0xff] }
 0x40a   : > { %4943 = vmax.xlane.f32.xlu0 %v4942_v56  ;;  %v2539_v56 = vadd.f32 %v2499_v6, %v2458_v29  ;;  %v2583_v61 = vmul.f32 %v14342_v48, %v19307_v16 }
 0x40b   : > { %v5367_v18 = vpop.xlane.xlu2 %5366 }
 0x40c   : > { %11369 = vrcp.f32 %v5367_v18  ;;  %v2620_v6 = vadd.f32 %v2580_v0, %v2539_v56  ;;  %v2623_v29 = vadd.f32 %v2583_v61, %v2542_v17  ;;  %v4945_v56 = vsel %vm4779_vm1, %v14992_v1, -inf  ;;  %v399_v61 = vld [vmem:[%s14907_s21 + $0x20] sm:$0xff]  ;;  %v400_v0 = vld [vmem:[%s14907_s21 + $0x28] sm:$0xff] }
 0x40d   : > { %10944 = vmatmul.msk.f32.vlgmr.msra.gmra.mxu2 %vm4779_vm1, %v5614_v44 }
 0x40e   : > { %v14979_v10 = vpop.eup %11365  ;;  %6644 = vmatpush.msra.mxu2 %v2660_v50  ;;  %10991 = vmatmul.msk.bf16.gmra.mxu0 %vm2698_vm0, %v7581_v38  ;;  %v14988_v50 = vpop.f32.mrf.mxu0  ;;  %v2661_v4 = vadd.f32 %v14355_v23, %v2620_v6 }
 0x40f   : > { %v5401_v18 = vsel %vm4779_vm1, %v14979_v10, 0.0  ;;  %v11368_v35 = vpop.eup %11367  ;;  %19309 = vst [vmem:[#allocation131_spill] sm:$0xff] %v14988_v50  ;;  %v15046_v2 = vpop.f32.mrf.mxu3 }
 0x410   : > { %5402 = vadd.xlane.f32.xlu1 %v5401_v18  ;;  %v5618_v38 = vmul.f32 %v11368_v35, %v14641_v21  ;;  %v2664_v18 = vadd.f32 %v14355_v23, %v2623_v29  ;;  %v7582_v21 = vpack.c.bf16 %v400_v0, %v399_v61  ;;  %v2464_v35 = vmul.f32 %v14326_v33, %v19180_v46 }
 0x412   : > { %5000 = vmax.xlane.f32.xlu0 %v4999_v45  ;;  %v11370_v44 = vpop.eup %11369 }
 0x413   : > { %v5615_v43 = vmul.f32 %v11370_v44, %v14653_v7  ;;  %v2505_v7 = vmul.f32 %v14331_v39, %v19027_v15  ;;  %v19311_v44 = vld [vmem:[#allocation2_spill] sm:$0xff] }
 0x414   : > { %v415_v15 = vld [vmem:[%s14907_s21 + $0xa0] sm:$0xff] }
 0x415   : > { %10945 = vmatmul.msk.f32.vlgmr.msrb.gmra.mxu3 %vm4779_vm1, %v5615_v43  ;;  %10948 = vmatmul.msk.f32.vlgmr.msrb.gmra.mxu2 %vm4779_vm1, %v5618_v38  ;;  %v2545_v45 = vadd.f32 %v2505_v7, %v2464_v35  ;;  %v2503_v38 = vmul.f32 %v14331_v39, %v19311_v44 }
 0x416   : > { %6667 = vmatpush.msrb.mxu3 %v2661_v4  ;;  %6736 = vmatpush.msrb.mxu2 %v2664_v18  ;;  %v15006_v6 = vpop.f32.mrf.mxu0  ;;  %v2586_v4 = vmul.f32 %v14342_v48, %v19181_v12  ;;  %v19312_v18 = vld [vmem:[#allocation14_spill] sm:$0xff] }
 0x417   : > { %19310 = vst [vmem:[#allocation132_spill] sm:$0xff] %v15006_v6  ;;  %v402_v6 = vld [vmem:[%s14907_s21 + $0x38] sm:$0xff] }
 0x418   : > { %4946 = vmax.xlane.f32.xlu1 %v4945_v56  ;;  %v2626_v29 = vadd.f32 %v2586_v4, %v2545_v45  ;;  %v2462_v56 = vmul.f32 %v14326_v33, %v19312_v18  ;;  %v401_v4 = vld [vmem:[%s14907_s21 + $0x30] sm:$0xff]  ;;  %v19332_v18 = vld [vmem:[#allocation134_spill] sm:$0xff] }
 0x419   : > { %v7583_v59 = vpack.c.bf16 %v402_v6, %v401_v4 }
 0x41a   : > { %v2667_v7 = vadd.f32 %v14355_v23, %v2626_v29  ;;  %v2543_v35 = vadd.f32 %v2503_v38, %v2462_v56 }
 0x41b   : > { %v5385_v17 = vpop.xlane.xlu0 %5384 }
 0x41c   : > { %11371 = vrcp.f32 %v5385_v17 }
 0x41e   : > { %10992 = vmatmul.msk.bf16.gmra.mxu0 %vm2698_vm0, %v7582_v21  ;;  %v19313_v21 = vld [vmem:[#allocation66_spill] sm:$0xff]  ;;  %v15020_v45 = vpop.f32.mrf.mxu0 }
 0x41f   : > { %v2584_v17 = vmul.f32 %v14342_v48, %v19313_v21  ;;  %19314 = vst [vmem:[#allocation154_spill] sm:$0xff] %v15020_v45 }
 0x421   : > { %v2624_v50 = vadd.f32 %v2584_v17, %v2543_v35 }
 0x422   : > { %v11372_v43 = vpop.eup %11371 }
 0x423   : > { %v5621_v61 = vmul.f32 %v11372_v43, %v14672_v9  ;;  %v5379_v0 = vpop.xlane.xlu2 %5378  ;;  %v2665_v29 = vadd.f32 %v14355_v23, %v2624_v50  ;;  %v19318_v50 = vld [vmem:[#allocation143_spill] sm:$0xff] }
 0x424   : > { %11373 = vrcp.f32 %v5379_v0 }
 0x425   : > { %10951 = vmatmul.msk.f32.vlgmr.msra.gmra.mxu1 %vm4779_vm1, %v5621_v61  ;;  %v19316_v61 = vld [vmem:[#allocation80_spill] sm:$0xff] }
 0x426   : > { %6805 = vmatpush.msra.mxu1 %v2667_v7  ;;  %v15029_v56 = vpop.f32.mrf.mxu0  ;;  %v2507_v6 = vmul.f32 %v14331_v39, %v19316_v61  ;;  %v15054_v61 = vpop.f32.mrf.mxu2 }
 0x427   : > { %19315 = vst [vmem:[#allocation109_spill] sm:$0xff] %v15029_v56 }
 0x42a   : > { %v11374_v30 = vpop.eup %11373 }
 0x42b   : > { %v5619_v9 = vmul.f32 %v11374_v30, %v14684_v19  ;;  %v4929_v43 = vpop.xlane.xlu2 %4928  ;;  %v19317_v19 = vld [vmem:[#allocation6_spill] sm:$0xff] }
 0x42c   : > { %v5069_v0 = vsub.f32 %v14661_v31, %v4929_v43  ;;  %v2466_v30 = vmul.f32 %v14326_v33, %v19317_v19 }
 0x42d   : > { %10949 = vmatmul.msk.f32.vlgmr.msra.gmra.mxu3 %vm4779_vm1, %v5619_v9 }
 0x42e   : > { %v5198_v38 = vmul.f32 1.442695, %v5069_v0  ;;  %6759 = vmatpush.msra.mxu3 %v2665_v29  ;;  %10993 = vmatmul.msk.bf16.gmra.mxu0 %vm2698_vm0, %v7583_v59  ;;  %v2547_v17 = vadd.f32 %v2507_v6, %v2466_v30  ;;  %v19319_v59 = vld [vmem:[#allocation73_spill] sm:$0xff]  ;;  %v15040_v0 = vpop.f32.mrf.mxu0  ;;  %v19321_v30 = vld [vmem:[#allocation144_spill] sm:$0xff] }
 0x42f   : > { %v2588_v43 = vmul.f32 %v14342_v48, %v19319_v59  ;;  %19320 = vst [vmem:[#allocation107_spill] sm:$0xff] %v15040_v0 }
 0x430   : > { %11375 = vpow2.f32 %v5198_v38  ;;  %v403_v38 = vld [vmem:[%s14907_s21 + $0x40] sm:$0xff] }
 0x431   : > { %v7584_v6 = vpack.c.bf16 %v404_v63, %v403_v38  ;;  %v19325_v38 = vld [vmem:[#allocation79_spill] sm:$0xff] }
 0x433   : > { %v4941_v31 = vpop.xlane.xlu2 %4940  ;;  %v5391_v7 = vpop.xlane.xlu1 %5390 }
 0x434   : > { %v5073_v35 = vsub.f32 %v19318_v50, %v4941_v31  ;;  %11377 = vrcp.f32 %v5391_v7  ;;  %v2628_v31 = vadd.f32 %v2588_v43, %v2547_v17 }
 0x436   : > { %v15036_v4 = vpop.eup %11375  ;;  %v5206_v9 = vmul.f32 1.442695, %v5073_v35  ;;  %v2669_v59 = vadd.f32 %v14355_v23, %v2628_v31  ;;  %v15059_v17 = vpop.f32.mrf.mxu0  ;;  %v2587_v31 = vmul.f32 %v14342_v48, %v19325_v38 }
 0x437   : > { %v5407_v29 = vsel %vm4779_vm1, %v15036_v4, 0.0  ;;  %19322 = vst [vmem:[#allocation148_spill] sm:$0xff] %v15059_v17 }
 0x438   : > { %11379 = vpow2.f32 %v5206_v9  ;;  %5408 = vadd.xlane.f32.xlu1 %v5407_v29  ;;  %v19323_v9 = vld [vmem:[#allocation70_spill] sm:$0xff] }
 0x439   : > { %v2506_v43 = vmul.f32 %v14331_v39, %v19323_v9 }
 0x43a   : > { %v11378_v7 = vpop.eup %11377 }
 0x43b   : > { %v5623_v50 = vmul.f32 %v11378_v7, %v19321_v30  ;;  %v4935_v35 = vpop.xlane.xlu1 %4934  ;;  %v4954_v30 = vsel %vm4779_vm1, %v15054_v61, -inf }
 0x43c   : > { %v5071_v34 = vsub.f32 %v14732_v40, %v4935_v35  ;;  %v15061_v40 = vpop.f32.mrf.mxu3  ;;  %v15075_v35 = vpop.f32.mrf.mxu2 }
 0x43d   : > { %10953 = vmatmul.msk.f32.vlgmr.msrb.gmra.mxu3 %vm4779_vm1, %v5623_v50  ;;  %v406_v50 = vld [vmem:[%s14907_s21 + $0x58] sm:$0xff]  ;;  %19326 = vst [vmem:[#allocation147_spill] sm:$0xff] %v15075_v35 }
 0x43e   : > { %v15052_v19 = vpop.eup %11379  ;;  %v5202_v21 = vmul.f32 1.442695, %v5071_v34  ;;  %6851 = vmatpush.msrb.mxu3 %v2669_v59  ;;  %10994 = vmatmul.msk.bf16.gmra.mxu0 %vm2698_vm0, %v7584_v6  ;;  %v19324_v34 = vld [vmem:[#allocation17_spill] sm:$0xff]  ;;  %v15079_v17 = vpop.f32.mrf.mxu0 }
 0x43f   : > { %v5419_v63 = vsel %vm4779_vm1, %v15052_v19, 0.0  ;;  %v2465_v59 = vmul.f32 %v14326_v33, %v19324_v34  ;;  %19327 = vst [vmem:[#allocation111_spill] sm:$0xff] %v15079_v17  ;;  %v409_v17 = vld [vmem:[%s14907_s21 + $0x70] sm:$0xff] }
 0x440   : > { %5420 = vadd.xlane.f32.xlu2 %v5419_v63  ;;  %11381 = vpow2.f32 %v5202_v21  ;;  %v405_v21 = vld [vmem:[%s14907_s21 + $0x50] sm:$0xff] }
 0x441   : > { %v2546_v7 = vadd.f32 %v2506_v43, %v2465_v59  ;;  %v7585_v38 = vpack.c.bf16 %v406_v50, %v405_v21 }
 0x444   : > { %v5388_v29 = vpop.xlane.xlu0 %5387  ;;  %v15082_v59 = vpop.f32.mrf.mxu3 }
 0x445   : > { %11383 = vrcp.f32 %v5388_v29  ;;  %v2627_v29 = vadd.f32 %v2587_v31, %v2546_v7  ;;  %v15094_v7 = vpop.f32.mrf.mxu2 }
 0x446   : > { %v15069_v6 = vpop.eup %11381 }
 0x447   : > { %v5413_v63 = vsel %vm4779_vm1, %v15069_v6, 0.0  ;;  %v2668_v16 = vadd.f32 %v14355_v23, %v2627_v29 }
 0x448   : > { %4955 = vmax.xlane.f32.xlu2 %v4954_v30  ;;  %5414 = vadd.xlane.f32.xlu1 %v5413_v63  ;;  %v15087_v30 = vpop.f32.mrf.mxu1 }
 0x44b   : > { %v11384_v34 = vpop.eup %11383 }
 0x44c   : > { %v5622_v43 = vmul.f32 %v11384_v34, %v14761_v51  ;;  %v4932_v9 = vpop.xlane.xlu0 %4931  ;;  %v4981_v51 = vsel %vm4779_vm1, %v15082_v59, -inf  ;;  %v15092_v34 = vpop.f32.mrf.mxu0 }
 0x44d   : > { %v5070_v36 = vsub.f32 %v14792_v49, %v4932_v9  ;;  %19328 = vst [vmem:[#allocation114_spill] sm:$0xff] %v15092_v34  ;;  %v4965_v49 = vpop.xlane.xlu2 %4964  ;;  %v15110_v27 = vpop.f32.mrf.mxu2 }
 0x44e   : > { %10952 = vmatmul.msk.f32.vlgmr.msra.gmra.mxu2 %vm4779_vm1, %v5622_v43  ;;  %10995 = vmatmul.msk.bf16.gmra.mxu0 %vm2698_vm0, %v7585_v38  ;;  %v408_v38 = vld [vmem:[%s14907_s21 + $0x68] sm:$0xff]  ;;  %v5081_v29 = vsub.f32 %v14695_v58, %v4965_v49  ;;  %v4957_v49 = vsel %vm4779_vm1, %v15046_v2, -inf }
 0x44f   : > { %6828 = vmatpush.msra.mxu2 %v2668_v16  ;;  %v5200_v31 = vmul.f32 1.442695, %v5070_v36  ;;  %v407_v16 = vld [vmem:[%s14907_s21 + $0x60] sm:$0xff]  ;;  %v15103_v36 = vpop.f32.mrf.mxu3 }
 0x450   : > { %4982 = vmax.xlane.f32.xlu2 %v4981_v51  ;;  %v15096_v21 = vpop.f32.mrf.mxu1  ;;  %v7586_v34 = vpack.c.bf16 %v408_v38, %v407_v16 }
 0x451   : > { %11385 = vpow2.f32 %v5200_v31  ;;  %19329 = vst [vmem:[#allocation118_spill] sm:$0xff] %v15096_v21 }
 0x454   : > { %v15108_v51 = vpop.f32.mrf.mxu0 }
 0x455   : > { %v4953_v9 = vpop.xlane.xlu0 %4952  ;;  %19330 = vst [vmem:[#allocation123_spill] sm:$0xff] %v15108_v51 }
 0x456   : > { %v5077_v50 = vsub.f32 %v14678_v57, %v4953_v9  ;;  %v5222_v57 = vmul.f32 1.442695, %v5081_v29  ;;  %v4977_v9 = vpop.xlane.xlu2 %4976 }
 0x457   : > { %v15099_v63 = vpop.eup %11385  ;;  %v5085_v44 = vsub.f32 %v19332_v18, %v4977_v9  ;;  %v19335_v18 = vld [vmem:[#allocation18_spill] sm:$0xff] }
 0x458   : > { %v5214_v43 = vmul.f32 1.442695, %v5077_v50  ;;  %v5410_v31 = vsel %vm4779_vm1, %v15099_v63, 0.0  ;;  %v15112_v56 = vpop.f32.mrf.mxu1  ;;  %v19333_v50 = vld [vmem:[#allocation81_spill] sm:$0xff]  ;;  %v2468_v29 = vmul.f32 %v14326_v33, %v19335_v18 }
 0x459   : > { %5411 = vadd.xlane.f32.xlu0 %v5410_v31  ;;  %19331 = vst [vmem:[#allocation135_spill] sm:$0xff] %v15112_v56  ;;  %v5230_v31 = vmul.f32 1.442695, %v5085_v44  ;;  %v411_v56 = vld [vmem:[%s14907_s21 + $0x80] sm:$0xff] }
 0x45a   : > { %11387 = vpow2.f32 %v5214_v43  ;;  %v2509_v43 = vmul.f32 %v14331_v39, %v19333_v50  ;;  %v15132_v50 = vpop.f32.mrf.mxu2 }
 0x45b   : > { %11389 = vpow2.f32 %v5222_v57 }
 0x45c   : > { %v15122_v16 = vpop.f32.mrf.mxu0  ;;  %v2549_v9 = vadd.f32 %v2509_v43, %v2468_v29  ;;  %v7587_v29 = vpack.c.bf16 %v410_v62, %v409_v17 }
 0x45d   : > { %19334 = vst [vmem:[#allocation124_spill] sm:$0xff] %v15122_v16 }
 0x45e   : > { %10996 = vmatmul.msk.bf16.gmra.mxu0 %vm2698_vm0, %v7586_v34  ;;  %v15126_v34 = vpop.f32.mrf.mxu3 }
 0x460   : > { %v15116_v58 = vpop.eup %11387  ;;  %v15134_v16 = vpop.f32.mrf.mxu1 }
 0x461   : > { %4958 = vmax.xlane.f32.xlu0 %v4957_v49  ;;  %v5431_v38 = vsel %vm4779_vm1, %v15116_v58, 0.0  ;;  %v15130_v51 = vpop.eup %11389  ;;  %19336 = vst [vmem:[#allocation121_spill] sm:$0xff] %v15134_v16  ;;  %v19337_v49 = vld [vmem:[#allocation27_spill] sm:$0xff] }
 0x462   : > { %5432 = vadd.xlane.f32.xlu1 %v5431_v38  ;;  %v2590_v21 = vmul.f32 %v14342_v48, %v19337_v49  ;;  %v4969_v38 = vsel %vm4779_vm1, %v15061_v40, -inf  ;;  %v5443_v44 = vsel %vm4779_vm1, %v15130_v51, 0.0  ;;  %v15156_v62 = vpop.f32.mrf.mxu2 }
 0x463   : > { %v5397_v57 = vpop.xlane.xlu1 %5396  ;;  %19340 = vst [vmem:[#allocation130_spill] sm:$0xff] %v15156_v62 }
 0x464   : > { %11391 = vrcp.f32 %v5397_v57  ;;  %v2630_v18 = vadd.f32 %v2590_v21, %v2549_v9 }
 0x465   : > { %11393 = vpow2.f32 %v5230_v31  ;;  %v15144_v57 = vpop.f32.mrf.mxu0 }
 0x466   : > { %19338 = vst [vmem:[#allocation120_spill] sm:$0xff] %v15144_v57  ;;  %v15147_v3 = vpop.f32.mrf.mxu3  ;;  %v2671_v31 = vadd.f32 %v14355_v23, %v2630_v18  ;;  %v19342_v18 = vld [vmem:[#allocation75_spill] sm:$0xff] }
 0x467   : > { %v2510_v9 = vmul.f32 %v14331_v39, %v19342_v18  ;;  %v4989_v18 = vpop.xlane.xlu2 %4988 }
 0x468   : > { %v15153_v21 = vpop.f32.mrf.mxu1 }
 0x469   : > { %4970 = vmax.xlane.f32.xlu0 %v4969_v38  ;;  %19339 = vst [vmem:[#allocation139_spill] sm:$0xff] %v15153_v21 }
 0x46a   : > { %v11392_v43 = vpop.eup %11391  ;;  %5444 = vadd.xlane.f32.xlu1 %v5443_v44  ;;  %v19343_v44 = vld [vmem:[#allocation9_spill] sm:$0xff]  ;;  %v15174_v11 = vpop.f32.mrf.mxu2 }
 0x46b   : > { %v5625_v16 = vmul.f32 %v11392_v43, %v14889_v25  ;;  %v15150_v49 = vpop.eup %11393  ;;  %v2469_v43 = vmul.f32 %v14326_v33, %v19343_v44 }
 0x46c   : > { %v5455_v25 = vsel %vm4779_vm1, %v15150_v49, 0.0 }
 0x46d   : > { %10955 = vmatmul.msk.f32.vlgmr.msrb.gmra.mxu1 %vm4779_vm1, %v5625_v16  ;;  %v2550_v21 = vadd.f32 %v2510_v9, %v2469_v43 }
 0x46e   : > { %6897 = vmatpush.msrb.mxu1 %v2671_v31  ;;  %10997 = vmatmul.msk.bf16.gmra.mxu0 %vm2698_vm0, %v7587_v29  ;;  %v15164_v38 = vpop.f32.mrf.mxu3  ;;  %v19344_v31 = vld [vmem:[#allocation55_spill] sm:$0xff] }
 0x46f   : > { %v2591_v29 = vmul.f32 %v14342_v48, %v19344_v31 }
 0x470   : > { %v15170_v57 = vpop.f32.mrf.mxu1 }
 0x471   : > { %5456 = vadd.xlane.f32.xlu0 %v5455_v25  ;;  %19345 = vst [vmem:[#allocation142_spill] sm:$0xff] %v15170_v57  ;;  %v412_v25 = vld [vmem:[%s14907_s21 + $0x88] sm:$0xff]  ;;  %v2631_v28 = vadd.f32 %v2591_v29, %v2550_v21 }
 0x473   : > { %v15160_v17 = vpop.f32.mrf.mxu0  ;;  %v2672_v9 = vadd.f32 %v14355_v23, %v2631_v28 }
 0x474   : > { %19341 = vst [vmem:[#allocation140_spill] sm:$0xff] %v15160_v17  ;;  %v4993_v17 = vsel %vm4779_vm1, %v15103_v36, -inf }
 0x475   : > { %v5400_v16 = vpop.xlane.xlu0 %5399 }
 0x476   : > { %11395 = vrcp.f32 %v5400_v16  ;;  %v7588_v16 = vpack.c.bf16 %v412_v25, %v411_v56  ;;  %v15183_v43 = vpop.f32.mrf.mxu3  ;;  %v15188_v56 = vpop.f32.mrf.mxu2 }
 0x477   : > { %19347 = vst [vmem:[#allocation125_spill] sm:$0xff] %v15183_v43  ;;  %v414_v43 = vld [vmem:[%s14907_s21 + $0x98] sm:$0xff] }
 0x478   : > { %19348 = vst [vmem:[#allocation133_spill] sm:$0xff] %v15188_v56  ;;  %v15190_v29 = vpop.f32.mrf.mxu1  ;;  %v413_v56 = vld [vmem:[%s14907_s21 + $0x90] sm:$0xff] }
 0x479   : > { %4994 = vmax.xlane.f32.xlu0 %v4993_v17  ;;  %v5089_v17 = vsub.f32 %v14748_v22, %v4989_v18  ;;  %19349 = vst [vmem:[#allocation102_spill] sm:$0xff] %v15190_v29  ;;  %v19353_v29 = vld [vmem:[#allocation78_spill] sm:$0xff] }
 0x47b   : > { %v15178_v12 = vpop.f32.mrf.mxu0  ;;  %v5238_v28 = vmul.f32 1.442695, %v5089_v17  ;;  %v2592_v17 = vmul.f32 %v14342_v48, %v19353_v29 }
 0x47c   : > { %v11396_v62 = vpop.eup %11395  ;;  %19346 = vst [vmem:[#allocation138_spill] sm:$0xff] %v15178_v12 }
 0x47d   : > { %v5626_v44 = vmul.f32 %v11396_v62, %v14939_v32  ;;  %v4944_v31 = vpop.xlane.xlu0 %4943  ;;  %v19350_v32 = vld [vmem:[#allocation82_spill] sm:$0xff]  ;;  %v5013_v62 = vpop.xlane.xlu2 %5012 }
 0x47e   : > { %v5074_v57 = vsub.f32 %v14955_v26, %v4944_v31  ;;  %10998 = vmatmul.msk.bf16.gmra.mxu0 %vm2698_vm0, %v7588_v16  ;;  %v2511_v26 = vmul.f32 %v14331_v39, %v19350_v32  ;;  %v15206_v46 = vpop.f32.mrf.mxu3 }
 0x47f   : > { %10956 = vmatmul.msk.f32.vlgmr.msrb.gmra.mxu2 %vm4779_vm1, %v5626_v44  ;;  %v19352_v44 = vld [vmem:[#allocation36_spill] sm:$0xff]  ;;  %19354 = vst [vmem:[#allocation50_spill] sm:$0xff] %v15206_v46 }
 0x480   : > { %v5208_v21 = vmul.f32 1.442695, %v5074_v57  ;;  %6920 = vmatpush.msrb.mxu2 %v2672_v9  ;;  %v2470_v25 = vmul.f32 %v14326_v33, %v19352_v44 }
 0x482   : > { %11397 = vpow2.f32 %v5208_v21  ;;  %v2551_v16 = vadd.f32 %v2511_v26, %v2470_v25  ;;  %v5097_v21 = vsub.f32 %v14826_v13, %v5013_v62  ;;  %v15210_v26 = vpop.f32.mrf.mxu2  ;;  %v15212_v25 = vpop.f32.mrf.mxu1 }
 0x483   : > { %v15194_v31 = vpop.f32.mrf.mxu0  ;;  %v5403_v57 = vpop.xlane.xlu1 %5402  ;;  %19355 = vst [vmem:[#allocation22_spill] sm:$0xff] %v15210_v26 }
 0x484   : > { %19351 = vst [vmem:[#allocation145_spill] sm:$0xff] %v15194_v31  ;;  %11399 = vrcp.f32 %v5403_v57  ;;  %v5254_v62 = vmul.f32 1.442695, %v5097_v21 }
 0x485   : > { %v5001_v22 = vpop.xlane.xlu0 %5000  ;;  %11401 = vpow2.f32 %v5238_v28  ;;  %19356 = vst [vmem:[#allocation64_spill] sm:$0xff] %v15212_v25  ;;  %v7589_v28 = vpack.c.bf16 %v414_v43, %v413_v56 }
 0x486   : > { %v5093_v18 = vsub.f32 %v14781_v60, %v5001_v22  ;;  %v2632_v60 = vadd.f32 %v2592_v17, %v2551_v16  ;;  %v11652_v16 = vld [vmem:[%s18309_s2 + $0x8] sm:$0x7f] }
 0x487   : > { %v15227_v43 = vperm.slane %v11652_v16, 0  ;;  %v19359_v17 = vld [vmem:[#allocation19_spill] sm:$0xff]  ;;  %v15239_v16 = vpop.f32.mrf.mxu3 }
 0x488   : > { %v15199_v9 = vpop.eup %11397  ;;  %v5246_v32 = vmul.f32 1.442695, %v5093_v18  ;;  %v2673_v21 = vadd.f32 %v14355_v23, %v2632_v60  ;;  %19361 = vst [vmem:[#allocation68_spill] sm:$0xff] %v15239_v16 }
 0x489   : > { %v5422_v44 = vsel %vm4779_vm1, %v15199_v9, 0.0 }
 0x48a   : > { %11403 = vpow2.f32 %v5246_v32  ;;  %5423 = vadd.xlane.f32.xlu1 %v5422_v44  ;;  %v11400_v13 = vpop.eup %11399  ;;  %v11651_v32 = vld [vmem:[%s18309_s2] sm:$0x7f] }
 0x48b   : > { %v15214_v22 = vpop.f32.mrf.mxu0  ;;  %v5627_v57 = vmul.f32 %v11400_v13, %v14979_v10  ;;  %v4947_v18 = vpop.xlane.xlu1 %4946  ;;  %v15222_v44 = vperm.slane %v11651_v32, 0  ;;  %11405 = vpow2.f32 %v5254_v62  ;;  %v19360_v32 = vld [vmem:[#allocation30_spill] sm:$0xff] }
 0x48c   : > { %19357 = vst [vmem:[#allocation53_spill] sm:$0xff] %v15214_v22  ;;  %v15217_v29 = vpop.eup %11401  ;;  %v5075_v56 = vsub.f32 %v14992_v1, %v4947_v18  ;;  %v1032_v25 = vmul.f32 %v15227_v43, %v19360_v32  ;;  %v15252_v18 = vpop.f32.mrf.mxu1 }
 0x48d   : > { %10957 = vmatmul.msk.f32.vlgmr.msra.gmra.mxu3 %vm4779_vm1, %v5627_v57  ;;  %v991_v13 = vmul.f32 %v15222_v44, %v19359_v17  ;;  %v5467_v60 = vsel %vm4779_vm1, %v15217_v29, 0.0  ;;  %v15250_v57 = vpop.f32.mrf.mxu2  ;;  %19363 = vst [vmem:[#allocation11_spill] sm:$0xff] %v15252_v18  ;;  %v1033_v17 = vmul.f32 %v15227_v43, %v19284_v52  ;;  %v992_v18 = vmul.f32 %v15222_v44, %v19286_v8  ;;  %v11654_v52 = vld [vmem:[%s18310_s3] sm:$0x7f] }
 0x48e   : > { %10999 = vmatmul.msk.bf16.gmra.mxu0 %vm2698_vm0, %v7589_v28  ;;  %v5210_v26 = vmul.f32 1.442695, %v5075_v56  ;;  %6943 = vmatpush.msra.mxu3 %v2673_v21  ;;  %v11653_v28 = vld [vmem:[%s18309_s2 + $0x10] sm:$0x7f]  ;;  %19362 = vst [vmem:[#allocation69_spill] sm:$0xff] %v15250_v57 }
 0x48f   : > { %v15248_v62 = vperm.slane %v11653_v28, 0  ;;  %v469_v56 = vld [vmem:[%s18313_s6] sm:$0x1f]  ;;  %v1072_v21 = vadd.f32 %v1032_v25, %v991_v13  ;;  %v15276_v13 = vperm.slane %v11654_v52, 0  ;;  %v1073_v46 = vadd.f32 %v1033_v17, %v992_v18 }
 0x490   : > { %v15233_v10 = vpop.eup %11403  ;;  %11407 = vpow2.f32 %v5210_v26  ;;  %v19366_v26 = vld [vmem:[#allocation20_spill] sm:$0xff] }
 0x491   : > { %19358 = vst [vmem:[#allocation8_spill] sm:$0xff] %v15233_v10  ;;  %v5479_v1 = vsel %vm4779_vm1, %v15233_v10, 0.0  ;;  %v15261_v28 = vpop.eup %11405  ;;  %v1114_v57 = vmul.f32 %v15248_v62, %v19287_v14  ;;  %v4966_v14 = vsel %vm4779_vm1, %v15075_v35, -inf }
 0x492   : > { %5480 = vadd.xlane.f32.xlu0 %v5479_v1  ;;  %5468 = vadd.xlane.f32.xlu1 %v5467_v60  ;;  %19365 = vst [vmem:[#allocation143_spill] sm:$0xff] %v15261_v28  ;;  %v1113_v1 = vmul.f32 %v15248_v62, %v19366_v26  ;;  %v15265_v60 = vperm.slane %v469_v56, 0  ;;  %v416_v26 = vld [vmem:[%s14907_s21 + $0xa8] sm:$0xff]  ;;  %v15280_v56 = vpop.f32.mrf.mxu3  ;;  %v5491_v8 = vsel %vm4779_vm1, %v15261_v28, 0.0 }
 0x493   : > { %v15259_v32 = vpop.f32.mrf.mxu0  ;;  %19368 = vst [vmem:[#allocation134_spill] sm:$0xff] %v15280_v56  ;;  %v1154_v10 = vadd.f32 %v1114_v57, %v1073_v46  ;;  %v7590_v52 = vpack.c.bf16 %v416_v26, %v415_v15  ;;  %v19372_v46 = vld [vmem:[#allocation151_spill] sm:$0xff]  ;;  %v4978_v15 = vsel %vm4779_vm1, %v15094_v7, -inf }
 0x494   : > { %19364 = vst [vmem:[#allocation57_spill] sm:$0xff] %v15259_v32  ;;  %v1153_v25 = vadd.f32 %v1113_v1, %v1072_v21  ;;  %v7770_v1 = vadd.f32 %v15265_v60, %v15178_v12  ;;  %v15292_v17 = vpop.f32.mrf.mxu1  ;;  %v7771_v28 = vadd.f32 %v15265_v60, %v15194_v31  ;;  %v7500_v57 = vmax.f32 %v19372_v46, 0.0 }
 0x495   : > { %v15290_v18 = vpop.f32.mrf.mxu2  ;;  %19370 = vst [vmem:[#allocation30_spill] sm:$0xff] %v15292_v17  ;;  %v1195_v35 = vadd.f32 %v15276_v13, %v1154_v10 }
 0x496   : > { %v15271_v16 = vpop.eup %11407  ;;  %19369 = vst [vmem:[#allocation19_spill] sm:$0xff] %v15290_v18  ;;  %v1194_v56 = vadd.f32 %v15276_v13, %v1153_v25  ;;  %v7501_v25 = vmax.f32 %v15087_v30, 0.0 }
 0x497   : > { %19367 = vst [vmem:[#allocation144_spill] sm:$0xff] %v15271_v16  ;;  %v5425_v21 = vsel %vm4779_vm1, %v15271_v16, 0.0 }
 0x498   : > { %5426 = vadd.xlane.f32.xlu2 %v5425_v21  ;;  %v7855_v16 = vsub.f32 %v7770_v1, %v1194_v56  ;;  %v5005_v56 = vsel %vm4779_vm1, %v15126_v34, -inf  ;;  %v18724_v21 = vmax.f32 %v15020_v45, 0.0 }
 0x49a   : > { %5492 = vadd.xlane.f32.xlu0 %v5491_v8  ;;  %4967 = vmax.xlane.f32.xlu1 %v4966_v14  ;;  %v7856_v8 = vsub.f32 %v7771_v28, %v1195_v35  ;;  %v15302_v14 = vpop.f32.mrf.mxu3  ;;  %v7895_v26 = vmul.f32 %v7855_v16, %v7500_v57  ;;  %v417_v57 = vld [vmem:[%s14907_s21 + $0xb0] sm:$0xff] }
 0x49b   : > { %v15297_v0 = vpop.f32.mrf.mxu0  ;;  %19373 = vst [vmem:[#allocation151_spill] sm:$0xff] %v15302_v14  ;;  %v19382_v14 = vld [vmem:[#allocation59_spill] sm:$0xff] }
 0x49c   : > { %19371 = vst [vmem:[#allocation20_spill] sm:$0xff] %v15297_v0  ;;  %v7896_v28 = vmul.f32 %v7856_v8, %v7501_v25  ;;  %v15319_v30 = vadd.f32 %v7895_v26, %v18724_v21  ;;  %v5017_v25 = vsel %vm4779_vm1, %v15147_v3, -inf  ;;  %v19379_v21 = vld [vmem:[#allocation12_spill] sm:$0xff] }
 0x49d   : > { %v2472_v12 = vmul.f32 %v14326_v33, %v19379_v21  ;;  %v19389_v21 = vld [vmem:[#allocation87_spill] sm:$0xff] }
 0x49e   : > { %11000 = vmatmul.msk.bf16.gmra.mxu0 %vm2698_vm0, %v7590_v52  ;;  %v15315_v52 = vpop.f32.mrf.mxu2 }
 0x49f   : > { %19376 = vst [vmem:[#allocation161_spill] sm:$0xff] %v15315_v52  ;;  %v2594_v52 = vmul.f32 %v14342_v48, %v19382_v14  ;;  %v420_v14 = vld [vmem:[%s14907_s21 + $0xc8] sm:$0xff] }
 0x4a0   : > { %5006 = vmax.xlane.f32.xlu2 %v5005_v56  ;;  %v19377_v56 = vld [vmem:[#allocation84_spill] sm:$0xff] }
 0x4a1   : > { %v2513_v8 = vmul.f32 %v14331_v39, %v19377_v56 }
 0x4a2   : > { %4979 = vmax.xlane.f32.xlu0 %v4978_v15  ;;  %v15309_v10 = vpop.f32.mrf.mxu1  ;;  %v418_v15 = vld [vmem:[%s14907_s21 + $0xb8] sm:$0xff]  ;;  %v15333_v31 = vpop.f32.mrf.mxu3 }
 0x4a3   : > { %19374 = vst [vmem:[#allocation159_spill] sm:$0xff] %v15309_v10  ;;  %v18726_v35 = vmax.f32 %v15309_v10, 0.0  ;;  %v15313_v1 = vpop.f32.mrf.mxu0  ;;  %v7591_v26 = vpack.c.bf16 %v418_v15, %v417_v57  ;;  %v2553_v46 = vadd.f32 %v2513_v8, %v2472_v12  ;;  %v19385_v10 = vld [vmem:[#allocation42_spill] sm:$0xff] }
 0x4a4   : > { %19375 = vst [vmem:[#allocation160_spill] sm:$0xff] %v15313_v1  ;;  %v2476_v45 = vmul.f32 %v14326_v33, %v19385_v10 }
 0x4a5   : > { %v15323_v16 = vadd.f32 %v7896_v28, %v18726_v35  ;;  %19378 = vst [vmem:[#allocation162_spill] sm:$0xff] %v15333_v31  ;;  %v2634_v18 = vadd.f32 %v2594_v52, %v2553_v46  ;;  %v19383_v31 = vld [vmem:[#allocation88_spill] sm:$0xff] }
 0x4a6   : > { %v15339_v17 = vpop.f32.mrf.mxu2  ;;  %v2517_v57 = vmul.f32 %v14331_v39, %v19383_v31  ;;  %v419_v31 = vld [vmem:[%s14907_s21 + $0xc0] sm:$0xff] }
 0x4a7   : > { %19381 = vst [vmem:[#allocation164_spill] sm:$0xff] %v15339_v17  ;;  %v2675_v52 = vadd.f32 %v14355_v23, %v2634_v18  ;;  %v19388_v17 = vld [vmem:[#allocation65_spill] sm:$0xff] }
 0x4a8   : > { %5018 = vmax.xlane.f32.xlu2 %v5017_v25  ;;  %v2557_v46 = vadd.f32 %v2517_v57, %v2476_v45  ;;  %v19392_v57 = vld [vmem:[#allocation24_spill] sm:$0xff] }
 0x4aa   : > { %v15346_v25 = vpop.f32.mrf.mxu3 }
 0x4ab   : > { %v15337_v28 = vpop.f32.mrf.mxu0  ;;  %v5409_v35 = vpop.xlane.xlu1 %5408  ;;  %19384 = vst [vmem:[#allocation165_spill] sm:$0xff] %v15346_v25  ;;  %v2598_v25 = vmul.f32 %v14342_v48, %v19388_v17 }
 0x4ac   : > { %19380 = vst [vmem:[#allocation163_spill] sm:$0xff] %v15337_v28  ;;  %11409 = vrcp.f32 %v5409_v35 }
 0x4ad   : > { %v2638_v10 = vadd.f32 %v2598_v25, %v2557_v46 }
 0x4ae   : > { %11001 = vmatmul.msk.bf16.gmra.mxu0 %vm2698_vm0, %v7591_v26  ;;  %v15353_v26 = vpop.f32.mrf.mxu2 }
 0x4af   : > { %19387 = vst [vmem:[#allocation167_spill] sm:$0xff] %v15353_v26  ;;  %v7592_v26 = vpack.c.bf16 %v420_v14, %v419_v31  ;;  %v2679_v25 = vadd.f32 %v14355_v23, %v2638_v10  ;;  %v19394_v14 = vld [vmem:[#allocation31_spill] sm:$0xff] }
 0x4b2   : > { %v11410_v15 = vpop.eup %11409  ;;  %v15363_v56 = vpop.f32.mrf.mxu3 }
 0x4b3   : > { %v5629_v35 = vmul.f32 %v11410_v15, %v15036_v4  ;;  %v15351_v12 = vpop.f32.mrf.mxu0  ;;  %v5421_v8 = vpop.xlane.xlu2 %5420  ;;  %v2515_v4 = vmul.f32 %v14331_v39, %v19389_v21  ;;  %19390 = vst [vmem:[#allocation168_spill] sm:$0xff] %v15363_v56 }
 0x4b4   : > { %19386 = vst [vmem:[#allocation166_spill] sm:$0xff] %v15351_v12  ;;  %11411 = vrcp.f32 %v5421_v8 }
 0x4b5   : > { %10959 = vmatmul.msk.f32.vlgmr.msra.gmra.mxu1 %vm4779_vm1, %v5629_v35  ;;  %v2474_v35 = vmul.f32 %v14326_v33, %v19392_v57 }
 0x4b6   : > { %6989 = vmatpush.msra.mxu1 %v2675_v52  ;;  %v15373_v21 = vpop.f32.mrf.mxu2 }
 0x4b7   : > { %v2555_v46 = vadd.f32 %v2515_v4, %v2474_v35  ;;  %19393 = vst [vmem:[#allocation170_spill] sm:$0xff] %v15373_v21  ;;  %v19403_v21 = vld [vmem:[#allocation93_spill] sm:$0xff] }
 0x4ba   : > { %v11412_v15 = vpop.eup %11411  ;;  %v15384_v4 = vpop.f32.mrf.mxu3 }
 0x4bb   : > { %v5633_v8 = vmul.f32 %v11412_v15, %v15052_v19  ;;  %v15366_v18 = vpop.f32.mrf.mxu0  ;;  %v4956_v45 = vpop.xlane.xlu2 %4955  ;;  %v1035_v19 = vmul.f32 %v15227_v43, %v19302_v47  ;;  %v2596_v15 = vmul.f32 %v14342_v48, %v19394_v14  ;;  %19395 = vst [vmem:[#allocation171_spill] sm:$0xff] %v15384_v4  ;;  %v1115_v47 = vmul.f32 %v15248_v62, %v19301_v53 }
 0x4bc   : > { %19391 = vst [vmem:[#allocation169_spill] sm:$0xff] %v15366_v18  ;;  %v5078_v52 = vsub.f32 %v15054_v61, %v4956_v45  ;;  %v5415_v17 = vpop.xlane.xlu1 %5414  ;;  %v1034_v61 = vmul.f32 %v15227_v43, %v19299_v55  ;;  %v7503_v4 = vmax.f32 %v15164_v38, 0.0 }
 0x4bd   : > { %11413 = vrcp.f32 %v5415_v17  ;;  %10963 = vmatmul.msk.f32.vlgmr.msrb.gmra.mxu1 %vm4779_vm1, %v5633_v8  ;;  %v994_v17 = vmul.f32 %v15222_v44, %v19303_v5  ;;  %v2636_v10 = vadd.f32 %v2596_v15, %v2555_v46  ;;  %v1116_v46 = vmul.f32 %v15248_v62, %v19308_v41 }
 0x4be   : > { %v5216_v31 = vmul.f32 1.442695, %v5078_v52  ;;  %7081 = vmatpush.msrb.mxu1 %v2679_v25  ;;  %11002 = vmatmul.msk.bf16.gmra.mxu0 %vm2698_vm0, %v7592_v26  ;;  %v993_v26 = vmul.f32 %v15222_v44, %v19300_v37  ;;  %v7772_v41 = vadd.f32 %v15265_v60, %v15214_v22  ;;  %v19401_v22 = vld [vmem:[#allocation85_spill] sm:$0xff] }
 0x4bf   : > { %v1075_v45 = vadd.f32 %v1035_v19, %v994_v17 }
 0x4c0   : > { %11415 = vpow2.f32 %v5216_v31  ;;  %v1074_v25 = vadd.f32 %v1034_v61, %v993_v26  ;;  %v2677_v31 = vadd.f32 %v14355_v23, %v2636_v10  ;;  %v7773_v61 = vadd.f32 %v15265_v60, %v15259_v32  ;;  %v19398_v26 = vld [vmem:[#allocation28_spill] sm:$0xff] }
 0x4c1   : > { %v1156_v19 = vadd.f32 %v1116_v46, %v1075_v45  ;;  %v19400_v46 = vld [vmem:[#allocation39_spill] sm:$0xff] }
 0x4c2   : > { %v1155_v53 = vadd.f32 %v1115_v47, %v1074_v25  ;;  %v2514_v47 = vmul.f32 %v14331_v39, %v19398_v26  ;;  %v19426_v26 = vld [vmem:[#allocation48_spill] sm:$0xff] }
 0x4c3   : > { %v11414_v8 = vpop.eup %11413  ;;  %v15390_v35 = vpop.f32.mrf.mxu0 }
 0x4c4   : > { %19396 = vst [vmem:[#allocation172_spill] sm:$0xff] %v15390_v35  ;;  %v4983_v52 = vpop.xlane.xlu2 %4982  ;;  %v5631_v55 = vmul.f32 %v11414_v8, %v15069_v6  ;;  %v421_v6 = vld [vmem:[%s14907_s21 + $0xd0] sm:$0xff]  ;;  %v422_v8 = vld [vmem:[%s14907_s21 + $0xd8] sm:$0xff]  ;;  %v1196_v45 = vadd.f32 %v15276_v13, %v1155_v53  ;;  %v4990_v53 = vsel %vm4779_vm1, %v15110_v27, -inf }
 0x4c5   : > { %v5087_v5 = vsub.f32 %v15082_v59, %v4983_v52  ;;  %v15404_v59 = vpop.f32.mrf.mxu2  ;;  %v7593_v10 = vpack.c.bf16 %v422_v8, %v421_v6  ;;  %v1197_v52 = vadd.f32 %v15276_v13, %v1156_v19  ;;  %v2595_v6 = vmul.f32 %v14342_v48, %v19401_v22 }
 0x4c6   : > { %v15397_v37 = vpop.eup %11415  ;;  %10961 = vmatmul.msk.f32.vlgmr.msrb.gmra.mxu3 %vm4779_vm1, %v5631_v55  ;;  %19397 = vst [vmem:[#allocation173_spill] sm:$0xff] %v15404_v59  ;;  %v15414_v55 = vpop.f32.mrf.mxu3  ;;  %v7502_v59 = vmax.f32 %v15174_v11, 0.0 }
 0x4c7   : > { %v5234_v15 = vmul.f32 1.442695, %v5087_v5  ;;  %7035 = vmatpush.msrb.mxu3 %v2677_v31  ;;  %v5434_v17 = vsel %vm4779_vm1, %v15397_v37, 0.0  ;;  %v2473_v31 = vmul.f32 %v14326_v33, %v19400_v46  ;;  %v18732_v32 = vmax.f32 %v15414_v55, 0.0  ;;  %v19408_v46 = vld [vmem:[#allocation97_spill] sm:$0xff] }
 0x4c8   : > { %5435 = vadd.xlane.f32.xlu2 %v5434_v17  ;;  %v7858_v17 = vsub.f32 %v7773_v61, %v1197_v52 }
 0x4c9   : > { %11417 = vpow2.f32 %v5234_v15  ;;  %v7857_v15 = vsub.f32 %v7772_v41, %v1196_v45  ;;  %v2554_v19 = vadd.f32 %v2514_v47, %v2473_v31  ;;  %v2521_v47 = vmul.f32 %v14331_v39, %v19403_v21 }
 0x4ca   : > { %v7898_v45 = vmul.f32 %v7858_v17, %v7503_v4 }
 0x4cb   : > { %v15416_v5 = vpop.f32.mrf.mxu0  ;;  %v7897_v52 = vmul.f32 %v7857_v15, %v7502_v59 }
 0x4cc   : > { %19399 = vst [vmem:[#allocation174_spill] sm:$0xff] %v15416_v5  ;;  %v5412_v25 = vpop.xlane.xlu0 %5411  ;;  %v15439_v38 = vadd.f32 %v7898_v45, %v18732_v32  ;;  %v19406_v32 = vld [vmem:[#allocation63_spill] sm:$0xff] }
 0x4cd   : > { %11419 = vrcp.f32 %v5412_v25  ;;  %v2635_v25 = vadd.f32 %v2595_v6, %v2554_v19  ;;  %v2602_v56 = vmul.f32 %v14342_v48, %v19406_v32 }
 0x4ce   : > { %11003 = vmatmul.msk.bf16.gmra.mxu0 %vm2698_vm0, %v7593_v10 }
 0x4cf   : > { %v15422_v8 = vpop.eup %11417 }
 0x4d0   : > { %v5461_v41 = vsel %vm4779_vm1, %v15422_v8, 0.0  ;;  %4991 = vmax.xlane.f32.xlu2 %v4990_v53  ;;  %v19404_v53 = vld [vmem:[#allocation51_spill] sm:$0xff] }
 0x4d1   : > { %5462 = vadd.xlane.f32.xlu0 %v5461_v41  ;;  %v15432_v61 = vpop.f32.mrf.mxu2  ;;  %v2480_v59 = vmul.f32 %v14326_v33, %v19404_v53  ;;  %v2676_v41 = vadd.f32 %v14355_v23, %v2635_v25 }
 0x4d2   : > { %19402 = vst [vmem:[#allocation175_spill] sm:$0xff] %v15432_v61  ;;  %v18731_v10 = vmax.f32 %v15432_v61, 0.0 }
 0x4d3   : > { %v11420_v11 = vpop.eup %11419  ;;  %v15452_v45 = vpop.f32.mrf.mxu0 }
 0x4d4   : > { %v15443_v31 = vadd.f32 %v7897_v52, %v18731_v10  ;;  %v5630_v4 = vmul.f32 %v11420_v11, %v15099_v63  ;;  %v4959_v17 = vpop.xlane.xlu0 %4958  ;;  %19405 = vst [vmem:[#allocation93_spill] sm:$0xff] %v15452_v45  ;;  %v2561_v52 = vadd.f32 %v2521_v47, %v2480_v59  ;;  %v423_v63 = vld [vmem:[%s14907_s21 + $0xe0] sm:$0xff]  ;;  %v424_v11 = vld [vmem:[%s14907_s21 + $0xe8] sm:$0xff] }
 0x4d5   : > { %v5079_v6 = vsub.f32 %v15046_v2, %v4959_v17  ;;  %v5433_v19 = vpop.xlane.xlu1 %5432  ;;  %v7594_v14 = vpack.c.bf16 %v424_v11, %v423_v63  ;;  %v19407_v2 = vld [vmem:[#allocation104_spill] sm:$0xff]  ;;  %v2488_v11 = vmul.f32 %v14326_v33, %v19263_v24 }
 0x4d6   : > { %11421 = vrcp.f32 %v5433_v19  ;;  %10960 = vmatmul.msk.f32.vlgmr.msra.gmra.mxu2 %vm4779_vm1, %v5630_v4  ;;  %v2642_v15 = vadd.f32 %v2602_v56, %v2561_v52  ;;  %v2484_v17 = vmul.f32 %v14326_v33, %v19407_v2  ;;  %v2525_v19 = vmul.f32 %v14331_v39, %v19408_v46 }
 0x4d7   : > { %v5218_v10 = vmul.f32 1.442695, %v5079_v6  ;;  %7012 = vmatpush.msra.mxu2 %v2676_v41 }
 0x4d8   : > { %v2683_v6 = vadd.f32 %v14355_v23, %v2642_v15  ;;  %v2565_v56 = vadd.f32 %v2525_v19, %v2484_v17  ;;  %v19411_v19 = vld [vmem:[#allocation116_spill] sm:$0xff] }
 0x4d9   : > { %11423 = vpow2.f32 %v5218_v10 }
 0x4db   : > { %v15470_v52 = vpop.f32.mrf.mxu0 }
 0x4dc   : > { %v11422_v25 = vpop.eup %11421  ;;  %v4971_v22 = vpop.xlane.xlu0 %4970  ;;  %19409 = vst [vmem:[#allocation51_spill] sm:$0xff] %v15470_v52 }
 0x4dd   : > { %v5637_v47 = vmul.f32 %v11422_v25, %v15116_v58  ;;  %v5083_v4 = vsub.f32 %v15061_v40, %v4971_v22  ;;  %v5445_v59 = vpop.xlane.xlu1 %5444  ;;  %v19410_v40 = vld [vmem:[#allocation13_spill] sm:$0xff] }
 0x4de   : > { %11425 = vrcp.f32 %v5445_v59  ;;  %11004 = vmatmul.msk.bf16.gmra.mxu0 %vm2698_vm0, %v7594_v14  ;;  %v2606_v22 = vmul.f32 %v14342_v48, %v19410_v40 }
 0x4df   : > { %v15467_v10 = vpop.eup %11423  ;;  %v5226_v41 = vmul.f32 1.442695, %v5083_v4  ;;  %10967 = vmatmul.msk.f32.vlgmr.msra.gmra.mxu1 %vm4779_vm1, %v5637_v47  ;;  %v2529_v47 = vmul.f32 %v14331_v39, %v19411_v19  ;;  %v19412_v4 = vld [vmem:[#allocation119_spill] sm:$0xff] }
 0x4e0   : > { %7173 = vmatpush.msra.mxu1 %v2683_v6  ;;  %v5437_v58 = vsel %vm4779_vm1, %v15467_v10, 0.0  ;;  %v2646_v14 = vadd.f32 %v2606_v22, %v2565_v56  ;;  %v2610_v59 = vmul.f32 %v14342_v48, %v19412_v4  ;;  %v425_v56 = vld [vmem:[%s14907_s21 + $0xf0] sm:$0xff] }
 0x4e1   : > { %11427 = vpow2.f32 %v5226_v41  ;;  %5438 = vadd.xlane.f32.xlu1 %v5437_v58  ;;  %v426_v41 = vld [vmem:[%s14907_s21 + $0xf8] sm:$0xff] }
 0x4e2   : > { %v2687_v25 = vadd.f32 %v14355_v23, %v2646_v14 }
 0x4e3   : > { %v15491_v22 = vpop.f32.mrf.mxu0 }
 0x4e4   : > { %v11426_v15 = vpop.eup %11425  ;;  %v5457_v63 = vpop.xlane.xlu0 %5456  ;;  %19413 = vst [vmem:[#allocation63_spill] sm:$0xff] %v15491_v22 }
 0x4e5   : > { %v5641_v17 = vmul.f32 %v11426_v15, %v15130_v51  ;;  %11429 = vrcp.f32 %v5457_v63  ;;  %v2569_v51 = vadd.f32 %v2529_v47, %v2488_v11  ;;  %v7595_v15 = vpack.c.bf16 %v426_v41, %v425_v56  ;;  %v19417_v41 = vld [vmem:[#allocation91_spill] sm:$0xff] }
 0x4e6   : > { %v5002_v11 = vsel %vm4779_vm1, %v15132_v50, -inf }
 0x4e7   : > { %v15484_v6 = vpop.eup %11427  ;;  %10971 = vmatmul.msk.f32.vlgmr.msrb.gmra.mxu1 %vm4779_vm1, %v5641_v17  ;;  %v2650_v14 = vadd.f32 %v2610_v59, %v2569_v51 }
 0x4e8   : > { %7265 = vmatpush.msrb.mxu1 %v2687_v25  ;;  %v5449_v58 = vsel %vm4779_vm1, %v15484_v6, 0.0 }
 0x4e9   : > { %5450 = vadd.xlane.f32.xlu1 %v5449_v58  ;;  %v2691_v17 = vadd.f32 %v14355_v23, %v2650_v14  ;;  %v2599_v58 = vmul.f32 %v14342_v48, %v19417_v41  ;;  %v19419_v14 = vld [vmem:[#allocation23_spill] sm:$0xff] }
 0x4eb   : > { %v11430_v63 = vpop.eup %11429  ;;  %v15500_v47 = vpop.f32.mrf.mxu0 }
 0x4ec   : > { %v5645_v40 = vmul.f32 %v11430_v63, %v15150_v49  ;;  %v4995_v46 = vpop.xlane.xlu0 %4994  ;;  %19414 = vst [vmem:[#allocation176_spill] sm:$0xff] %v15500_v47  ;;  %v19415_v49 = vld [vmem:[#allocation90_spill] sm:$0xff] }
 0x4ed   : > { %v5091_v2 = vsub.f32 %v15103_v36, %v4995_v46  ;;  %v2518_v46 = vmul.f32 %v14331_v39, %v19415_v49 }
 0x4ee   : > { %11005 = vmatmul.msk.bf16.gmra.mxu0 %vm2698_vm0, %v7595_v15  ;;  %v1040_v15 = vmul.f32 %v15227_v43, %v19419_v14  ;;  %v2492_v14 = vmul.f32 %v14326_v33, %v19273_v54 }
 0x4ef   : > { %v5242_v25 = vmul.f32 1.442695, %v5091_v2  ;;  %10975 = vmatmul.msk.f32.vlgmr.msra.gmra.mxu1 %vm4779_vm1, %v5645_v40  ;;  %v19416_v40 = vld [vmem:[#allocation83_spill] sm:$0xff] }
 0x4f0   : > { %7357 = vmatpush.msra.mxu1 %v2691_v17  ;;  %v2477_v56 = vmul.f32 %v14326_v33, %v19416_v40  ;;  %v19420_v17 = vld [vmem:[#allocation5_spill] sm:$0xff] }
 0x4f1   : > { %11431 = vpow2.f32 %v5242_v25  ;;  %5003 = vmax.xlane.f32.xlu1 %v5002_v11  ;;  %v999_v25 = vmul.f32 %v15222_v44, %v19420_v17  ;;  %v19421_v11 = vld [vmem:[#allocation37_spill] sm:$0xff] }
 0x4f2   : > { %v2558_v63 = vadd.f32 %v2518_v46, %v2477_v56 }
 0x4f3   : > { %v15512_v51 = vpop.f32.mrf.mxu0  ;;  %v1080_v24 = vadd.f32 %v1040_v15, %v999_v25  ;;  %v19423_v15 = vld [vmem:[#allocation86_spill] sm:$0xff] }
 0x4f4   : > { %19418 = vst [vmem:[#allocation177_spill] sm:$0xff] %v15512_v51  ;;  %v2639_v4 = vadd.f32 %v2599_v58, %v2558_v63  ;;  %v7778_v58 = vadd.f32 %v15265_v60, %v15366_v18  ;;  %v2519_v25 = vmul.f32 %v14331_v39, %v19423_v15  ;;  %v19425_v18 = vld [vmem:[#allocation147_spill] sm:$0xff] }
 0x4f5   : > { %v19428_v15 = vld [vmem:[#allocation107_spill] sm:$0xff] }
 0x4f6   : > { %v2680_v56 = vadd.f32 %v14355_v23, %v2639_v4  ;;  %v448_v4 = vld [vmem:[%s18312_s5 + $0x18] sm:$0xff]  ;;  %v18740_v61 = vmax.f32 %v19428_v15, 0.0 }
 0x4f7   : > { %v15502_v59 = vpop.eup %11431 }
 0x4f8   : > { %v5473_v36 = vsel %vm4779_vm1, %v15502_v59, 0.0 }
 0x4f9   : > { %5474 = vadd.xlane.f32.xlu2 %v5473_v36  ;;  %v1121_v36 = vmul.f32 %v15248_v62, %v19421_v11 }
 0x4fb   : > { %v1161_v46 = vadd.f32 %v1121_v36, %v1080_v24  ;;  %v15529_v63 = vpop.f32.mrf.mxu0  ;;  %v447_v24 = vld [vmem:[%s18312_s5 + $0x10] sm:$0xff] }
 0x4fc   : > { %19422 = vst [vmem:[#allocation23_spill] sm:$0xff] %v15529_v63 }
 0x4fd   : > { %v5424_v2 = vpop.xlane.xlu1 %5423 }
 0x4fe   : > { %11433 = vrcp.f32 %v5424_v2  ;;  %v2533_v2 = vmul.f32 %v14331_v39, %v19270_v42 }
 0x500   : > { %v2573_v17 = vadd.f32 %v2533_v2, %v2492_v14  ;;  %v459_v14 = vpack.c.bf16 %v447_v24, %v447_v24 }
 0x504   : > { %v11434_v19 = vpop.eup %11433 }
 0x505   : > { %v5634_v41 = vmul.f32 %v11434_v19, %v15199_v9  ;;  %v5481_v40 = vpop.xlane.xlu0 %5480  ;;  %v5469_v49 = vpop.xlane.xlu1 %5468  ;;  %v2614_v9 = vmul.f32 %v14342_v48, %v19274_v20  ;;  %v1202_v19 = vadd.f32 %v15276_v13, %v1161_v46  ;;  %v19424_v46 = vld [vmem:[#allocation128_spill] sm:$0xff] }
 0x506   : > { %11435 = vrcp.f32 %v5469_v49  ;;  %v7508_v20 = vmax.f32 %v19424_v46, 0.0 }
 0x507   : > { %10964 = vmatmul.msk.f32.vlgmr.msrb.gmra.mxu2 %vm4779_vm1, %v5634_v41  ;;  %v2654_v49 = vadd.f32 %v2614_v9, %v2573_v17  ;;  %v7863_v41 = vsub.f32 %v7778_v58, %v1202_v19  ;;  %11437 = vrcp.f32 %v5481_v40  ;;  %v2478_v17 = vmul.f32 %v14326_v33, %v19426_v26  ;;  %v445_v58 = vld [vmem:[%s18312_s5] sm:$0xff]  ;;  %v446_v40 = vld [vmem:[%s18312_s5 + $0x8] sm:$0xff]  ;;  %v19427_v19 = vld [vmem:[#allocation89_spill] sm:$0xff] }
 0x508   : > { %7104 = vmatpush.msrb.mxu2 %v2680_v56  ;;  %v460_v56 = vpack.c.bf16 %v448_v4, %v448_v4  ;;  %v457_v46 = vpack.c.bf16 %v445_v58, %v445_v58  ;;  %v458_v26 = vpack.c.bf16 %v446_v40, %v446_v40 }
 0x509   : > { %v2695_v9 = vadd.f32 %v14355_v23, %v2654_v49  ;;  %v7903_v24 = vmul.f32 %v7863_v41, %v7508_v20 }
 0x50a   : > { %v8200_v41 = vunpack.c.l.b16 %v457_v46 }
 0x50b   : > { %v5427_v42 = vpop.xlane.xlu2 %5426 }
 0x50c   : > { %v11436_v11 = vpop.eup %11435  ;;  %11439 = vrcp.f32 %v5427_v42  ;;  %v15558_v42 = vpop.f32.mrf.mxu0 }
 0x50d   : > { %v5493_v36 = vpop.xlane.xlu0 %5492  ;;  %v4968_v2 = vpop.xlane.xlu1 %4967  ;;  %v5649_v54 = vmul.f32 %v11436_v11, %v15217_v29  ;;  %v2600_v29 = vmul.f32 %v14342_v48, %v19427_v19  ;;  %v8202_v11 = vunpack.c.l.b16 %v459_v14  ;;  %19429 = vst [vmem:[#allocation5_spill] sm:$0xff] %v15558_v42  ;;  %v15562_v19 = vadd.f32 %v7903_v24, %v18740_v61  ;;  %v19430_v14 = vld [vmem:[#allocation8_spill] sm:$0xff] }
 0x50e   : > { %v5082_v57 = vsub.f32 %v19425_v18, %v4968_v2  ;;  %v2559_v18 = vadd.f32 %v2519_v25, %v2478_v17  ;;  %v8203_v2 = vunpack.c.l.b16 %v460_v56  ;;  %v11438_v51 = vpop.eup %11437  ;;  %v8201_v25 = vunpack.c.l.b16 %v458_v26  ;;  %v19431_v17 = vld [vmem:[#allocation144_spill] sm:$0xff] }
 0x50f   : > { %10979 = vmatmul.msk.f32.vlgmr.msrb.gmra.mxu1 %vm4779_vm1, %v5649_v54  ;;  %v5653_v56 = vmul.f32 %v11438_v51, %v19430_v14  ;;  %v19435_v14 = vld [vmem:[#allocation77_spill] sm:$0xff] }
 0x510   : > { %v5224_v4 = vmul.f32 1.442695, %v5082_v57  ;;  %7449 = vmatpush.msrb.mxu1 %v2695_v9  ;;  %v2640_v49 = vadd.f32 %v2600_v29, %v2559_v18  ;;  %v15564_v57 = vpack.c.b16 %v8203_v2, %v8202_v11  ;;  %v19434_v11 = vld [vmem:[#allocation143_spill] sm:$0xff] }
 0x512   : > { %11441 = vpow2.f32 %v5224_v4  ;;  %v11440_v20 = vpop.eup %11439  ;;  %v2681_v4 = vadd.f32 %v14355_v23, %v2640_v49 }
 0x513   : > { %11443 = vrcp.f32 %v5493_v36  ;;  %v5635_v58 = vmul.f32 %v11440_v20, %v19431_v17  ;;  %v5007_v9 = vpop.xlane.xlu2 %5006 }
 0x514   : > { %v5095_v29 = vsub.f32 %v15126_v34, %v5007_v9  ;;  %v15580_v51 = vpop.f32.mrf.mxu0 }
 0x515   : > { %v4980_v54 = vpop.xlane.xlu0 %4979  ;;  %10965 = vmatmul.msk.f32.vlgmr.msra.gmra.mxu3 %vm4779_vm1, %v5635_v58  ;;  %19433 = vst [vmem:[#allocation128_spill] sm:$0xff] %v15580_v51 }
 0x516   : > { %v5086_v40 = vsub.f32 %v15094_v7, %v4980_v54  ;;  %v5250_v36 = vmul.f32 1.442695, %v5095_v29  ;;  %7127 = vmatpush.msra.mxu3 %v2681_v4  ;;  %v15578_v7 = vpack.c.b16 %v8201_v25, %v8200_v41  ;;  %v19438_v29 = vld [vmem:[#allocation76_spill] sm:$0xff] }
 0x517   : > { %10983 = vmatmul.msk.f32.vlgmr.msra.gmra.mxu1 %vm4779_vm1, %v5653_v56  ;;  %v1041_v56 = vmul.f32 %v15227_v43, %v19435_v14  ;;  %v1122_v4 = vmul.f32 %v15248_v62, %v19438_v29  ;;  %v19445_v29 = vld [vmem:[#allocation32_spill] sm:$0xff] }
 0x518   : > { %v15571_v24 = vpop.eup %11441  ;;  %v5232_v18 = vmul.f32 1.442695, %v5086_v40  ;;  %8274 = vmatpush.bf16.msra.mxu1 %v15564_v57  ;;  %19432 = vst [vmem:[#allocation37_spill] sm:$0xff] %v15578_v7 }
 0x519   : > { %v5446_v26 = vsel %vm4779_vm1, %v15571_v24, 0.0  ;;  %v11444_v34 = vpop.eup %11443 }
 0x51a   : > { %11445 = vpow2.f32 %v5232_v18  ;;  %5447 = vadd.xlane.f32.xlu1 %v5446_v26  ;;  %v5657_v2 = vmul.f32 %v11444_v34, %v19434_v11  ;;  %v19439_v18 = vpack.c.bf16 %v15323_v16, %v15319_v30  ;;  %v19440_v26 = vld [vmem:[#allocation40_spill] sm:$0xff]  ;;  %v7779_v30 = vadd.f32 %v15265_v60, %v15390_v35 }
 0x51b   : > { %11447 = vpow2.f32 %v5250_v36  ;;  %v5019_v46 = vpop.xlane.xlu2 %5018  ;;  %v1048_v34 = vmul.f32 %v15227_v43, %v19440_v26 }
 0x51c   : > { %8275 = vmatpush.bf16.msra.mxu1 %v15578_v7  ;;  %v5099_v49 = vsub.f32 %v15147_v3, %v5019_v46  ;;  %v19436_v3 = vld [vmem:[#allocation29_spill] sm:$0xff]  ;;  %v15598_v9 = vpop.f32.mrf.mxu0 }
 0x51d   : > { %v1000_v58 = vmul.f32 %v15222_v44, %v19436_v3  ;;  %19437 = vst [vmem:[#allocation147_spill] sm:$0xff] %v15598_v9  ;;  %v19444_v3 = vld [vmem:[#allocation72_spill] sm:$0xff] }
 0x51e   : > { %v5258_v41 = vmul.f32 1.442695, %v5099_v49 }
 0x51f   : > { %10987 = vmatmul.msk.f32.vlgmr.msrb.gmra.mxu1 %vm4779_vm1, %v5657_v2  ;;  %v1081_v40 = vadd.f32 %v1041_v56, %v1000_v58  ;;  %v19441_v2 = vld [vmem:[#allocation130_spill] sm:$0xff]  ;;  %v1037_v58 = vmul.f32 %v15227_v43, %v19444_v3  ;;  %v19450_v3 = vld [vmem:[#allocation71_spill] sm:$0xff] }
 0x520   : > { %v15585_v20 = vpop.eup %11445  ;;  %11449 = vpow2.f32 %v5258_v41  ;;  %v5014_v46 = vsel %vm4779_vm1, %v19441_v2, -inf  ;;  %v15614_v41 = vpop.f32.mrf.mxu1  ;;  %v19443_v56 = vld [vmem:[#allocation62_spill] sm:$0xff] }
 0x521   : > { %v15588_v54 = vpop.eup %11447  ;;  %v5458_v25 = vsel %vm4779_vm1, %v15585_v20, 0.0  ;;  %v1162_v11 = vadd.f32 %v1122_v4, %v1081_v40  ;;  %v1129_v4 = vmul.f32 %v15248_v62, %v19445_v29  ;;  %v7786_v29 = vadd.f32 %v15265_v60, %v15529_v63  ;;  %v19461_v63 = vld [vmem:[#allocation2_spill] sm:$0xff] }
 0x522   : > { %v5485_v17 = vsel %vm4779_vm1, %v15588_v54, 0.0  ;;  %5459 = vadd.xlane.f32.xlu1 %v5458_v25  ;;  %v19442_v25 = vld [vmem:[#allocation21_spill] sm:$0xff] }
 0x523   : > { %5486 = vadd.xlane.f32.xlu0 %v5485_v17  ;;  %v1007_v14 = vmul.f32 %v15222_v44, %v19442_v25  ;;  %v1036_v17 = vmul.f32 %v15227_v43, %v19443_v56  ;;  %v1203_v40 = vadd.f32 %v15276_v13, %v1162_v11  ;;  %v1118_v11 = vmul.f32 %v15248_v62, %v19450_v3 }
 0x525   : > { %v1088_v16 = vadd.f32 %v1048_v34, %v1007_v14  ;;  %v7864_v25 = vsub.f32 %v7779_v30, %v1203_v40  ;;  %v15631_v34 = vpop.f32.mrf.mxu0  ;;  %v19449_v14 = vld [vmem:[#allocation135_spill] sm:$0xff] }
 0x526   : > { %v15606_v36 = vpop.eup %11449  ;;  %19448 = vst [vmem:[#allocation107_spill] sm:$0xff] %v15631_v34  ;;  %v7509_v56 = vmax.f32 %v19449_v14, 0.0 }
 0x527   : > { %11010 = vmatmul.msk.bf16.vlgmr.msra.gmra.mxu1 %vm2698_vm0, %v19439_v18  ;;  %v5497_v49 = vsel %vm4779_vm1, %v15606_v36, 0.0  ;;  %v19446_v18 = vld [vmem:[#allocation3_spill] sm:$0xff]  ;;  %v1169_v61 = vadd.f32 %v1129_v4, %v1088_v16 }
 0x528   : > { %5498 = vadd.xlane.f32.xlu2 %v5497_v49  ;;  %v995_v26 = vmul.f32 %v15222_v44, %v19446_v18  ;;  %v19451_v18 = vld [vmem:[#allocation34_spill] sm:$0xff]  ;;  %v7904_v16 = vmul.f32 %v7864_v25, %v7509_v56  ;;  %v19452_v25 = vpack.c.bf16 %v15439_v38, %v15443_v31 }
 0x529   : > { %v1117_v7 = vmul.f32 %v15248_v62, %v19451_v18  ;;  %v1210_v40 = vadd.f32 %v15276_v13, %v1169_v61  ;;  %v19457_v38 = vld [vmem:[#allocation54_spill] sm:$0xff] }
 0x52a   : > { %v1076_v35 = vadd.f32 %v1036_v17, %v995_v26  ;;  %v7774_v26 = vadd.f32 %v15265_v60, %v15297_v0  ;;  %v2481_v31 = vmul.f32 %v14326_v33, %v19457_v38 }
 0x52b   : > { %5015 = vmax.xlane.f32.xlu0 %v5014_v46  ;;  %v19447_v46 = vld [vmem:[#allocation4_spill] sm:$0xff] }
 0x52c   : > { %v996_v49 = vmul.f32 %v15222_v44, %v19447_v46  ;;  %v1157_v4 = vadd.f32 %v1117_v7, %v1076_v35  ;;  %v19453_v35 = vld [vmem:[#allocation146_spill] sm:$0xff] }
 0x52d   : > { %v7516_v61 = vmax.f32 %v19453_v35, 0.0  ;;  %v15661_v3 = vpop.f32.mrf.mxu0  ;;  %v19459_v35 = vld [vmem:[#allocation101_spill] sm:$0xff] }
 0x52e   : > { %v1077_v9 = vadd.f32 %v1037_v58, %v996_v49  ;;  %v7871_v58 = vsub.f32 %v7786_v29, %v1210_v40  ;;  %v7775_v49 = vadd.f32 %v15265_v60, %v15313_v1  ;;  %v1198_v7 = vadd.f32 %v15276_v13, %v1157_v4  ;;  %19454 = vst [vmem:[#allocation8_spill] sm:$0xff] %v15661_v3  ;;  %v19464_v3 = vld [vmem:[#allocation61_spill] sm:$0xff] }
 0x52f   : > { %v1039_v1 = vmul.f32 %v15227_v43, %v19461_v63 }
 0x530   : > { %v1158_v46 = vadd.f32 %v1118_v11, %v1077_v9  ;;  %v7911_v56 = vmul.f32 %v7871_v58, %v7516_v61  ;;  %v19455_v11 = vld [vmem:[#allocation92_spill] sm:$0xff]  ;;  %v7859_v18 = vsub.f32 %v7774_v26, %v1198_v7  ;;  %v19460_v58 = vld [vmem:[#allocation118_spill] sm:$0xff]  ;;  %v18752_v26 = vmax.f32 %v15614_v41, 0.0 }
 0x531   : > { %v2522_v29 = vmul.f32 %v14331_v39, %v19455_v11  ;;  %v7505_v61 = vmax.f32 %v19460_v58, 0.0  ;;  %v19463_v11 = vld [vmem:[#allocation109_spill] sm:$0xff]  ;;  %v1038_v58 = vmul.f32 %v15227_v43, %v19464_v3 }
 0x532   : > { %v15638_v51 = vpop.f32.mrf.mxu1  ;;  %v1199_v9 = vadd.f32 %v15276_v13, %v1158_v46  ;;  %v7504_v46 = vmax.f32 %v19459_v35, 0.0  ;;  %v18753_v35 = vmax.f32 %v19463_v11, 0.0 }
 0x533   : > { %v18745_v30 = vmax.f32 %v15638_v51, 0.0 }
 0x535   : > { %v15646_v17 = vadd.f32 %v7904_v16, %v18745_v30  ;;  %v7860_v16 = vsub.f32 %v7775_v49, %v1199_v9  ;;  %v19456_v30 = vld [vmem:[#allocation111_spill] sm:$0xff]  ;;  %v2562_v49 = vadd.f32 %v2522_v29, %v2481_v31  ;;  %v7899_v9 = vmul.f32 %v7859_v18, %v7504_v46  ;;  %v19465_v31 = vld [vmem:[#allocation25_spill] sm:$0xff]  ;;  %v19467_v46 = vld [vmem:[#allocation66_spill] sm:$0xff]  ;;  %v15695_v3 = vpop.f32.mrf.mxu0 }
 0x536   : > { %v18751_v14 = vmax.f32 %v19456_v30, 0.0  ;;  %19468 = vst [vmem:[#allocation144_spill] sm:$0xff] %v15695_v3 }
 0x537   : > { %11011 = vmatmul.msk.bf16.gmra.mxu1 %vm2698_vm0, %v19452_v25  ;;  %v19458_v25 = vld [vmem:[#allocation98_spill] sm:$0xff]  ;;  %v7900_v38 = vmul.f32 %v7860_v16, %v7505_v61  ;;  %v1120_v16 = vmul.f32 %v15248_v62, %v19467_v46  ;;  %v7777_v46 = vadd.f32 %v15265_v60, %v15351_v12 }
 0x538   : > { %v2603_v4 = vmul.f32 %v14342_v48, %v19458_v25  ;;  %v15677_v7 = vadd.f32 %v7911_v56, %v18751_v14  ;;  %v997_v56 = vmul.f32 %v15222_v44, %v19465_v31  ;;  %v19466_v14 = vld [vmem:[#allocation74_spill] sm:$0xff] }
 0x539   : > { %v7940_v63 = vadd.f32 %v7900_v38, %v18752_v26  ;;  %v1119_v18 = vmul.f32 %v15248_v62, %v19466_v14 }
 0x53a   : > { %v2643_v25 = vadd.f32 %v2603_v4, %v2562_v49  ;;  %v7939_v4 = vadd.f32 %v7899_v9, %v18753_v35  ;;  %v1078_v38 = vadd.f32 %v1038_v58, %v997_v56 }
 0x53b   : > { %v5436_v40 = vpop.xlane.xlu2 %5435 }
 0x53c   : > { %11451 = vrcp.f32 %v5436_v40  ;;  %v19462_v40 = vld [vmem:[#allocation14_spill] sm:$0xff]  ;;  %v1159_v14 = vadd.f32 %v1119_v18, %v1078_v38  ;;  %v19472_v18 = vld [vmem:[#allocation84_spill] sm:$0xff] }
 0x53d   : > { %v998_v0 = vmul.f32 %v15222_v44, %v19462_v40  ;;  %v8177_v40 = vpack.c.bf16 %v7940_v63, %v7939_v4  ;;  %v19471_v63 = vld [vmem:[#allocation6_spill] sm:$0xff]  ;;  %v15714_v4 = vpop.f32.mrf.mxu3 }
 0x53e   : > { %v1002_v56 = vmul.f32 %v15222_v44, %v19471_v63  ;;  %v19476_v63 = vld [vmem:[#allocation125_spill] sm:$0xff]  ;;  %v18757_v35 = vmax.f32 %v15714_v4, 0.0 }
 0x53f   : > { %v1079_v34 = vadd.f32 %v1039_v1, %v998_v0  ;;  %v2684_v1 = vadd.f32 %v14355_v23, %v2643_v25  ;;  %v7776_v25 = vadd.f32 %v15265_v60, %v15337_v28  ;;  %v7507_v26 = vmax.f32 %v19476_v63, 0.0 }
 0x541   : > { %v1160_v49 = vadd.f32 %v1120_v16, %v1079_v34  ;;  %v1049_v16 = vmul.f32 %v15227_v43, %v19472_v18 }
 0x542   : > { %v11452_v29 = vpop.eup %11451 }
 0x543   : > { %v5638_v61 = vmul.f32 %v11452_v29, %v15397_v37  ;;  %v4992_v0 = vpop.xlane.xlu2 %4991  ;;  %v19469_v37 = vld [vmem:[#allocation80_spill] sm:$0xff]  ;;  %v1201_v34 = vadd.f32 %v15276_v13, %v1160_v49 }
 0x544   : > { %v5090_v31 = vsub.f32 %v15110_v27, %v4992_v0  ;;  %v1043_v29 = vmul.f32 %v15227_v43, %v19469_v37  ;;  %v19470_v27 = vld [vmem:[#allocation70_spill] sm:$0xff]  ;;  %v19475_v37 = vld [vmem:[#allocation12_spill] sm:$0xff] }
 0x545   : > { %10968 = vmatmul.msk.f32.vlgmr.msra.gmra.mxu2 %vm4779_vm1, %v5638_v61  ;;  %v1042_v58 = vmul.f32 %v15227_v43, %v19470_v27  ;;  %v1200_v61 = vadd.f32 %v15276_v13, %v1159_v14  ;;  %v7862_v0 = vsub.f32 %v7777_v46, %v1201_v34  ;;  %v1008_v27 = vmul.f32 %v15222_v44, %v19475_v37  ;;  %v19477_v14 = vld [vmem:[#allocation73_spill] sm:$0xff]  ;;  %v19480_v37 = vld [vmem:[#allocation96_spill] sm:$0xff] }
 0x546   : > { %7196 = vmatpush.msra.mxu2 %v2684_v1  ;;  %v5240_v9 = vmul.f32 1.442695, %v5090_v31  ;;  %v19473_v1 = vld [vmem:[#allocation17_spill] sm:$0xff]  ;;  %v1083_v31 = vadd.f32 %v1043_v29, %v1002_v56  ;;  %v1124_v46 = vmul.f32 %v15248_v62, %v19477_v14  ;;  %v2482_v63 = vmul.f32 %v14326_v33, %v19480_v37  ;;  %v19481_v14 = vld [vmem:[#allocation59_spill] sm:$0xff] }
 0x547   : > { %11012 = vmatmul.msk.bf16.gmra.mxu1 %vm2698_vm0, %v8177_v40  ;;  %v1001_v38 = vmul.f32 %v15222_v44, %v19473_v1  ;;  %v19474_v40 = vld [vmem:[#allocation79_spill] sm:$0xff]  ;;  %v7861_v18 = vsub.f32 %v7776_v25, %v1200_v61  ;;  %v1089_v34 = vadd.f32 %v1049_v16, %v1008_v27  ;;  %v15729_v1 = vpop.f32.mrf.mxu0  ;;  %v19479_v29 = vld [vmem:[#allocation133_spill] sm:$0xff]  ;;  %v7902_v3 = vmul.f32 %v7862_v0, %v7507_v26 }
 0x548   : > { %11453 = vpow2.f32 %v5240_v9  ;;  %v1123_v49 = vmul.f32 %v15248_v62, %v19474_v40  ;;  %v15721_v9 = vpop.f32.mrf.mxu2  ;;  %19478 = vst [vmem:[#allocation143_spill] sm:$0xff] %v15729_v1  ;;  %v7506_v56 = vmax.f32 %v19479_v29, 0.0  ;;  %v1164_v61 = vadd.f32 %v1124_v46, %v1083_v31  ;;  %v19482_v29 = vld [vmem:[#allocation95_spill] sm:$0xff] }
 0x549   : > { %v1082_v28 = vadd.f32 %v1042_v58, %v1001_v38  ;;  %v1130_v16 = vmul.f32 %v15248_v62, %v19481_v14  ;;  %v7942_v27 = vadd.f32 %v7902_v3, %v18757_v35  ;;  %v2523_v40 = vmul.f32 %v14331_v39, %v19482_v29  ;;  %v15753_v3 = vpop.f32.mrf.mxu1 }
 0x54a   : > { %v7901_v38 = vmul.f32 %v7861_v18, %v7506_v56  ;;  %v7780_v26 = vadd.f32 %v15265_v60, %v15416_v5  ;;  %v19483_v0 = vmax.f32 %v15721_v9, 0.0  ;;  %v1205_v56 = vadd.f32 %v15276_v13, %v1164_v61  ;;  %v19486_v61 = vld [vmem:[#allocation45_spill] sm:$0xff] }
 0x54b   : > { %v1163_v25 = vadd.f32 %v1123_v49, %v1082_v28  ;;  %v7781_v28 = vadd.f32 %v15265_v60, %v15452_v45  ;;  %v1170_v31 = vadd.f32 %v1130_v16, %v1089_v34  ;;  %v2563_v18 = vadd.f32 %v2523_v40, %v2482_v63  ;;  %v15759_v45 = vpop.f32.mrf.mxu3 }
 0x54c   : > { %v7941_v49 = vadd.f32 %v7901_v38, %v19483_v0  ;;  %v7787_v5 = vadd.f32 %v15265_v60, %v15558_v42  ;;  %v19485_v38 = vld [vmem:[#allocation94_spill] sm:$0xff]  ;;  %v1015_v16 = vmul.f32 %v15222_v44, %v19486_v61 }
 0x54d   : > { %v1204_v46 = vadd.f32 %v15276_v13, %v1163_v25  ;;  %v2604_v34 = vmul.f32 %v14342_v48, %v19485_v38  ;;  %v7866_v63 = vsub.f32 %v7781_v28, %v1205_v56  ;;  %v1211_v25 = vadd.f32 %v15276_v13, %v1170_v31  ;;  %v19488_v42 = vld [vmem:[#allocation22_spill] sm:$0xff]  ;;  %v19490_v56 = vld [vmem:[#allocation139_spill] sm:$0xff] }
 0x54e   : > { %v15731_v12 = vpop.eup %11453  ;;  %v8178_v1 = vpack.c.bf16 %v7942_v27, %v7941_v49  ;;  %v7510_v27 = vmax.f32 %v19488_v42, 0.0  ;;  %v1016_v28 = vmul.f32 %v15222_v44, %v19404_v53  ;;  %v1057_v42 = vmul.f32 %v15227_v43, %v19403_v21 }
 0x54f   : > { %v5470_v58 = vsel %vm4779_vm1, %v15731_v12, 0.0  ;;  %v7865_v40 = vsub.f32 %v7780_v26, %v1204_v46  ;;  %v2644_v0 = vadd.f32 %v2604_v34, %v2563_v18  ;;  %v15769_v49 = vpop.f32.mrf.mxu0  ;;  %v7872_v29 = vsub.f32 %v7787_v5, %v1211_v25  ;;  %v19492_v25 = vld [vmem:[#allocation99_spill] sm:$0xff] }
 0x550   : > { %5471 = vadd.xlane.f32.xlu2 %v5470_v58  ;;  %v19484_v58 = vld [vmem:[#allocation46_spill] sm:$0xff]  ;;  %19489 = vst [vmem:[#allocation77_spill] sm:$0xff] %v15769_v49  ;;  %v7517_v34 = vmax.f32 %v19490_v56, 0.0  ;;  %v2486_v21 = vmul.f32 %v14326_v33, %v19492_v25 }
 0x551   : > { %v1056_v14 = vmul.f32 %v15227_v43, %v19484_v58  ;;  %v19487_v58 = vld [vmem:[#allocation50_spill] sm:$0xff]  ;;  %v2685_v61 = vadd.f32 %v14355_v23, %v2644_v0 }
 0x552   : > { %v7511_v30 = vmax.f32 %v19487_v58, 0.0  ;;  %v19491_v58 = vld [vmem:[#allocation105_spill] sm:$0xff]  ;;  %v7912_v0 = vmul.f32 %v7872_v29, %v7517_v34  ;;  %v19494_v56 = vld [vmem:[#allocation38_spill] sm:$0xff]  ;;  %v5463_v34 = vpop.xlane.xlu0 %5462 }
 0x553   : > { %v1096_v38 = vadd.f32 %v1056_v14, %v1015_v16  ;;  %v2527_v5 = vmul.f32 %v14331_v39, %v19491_v58 }
 0x554   : > { %v5439_v35 = vpop.xlane.xlu1 %5438  ;;  %v7906_v31 = vmul.f32 %v7866_v63, %v7511_v30 }
 0x555   : > { %11455 = vrcp.f32 %v5439_v35  ;;  %v18763_v35 = vmax.f32 %v15759_v45, 0.0 }
 0x557   : > { %11013 = vmatmul.msk.bf16.gmra.mxu1 %vm2698_vm0, %v8178_v1  ;;  %v7905_v1 = vmul.f32 %v7865_v40, %v7510_v27  ;;  %v15785_v14 = vadd.f32 %v7906_v31, %v18763_v35  ;;  %v19493_v27 = vld [vmem:[#allocation115_spill] sm:$0xff] }
 0x558   : > { %v2608_v31 = vmul.f32 %v14342_v48, %v19493_v27 }
 0x559   : > { %v15772_v26 = vpop.f32.mrf.mxu2 }
 0x55a   : > { %v18764_v46 = vmax.f32 %v15772_v26, 0.0 }
 0x55b   : > { %v11456_v18 = vpop.eup %11455 }
 0x55c   : > { %v5639_v53 = vmul.f32 %v11456_v18, %v15467_v10  ;;  %v15790_v30 = vadd.f32 %v7905_v1, %v18764_v46  ;;  %v15792_v40 = vpop.f32.mrf.mxu1  ;;  %v5451_v63 = vpop.xlane.xlu1 %5450  ;;  %v1137_v10 = vmul.f32 %v15248_v62, %v19494_v56  ;;  %v1097_v18 = vadd.f32 %v1057_v42, %v1016_v28  ;;  %v19497_v28 = vld [vmem:[#allocation127_spill] sm:$0xff] }
 0x55d   : > { %v18765_v16 = vmax.f32 %v15792_v40, 0.0  ;;  %11457 = vrcp.f32 %v5451_v63  ;;  %v2567_v46 = vadd.f32 %v2527_v5, %v2486_v21  ;;  %v19495_v63 = vld [vmem:[#allocation129_spill] sm:$0xff]  ;;  %v1138_v56 = vmul.f32 %v15248_v62, %v19406_v32 }
 0x55e   : > { %10969 = vmatmul.msk.f32.vlgmr.msrb.gmra.mxu3 %vm4779_vm1, %v5639_v53  ;;  %v1177_v29 = vadd.f32 %v1137_v10, %v1096_v38  ;;  %v2490_v27 = vmul.f32 %v14326_v33, %v19495_v63  ;;  %v15814_v53 = vpop.f32.mrf.mxu0  ;;  %v2531_v42 = vmul.f32 %v14331_v39, %v19497_v28  ;;  %v7794_v38 = vadd.f32 %v15265_v60, %v15769_v49  ;;  %v19511_v28 = vld [vmem:[#allocation7_spill] sm:$0xff] }
 0x55f   : > { %v15806_v35 = vadd.f32 %v7912_v0, %v18765_v16  ;;  %7219 = vmatpush.msrb.mxu3 %v2685_v61  ;;  %v2648_v25 = vadd.f32 %v2608_v31, %v2567_v46  ;;  %19496 = vst [vmem:[#allocation29_spill] sm:$0xff] %v15814_v53  ;;  %v1178_v61 = vadd.f32 %v1138_v56, %v1097_v18  ;;  %11459 = vrcp.f32 %v5463_v34  ;;  %v15831_v18 = vld [vmem:[%s18313_s6] sm:$0x1f] }
 0x560   : > { %v1218_v5 = vadd.f32 %v15276_v13, %v1177_v29  ;;  %v2571_v16 = vadd.f32 %v2531_v42, %v2490_v27  ;;  %v7795_v46 = vadd.f32 %v15265_v60, %v15814_v53  ;;  %v7810_v29 = vperm.slane %v15831_v18, 1 }
 0x561   : > { %v2689_v1 = vadd.f32 %v14355_v23, %v2648_v25  ;;  %v1219_v56 = vadd.f32 %v15276_v13, %v1178_v61  ;;  %v19502_v61 = vld [vmem:[#allocation102_spill] sm:$0xff] }
 0x562   : > { %v7879_v27 = vsub.f32 %v7794_v38, %v1218_v5  ;;  %v7525_v5 = vmax.f32 %v19502_v61, 0.0  ;;  %v19507_v61 = vld [vmem:[#allocation123_spill] sm:$0xff] }
 0x563   : > { %v11458_v0 = vpop.eup %11457  ;;  %v7880_v49 = vsub.f32 %v7795_v46, %v1219_v56 }
 0x564   : > { %v5643_v21 = vmul.f32 %v11458_v0, %v15484_v6  ;;  %v15822_v32 = vpop.f32.mrf.mxu1  ;;  %v5004_v10 = vpop.xlane.xlu1 %5003  ;;  %v19498_v6 = vld [vmem:[#allocation122_spill] sm:$0xff] }
 0x565   : > { %v5094_v31 = vsub.f32 %v15132_v50, %v5004_v10  ;;  %v2612_v34 = vmul.f32 %v14342_v48, %v19498_v6  ;;  %v19499_v50 = vpack.c.bf16 %v15646_v17, %v15562_v19  ;;  %v11460_v0 = vpop.eup %11459  ;;  %v19500_v10 = vld [vmem:[#allocation106_spill] sm:$0xff]  ;;  %v18768_v6 = vmax.f32 %v19507_v61, 0.0 }
 0x566   : > { %10973 = vmatmul.msk.f32.vlgmr.msra.gmra.mxu3 %vm4779_vm1, %v5643_v21  ;;  %v7524_v53 = vmax.f32 %v19500_v10, 0.0  ;;  %v19501_v21 = vld [vmem:[#allocation33_spill] sm:$0xff]  ;;  %v19504_v17 = vld [vmem:[#allocation158_spill] sm:$0xff] }
 0x567   : > { %v5248_v42 = vmul.f32 1.442695, %v5094_v31  ;;  %7311 = vmatpush.msra.mxu3 %v2689_v1  ;;  %11014 = vmatmul.msk.bf16.gmra.mxu1 %vm2698_vm0, %v19499_v50  ;;  %v2652_v25 = vadd.f32 %v2612_v34, %v2571_v16  ;;  %v1003_v38 = vmul.f32 %v15222_v44, %v19501_v21  ;;  %v19503_v1 = vld [vmem:[#allocation81_spill] sm:$0xff]  ;;  %v2535_v16 = vmul.f32 %v14331_v39, %v19504_v17  ;;  %v19506_v10 = vld [vmem:[#allocation126_spill] sm:$0xff] }
 0x568   : > { %7812 = vrot.lane.b32.xlu2 %v7810_v29, %s11701_s9  ;;  %v1045_v31 = vmul.f32 %v15227_v43, %v19503_v1  ;;  %v7919_v19 = vmul.f32 %v7879_v27, %v7524_v53  ;;  %v5647_v34 = vmul.f32 %v11460_v0, %v15422_v8  ;;  %v19505_v29 = vld [vmem:[#allocation152_spill] sm:$0xff]  ;;  %v2616_v21 = vmul.f32 %v14342_v48, %v19506_v10  ;;  %v19508_v1 = vld [vmem:[#allocation26_spill] sm:$0xff] }
 0x569   : > { %11461 = vpow2.f32 %v5248_v42  ;;  %v2693_v56 = vadd.f32 %v14355_v23, %v2652_v25  ;;  %v2494_v42 = vmul.f32 %v14326_v33, %v19505_v29  ;;  %v7920_v27 = vmul.f32 %v7880_v49, %v7525_v5  ;;  %v19509_v25 = vld [vmem:[#allocation18_spill] sm:$0xff] }
 0x56a   : > { %v1044_v8 = vmul.f32 %v15227_v43, %v19508_v1  ;;  %v1004_v17 = vmul.f32 %v15222_v44, %v19509_v25  ;;  %v15870_v29 = vadd.f32 %v7919_v19, %v18768_v6  ;;  %v19510_v25 = vmax.f32 %v15638_v51, 0.0  ;;  %v19531_v1 = vld [vmem:[#allocation117_spill] sm:$0xff] }
 0x56b   : > { %v2575_v49 = vadd.f32 %v2535_v16, %v2494_v42  ;;  %v7782_v51 = vadd.f32 %v15265_v60, %v15470_v52 }
 0x56c   : > { %v15852_v50 = vpop.f32.mrf.mxu1  ;;  %v5475_v46 = vpop.xlane.xlu2 %5474  ;;  %v1084_v5 = vadd.f32 %v1044_v8, %v1003_v38  ;;  %v19514_v8 = vmax.f32 %v15414_v55, 0.0 }
 0x56d   : > { %v18769_v53 = vmax.f32 %v15852_v50, 0.0  ;;  %11463 = vrcp.f32 %v5475_v46  ;;  %v2656_v19 = vadd.f32 %v2616_v21, %v2575_v49  ;;  %v7783_v21 = vadd.f32 %v15265_v60, %v15491_v22 }
 0x56e   : > { %10977 = vmatmul.msk.f32.vlgmr.msrb.gmra.mxu3 %vm4779_vm1, %v5647_v34  ;;  %v1085_v34 = vadd.f32 %v1045_v31, %v1004_v17 }
 0x56f   : > { %v15864_v0 = vpop.eup %11461  ;;  %v15874_v10 = vadd.f32 %v7920_v27, %v18769_v53  ;;  %7403 = vmatpush.msrb.mxu3 %v2693_v56  ;;  %v1125_v27 = vmul.f32 %v15248_v62, %v19511_v28  ;;  %v19512_v56 = vld [vmem:[#allocation27_spill] sm:$0xff]  ;;  %v2697_v17 = vadd.f32 %v14355_v23, %v2656_v19  ;;  %v19513_v28 = vpack.c.bf16 %v15785_v14, %v15790_v30 }
 0x570   : > { %v5482_v46 = vsel %vm4779_vm1, %v15864_v0, 0.0  ;;  %8033 = vrot.lane.b32.xlu2 %v19510_v25, %s11701_s9  ;;  %v1126_v38 = vmul.f32 %v15248_v62, %v19512_v56  ;;  %v19516_v25 = vld [vmem:[#allocation121_spill] sm:$0xff]  ;;  %v19517_v56 = vld [vmem:[#allocation148_spill] sm:$0xff] }
 0x571   : > { %5483 = vadd.xlane.f32.xlu0 %v5482_v46  ;;  %v1165_v42 = vadd.f32 %v1125_v27, %v1084_v5  ;;  %v19515_v46 = vld [vmem:[#allocation149_spill] sm:$0xff]  ;;  %v7513_v19 = vmax.f32 %v19516_v25, 0.0  ;;  %v18770_v27 = vmax.f32 %v15753_v3, 0.0  ;;  %v7552_v14 = vmax.f32 %v19517_v56, 0.0 }
 0x572   : > { %v1166_v31 = vadd.f32 %v1126_v38, %v1085_v34  ;;  %v7512_v34 = vmax.f32 %v19515_v46, 0.0 }
 0x573   : > { %v11464_v6 = vpop.eup %11463 }
 0x574   : > { %v5651_v16 = vmul.f32 %v11464_v6, %v15502_v59  ;;  %v1206_v59 = vadd.f32 %v15276_v13, %v1165_v42  ;;  %v1207_v6 = vadd.f32 %v15276_v13, %v1166_v31  ;;  %v19518_v31 = vld [vmem:[#allocation154_spill] sm:$0xff] }
 0x576   : > { %10981 = vmatmul.msk.f32.vlgmr.msra.gmra.mxu3 %vm4779_vm1, %v5651_v16  ;;  %v7867_v49 = vsub.f32 %v7782_v51, %v1206_v59  ;;  %v7868_v5 = vsub.f32 %v7783_v21, %v1207_v6  ;;  %v19520_v51 = vld [vmem:[#allocation82_spill] sm:$0xff]  ;;  %v19522_v59 = vld [vmem:[#allocation108_spill] sm:$0xff] }
 0x577   : > { %7495 = vmatpush.msra.mxu3 %v2697_v17  ;;  %11015 = vmatmul.msk.bf16.gmra.mxu1 %vm2698_vm0, %v19513_v28  ;;  %v19519_v17 = vmax.f32 %v19518_v31, 0.0  ;;  %v1047_v21 = vmul.f32 %v15227_v43, %v19520_v51  ;;  %v19521_v28 = vmax.f32 %v15721_v9, 0.0  ;;  %v2485_v6 = vmul.f32 %v14326_v33, %v19522_v59  ;;  %v19529_v31 = vld [vmem:[#allocation78_spill] sm:$0xff]  ;;  %v19530_v51 = vld [vmem:[#allocation16_spill] sm:$0xff] }
 0x578   : > { %8021 = vrot.lane.b32.xlu2 %v19514_v8, %s11701_s9  ;;  %v7907_v30 = vmul.f32 %v7867_v49, %v7512_v34  ;;  %v7908_v38 = vmul.f32 %v7868_v5, %v7513_v19  ;;  %v19523_v8 = vld [vmem:[#allocation112_spill] sm:$0xff]  ;;  %v19524_v5 = vld [vmem:[#allocation75_spill] sm:$0xff]  ;;  %v19526_v19 = vld [vmem:[#allocation9_spill] sm:$0xff] }
 0x579   : > { %v2526_v49 = vmul.f32 %v14331_v39, %v19523_v8  ;;  %v1046_v46 = vmul.f32 %v15227_v43, %v19524_v5  ;;  %v19525_v34 = vld [vmem:[#allocation36_spill] sm:$0xff]  ;;  %v1005_v56 = vmul.f32 %v15222_v44, %v19526_v19 }
 0x57a   : > { %v7948_v16 = vadd.f32 %v7908_v38, %v18770_v27  ;;  %v7947_v42 = vadd.f32 %v7907_v30, %v7552_v14  ;;  %v1006_v25 = vmul.f32 %v15222_v44, %v19525_v34  ;;  %v19527_v30 = vld [vmem:[#allocation55_spill] sm:$0xff]  ;;  %v19536_v27 = vld [vmem:[#allocation68_spill] sm:$0xff] }
 0x57b   : > { %v1127_v9 = vmul.f32 %v15248_v62, %v19527_v30  ;;  %v2530_v30 = vmul.f32 %v14331_v39, %v19531_v1 }
 0x57c   : > { %v8181_v55 = vpack.c.bf16 %v7948_v16, %v7947_v42  ;;  %v1087_v38 = vadd.f32 %v1047_v21, %v1006_v25  ;;  %v19528_v16 = vmax.f32 %v19428_v15, 0.0  ;;  %v2566_v42 = vadd.f32 %v2526_v49, %v2485_v6  ;;  %v19532_v15 = vld [vmem:[#allocation177_spill] sm:$0xff] }
 0x57d   : > { %v7784_v25 = vadd.f32 %v15265_v60, %v15500_v47  ;;  %v7785_v6 = vadd.f32 %v15265_v60, %v19532_v15  ;;  %v19537_v47 = vld [vmem:[#allocation69_spill] sm:$0xff] }
 0x580   : > { %8039 = vrot.lane.b32.xlu2 %v7552_v14, %s11701_s9 }
 0x585   : > { %8015 = vrot.lane.b32.xlu0 %v19519_v17, %s11701_s9  ;;  %v1128_v17 = vmul.f32 %v15248_v62, %v19529_v31  ;;  %v19535_v31 = vmax.f32 %v15772_v26, 0.0 }
 0x587   : > { %11016 = vmatmul.msk.bf16.gmra.mxu1 %vm2698_vm0, %v8181_v55  ;;  %v1086_v55 = vadd.f32 %v1046_v46, %v1005_v56  ;;  %v1168_v34 = vadd.f32 %v1128_v17, %v1087_v38  ;;  %v19533_v56 = vld [vmem:[#allocation113_spill] sm:$0xff] }
 0x588   : > { %8027 = vrot.lane.b32.xlu2 %v19521_v28, %s11701_s9  ;;  %v2607_v28 = vmul.f32 %v14342_v48, %v19530_v51 }
 0x589   : > { %v1167_v5 = vadd.f32 %v1127_v9, %v1086_v55 }
 0x58a   : > { %v2647_v19 = vadd.f32 %v2607_v28, %v2566_v42  ;;  %v1209_v42 = vadd.f32 %v15276_v13, %v1168_v34  ;;  %v7515_v34 = vmax.f32 %v19536_v27, 0.0 }
 0x58b   : > { %v1208_v38 = vadd.f32 %v15276_v13, %v1167_v5 }
 0x58c   : > { %v2688_v17 = vadd.f32 %v14355_v23, %v2647_v19  ;;  %v7870_v53 = vsub.f32 %v7785_v6, %v1209_v42  ;;  %v427_v42 = vld [vmem:[%s14907_s21 + $0x100] sm:$0xff] }
 0x58d   : > { %v5448_v14 = vpop.xlane.xlu1 %5447  ;;  %8031 = vrot.lane.b32.xlu0 %v19528_v16, %s11701_s9  ;;  %v19534_v16 = vld [vmem:[#allocation141_spill] sm:$0xff] }
 0x58e   : > { %11465 = vrcp.f32 %v5448_v14  ;;  %v2489_v14 = vmul.f32 %v14326_v33, %v19533_v56  ;;  %v2611_v9 = vmul.f32 %v14342_v48, %v19534_v16  ;;  %v7910_v22 = vmul.f32 %v7870_v53, %v7515_v34  ;;  %v430_v34 = vld [vmem:[%s14907_s21 + $0x118] sm:$0xff] }
 0x590   : > { %v2570_v28 = vadd.f32 %v2530_v30, %v2489_v14  ;;  %v19538_v14 = vmax.f32 %v19463_v11, 0.0  ;;  %v19540_v11 = vld [vmem:[#allocation136_spill] sm:$0xff] }
 0x592   : > { %v2651_v5 = vadd.f32 %v2611_v9, %v2570_v28  ;;  %v19542_v9 = vmax.f32 %v15753_v3, 0.0  ;;  %v19543_v28 = vld [vmem:[#allocation37_spill] sm:$0xff]  ;;  %v19544_v3 = vmax.f32 %v15714_v4, 0.0 }
 0x593   : > { %v19547_v4 = vld [vmem:[#allocation157_spill] sm:$0xff] }
 0x594   : > { %v11466_v21 = vpop.eup %11465  ;;  %v2692_v30 = vadd.f32 %v14355_v23, %v2651_v5  ;;  %v429_v5 = vld [vmem:[%s14907_s21 + $0x110] sm:$0xff] }
 0x595   : > { %v5642_v49 = vmul.f32 %v11466_v21, %v15571_v24  ;;  %v5460_v46 = vpop.xlane.xlu1 %5459  ;;  %8035 = vrot.lane.b32.xlu0 %v19535_v31, %s11701_s9  ;;  %v15955_v24 = vpop.f32.mrf.mxu2  ;;  %v7869_v21 = vsub.f32 %v7784_v25, %v1208_v38 }
 0x596   : > { %v5487_v55 = vpop.xlane.xlu0 %5486  ;;  %11467 = vrcp.f32 %v5460_v46  ;;  %v7514_v46 = vmax.f32 %v19537_v47, 0.0  ;;  %v7554_v15 = vmax.f32 %v15955_v24, 0.0 }
 0x597   : > { %11469 = vrcp.f32 %v5487_v55  ;;  %10972 = vmatmul.msk.f32.vlgmr.msrb.gmra.mxu2 %vm4779_vm1, %v5642_v49 }
 0x598   : > { %7288 = vmatpush.msrb.mxu2 %v2688_v17  ;;  %v6945_v26 = vpop.f32.mrf.mxu3  ;;  %v7909_v52 = vmul.f32 %v7869_v21, %v7514_v46  ;;  %v428_v17 = vld [vmem:[%s14907_s21 + $0x108] sm:$0xff]  ;;  %v19545_v21 = vpack.c.bf16 %v15806_v35, %v15677_v7  ;;  %v7597_v46 = vpack.c.bf16 %v430_v34, %v429_v5 }
 0x599   : > { %v7555_v19 = vmax.f32 %v6945_v26, 0.0  ;;  %v2493_v26 = vmul.f32 %v14326_v33, %v19547_v4  ;;  %v19550_v7 = vld [vmem:[#allocation155_spill] sm:$0xff] }
 0x59a   : > { %v7949_v25 = vadd.f32 %v7909_v52, %v7554_v15  ;;  %v2534_v35 = vmul.f32 %v14331_v39, %v19550_v7 }
 0x59b   : > { %v7950_v27 = vadd.f32 %v7910_v22, %v7555_v19  ;;  %v5499_v47 = vpop.xlane.xlu2 %5498  ;;  %8045 = vrot.lane.b32.xlu2 %v7555_v19, %s11701_s9  ;;  %v19539_v22 = vld [vmem:[#allocation103_spill] sm:$0xff] }
 0x59c   : > { %v11468_v31 = vpop.eup %11467  ;;  %11471 = vrcp.f32 %v5499_v47  ;;  %v432_v47 = vld [vmem:[%s14907_s21 + $0x128] sm:$0xff] }
 0x59d   : > { %v11470_v16 = vpop.eup %11469  ;;  %v5646_v55 = vmul.f32 %v11468_v31, %v15585_v20  ;;  %8023 = vrot.lane.b32.xlu0 %v19538_v14, %s11701_s9  ;;  %v8182_v20 = vpack.c.bf16 %v7950_v27, %v7949_v25  ;;  %v19548_v31 = vld [vmem:[#allocation159_spill] sm:$0xff]  ;;  %v19551_v25 = vld [vmem:[#allocation156_spill] sm:$0xff] }
 0x59e   : > { %v5655_v6 = vmul.f32 %v11470_v16, %v15588_v54  ;;  %v5016_v49 = vpop.xlane.xlu0 %5015  ;;  %v19541_v16 = vmax.f32 %v19507_v61, 0.0  ;;  %v7596_v61 = vpack.c.bf16 %v428_v17, %v427_v42  ;;  %v19549_v19 = vmax.f32 %v19548_v31, 0.0  ;;  %v19556_v42 = vld [vmem:[#allocation24_spill] sm:$0xff]  ;;  %v19558_v17 = vld [vmem:[#allocation39_spill] sm:$0xff] }
 0x59f   : > { %v5098_v53 = vsub.f32 %v19441_v2, %v5016_v49  ;;  %10976 = vmatmul.msk.f32.vlgmr.msra.gmra.mxu2 %vm4779_vm1, %v5646_v55  ;;  %11017 = vmatmul.msk.bf16.gmra.mxu1 %vm2698_vm0, %v8182_v20  ;;  %v16013_v55 = vpop.f32.mrf.mxu1  ;;  %v431_v49 = vld [vmem:[%s14907_s21 + $0x120] sm:$0xff]  ;;  %v19552_v20 = vld [vmem:[#allocation175_spill] sm:$0xff]  ;;  %v433_v31 = vld [vmem:[%s14907_s21 + $0x130] sm:$0xff] }
 0x5a0   : > { %7380 = vmatpush.msra.mxu2 %v2692_v30  ;;  %10985 = vmatmul.msk.f32.vlgmr.msrb.gmra.mxu3 %vm4779_vm1, %v5655_v6  ;;  %v2574_v30 = vadd.f32 %v2534_v35, %v2493_v26  ;;  %v2615_v6 = vmul.f32 %v14342_v48, %v19551_v25  ;;  %v7598_v39 = vpack.c.bf16 %v432_v47, %v431_v49  ;;  %v19554_v48 = vld [vmem:[#allocation87_spill] sm:$0xff]  ;;  %v19561_v35 = vld [vmem:[#allocation128_spill] sm:$0xff] }
 0x5a1   : > { %v5256_v52 = vmul.f32 1.442695, %v5098_v53  ;;  %11055 = vmatpush.bf16.msrb.mxu3 %v19539_v22 }
 0x5a2   : > { %v11472_v54 = vpop.eup %11471  ;;  %v2655_v33 = vadd.f32 %v2615_v6, %v2574_v30  ;;  %v19563_v6 = vmax.f32 %v15614_v41, 0.0  ;;  %v19567_v41 = vld [vmem:[#allocation42_spill] sm:$0xff] }
 0x5a3   : > { %11473 = vpow2.f32 %v5256_v52  ;;  %v5659_v2 = vmul.f32 %v11472_v54, %v15606_v36  ;;  %8063 = vrot.lane.b32.xlu2 %v19541_v16, %s11701_s9  ;;  %v19553_v52 = vmax.f32 %v19552_v20, 0.0  ;;  %v19555_v16 = vld [vmem:[#allocation28_spill] sm:$0xff] }
 0x5a4   : > { %v2696_v54 = vadd.f32 %v14355_v23, %v2655_v33  ;;  %v19557_v23 = vmax.f32 %v15759_v45, 0.0  ;;  %v7788_v45 = vadd.f32 %v15265_v60, %v19561_v35  ;;  %v19564_v33 = vld [vmem:[#allocation43_spill] sm:$0xff]  ;;  %v19565_v20 = vld [vmem:[#allocation88_spill] sm:$0xff] }
 0x5a5   : > { %11056 = vmatpush.bf16.msrb.mxu3 %v19540_v11  ;;  %8041 = vrot.lane.b32.xlu0 %v19542_v9, %s11701_s9  ;;  %v1050_v9 = vmul.f32 %v15227_v43, %v19555_v16  ;;  %v1012_v16 = vmul.f32 %v15222_v44, %v19567_v41 }
 0x5a7   : > { %v16025_v11 = vpop.f32.mrf.mxu1 }
 0x5a8   : > { %10989 = vmatmul.msk.f32.vlgmr.msra.gmra.mxu3 %vm4779_vm1, %v5659_v2  ;;  %v1051_v2 = vmul.f32 %v15227_v43, %v19554_v48  ;;  %v19566_v48 = vld [vmem:[#allocation15_spill] sm:$0xff] }
 0x5a9   : > { %v15984_v38 = vpop.eup %11473  ;;  %11057 = vmatpush.bf16.msra.mxu3 %v15564_v57  ;;  %v19546_v57 = vmax.f32 %v15792_v40, 0.0 }
 0x5aa   : > { %v5494_v36 = vsel %vm4779_vm1, %v15984_v38, 0.0 }
 0x5ab   : > { %5495 = vadd.xlane.f32.xlu1 %v5494_v36  ;;  %v1009_v36 = vmul.f32 %v15222_v44, %v19558_v17  ;;  %v1018_v17 = vmul.f32 %v15222_v44, %v19480_v37 }
 0x5ad   : > { %11058 = vmatpush.bf16.msra.mxu3 %v19543_v28  ;;  %8029 = vrot.lane.b32.xlu0 %v19544_v3, %s11701_s9 }
 0x5af   : > { %11018 = vmatmul.msk.bf16.gmra.mxu1 %vm2698_vm0, %v19545_v21  ;;  %v1090_v21 = vadd.f32 %v1050_v9, %v1009_v36  ;;  %v16044_v26 = vpop.f32.mrf.mxu1  ;;  %v19568_v9 = vld [vmem:[#allocation19_spill] sm:$0xff] }
 0x5b0   : > { %11006 = vmatmul.msk.bf16.vlgmr.msrb.gmra.mxu3 %vm2698_vm0, %v7596_v61  ;;  %v19559_v61 = vld [vmem:[#allocation85_spill] sm:$0xff] }
 0x5b1   : > { %v1131_v28 = vmul.f32 %v15248_v62, %v19559_v61 }
 0x5b3   : > { %v1171_v34 = vadd.f32 %v1131_v28, %v1090_v21 }
 0x5b5   : > { %8049 = vrot.lane.b32.xlu0 %v19546_v57, %s11701_s9  ;;  %v19560_v57 = vld [vmem:[#allocation31_spill] sm:$0xff]  ;;  %v1212_v49 = vadd.f32 %v15276_v13, %v1171_v34 }
 0x5b6   : > { %v1132_v5 = vmul.f32 %v15248_v62, %v19560_v57 }
 0x5b7   : > { %v16074_v57 = vpop.f32.mrf.mxu1 }
 0x5c0   : > { %11007 = vmatmul.msk.bf16.gmra.mxu3 %vm2698_vm0, %v7597_v46 }
 0x5c3   : > { %v5472_v40 = vpop.xlane.xlu2 %5471 }
 0x5c4   : > { %8017 = vrot.lane.b32.xlu1 %v19549_v19, %s11701_s9  ;;  %11475 = vrcp.f32 %v5472_v40  ;;  %v434_v19 = vld [vmem:[%s14907_s21 + $0x138] sm:$0xff]  ;;  %v19562_v40 = vld [vmem:[#allocation147_spill] sm:$0xff] }
 0x5c5   : > { %v7789_v30 = vadd.f32 %v15265_v60, %v19562_v40 }
 0x5c8   : > { %v7014_v27 = vpop.f32.mrf.mxu2 }
 0x5c9   : > { %v7558_v14 = vmax.f32 %v7014_v27, 0.0  ;;  %v7599_v27 = vpack.c.bf16 %v434_v19, %v433_v31  ;;  %v19571_v31 = vld [vmem:[#allocation35_spill] sm:$0xff] }
 0x5ca   : > { %v11476_v53 = vpop.eup %11475  ;;  %v1133_v19 = vmul.f32 %v15248_v62, %v19571_v31 }
 0x5cb   : > { %8051 = vrot.lane.b32.xlu0 %v7558_v14, %s11701_s9  ;;  %v5650_v22 = vmul.f32 %v11476_v53, %v15731_v12  ;;  %v1010_v12 = vmul.f32 %v15222_v44, %v19556_v42  ;;  %v1052_v53 = vmul.f32 %v15227_v43, %v19564_v33  ;;  %v7518_v42 = vmax.f32 %v19568_v9, 0.0 }
 0x5cc   : > { %8019 = vrot.lane.b32.xlu1 %v19553_v52, %s11701_s9  ;;  %v1053_v52 = vmul.f32 %v15227_v43, %v19565_v20 }
 0x5cd   : > { %10980 = vmatmul.msk.f32.vlgmr.msrb.gmra.mxu2 %vm4779_vm1, %v5650_v22  ;;  %v1091_v3 = vadd.f32 %v1051_v2, %v1010_v12  ;;  %v7873_v22 = vsub.f32 %v7788_v45, %v1212_v49  ;;  %v1011_v2 = vmul.f32 %v15222_v44, %v19566_v48  ;;  %v19569_v12 = vld [vmem:[#allocation134_spill] sm:$0xff]  ;;  %v19572_v45 = vld [vmem:[#allocation65_spill] sm:$0xff] }
 0x5ce   : > { %7472 = vmatpush.msrb.mxu2 %v2696_v54  ;;  %v1093_v61 = vadd.f32 %v1053_v52, %v1012_v16  ;;  %v1134_v37 = vmul.f32 %v15248_v62, %v19572_v45  ;;  %v7561_v45 = vmax.f32 %v15822_v32, 0.0 }
 0x5cf   : > { %v1172_v46 = vadd.f32 %v1132_v5, %v1091_v3  ;;  %v1092_v36 = vadd.f32 %v1052_v53, %v1011_v2  ;;  %v19570_v3 = vld [vmem:[#allocation95_spill] sm:$0xff]  ;;  %v7913_v5 = vmul.f32 %v7873_v22, %v7518_v42  ;;  %v19573_v53 = vld [vmem:[#allocation94_spill] sm:$0xff] }
 0x5d0   : > { %11008 = vmatmul.msk.bf16.gmra.mxu3 %vm2698_vm0, %v7598_v39  ;;  %v16061_v39 = vpop.f32.mrf.mxu0  ;;  %v1059_v21 = vmul.f32 %v15227_v43, %v19570_v3  ;;  %v1174_v33 = vadd.f32 %v1134_v37, %v1093_v61  ;;  %v1140_v20 = vmul.f32 %v15248_v62, %v19573_v53  ;;  %v19576_v42 = vld [vmem:[#allocation111_spill] sm:$0xff]  ;;  %v19580_v37 = vld [vmem:[#allocation162_spill] sm:$0xff] }
 0x5d1   : > { %v1213_v47 = vadd.f32 %v15276_v13, %v1172_v46  ;;  %v1173_v49 = vadd.f32 %v1133_v19, %v1092_v36 }
 0x5d2   : > { %v1215_v16 = vadd.f32 %v15276_v13, %v1174_v33 }
 0x5d3   : > { %v7874_v54 = vsub.f32 %v7789_v30, %v1213_v47  ;;  %v1099_v30 = vadd.f32 %v1059_v21, %v1018_v17  ;;  %v1214_v41 = vadd.f32 %v15276_v13, %v1173_v49  ;;  %v19578_v21 = vld [vmem:[#allocation150_spill] sm:$0xff] }
 0x5d4   : > { %8037 = vrot.lane.b32.xlu1 %v19557_v23, %s11701_s9  ;;  %v7519_v23 = vmax.f32 %v19569_v12, 0.0  ;;  %v19577_v12 = vmax.f32 %v19576_v42, 0.0 }
 0x5d5   : > { %v1180_v2 = vadd.f32 %v1140_v20, %v1099_v30  ;;  %v7527_v30 = vmax.f32 %v19580_v37, 0.0 }
 0x5d6   : > { %v7914_v46 = vmul.f32 %v7874_v54, %v7519_v23  ;;  %v19574_v54 = vld [vmem:[#allocation107_spill] sm:$0xff] }
 0x5d7   : > { %v7790_v24 = vadd.f32 %v15265_v60, %v19574_v54  ;;  %v1221_v61 = vadd.f32 %v15276_v13, %v1180_v2 }
 0x5d8   : > { %v16085_v22 = vpop.f32.mrf.mxu0 }
 0x5d9   : > { %v7797_v9 = vadd.f32 %v15265_v60, %v16085_v22  ;;  %v7875_v17 = vsub.f32 %v7790_v24, %v1214_v41 }
 0x5db   : > { %v7882_v19 = vsub.f32 %v7797_v9, %v1221_v61  ;;  %v19584_v9 = vld [vmem:[#allocation86_spill] sm:$0xff]  ;;  %v19587_v61 = vld [vmem:[#allocation48_spill] sm:$0xff] }
 0x5dc   : > { %8025 = vrot.lane.b32.xlu1 %v19563_v6, %s11701_s9  ;;  %v7953_v6 = vadd.f32 %v7913_v5, %v7558_v14  ;;  %v7520_v5 = vmax.f32 %v19578_v21, 0.0  ;;  %v1055_v42 = vmul.f32 %v15227_v43, %v19584_v9  ;;  %v19588_v21 = vld [vmem:[#allocation89_spill] sm:$0xff] }
 0x5e0   : > { %11009 = vmatmul.msk.bf16.gmra.mxu3 %vm2698_vm0, %v7599_v27 }
 0x5e1   : > { %v7037_v28 = vpop.f32.mrf.mxu3 }
 0x5e2   : > { %v7559_v34 = vmax.f32 %v7037_v28, 0.0  ;;  %v16102_v28 = vpop.f32.mrf.mxu1 }
 0x5e4   : > { %8043 = vrot.lane.b32.xlu1 %v7554_v15, %s11701_s9  ;;  %v7954_v27 = vadd.f32 %v7914_v46, %v7559_v34  ;;  %v5484_v47 = vpop.xlane.xlu0 %5483  ;;  %v19575_v15 = vld [vmem:[#allocation8_spill] sm:$0xff]  ;;  %v19579_v46 = vld [vmem:[#allocation142_spill] sm:$0xff] }
 0x5e5   : > { %11477 = vrcp.f32 %v5484_v47  ;;  %v7791_v48 = vadd.f32 %v15265_v60, %v19575_v15  ;;  %v7521_v31 = vmax.f32 %v19579_v46, 0.0  ;;  %v19581_v47 = vld [vmem:[#allocation114_spill] sm:$0xff]  ;;  %v451_v46 = vld [vmem:[%s18312_s5 + $0x30] sm:$0xff] }
 0x5e6   : > { %v8184_v52 = vpack.c.bf16 %v7954_v27, %v7953_v6  ;;  %v7915_v6 = vmul.f32 %v7875_v17, %v7520_v5  ;;  %v18775_v33 = vmax.f32 %v19581_v47, 0.0  ;;  %v1136_v5 = vmul.f32 %v15248_v62, %v19588_v21  ;;  %v19590_v21 = vld [vmem:[#allocation92_spill] sm:$0xff] }
 0x5e7   : > { %v7876_v36 = vsub.f32 %v7791_v48, %v1215_v16 }
 0x5e8   : > { %11019 = vmatmul.msk.bf16.gmra.mxu1 %vm2698_vm0, %v8184_v52  ;;  %v7922_v52 = vmul.f32 %v7882_v19, %v7527_v30  ;;  %v7955_v24 = vadd.f32 %v7915_v6, %v18775_v33  ;;  %v449_v19 = vld [vmem:[%s18312_s5 + $0x20] sm:$0xff]  ;;  %v463_v30 = vpack.c.bf16 %v451_v46, %v451_v46  ;;  %v19591_v46 = vld [vmem:[#allocation144_spill] sm:$0xff] }
 0x5e9   : > { %v16092_v14 = vpop.f32.mrf.mxu3  ;;  %v7916_v27 = vmul.f32 %v7876_v36, %v7521_v31  ;;  %v19586_v36 = vld [vmem:[#allocation83_spill] sm:$0xff]  ;;  %v452_v31 = vld [vmem:[%s18312_s5 + $0x38] sm:$0xff] }
 0x5ea   : > { %v16119_v2 = vpop.f32.mrf.mxu1  ;;  %v464_v6 = vpack.c.bf16 %v452_v31, %v452_v31  ;;  %v7792_v31 = vadd.f32 %v15265_v60, %v19591_v46 }
 0x5eb   : > { %v11478_v23 = vpop.eup %11477  ;;  %v7956_v53 = vadd.f32 %v7916_v27, %v7561_v45  ;;  %v450_v27 = vld [vmem:[%s18312_s5 + $0x28] sm:$0xff] }
 0x5ec   : > { %8047 = vrot.lane.b32.xlu1 %v19577_v12, %s11701_s9  ;;  %v5654_v3 = vmul.f32 %v11478_v23, %v15864_v0  ;;  %v19582_v0 = vmax.f32 %v15852_v50, 0.0  ;;  %v19583_v50 = vld [vmem:[#allocation124_spill] sm:$0xff]  ;;  %v19585_v12 = vld [vmem:[#allocation90_spill] sm:$0xff] }
 0x5ed   : > { %v8185_v48 = vpack.c.bf16 %v7956_v53, %v7955_v24  ;;  %v18774_v16 = vmax.f32 %v19583_v50, 0.0  ;;  %v1054_v23 = vmul.f32 %v15227_v43, %v19585_v12  ;;  %v8445_v24 = vunpack.c.l.b16 %v464_v6 }
 0x5ee   : > { %10984 = vmatmul.msk.f32.vlgmr.msra.gmra.mxu2 %vm4779_vm1, %v5654_v3  ;;  %v1014_v3 = vmul.f32 %v15222_v44, %v19587_v61 }
 0x5f0   : > { %v1095_v53 = vadd.f32 %v1055_v42, %v1014_v3  ;;  %v19593_v3 = vld [vmem:[#allocation54_spill] sm:$0xff] }
 0x5f1   : > { %v7221_v49 = vpop.f32.mrf.mxu3 }
 0x5f2   : > { %v7567_v20 = vmax.f32 %v7221_v49, 0.0  ;;  %v16124_v41 = vpop.f32.mrf.mxu1  ;;  %v461_v49 = vpack.c.bf16 %v449_v19, %v449_v19  ;;  %v19594_v19 = vld [vmem:[#allocation98_spill] sm:$0xff] }
 0x5f4   : > { %8065 = vrot.lane.b32.xlu1 %v19582_v0, %s11701_s9  ;;  %v16116_v32 = vadd.f32 %v7922_v52, %v7567_v20  ;;  %8069 = vrot.lane.b32.xlu0 %v7567_v20, %s11701_s9  ;;  %v462_v20 = vpack.c.bf16 %v450_v27, %v450_v27  ;;  %v8444_v0 = vunpack.c.l.b16 %v463_v30 }
 0x5f6   : > { %v8443_v9 = vunpack.c.l.b16 %v462_v20  ;;  %v8447_v61 = vpack.c.b16 %v8445_v24, %v8444_v0 }
 0x5f8   : > { %11020 = vmatmul.msk.bf16.gmra.mxu1 %vm2698_vm0, %v8185_v48  ;;  %v8442_v48 = vunpack.c.l.b16 %v461_v49  ;;  %8516 = vmatpush.bf16.msra.mxu2 %v8447_v61 }
 0x5f9   : > { %11059 = vmatpush.bf16.msrb.mxu3 %v8447_v61  ;;  %v16175_v61 = vpop.f32.mrf.mxu3 }
 0x5fa   : > { %v16134_v17 = vpop.f32.mrf.mxu1  ;;  %v8446_v42 = vpack.c.b16 %v8443_v9, %v8442_v48  ;;  %v18778_v48 = vmax.f32 %v16092_v14, 0.0 }
 0x5fc   : > { %8053 = vrot.lane.b32.xlu1 %v7559_v34, %s11701_s9  ;;  %8057 = vrot.lane.b32.xlu0 %v7561_v45, %s11701_s9  ;;  %v1013_v34 = vmul.f32 %v15222_v44, %v19586_v36  ;;  %v19589_v45 = vld [vmem:[#allocation91_spill] sm:$0xff]  ;;  %v1176_v36 = vadd.f32 %v1136_v5, %v1095_v53  ;;  %v1017_v5 = vmul.f32 %v15222_v44, %v19593_v3  ;;  %v19595_v53 = vld [vmem:[#allocation161_spill] sm:$0xff] }
 0x5fd   : > { %v1135_v37 = vmul.f32 %v15248_v62, %v19589_v45  ;;  %v1058_v45 = vmul.f32 %v15227_v43, %v19590_v21  ;;  %8517 = vmatpush.bf16.msra.mxu2 %v8446_v42  ;;  %11060 = vmatpush.bf16.msrb.mxu3 %v8446_v42  ;;  %v7522_v20 = vmax.f32 %v19595_v53, 0.0 }
 0x5fe   : > { %v1094_v52 = vadd.f32 %v1054_v23, %v1013_v34  ;;  %v1217_v34 = vadd.f32 %v15276_v13, %v1176_v36 }
 0x5ff   : > { %v1098_v49 = vadd.f32 %v1058_v45, %v1017_v5 }
 0x600   : > { %v1175_v12 = vadd.f32 %v1135_v37, %v1094_v52  ;;  %v1139_v37 = vmul.f32 %v15248_v62, %v19594_v19  ;;  %v19596_v52 = vld [vmem:[#allocation151_spill] sm:$0xff]  ;;  %v19597_v19 = vld [vmem:[#allocation164_spill] sm:$0xff] }
 0x601   : > { %v7523_v0 = vmax.f32 %v19596_v52, 0.0  ;;  %v16189_v52 = vperm.slane %v15831_v18, 2 }
 0x602   : > { %v1216_v23 = vadd.f32 %v15276_v13, %v1175_v12  ;;  %v16168_v30 = vpop.f32.mrf.mxu1  ;;  %v1179_v24 = vadd.f32 %v1139_v37, %v1098_v49  ;;  %v7796_v12 = vadd.f32 %v15265_v60, %v16061_v39  ;;  %v7526_v37 = vmax.f32 %v19597_v19, 0.0 }
 0x603   : > { %v8278_v18 = vadd.f32 %v16074_v57, %v16189_v52  ;;  %v19601_v57 = vmax.f32 %v19581_v47, 0.0 }
 0x604   : > { %8071 = vrot.lane.b32.xlu1 %v18774_v16, %s11701_s9  ;;  %v19592_v16 = vld [vmem:[#allocation143_spill] sm:$0xff]  ;;  %v7877_v6 = vsub.f32 %v7792_v31, %v1216_v23 }
 0x605   : > { %v7793_v33 = vadd.f32 %v15265_v60, %v19592_v16 }
 0x606   : > { %v7917_v31 = vmul.f32 %v7877_v6, %v7522_v20  ;;  %v18776_v6 = vmax.f32 %v16175_v61, 0.0 }
 0x607   : > { %v7878_v27 = vsub.f32 %v7793_v33, %v1217_v34  ;;  %v1220_v33 = vadd.f32 %v15276_v13, %v1179_v24 }
 0x609   : > { %v7918_v36 = vmul.f32 %v7878_v27, %v7523_v0  ;;  %v7881_v34 = vsub.f32 %v7796_v12, %v1220_v33  ;;  %v19598_v33 = vld [vmem:[#allocation52_spill] sm:$0xff] }
 0x60a   : > { %v16181_v3 = vpop.f32.mrf.mxu1 }
 0x60b   : > { %v7958_v45 = vadd.f32 %v7918_v36, %v18778_v48  ;;  %v7921_v53 = vmul.f32 %v7881_v34, %v7526_v37  ;;  %v19600_v34 = vld [vmem:[#allocation56_spill] sm:$0xff] }
 0x61a   : > { %v7106_v9 = vpop.f32.mrf.mxu2 }
 0x61b   : > { %v7562_v21 = vmax.f32 %v7106_v9, 0.0  ;;  %v8280_v9 = vadd.f32 %v16102_v28, %v16189_v52  ;;  %v19599_v28 = vld [vmem:[#allocation44_spill] sm:$0xff] }
 0x61d   : > { %v7957_v42 = vadd.f32 %v7917_v31, %v7562_v21  ;;  %8059 = vrot.lane.b32.xlu1 %v7562_v21, %s11701_s9  ;;  %v16205_v21 = vpop.f32.mrf.mxu1  ;;  %v8378_v31 = vmax.f32 %v8280_v9, 0.0 }
 0x61e   : > { %v5496_v23 = vpop.xlane.xlu1 %5495 }
 0x61f   : > { %v8186_v5 = vpack.c.bf16 %v7958_v45, %v7957_v42  ;;  %11479 = vrcp.f32 %v5496_v23  ;;  %v1023_v45 = vmul.f32 %v15222_v44, %v19598_v33  ;;  %v8377_v23 = vmax.f32 %v8278_v18, 0.0 }
 0x621   : > { %11021 = vmatmul.msk.bf16.gmra.mxu1 %vm2698_vm0, %v8186_v5  ;;  %v8417_v5 = vpack.c.bf16 %v8378_v31, %v8377_v23  ;;  %v19604_v31 = vld [vmem:[#allocation116_spill] sm:$0xff] }
 0x622   : > { %v7198_v27 = vpop.f32.mrf.mxu2 }
 0x623   : > { %v7566_v49 = vmax.f32 %v7198_v27, 0.0  ;;  %v16186_v20 = vpop.f32.mrf.mxu3  ;;  %v19602_v27 = vpack.c.bf16 %v15874_v10, %v15870_v29  ;;  %v1065_v29 = vmul.f32 %v15227_v43, %v19604_v31  ;;  %v19605_v10 = vld [vmem:[#allocation119_spill] sm:$0xff] }
 0x624   : > { %v1146_v33 = vmul.f32 %v15248_v62, %v19605_v10 }
 0x625   : > { %v11480_v0 = vpop.eup %11479  ;;  %v16191_v24 = vadd.f32 %v7921_v53, %v7566_v49  ;;  %8077 = vrot.lane.b32.xlu1 %v18776_v6, %s11701_s9  ;;  %8067 = vrot.lane.b32.xlu2 %v7566_v49, %s11701_s9  ;;  %v16223_v49 = vpop.f32.mrf.mxu0  ;;  %v19603_v53 = vld [vmem:[#allocation110_spill] sm:$0xff]  ;;  %v19610_v6 = vld [vmem:[#allocation41_spill] sm:$0xff] }
 0x626   : > { %v5658_v12 = vmul.f32 %v11480_v0, %v15984_v38  ;;  %v1064_v38 = vmul.f32 %v15227_v43, %v19599_v28  ;;  %v1024_v0 = vmul.f32 %v15222_v44, %v19603_v53  ;;  %v16228_v9 = vpop.f32.mrf.mxu1  ;;  %v8285_v28 = vadd.f32 %v16124_v41, %v16189_v52 }
 0x627   : > { %v8188_v36 = vpack.c.bf16 %v16116_v32, %v16191_v24  ;;  %v1145_v32 = vmul.f32 %v15248_v62, %v19600_v34  ;;  %v18777_v24 = vmax.f32 %v16013_v55, 0.0  ;;  %v8283_v53 = vadd.f32 %v16119_v2, %v16189_v52 }
 0x628   : > { %10988 = vmatmul.msk.f32.vlgmr.msrb.gmra.mxu2 %vm4779_vm1, %v5658_v12  ;;  %v1104_v19 = vadd.f32 %v1064_v38, %v1023_v45  ;;  %v19606_v45 = vld [vmem:[#allocation131_spill] sm:$0xff]  ;;  %v1105_v34 = vadd.f32 %v1065_v29, %v1024_v0  ;;  %v8380_v0 = vmax.f32 %v8285_v28, 0.0  ;;  %v19613_v28 = vld [vmem:[#allocation13_spill] sm:$0xff] }
 0x629   : > { %v7532_v23 = vmax.f32 %v19606_v45, 0.0  ;;  %v1060_v45 = vmul.f32 %v15227_v43, %v19610_v6  ;;  %v8379_v2 = vmax.f32 %v8283_v53, 0.0 }
 0x62a   : > { %v1185_v37 = vadd.f32 %v1145_v32, %v1104_v19  ;;  %v19607_v32 = vld [vmem:[#allocation49_spill] sm:$0xff]  ;;  %v1186_v10 = vadd.f32 %v1146_v33, %v1105_v34 }
 0x62b   : > { %v16209_v42 = vpop.f32.mrf.mxu3  ;;  %v8418_v53 = vpack.c.bf16 %v8380_v0, %v8379_v2 }
 0x62c   : > { %v1226_v12 = vadd.f32 %v15276_v13, %v1185_v37  ;;  %v19609_v37 = vld [vmem:[#allocation120_spill] sm:$0xff]  ;;  %v1227_v33 = vadd.f32 %v15276_v13, %v1186_v10 }
 0x62d   : > { %8055 = vrot.lane.b32.xlu2 %v19601_v57, %s11701_s9  ;;  %v1019_v57 = vmul.f32 %v15222_v44, %v19607_v32  ;;  %v16262_v48 = vpop.f32.mrf.mxu0 }
 0x62e   : > { %v16271_v34 = vpop.f32.mrf.mxu1 }
 0x62f   : > { %v1100_v29 = vadd.f32 %v1060_v45, %v1019_v57  ;;  %v19614_v57 = vmax.f32 %v16092_v14, 0.0 }
 0x630   : > { %11030 = vmatmul.msk.bf16.vlgmr.msra.gmra.mxu2 %vm2698_vm0, %v8417_v5  ;;  %v19608_v5 = vld [vmem:[#allocation104_spill] sm:$0xff] }
 0x631   : > { %11022 = vmatmul.msk.bf16.gmra.mxu1 %vm2698_vm0, %v19602_v27  ;;  %v1020_v19 = vmul.f32 %v15222_v44, %v19608_v5  ;;  %v18779_v27 = vmax.f32 %v19609_v37, 0.0 }
 0x633   : > { %v16230_v47 = vpop.f32.mrf.mxu3 }
 0x634   : > { %v7802_v18 = vadd.f32 %v15265_v60, %v16230_v47 }
 0x635   : > { %8073 = vrot.lane.b32.xlu2 %v18777_v24, %s11701_s9  ;;  %v19611_v24 = vld [vmem:[#allocation97_spill] sm:$0xff] }
 0x636   : > { %v7887_v38 = vsub.f32 %v7802_v18, %v1226_v12  ;;  %v1061_v41 = vmul.f32 %v15227_v43, %v19611_v24  ;;  %v16256_v12 = vpop.permute.xlu0 %8015 }
 0x638   : > { %v7927_v31 = vmul.f32 %v7887_v38, %v7532_v23  ;;  %v1101_v32 = vadd.f32 %v1061_v41, %v1020_v19  ;;  %v19612_v23 = vld [vmem:[#allocation10_spill] sm:$0xff]  ;;  %v1142_v38 = vmul.f32 %v15248_v62, %v19613_v28  ;;  %v19615_v19 = vld [vmem:[#allocation11_spill] sm:$0xff]  ;;  %v7799_v28 = vadd.f32 %v15265_v60, %v16262_v48 }
 0x639   : > { %v1141_v24 = vmul.f32 %v15248_v62, %v19612_v23  ;;  %v7798_v23 = vadd.f32 %v15265_v60, %v16223_v49 }
 0x63a   : > { %v7967_v18 = vadd.f32 %v7927_v31, %v18779_v27  ;;  %v7533_v31 = vmax.f32 %v19615_v19, 0.0  ;;  %v1182_v41 = vadd.f32 %v1142_v38, %v1101_v32  ;;  %v7573_v27 = vmax.f32 %v16025_v11, 0.0 }
 0x63b   : > { %v16260_v5 = vpop.f32.mrf.mxu3  ;;  %v1181_v10 = vadd.f32 %v1141_v24, %v1100_v29  ;;  %v19616_v24 = vld [vmem:[#allocation100_spill] sm:$0xff]  ;;  %v1021_v19 = vmul.f32 %v15222_v44, %v19522_v59 }
 0x63c   : > { %v7803_v6 = vadd.f32 %v15265_v60, %v16260_v5  ;;  %v1223_v0 = vadd.f32 %v15276_v13, %v1182_v41 }
 0x63d   : > { %8061 = vrot.lane.b32.xlu2 %v19614_v57, %s11701_s9  ;;  %v1222_v57 = vadd.f32 %v15276_v13, %v1181_v10  ;;  %v19618_v10 = vld [vmem:[#allocation140_spill] sm:$0xff] }
 0x63e   : > { %v7888_v45 = vsub.f32 %v7803_v6, %v1227_v33  ;;  %v8032_v29 = vpop.permute.xlu0 %8031  ;;  %v7884_v11 = vsub.f32 %v7799_v28, %v1223_v0  ;;  %v16287_v33 = vpop.f32.mrf.mxu0  ;;  %v8290_v6 = vadd.f32 %v16168_v30, %v16189_v52  ;;  %v18781_v41 = vmax.f32 %v19618_v10, 0.0  ;;  %v19620_v0 = vld [vmem:[#allocation99_spill] sm:$0xff] }
 0x63f   : > { %v7883_v2 = vsub.f32 %v7798_v23, %v1222_v57  ;;  %v1063_v28 = vmul.f32 %v15227_v43, %v19491_v58 }
 0x640   : > { %v7928_v46 = vmul.f32 %v7888_v45, %v7533_v31  ;;  %11031 = vmatmul.msk.bf16.gmra.mxu2 %vm2698_vm0, %v8418_v53  ;;  %v16298_v31 = vpop.f32.mrf.mxu1  ;;  %v8382_v30 = vmax.f32 %v8290_v6, 0.0 }
 0x641   : > { %11023 = vmatmul.msk.bf16.gmra.mxu1 %vm2698_vm0, %v8188_v36  ;;  %v7528_v36 = vmax.f32 %v19616_v24, 0.0 }
 0x642   : > { %v7968_v14 = vadd.f32 %v7928_v46, %v7573_v27  ;;  %v19617_v46 = vld [vmem:[#allocation64_spill] sm:$0xff] }
 0x643   : > { %v7529_v38 = vmax.f32 %v19617_v46, 0.0  ;;  %v7923_v53 = vmul.f32 %v7883_v2, %v7528_v36 }
 0x644   : > { %v8191_v32 = vpack.c.bf16 %v7968_v14, %v7967_v18  ;;  %v1062_v18 = vmul.f32 %v15227_v43, %v19523_v8  ;;  %v19619_v14 = vmax.f32 %v16013_v55, 0.0  ;;  %v1143_v8 = vmul.f32 %v15248_v62, %v19530_v51 }
 0x645   : > { %8081 = vrot.lane.b32.xlu2 %v7573_v27, %s11701_s9  ;;  %v8288_v27 = vadd.f32 %v16134_v17, %v16189_v52  ;;  %v7924_v45 = vmul.f32 %v7884_v11, %v7529_v38  ;;  %v19621_v17 = vld [vmem:[#allocation115_spill] sm:$0xff]  ;;  %v19622_v11 = vmax.f32 %v19583_v50, 0.0  ;;  %v7800_v51 = vadd.f32 %v15265_v60, %v16287_v33 }
 0x646   : > { %11026 = vmatmul.msk.bf16.vlgmr.msra.gmra.mxu3 %vm2698_vm0, %v8191_v32  ;;  %v1102_v23 = vadd.f32 %v1062_v18, %v1021_v19  ;;  %v1022_v32 = vmul.f32 %v15222_v44, %v19620_v0  ;;  %v1144_v2 = vmul.f32 %v15248_v62, %v19621_v17  ;;  %v8036_v55 = vpop.permute.xlu0 %8035  ;;  %v16318_v38 = vpop.f32.mrf.mxu0  ;;  %v8293_v17 = vadd.f32 %v16181_v3, %v16189_v52 }
 0x647   : > { %v7964_v59 = vadd.f32 %v7924_v45, %v19619_v14  ;;  %v8381_v57 = vmax.f32 %v8288_v27, 0.0  ;;  %v7963_v6 = vadd.f32 %v7923_v53, %v19622_v11  ;;  %v7801_v53 = vadd.f32 %v15265_v60, %v16318_v38  ;;  %v16338_v0 = vpop.f32.mrf.mxu3  ;;  %v19624_v11 = vld [vmem:[#allocation165_spill] sm:$0xff] }
 0x648   : > { %v1183_v24 = vadd.f32 %v1143_v8, %v1102_v23  ;;  %v1103_v36 = vadd.f32 %v1063_v28, %v1022_v32  ;;  %v16323_v18 = vpop.f32.mrf.mxu1  ;;  %v18780_v45 = vmax.f32 %v16209_v42, 0.0  ;;  %v8295_v14 = vadd.f32 %v16205_v21, %v16189_v52  ;;  %v16340_v32 = vpop.permute.xlu2 %7812 }
 0x649   : > { %v8419_v58 = vpack.c.bf16 %v8382_v30, %v8381_v57  ;;  %v8189_v46 = vpack.c.bf16 %v7964_v59, %v7963_v6  ;;  %v19623_v59 = vld [vmem:[#allocation167_spill] sm:$0xff]  ;;  %v7531_v6 = vmax.f32 %v19624_v11, 0.0  ;;  %v19627_v3 = vmax.f32 %v19609_v37, 0.0 }
 0x64a   : > { %v1184_v19 = vadd.f32 %v1144_v2, %v1103_v36  ;;  %v1224_v27 = vadd.f32 %v15276_v13, %v1183_v24  ;;  %v7530_v57 = vmax.f32 %v19623_v59, 0.0 }
 0x64c   : > { %v7885_v23 = vsub.f32 %v7800_v51, %v1224_v27  ;;  %v1225_v28 = vadd.f32 %v15276_v13, %v1184_v19  ;;  %v8383_v27 = vmax.f32 %v8293_v17, 0.0 }
 0x64d   : > { %8087 = vrot.lane.b32.xlu2 %v18781_v41, %s11701_s9 }
 0x64e   : > { %v7886_v8 = vsub.f32 %v7801_v53, %v1225_v28  ;;  %v8024_v2 = vpop.permute.xlu0 %8023  ;;  %v7925_v36 = vmul.f32 %v7885_v23, %v7530_v57  ;;  %v19626_v53 = vmax.f32 %v16175_v61, 0.0  ;;  %v1026_v23 = vmul.f32 %v15222_v44, %v19495_v63  ;;  %v19629_v57 = vld [vmem:[#allocation127_spill] sm:$0xff] }
 0x64f   : > { %v1066_v63 = vmul.f32 %v15227_v43, %v19531_v1  ;;  %v8298_v1 = vadd.f32 %v16228_v9, %v16189_v52 }
 0x650   : > { %11032 = vmatmul.msk.bf16.gmra.mxu2 %vm2698_vm0, %v8419_v58  ;;  %v7290_v50 = vpop.f32.mrf.mxu2  ;;  %v19625_v58 = vld [vmem:[#allocation169_spill] sm:$0xff]  ;;  %v7926_v51 = vmul.f32 %v7886_v8, %v7531_v6  ;;  %v16347_v19 = vpop.f32.mrf.mxu1  ;;  %v1067_v8 = vmul.f32 %v15227_v43, %v19629_v57  ;;  %v7575_v6 = vmax.f32 %v16186_v20, 0.0  ;;  %v19631_v20 = vld [vmem:[#allocation122_spill] sm:$0xff] }
 0x651   : > { %11024 = vmatmul.msk.bf16.gmra.mxu1 %vm2698_vm0, %v8189_v46  ;;  %v7570_v30 = vmax.f32 %v7290_v50, 0.0  ;;  %v7823_v24 = vadd.f32 %v16340_v32, %v19625_v58  ;;  %v8384_v46 = vmax.f32 %v8295_v14, 0.0  ;;  %v16360_v14 = vpop.f32.mrf.mxu3  ;;  %v16365_v37 = vpop.permute.xlu2 %8033 }
 0x652   : > { %v7966_v28 = vadd.f32 %v7926_v51, %v19626_v53  ;;  %v1107_v58 = vadd.f32 %v1067_v8, %v1026_v23  ;;  %v19630_v51 = vld [vmem:[#allocation141_spill] sm:$0xff]  ;;  %v19632_v53 = vld [vmem:[#allocation20_spill] sm:$0xff]  ;;  %v8385_v23 = vmax.f32 %v8298_v1, 0.0  ;;  %v19636_v1 = vld [vmem:[#allocation58_spill] sm:$0xff] }
 0x653   : > { %8075 = vrot.lane.b32.xlu0 %v7570_v30, %s11701_s9  ;;  %v8143_v21 = vadd.f32 %v8032_v29, %v7823_v24  ;;  %v7965_v50 = vadd.f32 %v7925_v36, %v7570_v30  ;;  %v8420_v59 = vpack.c.bf16 %v8384_v46, %v8383_v27  ;;  %v19628_v29 = vld [vmem:[#allocation174_spill] sm:$0xff]  ;;  %v8300_v36 = vadd.f32 %v16271_v34, %v16189_v52 }
 0x654   : > { %v7825_v30 = vadd.f32 %v16340_v32, %v19628_v29  ;;  %v1025_v46 = vmul.f32 %v15222_v44, %v19533_v56  ;;  %v7805_v34 = vadd.f32 %v15265_v60, %v16360_v14 }
 0x655   : > { %8093 = vrot.lane.b32.xlu2 %v18780_v45, %s11701_s9  ;;  %v8190_v11 = vpack.c.bf16 %v7966_v28, %v7965_v50  ;;  %v7819_v28 = vadd.f32 %v16340_v32, %v19632_v53 }
 0x656   : > { %v8042_v61 = vpop.permute.xlu0 %8041  ;;  %v8145_v17 = vadd.f32 %v8036_v55, %v7825_v30  ;;  %v1147_v55 = vmul.f32 %v15248_v62, %v19630_v51  ;;  %v1106_v50 = vadd.f32 %v1066_v63, %v1025_v46  ;;  %v7804_v30 = vadd.f32 %v15265_v60, %v16338_v0  ;;  %v19634_v46 = vld [vmem:[#allocation168_spill] sm:$0xff] }
 0x657   : > { %v8139_v56 = vadd.f32 %v8024_v2, %v7819_v28  ;;  %v19633_v2 = vld [vmem:[#allocation153_spill] sm:$0xff]  ;;  %v7535_v51 = vmax.f32 %v19634_v46, 0.0  ;;  %v19638_v28 = vld [vmem:[#allocation170_spill] sm:$0xff] }
 0x658   : > { %v16370_v24 = vpop.f32.mrf.mxu1 }
 0x659   : > { %v16393_v57 = vpop.permute.xlu2 %8021 }
 0x65b   : > { %8079 = vrot.lane.b32.xlu0 %v19627_v3, %s11701_s9  ;;  %v8386_v3 = vmax.f32 %v8300_v36, 0.0  ;;  %v1069_v36 = vmul.f32 %v15227_v43, %v19633_v2 }
 0x65d   : > { %9075 = vrot.lane.b32.xlu2 %v8143_v21, %s11702_s19  ;;  %v1148_v21 = vmul.f32 %v15248_v62, %v19631_v20  ;;  %v19635_v20 = vld [vmem:[#allocation67_spill] sm:$0xff] }
 0x65e   : > { %v8030_v29 = vpop.permute.xlu0 %8029 }
 0x65f   : > { %v1188_v27 = vadd.f32 %v1148_v21, %v1107_v58  ;;  %v1068_v21 = vmul.f32 %v15227_v43, %v19635_v20  ;;  %v19641_v20 = vld [vmem:[#allocation137_spill] sm:$0xff] }
 0x660   : > { %11033 = vmatmul.msk.bf16.gmra.mxu2 %vm2698_vm0, %v8420_v59  ;;  %v1187_v59 = vadd.f32 %v1147_v55, %v1106_v50  ;;  %v16395_v8 = vpop.f32.mrf.mxu1  ;;  %v1028_v50 = vmul.f32 %v15222_v44, %v19636_v1  ;;  %v1150_v1 = vmul.f32 %v15248_v62, %v19641_v20 }
 0x661   : > { %11025 = vmatmul.msk.bf16.gmra.mxu1 %vm2698_vm0, %v8190_v11  ;;  %v16388_v11 = vpop.f32.mrf.mxu3  ;;  %v1229_v9 = vadd.f32 %v15276_v13, %v1188_v27  ;;  %v19637_v27 = vld [vmem:[#allocation63_spill] sm:$0xff] }
 0x662   : > { %v1228_v63 = vadd.f32 %v15276_v13, %v1187_v59  ;;  %v7828_v53 = vadd.f32 %v16340_v32, %v19637_v27  ;;  %v16422_v27 = vpop.permute.xlu2 %8039 }
 0x663   : > { %8085 = vrot.lane.b32.xlu0 %v7575_v6, %s11701_s9  ;;  %v7890_v58 = vsub.f32 %v7805_v34, %v1229_v9  ;;  %v19639_v34 = vld [vmem:[#allocation47_spill] sm:$0xff] }
 0x664   : > { %v7889_v55 = vsub.f32 %v7804_v30, %v1228_v63  ;;  %v8148_v9 = vadd.f32 %v8042_v61, %v7828_v53  ;;  %v19640_v30 = vld [vmem:[#allocation60_spill] sm:$0xff]  ;;  %v8303_v53 = vadd.f32 %v16298_v31, %v16189_v52 }
 0x665   : > { %9079 = vrot.lane.b32.xlu2 %v8145_v17, %s11702_s19  ;;  %v8421_v17 = vpack.c.bf16 %v8386_v3, %v8385_v23  ;;  %v7534_v3 = vmax.f32 %v19638_v28, 0.0  ;;  %v7930_v59 = vmul.f32 %v7890_v58, %v7535_v51  ;;  %v1109_v23 = vadd.f32 %v1069_v36, %v1028_v50 }
 0x666   : > { %v1149_v63 = vmul.f32 %v15248_v62, %v19640_v30  ;;  %v8305_v58 = vadd.f32 %v16323_v18, %v16189_v52  ;;  %v8050_v51 = vpop.permute.xlu0 %8049  ;;  %v8387_v31 = vmax.f32 %v8303_v53, 0.0  ;;  %v19646_v53 = vld [vmem:[#allocation138_spill] sm:$0xff] }
 0x667   : > { %v7929_v45 = vmul.f32 %v7889_v55, %v7534_v3  ;;  %v1190_v36 = vadd.f32 %v1150_v1, %v1109_v23  ;;  %v7970_v50 = vadd.f32 %v7930_v59, %v7575_v6  ;;  %v7577_v23 = vmax.f32 %v16044_v26, 0.0  ;;  %v19645_v26 = vld [vmem:[#allocation5_spill] sm:$0xff] }
 0x669   : > { %v16416_v41 = vpop.f32.mrf.mxu3  ;;  %v1231_v6 = vadd.f32 %v15276_v13, %v1190_v36 }
 0x66a   : > { %v7807_v28 = vadd.f32 %v15265_v60, %v16416_v41 }
 0x66c   : > { %v7892_v30 = vsub.f32 %v7807_v28, %v1231_v6 }
 0x66d   : > { %9067 = vrot.lane.b32.xlu2 %v8139_v56, %s11702_s19  ;;  %v1027_v56 = vmul.f32 %v15222_v44, %v19639_v34  ;;  %v19642_v34 = vld [vmem:[#allocation166_spill] sm:$0xff] }
 0x66e   : > { %v7822_v18 = vadd.f32 %v16340_v32, %v19642_v34  ;;  %v8052_v20 = vpop.permute.xlu0 %8051 }
 0x66f   : > { %v1108_v46 = vadd.f32 %v1068_v21, %v1027_v56  ;;  %v8314_v21 = vpop.f32.mrf.mxu1  ;;  %v8388_v56 = vmax.f32 %v8305_v58, 0.0 }
 0x670   : > { %11034 = vmatmul.msk.bf16.gmra.mxu2 %vm2698_vm0, %v8421_v17  ;;  %v8142_v59 = vadd.f32 %v8030_v29, %v7822_v18  ;;  %v16441_v29 = vpop.permute.xlu2 %8027 }
 0x671   : > { %v7382_v2 = vpop.f32.mrf.mxu2  ;;  %v1189_v55 = vadd.f32 %v1149_v63, %v1108_v46  ;;  %v19643_v63 = vld [vmem:[#allocation30_spill] sm:$0xff]  ;;  %v8422_v46 = vpack.c.bf16 %v8388_v56, %v8387_v31  ;;  %v8310_v56 = vadd.f32 %v16370_v24, %v16189_v52  ;;  %v19648_v31 = vld [vmem:[#allocation172_spill] sm:$0xff] }
 0x672   : > { %v7574_v17 = vmax.f32 %v7382_v2, 0.0  ;;  %v7537_v2 = vmax.f32 %v19643_v63, 0.0 }
 0x673   : > { %v8390_v24 = vmax.f32 %v8310_v56, 0.0  ;;  %v19651_v56 = vld [vmem:[#allocation158_spill] sm:$0xff] }
 0x674   : > { %v7969_v61 = vadd.f32 %v7929_v45, %v7574_v17  ;;  %8083 = vrot.lane.b32.xlu1 %v7574_v17, %s11701_s9  ;;  %v7806_v45 = vadd.f32 %v15265_v60, %v16388_v11  ;;  %v19644_v17 = vld [vmem:[#allocation132_spill] sm:$0xff]  ;;  %v7932_v36 = vmul.f32 %v7892_v30, %v7537_v2  ;;  %v7833_v30 = vadd.f32 %v16340_v32, %v19561_v35 }
 0x675   : > { %9085 = vrot.lane.b32.xlu2 %v8148_v9, %s11702_s19  ;;  %v1230_v9 = vadd.f32 %v15276_v13, %v1189_v55  ;;  %v7536_v58 = vmax.f32 %v19644_v17, 0.0  ;;  %v7815_v55 = vadd.f32 %v16340_v32, %v19646_v53  ;;  %v7836_v35 = vadd.f32 %v16340_v32, %v19575_v15  ;;  %v16482_v53 = vpop.f32.mrf.mxu3 }
 0x676   : > { %v8192_v3 = vpack.c.bf16 %v7970_v50, %v7969_v61  ;;  %v7832_v61 = vadd.f32 %v16340_v32, %v19645_v26  ;;  %v7972_v18 = vadd.f32 %v7932_v36, %v7577_v23  ;;  %v8153_v63 = vadd.f32 %v8052_v20, %v7833_v30 }
 0x677   : > { %v7891_v1 = vsub.f32 %v7806_v45, %v1230_v9  ;;  %v16445_v50 = vpop.f32.mrf.mxu1  ;;  %v8135_v34 = vadd.f32 %v16256_v12, %v7815_v55  ;;  %v19647_v45 = vmax.f32 %v19618_v10, 0.0  ;;  %v7824_v9 = vadd.f32 %v16340_v32, %v19648_v31 }
 0x678   : > { %11027 = vmatmul.msk.bf16.gmra.mxu3 %vm2698_vm0, %v8192_v3  ;;  %v8152_v3 = vadd.f32 %v8050_v51, %v7832_v61  ;;  %v8308_v51 = vadd.f32 %v16347_v19, %v16189_v52  ;;  %v16470_v19 = vpop.permute.xlu1 %8017  ;;  %v8315_v55 = vadd.f32 %v8314_v21, %v16189_v52  ;;  %v1070_v21 = vmul.f32 %v15227_v43, %v19550_v7 }
 0x679   : > { %v7931_v28 = vmul.f32 %v7891_v1, %v7536_v58  ;;  %v8144_v2 = vadd.f32 %v16365_v37, %v7824_v9  ;;  %v19649_v58 = vld [vmem:[#allocation57_spill] sm:$0xff] }
 0x67a   : > { %v7818_v36 = vadd.f32 %v16340_v32, %v19649_v58 }
 0x67b   : > { %v7971_v6 = vadd.f32 %v7931_v28, %v19647_v45  ;;  %v19650_v28 = vld [vmem:[#allocation51_spill] sm:$0xff]  ;;  %v1071_v45 = vmul.f32 %v15227_v43, %v19651_v56  ;;  %v1151_v43 = vmul.f32 %v15248_v62, %v19551_v25  ;;  %v19657_v56 = vld [vmem:[#allocation173_spill] sm:$0xff] }
 0x67c   : > { %8089 = vrot.lane.b32.xlu1 %v7577_v23, %s11701_s9  ;;  %v16462_v23 = vpop.permute.xlu2 %8045  ;;  %v8138_v61 = vadd.f32 %v16393_v57, %v7818_v36  ;;  %v7827_v15 = vadd.f32 %v16340_v32, %v19650_v28  ;;  %v1029_v57 = vmul.f32 %v15222_v44, %v19547_v4  ;;  %v7808_v36 = vadd.f32 %v15265_v60, %v16482_v53 }
 0x67d   : > { %9073 = vrot.lane.b32.xlu2 %v8142_v59, %s11702_s19  ;;  %v16455_v59 = vpop.permute.xlu0 %8069  ;;  %v8193_v12 = vpack.c.bf16 %v7972_v18, %v7971_v6 }
 0x67e   : > { %v8147_v31 = vadd.f32 %v16422_v27, %v7827_v15  ;;  %v1110_v4 = vadd.f32 %v1070_v21, %v1029_v57  ;;  %v19654_v27 = vld [vmem:[#allocation163_spill] sm:$0xff]  ;;  %v8318_v57 = vadd.f32 %v16445_v50, %v16189_v52 }
 0x67f   : > { %v8319_v10 = vpop.f32.mrf.mxu1  ;;  %v19655_v15 = vld [vmem:[#allocation171_spill] sm:$0xff] }
 0x680   : > { %11035 = vmatmul.msk.bf16.gmra.mxu2 %vm2698_vm0, %v8422_v46  ;;  %v8389_v46 = vmax.f32 %v8308_v51, 0.0  ;;  %v16491_v18 = vpop.permute.xlu1 %8019  ;;  %v19652_v51 = vld [vmem:[#allocation152_spill] sm:$0xff] }
 0x682   : > { %v8423_v1 = vpack.c.bf16 %v8390_v24, %v8389_v46  ;;  %v16507_v46 = vpop.f32.mrf.mxu3 }
 0x684   : > { %9059 = vrot.lane.b32.xlu1 %v8135_v34, %s11702_s19  ;;  %v16477_v20 = vpop.permute.xlu2 %8063  ;;  %v8392_v34 = vmax.f32 %v8315_v55, 0.0 }
 0x685   : > { %9093 = vrot.lane.b32.xlu2 %v8152_v3, %s11702_s19  ;;  %v8058_v17 = vpop.permute.xlu0 %8057  ;;  %v8313_v3 = vadd.f32 %v16395_v8, %v16189_v52  ;;  %v1030_v8 = vmul.f32 %v15222_v44, %v19652_v51  ;;  %v7821_v44 = vadd.f32 %v16340_v32, %v19654_v27  ;;  %v19659_v27 = vld [vmem:[#allocation145_spill] sm:$0xff] }
 0x686   : > { %v8156_v26 = vadd.f32 %v8058_v17, %v7836_v35  ;;  %v7809_v17 = vadd.f32 %v15265_v60, %v16507_v46 }
 0x687   : > { %v16479_v37 = vpop.f32.mrf.mxu1  ;;  %v8391_v9 = vmax.f32 %v8313_v3, 0.0  ;;  %v8141_v35 = vadd.f32 %v16441_v29, %v7821_v44  ;;  %v7539_v3 = vmax.f32 %v19655_v15, 0.0  ;;  %v7835_v44 = vadd.f32 %v16340_v32, %v19574_v54 }
 0x688   : > { %11028 = vmatmul.msk.bf16.gmra.mxu3 %vm2698_vm0, %v8193_v12  ;;  %v19653_v12 = vld [vmem:[#allocation126_spill] sm:$0xff]  ;;  %v8038_v58 = vpop.permute.xlu1 %8037 }
 0x689   : > { %v1152_v30 = vmul.f32 %v15248_v62, %v19653_v12  ;;  %v8320_v62 = vadd.f32 %v8319_v10, %v16189_v52 }
 0x68b   : > { %v8394_v21 = vmax.f32 %v8320_v62, 0.0 }
 0x68c   : > { %9077 = vrot.lane.b32.xlu1 %v8144_v2, %s11702_s19  ;;  %v16499_v6 = vpop.permute.xlu2 %8067  ;;  %v1111_v2 = vadd.f32 %v1071_v45, %v1030_v8  ;;  %v7538_v45 = vmax.f32 %v19657_v56, 0.0 }
 0x68d   : > { %9095 = vrot.lane.b32.xlu2 %v8153_v63, %s11702_s19  ;;  %v8424_v63 = vpack.c.bf16 %v8392_v34, %v8391_v9  ;;  %v19656_v34 = vld [vmem:[#allocation177_spill] sm:$0xff]  ;;  %v8393_v9 = vmax.f32 %v8318_v57, 0.0 }
 0x68e   : > { %v1192_v7 = vadd.f32 %v1152_v30, %v1111_v2  ;;  %v7830_v29 = vadd.f32 %v16340_v32, %v19656_v34  ;;  %v19661_v34 = vld [vmem:[#allocation77_spill] sm:$0xff] }
 0x68f   : > { %v8324_v24 = vpop.f32.mrf.mxu1  ;;  %v8425_v12 = vpack.c.bf16 %v8394_v21, %v8393_v9  ;;  %v7841_v9 = vadd.f32 %v16340_v32, %v16061_v39  ;;  %v7844_v39 = vadd.f32 %v16340_v32, %v16262_v48 }
 0x690   : > { %11036 = vmatmul.msk.bf16.gmra.mxu2 %vm2698_vm0, %v8423_v1  ;;  %v1191_v1 = vadd.f32 %v1151_v43, %v1110_v4  ;;  %v8026_v30 = vpop.permute.xlu1 %8025  ;;  %v19658_v4 = vmax.f32 %v16209_v42, 0.0 }
 0x692   : > { %v1232_v25 = vadd.f32 %v15276_v13, %v1191_v1 }
 0x694   : > { %9065 = vrot.lane.b32.xlu1 %v8138_v61, %s11702_s19  ;;  %v8056_v61 = vpop.permute.xlu2 %8055  ;;  %v7893_v60 = vsub.f32 %v7808_v36, %v1232_v25  ;;  %v8323_v36 = vadd.f32 %v16479_v37, %v16189_v52  ;;  %v19660_v25 = vld [vmem:[#allocation53_spill] sm:$0xff]  ;;  %v7839_v37 = vadd.f32 %v16340_v32, %v19661_v34 }
 0x695   : > { %9101 = vrot.lane.b32.xlu2 %v8156_v26, %s11702_s19  ;;  %v1233_v26 = vadd.f32 %v15276_v13, %v1192_v7  ;;  %v8150_v13 = vadd.f32 %v16462_v23, %v7830_v29  ;;  %v7816_v23 = vadd.f32 %v16340_v32, %v19659_v27  ;;  %v8155_v1 = vadd.f32 %v8056_v61, %v7835_v44  ;;  %v19662_v29 = vld [vmem:[#allocation93_spill] sm:$0xff] }
 0x696   : > { %v7933_v8 = vmul.f32 %v7893_v60, %v7538_v45  ;;  %v7817_v54 = vadd.f32 %v16340_v32, %v19660_v25  ;;  %v7826_v57 = vadd.f32 %v16340_v32, %v19662_v29  ;;  %v7848_v25 = vadd.f32 %v16340_v32, %v16260_v5 }
 0x697   : > { %v7894_v55 = vsub.f32 %v7809_v17, %v1233_v26  ;;  %v8327_v28 = vpop.f32.mrf.mxu1  ;;  %v8136_v42 = vadd.f32 %v16470_v19, %v7816_v23  ;;  %v8325_v17 = vadd.f32 %v8324_v24, %v16189_v52  ;;  %v7838_v19 = vadd.f32 %v16340_v32, %v19592_v16 }
 0x698   : > { %v8137_v61 = vadd.f32 %v16491_v18, %v7817_v54  ;;  %v8395_v24 = vmax.f32 %v8323_v36, 0.0  ;;  %v8159_v16 = vadd.f32 %v16477_v20, %v7839_v37  ;;  %v8146_v18 = vadd.f32 %v8038_v58, %v7826_v57 }
 0x699   : > { %v8328_v21 = vadd.f32 %v8327_v28, %v16189_v52  ;;  %v8161_v20 = vadd.f32 %v16499_v6, %v7841_v9  ;;  %v19664_v28 = vld [vmem:[#allocation176_spill] sm:$0xff]  ;;  %v7847_v23 = vadd.f32 %v16340_v32, %v16230_v47 }
 0x69a   : > { %v19666_v9 = vld [vmem:[#allocation144_spill] sm:$0xff] }
 0x69c   : > { %9083 = vrot.lane.b32.xlu1 %v8147_v31, %s11702_s19  ;;  %v7934_v31 = vmul.f32 %v7894_v55, %v7539_v3  ;;  %v8074_v50 = vpop.permute.xlu2 %8073  ;;  %v8396_v55 = vmax.f32 %v8325_v17, 0.0 }
 0x69d   : > { %v8164_v6 = vadd.f32 %v8074_v50, %v7844_v39 }
 0x69e   : > { %v7974_v2 = vadd.f32 %v7934_v31, %v19658_v4  ;;  %v8426_v3 = vpack.c.bf16 %v8396_v55, %v8395_v24  ;;  %v19663_v31 = vld [vmem:[#allocation160_spill] sm:$0xff] }
 0x69f   : > { %v8329_v7 = vpop.f32.mrf.mxu1 }
 0x6a0   : > { %11037 = vmatmul.msk.bf16.gmra.mxu2 %vm2698_vm0, %v8424_v63  ;;  %v8330_v45 = vadd.f32 %v8329_v7, %v16189_v52 }
 0x6a4   : > { %9071 = vrot.lane.b32.xlu1 %v8141_v35, %s11702_s19  ;;  %v8044_v35 = vpop.permute.xlu1 %8043  ;;  %v8062_v26 = vpop.permute.xlu2 %8061 }
 0x6a5   : > { %v8158_v15 = vadd.f32 %v8062_v26, %v7838_v19 }
 0x6a7   : > { %v8332_v62 = vpop.f32.mrf.mxu1 }
 0x6ab   : > { %v7474_v10 = vpop.f32.mrf.mxu2 }
 0x6ac   : > { %v7578_v51 = vmax.f32 %v7474_v10, 0.0  ;;  %9089 = vrot.lane.b32.xlu1 %v8150_v13, %s11702_s19  ;;  %v8048_v60 = vpop.permute.xlu1 %8047  ;;  %v7820_v10 = vadd.f32 %v16340_v32, %v19663_v31  ;;  %v8398_v13 = vmax.f32 %v8330_v45, 0.0  ;;  %v8082_v7 = vpop.permute.xlu2 %8081 }
 0x6ae   : > { %v7973_v63 = vadd.f32 %v7933_v8, %v7578_v51  ;;  %8091 = vrot.lane.b32.xlu0 %v7578_v51, %s11701_s9  ;;  %v8140_v51 = vadd.f32 %v8026_v30, %v7820_v10  ;;  %v8397_v8 = vmax.f32 %v8328_v21, 0.0 }
 0x6af   : > { %v8334_v56 = vpop.f32.mrf.mxu1 }
 0x6b0   : > { %v8194_v43 = vpack.c.bf16 %v7974_v2, %v7973_v63  ;;  %11038 = vmatmul.msk.bf16.gmra.mxu2 %vm2698_vm0, %v8425_v12  ;;  %v8427_v63 = vpack.c.bf16 %v8398_v13, %v8397_v8  ;;  %v8335_v27 = vadd.f32 %v8334_v56, %v16189_v52  ;;  %v7851_v56 = vadd.f32 %v16340_v32, %v16388_v11 }
 0x6b1   : > { %v7854_v13 = vadd.f32 %v16340_v32, %v16507_v46 }
 0x6b2   : > { %11029 = vmatmul.msk.bf16.gmra.mxu3 %vm2698_vm0, %v8194_v43  ;;  %v7829_v43 = vadd.f32 %v16340_v32, %v19664_v28  ;;  %v8400_v54 = vmax.f32 %v8335_v27, 0.0 }
 0x6b3   : > { %v16588_v55 = vpop.f32.mrf.mxu2 }
 0x6b4   : > { %9099 = vrot.lane.b32.xlu1 %v8155_v1, %s11702_s19  ;;  %v16568_v58 = vpop.permute.xlu1 %8065  ;;  %v8149_v30 = vadd.f32 %v8044_v35, %v7829_v43  ;;  %v8333_v1 = vadd.f32 %v8332_v62, %v16189_v52  ;;  %v19665_v35 = vld [vmem:[#allocation23_spill] sm:$0xff]  ;;  %v8088_v5 = vpop.permute.xlu2 %8087 }
 0x6b5   : > { %v7831_v50 = vadd.f32 %v16340_v32, %v19665_v35 }
 0x6b6   : > { %9061 = vrot.lane.b32.xlu0 %v8136_v42, %s11702_s19  ;;  %v8399_v62 = vmax.f32 %v8333_v1, 0.0 }
 0x6b7   : > { %v8337_v12 = vpop.f32.mrf.mxu1  ;;  %v8151_v19 = vadd.f32 %v8048_v60, %v7831_v50 }
 0x6b8   : > { %v8428_v34 = vpack.c.bf16 %v8400_v54, %v8399_v62  ;;  %v8338_v11 = vadd.f32 %v8337_v12, %v16189_v52  ;;  %v19667_v12 = vld [vmem:[#allocation29_spill] sm:$0xff] }
 0x6b9   : > { %v7840_v46 = vadd.f32 %v16340_v32, %v19667_v12 }
 0x6bb   : > { %v16604_v45 = vpop.f32.mrf.mxu2 }
 0x6bc   : > { %9105 = vrot.lane.b32.xlu1 %v8158_v15, %s11702_s19  ;;  %v8054_v44 = vpop.permute.xlu1 %8053  ;;  %v8094_v10 = vpop.permute.xlu2 %8093 }
 0x6bd   : > { %v8174_v28 = vadd.f32 %v8094_v10, %v7854_v13 }
 0x6be   : > { %9063 = vrot.lane.b32.xlu0 %v8137_v61, %s11702_s19  ;;  %v8168_v61 = vadd.f32 %v8082_v7, %v7848_v25 }
 0x6bf   : > { %v8339_v42 = vpop.f32.mrf.mxu1 }
 0x6c0   : > { %11039 = vmatmul.msk.bf16.gmra.mxu2 %vm2698_vm0, %v8426_v3  ;;  %v7842_v3 = vadd.f32 %v16340_v32, %v16085_v22  ;;  %v7834_v22 = vadd.f32 %v16340_v32, %v19562_v40  ;;  %v8340_v21 = vadd.f32 %v8339_v42, %v16189_v52 }
 0x6c2   : > { %v8162_v29 = vadd.f32 %v16455_v59, %v7842_v3  ;;  %v7845_v59 = vadd.f32 %v16340_v32, %v16287_v33  ;;  %v8402_v8 = vmax.f32 %v8340_v21, 0.0 }
 0x6c3   : > { %v16617_v33 = vpop.f32.mrf.mxu2 }
 0x6c4   : > { %9107 = vrot.lane.b32.xlu1 %v8159_v16, %s11702_s19  ;;  %v8072_v57 = vpop.permute.xlu1 %8071  ;;  %v8154_v16 = vadd.f32 %v8054_v44, %v7834_v22 }
 0x6c5   : > { %v8076_v4 = vpop.permute.xlu0 %8075 }
 0x6c6   : > { %9081 = vrot.lane.b32.xlu0 %v8146_v18, %s11702_s19  ;;  %v8171_v18 = vadd.f32 %v8088_v5, %v7851_v56  ;;  %v8165_v40 = vadd.f32 %v8076_v4, %v7845_v59  ;;  %v8160_v4 = vadd.f32 %v16568_v58, %v7840_v46  ;;  %v7852_v56 = vadd.f32 %v16340_v32, %v16416_v41 }
 0x6c7   : > { %v8342_v60 = vpop.f32.mrf.mxu1 }
 0x6c8   : > { %v8343_v7 = vadd.f32 %v8342_v60, %v16189_v52 }
 0x6c9   : > { %v8357_v2 = vpop.f32.mrf.mxu3 }
 0x6ca   : > { %v8358_v17 = vadd.f32 %v8357_v2, %v16189_v52  ;;  %v8401_v2 = vmax.f32 %v8338_v11, 0.0  ;;  %v8403_v58 = vmax.f32 %v8343_v7, 0.0 }
 0x6cb   : > { %v16630_v27 = vpop.f32.mrf.mxu2 }
 0x6cc   : > { %9111 = vrot.lane.b32.xlu1 %v8161_v20, %s11702_s19  ;;  %v8409_v24 = vmax.f32 %v8358_v17, 0.0  ;;  %v8060_v31 = vpop.permute.xlu1 %8059  ;;  %v8429_v43 = vpack.c.bf16 %v8402_v8, %v8401_v2 }
 0x6cd   : > { %v8080_v36 = vpop.permute.xlu0 %8079 }
 0x6ce   : > { %9069 = vrot.lane.b32.xlu0 %v8140_v51, %s11702_s19  ;;  %v8167_v26 = vadd.f32 %v8080_v36, %v7847_v23  ;;  %v7837_v51 = vadd.f32 %v16340_v32, %v19666_v9  ;;  %v7850_v23 = vadd.f32 %v16340_v32, %v16360_v14 }
 0x6cf   : > { %v8344_v20 = vpop.f32.mrf.mxu1 }
 0x6d0   : > { %11040 = vmatmul.msk.bf16.gmra.mxu2 %vm2698_vm0, %v8427_v63  ;;  %9123 = vrot.lane.b32.xlu2 %v8167_v26, %s11702_s19  ;;  %v8157_v63 = vadd.f32 %v8060_v31, %v7837_v51 }
 0x6d1   : > { %v8359_v48 = vpop.f32.mrf.mxu3 }
 0x6d2   : > { %v8360_v47 = vadd.f32 %v8359_v48, %v16189_v52 }
 0x6d3   : > { %v8529_v50 = vpop.f32.mrf.mxu2 }
 0x6d4   : > { %9117 = vrot.lane.b32.xlu1 %v8164_v6, %s11702_s19  ;;  %v8410_v15 = vmax.f32 %v8360_v47, 0.0  ;;  %v7843_v6 = vadd.f32 %v16340_v32, %v16223_v49  ;;  %v7846_v49 = vadd.f32 %v16340_v32, %v16318_v38  ;;  %v8078_v35 = vpop.permute.xlu1 %8077 }
 0x6d5   : > { %v8086_v42 = vpop.permute.xlu0 %8085 }
 0x6d6   : > { %9087 = vrot.lane.b32.xlu0 %v8149_v30, %s11702_s19  ;;  %v8433_v37 = vpack.c.bf16 %v8410_v15, %v8409_v24  ;;  %v8345_v30 = vadd.f32 %v8344_v20, %v16189_v52  ;;  %v8170_v1 = vadd.f32 %v8086_v42, %v7850_v23  ;;  %v8163_v17 = vadd.f32 %v8072_v57, %v7843_v6 }
 0x6d7   : > { %v8347_v39 = vpop.f32.mrf.mxu1  ;;  %v8166_v26 = vadd.f32 %v8078_v35, %v7846_v49 }
 0x6d8   : > { %11046 = vmatmul.msk.bf16.vlgmr.msrb.gmra.mxu3 %vm2698_vm0, %v8433_v37  ;;  %9113 = vrot.lane.b32.xlu2 %v8162_v29, %s11702_s19  ;;  %v8404_v44 = vmax.f32 %v8345_v30, 0.0  ;;  %v8348_v25 = vadd.f32 %v8347_v39, %v16189_v52 }
 0x6da   : > { %v8430_v36 = vpack.c.bf16 %v8404_v44, %v8403_v58  ;;  %v8405_v62 = vmax.f32 %v8348_v25, 0.0 }
 0x6dc   : > { %9125 = vrot.lane.b32.xlu1 %v8168_v61, %s11702_s19  ;;  %v16644_v61 = vpop.f32.mrf.mxu2 }
 0x6de   : > { %9091 = vrot.lane.b32.xlu0 %v8151_v19, %s11702_s19  ;;  %v7849_v19 = vadd.f32 %v16340_v32, %v16338_v0 }
 0x6df   : > { %v8349_v48 = vpop.f32.mrf.mxu1 }
 0x6e0   : > { %11041 = vmatmul.msk.bf16.gmra.mxu2 %vm2698_vm0, %v8428_v34  ;;  %9119 = vrot.lane.b32.xlu2 %v8165_v40, %s11702_s19  ;;  %v8350_v14 = vadd.f32 %v8349_v48, %v16189_v52 }
 0x6e2   : > { %v8406_v47 = vmax.f32 %v8350_v14, 0.0 }
 0x6e4   : > { %9131 = vrot.lane.b32.xlu1 %v8171_v18, %s11702_s19  ;;  %v8431_v24 = vpack.c.bf16 %v8406_v47, %v8405_v62  ;;  %v16648_v34 = vpop.f32.mrf.mxu2  ;;  %v11656_v18 = vld [vmem:[%s18313_s6] sm:$0x1f] }
 0x6e5   : > { %v16659_v21 = vperm.slane %v11656_v18, 3 }
 0x6e6   : > { %9097 = vrot.lane.b32.xlu0 %v8154_v16, %s11702_s19  ;;  %v8084_v38 = vpop.permute.xlu1 %8083 }
 0x6e7   : > { %v8352_v54 = vpop.f32.mrf.mxu1  ;;  %v8169_v15 = vadd.f32 %v8084_v38, %v7849_v19  ;;  %v8530_v59 = vadd.f32 %v8529_v50, %v16659_v21  ;;  %v8520_v51 = vadd.f32 %v16588_v55, %v16659_v21  ;;  %v16670_v12 = vadd.f32 %v16604_v45, %v16659_v21 }
 0x6e8   : > { %9129 = vrot.lane.b32.xlu2 %v8170_v1, %s11702_s19  ;;  %v8353_v5 = vadd.f32 %v8352_v54, %v16189_v52  ;;  %v16678_v45 = vadd.f32 %v16617_v33, %v16659_v21  ;;  %v16683_v49 = vadd.f32 %v16630_v27, %v16659_v21 }
 0x6e9   : > { %v8647_v11 = vsel %vm2698_vm0, %v8530_v59, -inf  ;;  %v8626_v7 = vsel %vm2698_vm0, %v16670_v12, -inf }
 0x6ea   : > { %v8407_v57 = vmax.f32 %v8353_v5, 0.0  ;;  %v8648_v31 = vrot.slane %v8647_v11, 4  ;;  %v8633_v25 = vsel %vm2698_vm0, %v16678_v45, -inf  ;;  %v8640_v33 = vsel %vm2698_vm0, %v16683_v49, -inf  ;;  %v16696_v5 = vpop.permute.xlu2 %9075 }
 0x6eb   : > { %v8634_v62 = vrot.slane %v8633_v25, 4 }
 0x6ec   : > { %9137 = vrot.lane.b32.xlu1 %v8174_v28, %s11702_s19  ;;  %v8536_v60 = vpop.f32.mrf.mxu2  ;;  %v8649_v10 = vmax.f32 %v8647_v11, %v8648_v31 }
 0x6ed   : > { %v8537_v41 = vadd.f32 %v8536_v60, %v16659_v21 }
 0x6ee   : > { %9103 = vrot.lane.b32.xlu0 %v8157_v63, %s11702_s19  ;;  %v8090_v22 = vpop.permute.xlu1 %8089  ;;  %v8650_v40 = vrot.slane %v8649_v10, 2  ;;  %v8619_v63 = vsel %vm2698_vm0, %v8520_v51, -inf }
 0x6ef   : > { %v8354_v3 = vpop.f32.mrf.mxu1  ;;  %v8172_v16 = vadd.f32 %v8090_v22, %v7852_v56  ;;  %v8668_v20 = vsel %vm2698_vm0, %v8537_v41, -inf  ;;  %v16702_v22 = vadd.f32 %v16644_v61, %v16659_v21 }
 0x6f0   : > { %11042 = vmatmul.msk.bf16.gmra.mxu2 %vm2698_vm0, %v8429_v43  ;;  %v8355_v37 = vadd.f32 %v8354_v3, %v16189_v52  ;;  %v8651_v13 = vmax.f32 %v8649_v10, %v8650_v40  ;;  %v8669_v28 = vrot.slane %v8668_v20, 4  ;;  %v8620_v43 = vrot.slane %v8619_v63, 4 }
 0x6f1   : > { %v16706_v10 = vadd.f32 %v16648_v34, %v16659_v21 }
 0x6f2   : > { %v8408_v29 = vmax.f32 %v8355_v37, 0.0  ;;  %v8652_v8 = vrot.slane %v8651_v13, 1  ;;  %v8670_v30 = vmax.f32 %v8668_v20, %v8669_v28  ;;  %v8621_v55 = vmax.f32 %v8619_v63, %v8620_v43  ;;  %v16712_v28 = vpop.permute.xlu2 %9079 }
 0x6f4   : > { %v8432_v0 = vpack.c.bf16 %v8408_v29, %v8407_v57  ;;  %v8653_v2 = vmax.f32 %v8651_v13, %v8652_v8  ;;  %v8671_v1 = vrot.slane %v8670_v30, 2  ;;  %v8622_v58 = vrot.slane %v8621_v55, 2  ;;  %v8539_v48 = vpop.f32.mrf.mxu2 }
 0x6f5   : > { %v16686_v14 = vadd.f32 %v8539_v48, %v16659_v21  ;;  %v8635_v57 = vmax.f32 %v8633_v25, %v8634_v62 }
 0x6f6   : > { %9109 = vrot.lane.b32.xlu0 %v8160_v4, %s11702_s19  ;;  %v8903_v39 = vsub.f32 %v8530_v59, %v8653_v2  ;;  %v8672_v35 = vmax.f32 %v8670_v30, %v8671_v1  ;;  %v8623_v50 = vmax.f32 %v8621_v55, %v8622_v58 }
 0x6f7   : > { %v8675_v27 = vsel %vm2698_vm0, %v16686_v14, -inf  ;;  %v8636_v31 = vrot.slane %v8635_v57, 2 }
 0x6f8   : > { %v8947_v42 = vmul.f32 1.442695, %v8903_v39  ;;  %v8673_v54 = vrot.slane %v8672_v35, 1  ;;  %v8624_v47 = vrot.slane %v8623_v50, 1  ;;  %v8676_v3 = vrot.slane %v8675_v27, 4 }
 0x6f9   : > { %v8637_v61 = vmax.f32 %v8635_v57, %v8636_v31 }
 0x6fa   : > { %11481 = vpow2.f32 %v8947_v42  ;;  %v8625_v37 = vmax.f32 %v8623_v50, %v8624_v47  ;;  %v8677_v18 = vmax.f32 %v8675_v27, %v8676_v3 }
 0x6fb   : > { %v8362_v9 = vpop.f32.mrf.mxu3  ;;  %v8638_v30 = vrot.slane %v8637_v61, 1 }
 0x6fc   : > { %v8363_v46 = vadd.f32 %v8362_v9, %v16189_v52  ;;  %v8899_v59 = vsub.f32 %v8520_v51, %v8625_v37  ;;  %v8654_v9 = vsel %vm2698_vm0, %v16702_v22, -inf  ;;  %v8678_v20 = vrot.slane %v8677_v18, 2 }
 0x6fd   : > { %v8655_v43 = vrot.slane %v8654_v9, 4  ;;  %v8639_v58 = vmax.f32 %v8637_v61, %v8638_v30 }
 0x6fe   : > { %9115 = vrot.lane.b32.xlu0 %v8163_v17, %s11702_s19  ;;  %v8411_v23 = vmax.f32 %v8363_v46, 0.0  ;;  %v8939_v63 = vmul.f32 1.442695, %v8899_v59 }
 0x6ff   : > { %v8901_v47 = vsub.f32 %v16678_v45, %v8639_v58 }
 0x700   : > { %11043 = vmatmul.msk.bf16.gmra.mxu2 %vm2698_vm0, %v8430_v36  ;;  %v8627_v36 = vrot.slane %v8626_v7, 4  ;;  %v16694_v38 = vpop.eup %11481 }
 0x703   : > { %v8364_v4 = vpop.f32.mrf.mxu3 }
 0x704   : > { %v8365_v6 = vadd.f32 %v8364_v4, %v16189_v52  ;;  %v8679_v4 = vmax.f32 %v8677_v18, %v8678_v20 }
 0x706   : > { %9121 = vrot.lane.b32.xlu0 %v8166_v26, %s11702_s19  ;;  %v8412_v44 = vmax.f32 %v8365_v6, 0.0  ;;  %v8628_v26 = vmax.f32 %v8626_v7, %v8627_v36  ;;  %v8541_v6 = vpop.f32.mrf.mxu2  ;;  %v8656_v7 = vmax.f32 %v8654_v9, %v8655_v43  ;;  %v8680_v42 = vrot.slane %v8679_v4, 1 }
 0x707   : > { %v16716_v1 = vadd.f32 %v8541_v6, %v16659_v21 }
 0x708   : > { %v8434_v17 = vpack.c.bf16 %v8412_v44, %v8411_v23  ;;  %v8629_v19 = vrot.slane %v8628_v26, 2 }
 0x70a   : > { %11047 = vmatmul.msk.bf16.gmra.mxu3 %vm2698_vm0, %v8434_v17  ;;  %v8630_v29 = vmax.f32 %v8628_v26, %v8629_v19  ;;  %v8657_v26 = vrot.slane %v8656_v7, 2  ;;  %v9068_v19 = vpop.permute.xlu2 %9067 }
 0x70c   : > { %v8631_v11 = vrot.slane %v8630_v29, 1 }
 0x70e   : > { %9127 = vrot.lane.b32.xlu0 %v8169_v15, %s11702_s19  ;;  %v8674_v15 = vmax.f32 %v8672_v35, %v8673_v54  ;;  %v8632_v2 = vmax.f32 %v8630_v29, %v8631_v11  ;;  %v8367_v35 = vpop.f32.mrf.mxu3  ;;  %v8682_v54 = vsel %vm2698_vm0, %v16716_v1, -inf }
 0x70f   : > { %v8683_v3 = vrot.slane %v8682_v54, 4  ;;  %v8368_v11 = vadd.f32 %v8367_v35, %v16189_v52 }
 0x710   : > { %11044 = vmatmul.msk.bf16.gmra.mxu2 %vm2698_vm0, %v8431_v24  ;;  %v8641_v24 = vrot.slane %v8640_v33, 4  ;;  %v8900_v39 = vsub.f32 %v16670_v12, %v8632_v2 }
 0x711   : > { %v8684_v59 = vmax.f32 %v8682_v54, %v8683_v3 }
 0x712   : > { %v8642_v60 = vmax.f32 %v8640_v33, %v8641_v24  ;;  %v8941_v17 = vmul.f32 1.442695, %v8900_v39  ;;  %v8681_v33 = vmax.f32 %v8679_v4, %v8680_v42 }
 0x713   : > { %v8685_v61 = vrot.slane %v8684_v59, 2 }
 0x714   : > { %v8643_v40 = vrot.slane %v8642_v60, 2 }
 0x716   : > { %9133 = vrot.lane.b32.xlu0 %v8172_v16, %s11702_s19  ;;  %v8906_v16 = vsub.f32 %v8537_v41, %v8674_v15  ;;  %v8661_v41 = vsel %vm2698_vm0, %v16706_v10, -inf  ;;  %v8644_v51 = vmax.f32 %v8642_v60, %v8643_v40  ;;  %v8658_v15 = vmax.f32 %v8656_v7, %v8657_v26 }
 0x717   : > { %v8662_v34 = vrot.slane %v8661_v41, 4 }
 0x718   : > { %v8953_v8 = vmul.f32 1.442695, %v8906_v16  ;;  %v8645_v55 = vrot.slane %v8644_v51, 1  ;;  %v8659_v18 = vrot.slane %v8658_v15, 1 }
 0x719   : > { %v8663_v44 = vmax.f32 %v8661_v41, %v8662_v34  ;;  %v8413_v41 = vmax.f32 %v8368_v11, 0.0  ;;  %v8544_v34 = vpop.f32.mrf.mxu2 }
 0x71a   : > { %11483 = vpow2.f32 %v8953_v8  ;;  %v8646_v48 = vmax.f32 %v8644_v51, %v8645_v55  ;;  %v9183_v8 = vmul.f32 %v16694_v38, %v9068_v19  ;;  %v8660_v2 = vmax.f32 %v8658_v15, %v8659_v18 }
 0x71b   : > { %11485 = vpow2.f32 %v8939_v63  ;;  %v8664_v25 = vrot.slane %v8663_v44, 2  ;;  %v16741_v63 = vpop.permute.xlu2 %9085 }
 0x71c   : > { %11487 = vpow2.f32 %v8941_v17  ;;  %v8902_v24 = vsub.f32 %v16683_v49, %v8646_v48  ;;  %v9247_v39 = vsel %vm2698_vm0, %v9183_v8, 0.0  ;;  %v8904_v7 = vsub.f32 %v16702_v22, %v8660_v2 }
 0x71d   : > { %v8665_v29 = vmax.f32 %v8663_v44, %v8664_v25  ;;  %v16750_v44 = vadd.f32 %v8544_v34, %v16659_v21  ;;  %v9248_v17 = vrot.slane %v9247_v39, 4 }
 0x71e   : > { %v8945_v45 = vmul.f32 1.442695, %v8902_v24 }
 0x71f   : > { %v8666_v49 = vrot.slane %v8665_v29, 1 }
 0x720   : > { %11045 = vmatmul.msk.bf16.gmra.mxu2 %vm2698_vm0, %v8432_v0  ;;  %v9527_v0 = vsel %vm2698_vm0, %v16694_v38, 0.0  ;;  %v16718_v36 = vpop.eup %11483 }
 0x721   : > { %v9528_v56 = vrot.slane %v9527_v0, 4  ;;  %v16720_v50 = vpop.eup %11485  ;;  %v9548_v62 = vsel %vm2698_vm0, %v16718_v36, 0.0  ;;  %v8667_v43 = vmax.f32 %v8665_v29, %v8666_v49 }
 0x722   : > { %v9499_v27 = vsel %vm2698_vm0, %v16720_v50, 0.0  ;;  %v9549_v57 = vrot.slane %v9548_v62, 4  ;;  %v16733_v16 = vpop.eup %11487 }
 0x723   : > { %v9529_v13 = vadd.f32 %v9528_v56, %v9527_v0  ;;  %v8907_v0 = vsub.f32 %v16686_v14, %v8681_v33  ;;  %v9500_v60 = vrot.slane %v9499_v27, 4  ;;  %v8943_v56 = vmul.f32 1.442695, %v8901_v47  ;;  %v9074_v3 = vpop.permute.xlu2 %9073 }
 0x724   : > { %v9550_v31 = vadd.f32 %v9549_v57, %v9548_v62  ;;  %v9506_v20 = vsel %vm2698_vm0, %v16733_v16, 0.0  ;;  %v8905_v58 = vsub.f32 %v16706_v10, %v8667_v43  ;;  %v8949_v33 = vmul.f32 1.442695, %v8904_v7  ;;  %v16778_v43 = vpop.f32.mrf.mxu2 }
 0x725   : > { %v9530_v46 = vrot.slane %v9529_v13, 2  ;;  %v8955_v40 = vmul.f32 1.442695, %v8907_v0  ;;  %v9501_v9 = vadd.f32 %v9500_v60, %v9499_v27  ;;  %v9507_v6 = vrot.slane %v9506_v20, 4 }
 0x726   : > { %v8689_v47 = vsel %vm2698_vm0, %v16750_v44, -inf  ;;  %v9249_v10 = vadd.f32 %v9248_v17, %v9247_v39  ;;  %v8951_v62 = vmul.f32 1.442695, %v8905_v58  ;;  %v9186_v0 = vmul.f32 %v16718_v36, %v9074_v3 }
 0x727   : > { %v9531_v23 = vadd.f32 %v9530_v46, %v9529_v13  ;;  %v8369_v13 = vpop.f32.mrf.mxu3  ;;  %v9551_v46 = vrot.slane %v9550_v31, 2  ;;  %v9502_v4 = vrot.slane %v9501_v9, 2  ;;  %v9508_v25 = vadd.f32 %v9507_v6, %v9506_v20 }
 0x728   : > { %v8370_v14 = vadd.f32 %v8369_v13, %v16189_v52  ;;  %v8690_v60 = vrot.slane %v8689_v47, 4  ;;  %v9060_v13 = vpop.permute.xlu1 %9059  ;;  %v9268_v8 = vsel %vm2698_vm0, %v9186_v0, 0.0 }
 0x729   : > { %v9532_v12 = vrot.slane %v9531_v23, 1  ;;  %v9552_v48 = vadd.f32 %v9551_v46, %v9550_v31  ;;  %v9503_v35 = vadd.f32 %v9502_v4, %v9501_v9  ;;  %v9269_v4 = vrot.slane %v9268_v8, 4 }
 0x72a   : > { %v8414_v51 = vmax.f32 %v8370_v14, 0.0  ;;  %v8691_v14 = vmax.f32 %v8689_v47, %v8690_v60 }
 0x72b   : > { %v16730_v37 = vadd.f32 %v9532_v12, %v9531_v23  ;;  %v8686_v23 = vmax.f32 %v8684_v59, %v8685_v61  ;;  %v9553_v27 = vrot.slane %v9552_v48, 1  ;;  %v9504_v24 = vrot.slane %v9503_v35, 1 }
 0x72c   : > { %v8435_v38 = vpack.c.bf16 %v8414_v51, %v8413_v41  ;;  %v9250_v59 = vrot.slane %v9249_v10, 2  ;;  %v9179_v51 = vmul.f32 %v16720_v50, %v9060_v13  ;;  %v8692_v6 = vrot.slane %v8691_v14, 2 }
 0x72d   : > { %11489 = vrcp.f32 %v16730_v37  ;;  %v8687_v54 = vrot.slane %v8686_v23, 1  ;;  %v16769_v11 = vadd.f32 %v9553_v27, %v9552_v48  ;;  %v16771_v31 = vadd.f32 %v9504_v24, %v9503_v35 }
 0x72e   : > { %11491 = vpow2.f32 %v8943_v56  ;;  %11048 = vmatmul.msk.bf16.gmra.mxu3 %vm2698_vm0, %v8435_v38  ;;  %v9509_v56 = vrot.slane %v9508_v25, 2  ;;  %v9251_v61 = vadd.f32 %v9250_v59, %v9249_v10  ;;  %v9850_v38 = vand.u32 2147483648, %v16730_v37 }
 0x72f   : > { %11493 = vpow2.f32 %v8945_v45  ;;  %v8688_v18 = vmax.f32 %v8686_v23, %v8687_v54  ;;  %vm9844_vm3 = vweird.f32 %v16730_v37  ;;  %v9848_v50 = vand.u32 2147483647, %v16730_v37 }
 0x730   : > { %11495 = vpow2.f32 %v8955_v40  ;;  %v9510_v36 = vadd.f32 %v9509_v56, %v9508_v25  ;;  %v9252_v58 = vrot.slane %v9251_v61, 1  ;;  %v8693_v10 = vmax.f32 %v8691_v14, %v8692_v6 }
 0x731   : > { %11497 = vpow2.f32 %v8949_v33  ;;  %v8908_v2 = vsub.f32 %v16716_v1, %v8688_v18  ;;  %v9270_v33 = vadd.f32 %v9269_v4, %v9268_v8  ;;  %vm9849_vm5 = vcmp.eq.f32.partialorder %v9848_v50, 8.507059e+37 }
 0x732   : > { %11499 = vpow2.f32 %v8951_v62  ;;  %v9511_v17 = vrot.slane %v9510_v36, 1  ;;  %v9253_v0 = vadd.f32 %v9252_v58, %v9251_v61  ;;  %v8694_v59 = vrot.slane %v8693_v10, 1 }
 0x733   : > { %v16744_v30 = vpop.eup %11489  ;;  %11501 = vrcp.f32 %v16769_v11  ;;  %v8957_v23 = vmul.f32 1.442695, %v8908_v2  ;;  %v9271_v60 = vrot.slane %v9270_v33, 2  ;;  %v7853_v8 = vadd.f32 %v16340_v32, %v16482_v53 }
 0x734   : > { %v16746_v55 = vpop.eup %11491  ;;  %v9840_v26 = vmul.f32 %v16744_v30, %v16730_v37  ;;  %11503 = vrcp.f32 %v16771_v31  ;;  %vm9845_vm2 = vweird.f32 %v16744_v30  ;;  %vm9889_vm6 = vweird.f32 %v16769_v11 }
 0x735   : > { %v16753_v42 = vpop.eup %11493  ;;  %v9513_v22 = vsel %vm2698_vm0, %v16746_v55, 0.0  ;;  %vm16790_vm4 = vmor %vm9844_vm3, %vm9845_vm2  ;;  %11505 = vpow2.f32 %v8957_v23  ;;  %v9272_v61 = vadd.f32 %v9271_v60, %v9270_v33  ;;  %vm9784_vm10 = vweird.f32 %v16771_v31 }
 0x736   : > { %v16758_v12 = vpop.eup %11495  ;;  %v9520_v19 = vsel %vm2698_vm0, %v16753_v42, 0.0  ;;  %v9841_v15 = vsub.f32 1.0, %v9840_v26  ;;  %v9514_v57 = vrot.slane %v9513_v22, 4  ;;  %v9219_v26 = vsel %vm2698_vm0, %v9179_v51, 0.0 }
 0x737   : > { %v9555_v29 = vsel %vm2698_vm0, %v16758_v12, 0.0  ;;  %v9521_v45 = vrot.slane %v9520_v19, 4  ;;  %v16780_v46 = vpop.eup %11497  ;;  %v9220_v24 = vrot.slane %v9219_v26, 4  ;;  %v9273_v48 = vrot.slane %v9272_v61, 1 }
 0x738   : > { %v9556_v49 = vrot.slane %v9555_v29, 4  ;;  %v9842_v40 = vmul.f32 %v16744_v30, %v9841_v15  ;;  %v9515_v9 = vadd.f32 %v9514_v57, %v9513_v22  ;;  %v16785_v39 = vpop.eup %11499  ;;  %v9534_v22 = vsel %vm2698_vm0, %v16780_v46, 0.0 }
 0x739   : > { %v9522_v20 = vadd.f32 %v9521_v45, %v9520_v19  ;;  %v9541_v37 = vsel %vm2698_vm0, %v16785_v39, 0.0  ;;  %v16802_v54 = vpop.eup %11501  ;;  %v9851_v19 = vor.u32 1.1754944e-38, %v9850_v38  ;;  %v16806_v57 = vadd.f32 %v9511_v17, %v9510_v36 }
 0x73a   : > { %v9557_v41 = vadd.f32 %v9556_v49, %v9555_v29  ;;  %v9843_v34 = vadd.f32 %v16744_v30, %v9842_v40  ;;  %v9516_v1 = vrot.slane %v9515_v9, 2  ;;  %v16804_v62 = vpop.eup %11503  ;;  %v9542_v3 = vrot.slane %v9541_v37, 4  ;;  %v8549_v49 = vpop.f32.mrf.mxu2 }
 0x73b   : > { %v9523_v7 = vrot.slane %v9522_v20, 2  ;;  %v9885_v56 = vmul.f32 %v16802_v54, %v16769_v11  ;;  %v9780_v18 = vmul.f32 %v16804_v62, %v16771_v31  ;;  %v16814_v2 = vpop.eup %11505  ;;  %11507 = vrcp.f32 %v16806_v57 }
 0x73c   : > { %v9558_v35 = vrot.slane %v9557_v41, 2  ;;  %v9847_v25 = vsel %vm16790_vm4, %v16744_v30, %v9843_v34  ;;  %v9517_v47 = vadd.f32 %v9516_v1, %v9515_v9  ;;  %v9535_v30 = vrot.slane %v9534_v22, 4  ;;  %v8092_v34 = vpop.permute.xlu0 %8091 }
 0x73d   : > { %v9524_v27 = vadd.f32 %v9523_v7, %v9522_v20  ;;  %v9852_v15 = vsel %vm9849_vm5, %v9851_v19, %v9847_v25  ;;  %v9221_v9 = vadd.f32 %v9220_v24, %v9219_v26  ;;  %v9543_v36 = vadd.f32 %v9542_v3, %v9541_v37  ;;  %v9078_v3 = vpop.permute.xlu1 %9077 }
 0x73e   : > { %v9559_v29 = vadd.f32 %v9558_v35, %v9557_v41  ;;  %v9518_v45 = vrot.slane %v9517_v47, 1  ;;  %v9853_v13 = vmul.f32 %v9852_v15, %v9253_v0  ;;  %v9536_v14 = vadd.f32 %v9535_v30, %v9534_v22 }
 0x73f   : > { %v9525_v40 = vrot.slane %v9524_v27, 1  ;;  %v9886_v41 = vsub.f32 1.0, %v9885_v56  ;;  %v16818_v51 = vadd.f32 %v8549_v49, %v16659_v21  ;;  %v9781_v1 = vsub.f32 1.0, %v9780_v18 }
 0x740   : > { %v9560_v20 = vrot.slane %v9559_v29, 1  ;;  %v16820_v4 = vadd.f32 %v9518_v45, %v9517_v47  ;;  %v8695_v38 = vmax.f32 %v8693_v10, %v8694_v59  ;;  %v8173_v6 = vadd.f32 %v8092_v34, %v7853_v8 }
 0x741   : > { %v16822_v7 = vadd.f32 %v9525_v40, %v9524_v27  ;;  %v10383_v32 = vmax.f32 %v9853_v13, 0.0  ;;  %v9222_v53 = vrot.slane %v9221_v9, 2  ;;  %v9537_v50 = vrot.slane %v9536_v14, 2  ;;  %v16837_v33 = vpop.eup %11507 }
 0x742   : > { %v9544_v23 = vrot.slane %v9543_v36, 2  ;;  %v16824_v17 = vadd.f32 %v9560_v20, %v9559_v29  ;;  %v9562_v58 = vsel %vm2698_vm0, %v16814_v2, 0.0  ;;  %9135 = vrot.lane.b32.xlu2 %v8173_v6, %s11702_s19  ;;  %v9887_v35 = vmul.f32 %v16802_v54, %v9886_v41  ;;  %v8551_v8 = vpop.f32.mrf.mxu2 }
 0x743   : > { %v8703_v26 = vsel %vm2698_vm0, %v16818_v51, -inf  ;;  %11509 = vrcp.f32 %v16820_v4  ;;  %v9187_v25 = vmul.f32 %v16758_v12, %v16696_v5  ;;  %v9782_v22 = vmul.f32 %v16804_v62, %v9781_v1 }
 0x744   : > { %v8909_v37 = vsub.f32 %v16750_v44, %v8695_v38  ;;  %11511 = vrcp.f32 %v16822_v7  ;;  %v16840_v47 = vpack.c.bf16 %v10383_v32, %v10383_v32  ;;  %v9223_v19 = vadd.f32 %v9222_v53, %v9221_v9  ;;  %v9062_v18 = vpop.permute.xlu0 %9061 }
 0x745   : > { %v9563_v10 = vrot.slane %v9562_v58, 4  ;;  %v16842_v27 = vadd.f32 %v9537_v50, %v9536_v14  ;;  %v16844_v24 = vadd.f32 %v9544_v23, %v9543_v36  ;;  %11513 = vrcp.f32 %v16824_v17 }
 0x746   : > { %v8704_v15 = vrot.slane %v8703_v26, 4  ;;  %v16847_v5 = vadd.f32 %v9273_v48, %v9272_v61  ;;  %v9888_v12 = vadd.f32 %v16802_v54, %v9887_v35  ;;  %vm9890_vm7 = vweird.f32 %v16802_v54 }
 0x747   : > { %v9275_v44 = vsel %vm2698_vm0, %v9187_v25, 0.0  ;;  %v9783_v30 = vadd.f32 %v16804_v62, %v9782_v22  ;;  %vm9785_vm8 = vweird.f32 %v16804_v62  ;;  %v8959_v29 = vmul.f32 1.442695, %v8909_v37  ;;  %vm16863_vm9 = vmor %vm9889_vm6, %vm9890_vm7 }
 0x748   : > { %v9224_v0 = vrot.slane %v9223_v19, 1  ;;  %v9564_v60 = vadd.f32 %v9563_v10, %v9562_v58  ;;  %v16857_v56 = vadd.f32 %v16778_v43, %v16659_v21  ;;  %v9795_v45 = vmul.f32 %v16837_v33, %v16806_v57  ;;  %vm16875_vm11 = vmor %vm9784_vm10, %vm9785_vm8 }
 0x749   : > { %v16861_v59 = vpop.eup %11509  ;;  %v9893_v40 = vand.u32 2147483647, %v16769_v11  ;;  %v9790_v13 = vand.u32 2147483648, %v16771_v31  ;;  %v8705_v9 = vmax.f32 %v8703_v26, %v8704_v15  ;;  %v9895_v14 = vand.u32 2147483648, %v16769_v11 }
 0x74a   : > { %v16870_v43 = vpop.eup %11511  ;;  %v9788_v20 = vand.u32 2147483647, %v16771_v31  ;;  %v9796_v61 = vsub.f32 1.0, %v9795_v45  ;;  %v9180_v41 = vmul.f32 %v16733_v16, %v9062_v18  ;;  %v9892_v1 = vsel %vm16863_vm9, %v16802_v54, %v9888_v12  ;;  %v9066_v12 = vpop.permute.xlu1 %9065 }
 0x74b   : > { %v16881_v34 = vpop.eup %11513  ;;  %v9276_v38 = vrot.slane %v9275_v44, 4  ;;  %v9787_v11 = vsel %vm16875_vm11, %v16804_v62, %v9783_v30  ;;  %11515 = vpow2.f32 %v8959_v29  ;;  %v9225_v6 = vadd.f32 %v9224_v0, %v9223_v19 }
 0x74c   : > { %v9565_v32 = vrot.slane %v9564_v60, 2  ;;  %v8696_v31 = vsel %vm2698_vm0, %v16857_v56, -inf  ;;  %v9226_v53 = vsel %vm2698_vm0, %v9180_v41, 0.0  ;;  %v9791_v16 = vor.u32 1.1754944e-38, %v9790_v13  ;;  %v16906_v13 = vpop.f32.mrf.mxu2 }
 0x74d   : > { %v8706_v50 = vrot.slane %v8705_v9, 2  ;;  %v9797_v23 = vmul.f32 %v16837_v33, %v9796_v61  ;;  %v9227_v58 = vrot.slane %v9226_v53, 4  ;;  %v9896_v48 = vor.u32 1.1754944e-38, %v9895_v14 }
 0x74e   : > { %v9900_v54 = vmul.f32 %v16881_v34, %v16824_v17  ;;  %vm9789_vm12 = vcmp.eq.f32.partialorder %v9788_v20, 8.507059e+37  ;;  %v16896_v62 = vadd.f32 %v8551_v8, %v16659_v21  ;;  %vm9894_vm13 = vcmp.eq.f32.partialorder %v9893_v40, 8.507059e+37 }
 0x74f   : > { %v9792_v35 = vsel %vm9789_vm12, %v9791_v16, %v9787_v11  ;;  %v8697_v26 = vrot.slane %v8696_v31, 4  ;;  %v9228_v25 = vadd.f32 %v9227_v58, %v9226_v53  ;;  %v9897_v22 = vsel %vm9894_vm13, %v9896_v48, %v9892_v1 }
 0x750   : > { %v9277_v37 = vadd.f32 %v9276_v38, %v9275_v44  ;;  %v9793_v19 = vmul.f32 %v9792_v35, %v9225_v6  ;;  %v9566_v10 = vadd.f32 %v9565_v32, %v9564_v60  ;;  %v8707_v30 = vmax.f32 %v8705_v9, %v8706_v50 }
 0x751   : > { %v16898_v15 = vpop.eup %11515  ;;  %v9798_v29 = vadd.f32 %v16837_v33, %v9797_v23  ;;  %vm9800_vm14 = vweird.f32 %v16837_v33  ;;  %v9229_v0 = vrot.slane %v9228_v25, 2  ;;  %v9901_v45 = vsub.f32 1.0, %v9900_v54 }
 0x752   : > { %v9188_v18 = vmul.f32 %v16814_v2, %v9078_v3  ;;  %v8710_v49 = vsel %vm2698_vm0, %v16896_v62, -inf  ;;  %v9805_v40 = vand.u32 2147483648, %v16806_v57  ;;  %v8698_v44 = vmax.f32 %v8696_v31, %v8697_v26 }
 0x753   : > { %vm9799_vm15 = vweird.f32 %v16806_v57  ;;  %v9803_v60 = vand.u32 2147483647, %v16806_v57  ;;  %v9230_v9 = vadd.f32 %v9229_v0, %v9228_v25  ;;  %v16911_v8 = vmul.f32 %v9897_v22, %v16847_v5 }
 0x754   : > { %v9567_v14 = vrot.slane %v9566_v10, 1  ;;  %v9569_v2 = vsel %vm2698_vm0, %v16898_v15, 0.0  ;;  %v9182_v3 = vmul.f32 %v16753_v42, %v9066_v12  ;;  %vm16918_vm1 = vmor %vm9799_vm15, %vm9800_vm14  ;;  %v8708_v20 = vrot.slane %v8707_v30, 1 }
 0x755   : > { %v8711_v61 = vrot.slane %v8710_v49, 4  ;;  %v9802_v57 = vsel %vm16918_vm1, %v16837_v33, %v9798_v29  ;;  %v9231_v5 = vrot.slane %v9230_v9, 1  ;;  %v9278_v41 = vrot.slane %v9277_v37, 2 }
 0x756   : > { %v10379_v1 = vmax.f32 %v9793_v19, 0.0  ;;  %v9282_v38 = vsel %vm2698_vm0, %v9188_v18, 0.0  ;;  %v9806_v11 = vor.u32 1.1754944e-38, %v9805_v40  ;;  %v9902_v42 = vmul.f32 %v16881_v34, %v9901_v45  ;;  %v8556_v40 = vpop.f32.mrf.mxu2 }
 0x757   : > { %v8699_v6 = vrot.slane %v8698_v44, 2  ;;  %vm9804_vm2 = vcmp.eq.f32.partialorder %v9803_v60, 8.507059e+37  ;;  %v9232_v32 = vadd.f32 %v9231_v5, %v9230_v9  ;;  %v16927_v31 = vadd.f32 %v9567_v14, %v9566_v10 }
 0x758   : > { %v9570_v53 = vrot.slane %v9569_v2, 4  ;;  %v9240_v16 = vsel %vm2698_vm0, %v9182_v3, 0.0  ;;  %v9807_v50 = vsel %vm9804_vm2, %v9806_v11, %v9802_v57  ;;  %v9283_v23 = vrot.slane %v9282_v38, 4 }
 0x759   : > { %v8709_v58 = vmax.f32 %v8707_v30, %v8708_v20  ;;  %v8712_v33 = vmax.f32 %v8710_v49, %v8711_v61  ;;  %v9808_v48 = vmul.f32 %v9807_v50, %v9232_v32  ;;  %v9539_v54 = vrot.slane %v16842_v27, 1 }
 0x75a   : > { %v9546_v35 = vrot.slane %v16844_v24, 1  ;;  %v10386_v26 = vmax.f32 %v16911_v8, 0.0  ;;  %v9279_v25 = vadd.f32 %v9278_v41, %v9277_v37  ;;  %v10419_v22 = vpack.c.bf16 %v10379_v1, %v10379_v1 }
 0x75b   : > { %v9241_v19 = vrot.slane %v9240_v16, 4  ;;  %v8700_v12 = vmax.f32 %v8698_v44, %v8699_v6  ;;  %v10380_v10 = vmax.f32 %v9808_v48, 0.0  ;;  %v9903_v29 = vadd.f32 %v16881_v34, %v9902_v42 }
 0x75c   : > { %vm9905_vm3 = vweird.f32 %v16881_v34  ;;  %11517 = vrcp.f32 %v16927_v31  ;;  %v9571_v30 = vadd.f32 %v9570_v53, %v9569_v2  ;;  %v9284_v0 = vadd.f32 %v9283_v23, %v9282_v38 }
 0x75d   : > { %v8911_v45 = vsub.f32 %v16818_v51, %v8709_v58  ;;  %v8713_v18 = vrot.slane %v8712_v33, 2  ;;  %v10420_v49 = vpack.c.bf16 %v10380_v10, %v10380_v10  ;;  %vm9904_vm4 = vweird.f32 %v16824_v17 }
 0x75e   : > { %v9908_v37 = vand.u32 2147483647, %v16824_v17  ;;  %v9910_v44 = vand.u32 2147483648, %v16824_v17  ;;  %v9825_v60 = vmul.f32 %v16870_v43, %v16822_v7  ;;  %vm16942_vm5 = vmor %vm9904_vm4, %vm9905_vm3  ;;  %v10500_v8 = vunpack.c.l.b16 %v10419_v22 }
 0x75f   : > { %v9242_v14 = vadd.f32 %v9241_v19, %v9240_v16  ;;  %v8701_v2 = vrot.slane %v8700_v12, 1  ;;  %v10501_v51 = vunpack.c.l.b16 %v10420_v49  ;;  %v9907_v3 = vsel %vm16942_vm5, %v16881_v34, %v9903_v29 }
 0x760   : > { %vm10540_vm6 = vcmask 1041409   ;;  %v9572_v36 = vrot.slane %v9571_v30, 2  ;;  %v16950_v20 = vadd.f32 %v8556_v40, %v16659_v21  ;;  %v9285_v17 = vrot.slane %v9284_v0, 2 }
 0x761   : > { %v8963_v61 = vmul.f32 1.442695, %v8911_v45  ;;  %v8714_v57 = vmax.f32 %v8712_v33, %v8713_v18  ;;  %v16953_v5 = vsel %vm10540_vm6, %v10501_v51, %v10500_v8  ;;  %v16958_v1 = vadd.f32 %v9539_v54, %v16842_v27  ;;  %v9064_v18 = vpop.permute.xlu0 %9063 }
 0x762   : > { %v16955_v41 = vpop.eup %11517  ;;  %v9280_v38 = vrot.slane %v9279_v25, 1  ;;  %v9911_v11 = vor.u32 1.1754944e-38, %v9910_v44  ;;  %v9826_v42 = vsub.f32 1.0, %v9825_v60  ;;  %v16961_v34 = vadd.f32 %v9546_v35, %v16844_v24 }
 0x763   : > { %vm9909_vm7 = vcmp.eq.f32.partialorder %v9908_v37, 8.507059e+37  ;;  %v9243_v6 = vrot.slane %v9242_v14, 2  ;;  %v8702_v32 = vmax.f32 %v8700_v12, %v8701_v2  ;;  %v16963_v53 = vpack.c.bf16 %v10386_v26, %v10386_v26 }
 0x764   : > { %v9912_v16 = vsel %vm9909_vm7, %v9911_v11, %v9907_v3  ;;  %v9573_v50 = vadd.f32 %v9572_v36, %v9571_v30  ;;  %v8724_v23 = vsel %vm2698_vm0, %v16950_v20, -inf  ;;  %v9915_v27 = vmul.f32 %v16955_v41, %v16927_v31 }
 0x765   : > { %v16969_v58 = vadd.f32 %v9285_v17, %v9284_v0  ;;  %11519 = vpow2.f32 %v8963_v61  ;;  %v8715_v33 = vrot.slane %v8714_v57, 1  ;;  %v10504_v24 = vunpack.c.l.b16 %v16840_v47 }
 0x766   : > { %11521 = vrcp.f32 %v16958_v1  ;;  %v9281_v48 = vadd.f32 %v9280_v38, %v9279_v25  ;;  %v9827_v54 = vmul.f32 %v16870_v43, %v9826_v42  ;;  %v9244_v35 = vadd.f32 %v9243_v6, %v9242_v14  ;;  %v8559_v38 = vpop.f32.mrf.mxu2 }
 0x767   : > { %v8910_v26 = vsub.f32 %v16857_v56, %v8702_v32  ;;  %v16977_v22 = vadd.f32 %v16906_v13, %v16659_v21  ;;  %v8725_v19 = vrot.slane %v8724_v23, 4  ;;  %11523 = vrcp.f32 %v16961_v34 }
 0x768   : > { %v10507_v12 = vunpack.c.l.b16 %v16963_v53  ;;  %v16981_v10 = vmul.f32 %v9912_v16, %v9281_v48  ;;  %v9574_v29 = vrot.slane %v9573_v50, 1  ;;  %v9916_v30 = vsub.f32 1.0, %v9915_v27 }
 0x769   : > { %v9923_v25 = vand.u32 2147483647, %v16927_v31  ;;  %v9287_v0 = vrot.slane %v16969_v58, 1  ;;  %v8716_v45 = vmax.f32 %v8714_v57, %v8715_v33  ;;  %v9828_v56 = vadd.f32 %v16870_v43, %v9827_v54  ;;  %v17013_v57 = vpop.permute.xlu1 %9083 }
 0x76a   : > { %vm9829_vm8 = vweird.f32 %v16822_v7  ;;  %vm9830_vm9 = vweird.f32 %v16870_v43  ;;  %v9810_v13 = vmul.f32 %v16861_v59, %v16820_v4  ;;  %v9245_v40 = vrot.slane %v9244_v35, 1 }
 0x76b   : > { %v16990_v49 = vpop.eup %11519  ;;  %v8961_v37 = vmul.f32 1.442695, %v8910_v26  ;;  %v8717_v44 = vsel %vm2698_vm0, %v16977_v22, -inf  ;;  %v8726_v60 = vmax.f32 %v8724_v23, %v8725_v19  ;;  %v16996_v8 = vadd.f32 %v9574_v29, %v9573_v50  ;;  %vm17008_vm11 = vmor %vm9829_vm8, %vm9830_vm9 }
 0x76c   : > { %v16994_v9 = vpop.eup %11521  ;;  %v9835_v14 = vand.u32 2147483648, %v16822_v7  ;;  %v9811_v2 = vsub.f32 1.0, %v9810_v13  ;;  %v9181_v51 = vmul.f32 %v16746_v55, %v9064_v18  ;;  %v9917_v3 = vmul.f32 %v16955_v41, %v9916_v30 }
 0x76d   : > { %vm9919_vm10 = vweird.f32 %v16927_v31  ;;  %v9189_v36 = vmul.f32 %v16898_v15, %v16712_v28  ;;  %v9833_v61 = vand.u32 2147483647, %v16822_v7  ;;  %v8912_v55 = vsub.f32 %v16896_v62, %v8716_v45  ;;  %v17016_v11 = vpop.eup %11523 }
 0x76e   : > { %v9832_v28 = vsel %vm17008_vm11, %v16870_v43, %v9828_v56  ;;  %v9583_v15 = vsel %vm2698_vm0, %v16990_v49, 0.0  ;;  %v8718_v42 = vrot.slane %v8717_v44, 4  ;;  %v9233_v6 = vsel %vm2698_vm0, %v9181_v51, 0.0 }
 0x76f   : > { %v9246_v32 = vadd.f32 %v9245_v40, %v9244_v35  ;;  %11525 = vpow2.f32 %v8961_v37  ;;  %v8727_v7 = vrot.slane %v8726_v60, 2  ;;  %v9234_v16 = vrot.slane %v9233_v6, 4 }
 0x770   : > { %11527 = vrcp.f32 %v16996_v8  ;;  %v9836_v62 = vor.u32 1.1754944e-38, %v9835_v14  ;;  %v9812_v50 = vmul.f32 %v16861_v59, %v9811_v2  ;;  %v17027_v23 = vadd.f32 %v8559_v38, %v16659_v21 }
 0x771   : > { %vm9834_vm12 = vcmp.eq.f32.partialorder %v9833_v61, 8.507059e+37  ;;  %v9584_v43 = vrot.slane %v9583_v15, 4  ;;  %v8965_v27 = vmul.f32 1.442695, %v8912_v55  ;;  %v9235_v33 = vadd.f32 %v9234_v16, %v9233_v6  ;;  %v9072_v55 = vpop.permute.xlu1 %9071 }
 0x772   : > { %v9925_v48 = vand.u32 2147483648, %v16927_v31  ;;  %v9289_v54 = vsel %vm2698_vm0, %v9189_v36, 0.0  ;;  %v9837_v35 = vsel %vm9834_vm12, %v9836_v62, %v9832_v28  ;;  %v8719_v26 = vmax.f32 %v8717_v44, %v8718_v42 }
 0x773   : > { %v9918_v19 = vadd.f32 %v16955_v41, %v9917_v3  ;;  %vm9920_vm13 = vweird.f32 %v16955_v41  ;;  %v9838_v29 = vmul.f32 %v9837_v35, %v9246_v32  ;;  %v8728_v30 = vmax.f32 %v8726_v60, %v8727_v7 }
 0x774   : > { %v9813_v45 = vadd.f32 %v16861_v59, %v9812_v50  ;;  %vm9815_vm14 = vweird.f32 %v16861_v59  ;;  %v9236_v56 = vrot.slane %v9235_v33, 2  ;;  %v8731_v13 = vsel %vm2698_vm0, %v17027_v23, -inf  ;;  %vm17044_vm15 = vmor %vm9919_vm10, %vm9920_vm13 }
 0x775   : > { %v17037_v18 = vpop.eup %11525  ;;  %v9290_v40 = vrot.slane %v9289_v54, 4  ;;  %v9585_v37 = vadd.f32 %v9584_v43, %v9583_v15  ;;  %11529 = vpow2.f32 %v8965_v27  ;;  %v9820_v44 = vand.u32 2147483648, %v16820_v4 }
 0x776   : > { %v17040_v14 = vpop.eup %11527  ;;  %v8720_v2 = vrot.slane %v8719_v26, 2  ;;  %vm9814_vm1 = vweird.f32 %v16820_v4  ;;  %v9818_v51 = vand.u32 2147483647, %v16820_v4  ;;  %v9237_v3 = vadd.f32 %v9236_v56, %v9235_v33 }
 0x777   : > { %v9922_v36 = vsel %vm17044_vm15, %v16955_v41, %v9918_v19  ;;  %v9926_v17 = vor.u32 1.1754944e-38, %v9925_v48  ;;  %v10382_v61 = vmax.f32 %v9838_v29, 0.0  ;;  %vm17055_vm2 = vmor %vm9814_vm1, %vm9815_vm14  ;;  %v8732_v28 = vrot.slane %v8731_v13, 4  ;;  %v8561_v41 = vpop.f32.mrf.mxu2 }
 0x778   : > { %v9576_v15 = vsel %vm2698_vm0, %v17037_v18, 0.0  ;;  %v8729_v42 = vrot.slane %v8728_v30, 1  ;;  %v9817_v4 = vsel %vm17055_vm2, %v16861_v59, %v9813_v45  ;;  %v9238_v6 = vrot.slane %v9237_v3, 1 }
 0x779   : > { %v9291_v32 = vadd.f32 %v9290_v40, %v9289_v54  ;;  %v9930_v7 = vmul.f32 %v17040_v14, %v16996_v8  ;;  %v9586_v16 = vrot.slane %v9585_v37, 2  ;;  %v9821_v62 = vor.u32 1.1754944e-38, %v9820_v44 }
 0x77a   : > { %v9185_v50 = vmul.f32 %v16785_v39, %v9072_v55  ;;  %v8721_v43 = vmax.f32 %v8719_v26, %v8720_v2  ;;  %vm9819_vm3 = vcmp.eq.f32.partialorder %v9818_v51, 8.507059e+37  ;;  %v9239_v27 = vadd.f32 %v9238_v6, %v9237_v3 }
 0x77b   : > { %v17067_v33 = vpop.eup %11529  ;;  %v9577_v48 = vrot.slane %v9576_v15, 4  ;;  %v9822_v35 = vsel %vm9819_vm3, %v9821_v62, %v9817_v4  ;;  %v8733_v19 = vmax.f32 %v8731_v13, %v8732_v28  ;;  %v17070_v59 = vadd.f32 %v8561_v41, %v16659_v21 }
 0x77c   : > { %vm9924_vm4 = vcmp.eq.f32.partialorder %v9923_v25, 8.507059e+37  ;;  %v10422_v54 = vpack.c.bf16 %v10382_v61, %v10382_v61  ;;  %v8730_v29 = vmax.f32 %v8728_v30, %v8729_v42  ;;  %v9823_v45 = vmul.f32 %v9822_v35, %v9239_v27 }
 0x77d   : > { %v9927_v56 = vsel %vm9924_vm4, %v9926_v17, %v9922_v36  ;;  %v9292_v40 = vrot.slane %v9291_v32, 2  ;;  %v9587_v39 = vadd.f32 %v9586_v16, %v9585_v37  ;;  %v8738_v26 = vsel %vm2698_vm0, %v17070_v59, -inf }
 0x77e   : > { %v9931_v44 = vsub.f32 1.0, %v9930_v7  ;;  %v9261_v60 = vsel %vm2698_vm0, %v9185_v50, 0.0  ;;  %v8722_v2 = vrot.slane %v8721_v43, 1  ;;  %v10381_v13 = vmax.f32 %v9823_v45, 0.0 }
 0x77f   : > { %v9578_v51 = vadd.f32 %v9577_v48, %v9576_v15  ;;  %v9590_v3 = vsel %vm2698_vm0, %v17067_v33, 0.0  ;;  %v8734_v31 = vrot.slane %v8733_v19, 2  ;;  %v8739_v25 = vrot.slane %v8738_v26, 4 }
 0x780   : > { %v10503_v61 = vunpack.c.l.b16 %v10422_v54  ;;  %v9191_v30 = vmul.f32 %v16990_v49, %v17013_v57  ;;  %v8914_v37 = vsub.f32 %v16950_v20, %v8730_v29  ;;  %v10421_v36 = vpack.c.bf16 %v10381_v13, %v10381_v13 }
 0x781   : > { %v9588_v17 = vrot.slane %v9587_v39, 1  ;;  %v9870_v55 = vmul.f32 %v17016_v11, %v16961_v34  ;;  %v9262_v38 = vrot.slane %v9261_v60, 4  ;;  %v8740_v28 = vmax.f32 %v8738_v26, %v8739_v25 }
 0x782   : > { %v9591_v42 = vrot.slane %v9590_v3, 4  ;;  %v8723_v15 = vmax.f32 %v8721_v43, %v8722_v2  ;;  %vm10544_vm5 = vcmask 1043459   ;;  %v10502_v4 = vunpack.c.l.b16 %v10421_v36  ;;  %v8372_v36 = vpop.f32.mrf.mxu3 }
 0x783   : > { %v9579_v6 = vrot.slane %v9578_v51, 2  ;;  %vm10542_vm7 = vcmask 1042434   ;;  %v8735_v41 = vmax.f32 %v8733_v19, %v8734_v31  ;;  %v8741_v7 = vrot.slane %v8740_v28, 2 }
 0x784   : > { %v9932_v16 = vmul.f32 %v17040_v14, %v9931_v44  ;;  %v9303_v49 = vsel %vm2698_vm0, %v9191_v30, 0.0  ;;  %v8969_v20 = vmul.f32 1.442695, %v8914_v37  ;;  %v10543_v57 = vsel %vm10542_vm7, %v10502_v4, %v16953_v5 }
 0x785   : > { %v17088_v62 = vadd.f32 %v9588_v17, %v9587_v39  ;;  %v9263_v50 = vadd.f32 %v9262_v38, %v9261_v60  ;;  %v17091_v27 = vsel %vm10544_vm5, %v10503_v61, %v10543_v57  ;;  %v8742_v43 = vmax.f32 %v8740_v28, %v8741_v7  ;;  %v17120_v17 = vpop.permute.xlu0 %9081 }
 0x786   : > { %v9293_v48 = vadd.f32 %v9292_v40, %v9291_v32  ;;  %v9871_v35 = vsub.f32 1.0, %v9870_v55  ;;  %v9592_v54 = vadd.f32 %v9591_v42, %v9590_v3  ;;  %v8913_v19 = vsub.f32 %v16977_v22, %v8723_v15 }
 0x787   : > { %v9938_v29 = vand.u32 2147483647, %v16996_v8  ;;  %v9580_v45 = vadd.f32 %v9579_v6, %v9578_v51  ;;  %v8736_v26 = vrot.slane %v8735_v41, 1  ;;  %v8743_v44 = vrot.slane %v8742_v43, 1 }
 0x788   : > { %vm9935_vm8 = vweird.f32 %v17040_v14  ;;  %v9940_v5 = vand.u32 2147483648, %v16996_v8  ;;  %v9304_v39 = vrot.slane %v9303_v49, 4  ;;  %11531 = vpow2.f32 %v8969_v20 }
 0x789   : > { %v9933_v60 = vadd.f32 %v17040_v14, %v9932_v16  ;;  %11533 = vrcp.f32 %v17088_v62  ;;  %v9264_v32 = vrot.slane %v9263_v50, 2  ;;  %v8744_v40 = vmax.f32 %v8742_v43, %v8743_v44 }
 0x78a   : > { %v9288_v22 = vadd.f32 %v9287_v0, %v16969_v58  ;;  %v9872_v2 = vmul.f32 %v17016_v11, %v9871_v35  ;;  %v9593_v13 = vrot.slane %v9592_v54, 2  ;;  %v8967_v51 = vmul.f32 1.442695, %v8913_v19 }
 0x78b   : > { %vm9934_vm9 = vweird.f32 %v16996_v8  ;;  %v9581_v3 = vrot.slane %v9580_v45, 1  ;;  %v8737_v31 = vmax.f32 %v8735_v41, %v8736_v26  ;;  %v8916_v25 = vsub.f32 %v17070_v59, %v8744_v40 }
 0x78c   : > { %v17105_v61 = vmul.f32 %v9927_v56, %v9288_v22  ;;  %v9294_v30 = vrot.slane %v9293_v48, 1  ;;  %vm17109_vm10 = vmor %vm9934_vm9, %vm9935_vm8  ;;  %vm17113_vm11 = vcmp.eq.f32.partialorder %v9938_v29, 8.507059e+37  ;;  %v9305_v0 = vadd.f32 %v9304_v39, %v9303_v49 }
 0x78d   : > { %v9937_v8 = vsel %vm17109_vm10, %v17040_v14, %v9933_v60  ;;  %v9941_v59 = vor.u32 1.1754944e-38, %v9940_v5  ;;  %v9265_v56 = vadd.f32 %v9264_v32, %v9263_v50  ;;  %v8973_v55 = vmul.f32 1.442695, %v8916_v25 }
 0x78e   : > { %v17122_v38 = vpop.eup %11531  ;;  %v9873_v28 = vadd.f32 %v17016_v11, %v9872_v2  ;;  %vm9875_vm12 = vweird.f32 %v17016_v11  ;;  %v9594_v42 = vadd.f32 %v9593_v13, %v9592_v54  ;;  %11535 = vpow2.f32 %v8967_v51  ;;  %v8374_v51 = vpop.f32.mrf.mxu3 }
 0x78f   : > { %v17126_v15 = vpop.eup %11533  ;;  %v17128_v4 = vadd.f32 %v9581_v3, %v9580_v45  ;;  %v9880_v6 = vand.u32 2147483648, %v16961_v34  ;;  %v8915_v14 = vsub.f32 %v17027_v23, %v8737_v31  ;;  %11537 = vpow2.f32 %v8973_v55 }
 0x790   : > { %v9942_v41 = vsel %vm17113_vm11, %v9941_v59, %v9937_v8  ;;  %v9306_v7 = vrot.slane %v9305_v0, 2  ;;  %vm9874_vm13 = vweird.f32 %v16961_v34  ;;  %v9878_v16 = vand.u32 2147483647, %v16961_v34 }
 0x791   : > { %v10387_v49 = vmax.f32 %v16981_v10, 0.0  ;;  %v9295_v20 = vadd.f32 %v9294_v30, %v9293_v48  ;;  %vm17137_vm14 = vmor %vm9874_vm13, %vm9875_vm12  ;;  %v9266_v50 = vrot.slane %v9265_v56, 1  ;;  %v9604_v23 = vsel %vm2698_vm0, %v17122_v38, 0.0  ;;  %v9070_v30 = vpop.permute.xlu0 %9069 }
 0x792   : > { %v10388_v43 = vmax.f32 %v17105_v61, 0.0  ;;  %v9960_v35 = vmul.f32 %v17126_v15, %v17088_v62  ;;  %v9877_v34 = vsel %vm17137_vm14, %v17016_v11, %v9873_v28  ;;  %v9595_v54 = vrot.slane %v9594_v42, 1 }
 0x793   : > { %v17149_v19 = vmul.f32 %v9942_v41, %v9295_v20  ;;  %11539 = vrcp.f32 %v17128_v4  ;;  %v9881_v48 = vor.u32 1.1754944e-38, %v9880_v6  ;;  %v8971_v29 = vmul.f32 1.442695, %v8915_v14 }
 0x794   : > { %v17152_v45 = vpop.eup %11535  ;;  %v17154_v26 = vadd.f32 %v9306_v7, %v9305_v0  ;;  %vm9879_vm15 = vcmp.eq.f32.partialorder %v9878_v16, 8.507059e+37  ;;  %v9605_v44 = vrot.slane %v9604_v23, 4  ;;  %v9855_v5 = vmul.f32 %v16994_v9, %v16958_v1 }
 0x795   : > { %v17158_v39 = vpop.eup %11537  ;;  %v9882_v60 = vsel %vm9879_vm15, %v9881_v48, %v9877_v34  ;;  %v9267_v11 = vadd.f32 %v9266_v50, %v9265_v56  ;;  %v8373_v32 = vadd.f32 %v8372_v36, %v16189_v52  ;;  %vm18784_vm1 = vcmask 1044484   ;;  %v9090_v48 = vpop.permute.xlu1 %9089 }
 0x796   : > { %v9961_v40 = vsub.f32 1.0, %v9960_v35  ;;  %v9192_v22 = vmul.f32 %v17067_v33, %v16741_v63  ;;  %v17163_v2 = vadd.f32 %v9595_v54, %v9594_v42  ;;  %v9618_v13 = vsel %vm2698_vm0, %v17158_v39, 0.0  ;;  %v8564_v33 = vpop.f32.mrf.mxu2 }
 0x797   : > { %v9597_v3 = vsel %vm2698_vm0, %v17152_v45, 0.0  ;;  %11541 = vpow2.f32 %v8971_v29  ;;  %v9619_v31 = vrot.slane %v9618_v13, 4  ;;  %v8375_v25 = vadd.f32 %v8374_v51, %v16189_v52 }
 0x798   : > { %v9606_v37 = vadd.f32 %v9605_v44, %v9604_v23  ;;  %v9856_v58 = vsub.f32 1.0, %v9855_v5  ;;  %v9184_v0 = vmul.f32 %v16780_v46, %v9070_v30  ;;  %v17175_v63 = vsel %vm18784_vm1, %v10504_v24, %v17091_v27 }
 0x799   : > { %v17177_v36 = vpop.eup %11539  ;;  %v8415_v8 = vmax.f32 %v8373_v32, 0.0  ;;  %v9620_v59 = vadd.f32 %v9619_v31, %v9618_v13  ;;  %v8416_v56 = vmax.f32 %v8375_v25, 0.0  ;;  %v17180_v55 = vadd.f32 %v8564_v33, %v16659_v21 }
 0x79a   : > { %v9883_v52 = vmul.f32 %v9882_v60, %v9267_v11  ;;  %11543 = vrcp.f32 %v17163_v2  ;;  %v9598_v28 = vrot.slane %v9597_v3, 4  ;;  %v9254_v46 = vsel %vm2698_vm0, %v9184_v0, 0.0 }
 0x79b   : > { %v9310_v47 = vsel %vm2698_vm0, %v9192_v22, 0.0  ;;  %v9621_v42 = vrot.slane %v9620_v59, 2  ;;  %v8436_v24 = vpack.c.bf16 %v8416_v56, %v8415_v8  ;;  %v9255_v27 = vrot.slane %v9254_v46, 4 }
 0x79c   : > { %v9968_v6 = vand.u32 2147483647, %v17088_v62  ;;  %v9607_v14 = vrot.slane %v9606_v37, 2  ;;  %v9857_v41 = vmul.f32 %v16994_v9, %v9856_v58  ;;  %v8745_v7 = vsel %vm2698_vm0, %v17180_v55, -inf }
 0x79d   : > { %v17189_v16 = vpop.eup %11541  ;;  %v9970_v20 = vand.u32 2147483648, %v17088_v62  ;;  %v9622_v57 = vadd.f32 %v9621_v42, %v9620_v59  ;;  %v9256_v50 = vadd.f32 %v9255_v27, %v9254_v46  ;;  %v8746_v23 = vrot.slane %v8745_v7, 4  ;;  %11049 = vmatmul.msk.bf16.gmra.mxu3 %vm2698_vm0, %v8436_v24  ;;  %v9094_v46 = vpop.permute.xlu2 %9093 }
 0x79e   : > { %v9962_v35 = vmul.f32 %v17126_v15, %v9961_v40  ;;  %v10385_v34 = vmax.f32 %v9883_v52, 0.0  ;;  %v9311_v54 = vrot.slane %v9310_v47, 4  ;;  %v9599_v29 = vadd.f32 %v9598_v28, %v9597_v3 }
 0x79f   : > { %vm9964_vm2 = vweird.f32 %v17088_v62  ;;  %v9194_v44 = vmul.f32 %v17122_v38, %v9090_v48  ;;  %v9623_v5 = vrot.slane %v9622_v57, 1  ;;  %v9257_v60 = vrot.slane %v9256_v50, 2 }
 0x7a0   : > { %v8747_v11 = vmax.f32 %v8745_v7, %v8746_v23  ;;  %v17196_v32 = vpop.eup %11543  ;;  %v9608_v22 = vadd.f32 %v9607_v14, %v9606_v37  ;;  %v9611_v13 = vsel %vm2698_vm0, %v17189_v16, 0.0  ;;  %v9858_v51 = vadd.f32 %v16994_v9, %v9857_v41 }
 0x7a1   : > { %vm9860_vm3 = vweird.f32 %v16994_v9  ;;  %v17202_v40 = vadd.f32 %v9623_v5, %v9622_v57  ;;  %v9865_v3 = vand.u32 2147483648, %v16958_v1  ;;  %v9258_v31 = vadd.f32 %v9257_v60, %v9256_v50 }
 0x7a2   : > { %v8748_v25 = vrot.slane %v8747_v11, 2  ;;  %v9963_v38 = vadd.f32 %v17126_v15, %v9962_v35  ;;  %vm9965_vm4 = vweird.f32 %v17126_v15  ;;  %vm9859_vm8 = vweird.f32 %v16958_v1 }
 0x7a3   : > { %v9863_v30 = vand.u32 2147483647, %v16958_v1  ;;  %v17209_v37 = vpack.c.bf16 %v10385_v34, %v10385_v34  ;;  %v9975_v58 = vmul.f32 %v17196_v32, %v17163_v2  ;;  %v9600_v0 = vrot.slane %v9599_v29, 2  ;;  %vm17213_vm9 = vmor %vm9859_vm8, %vm9860_vm3 }
 0x7a4   : > { %v9612_v33 = vrot.slane %v9611_v13, 4  ;;  %v9312_v59 = vadd.f32 %v9311_v54, %v9310_v47  ;;  %v9862_v56 = vsel %vm17213_vm9, %v16994_v9, %v9858_v51  ;;  %v9259_v52 = vrot.slane %v9258_v31, 1  ;;  %vm17228_vm11 = vmor %vm9964_vm2, %vm9965_vm4 }
 0x7a5   : > { %v8749_v28 = vmax.f32 %v8747_v11, %v8748_v25  ;;  %v9324_v1 = vsel %vm2698_vm0, %v9194_v44, 0.0  ;;  %v9609_v42 = vrot.slane %v9608_v22, 1  ;;  %11545 = vrcp.f32 %v17202_v40 }
 0x7a6   : > { %v9866_v24 = vor.u32 1.1754944e-38, %v9865_v3  ;;  %v9196_v27 = vmul.f32 %v17158_v39, %v9094_v46  ;;  %vm9864_vm10 = vcmp.eq.f32.partialorder %v9863_v30, 8.507059e+37  ;;  %v9260_v14 = vadd.f32 %v9259_v52, %v9258_v31 }
 0x7a7   : > { %v8750_v41 = vrot.slane %v8749_v28, 1  ;;  %v9976_v7 = vsub.f32 1.0, %v9975_v58  ;;  %v9601_v47 = vadd.f32 %v9600_v0, %v9599_v29  ;;  %v9613_v57 = vadd.f32 %v9612_v33, %v9611_v13 }
 0x7a8   : > { %v9867_v50 = vsel %vm9864_vm10, %v9866_v24, %v9862_v56  ;;  %v9308_v9 = vrot.slane %v17154_v26, 1  ;;  %v9325_v35 = vrot.slane %v9324_v1, 4  ;;  %v9967_v54 = vsel %vm17228_vm11, %v17126_v15, %v9963_v38 }
 0x7a9   : > { %v9868_v34 = vmul.f32 %v9867_v50, %v9260_v14  ;;  %v8751_v39 = vmax.f32 %v8749_v28, %v8750_v41  ;;  %vm17235_vm12 = vcmp.eq.f32.partialorder %v9968_v6, 8.507059e+37  ;;  %v9971_v29 = vor.u32 1.1754944e-38, %v9970_v20 }
 0x7aa   : > { %v17239_v44 = vadd.f32 %v9609_v42, %v9608_v22  ;;  %v10506_v62 = vunpack.c.l.b16 %v17209_v37  ;;  %v9338_v5 = vsel %vm2698_vm0, %v9196_v27, 0.0  ;;  %v9313_v51 = vrot.slane %v9312_v59, 2 }
 0x7ab   : > { %v10384_v60 = vmax.f32 %v9868_v34, 0.0  ;;  %v8917_v11 = vsub.f32 %v17180_v55, %v8751_v39  ;;  %v17244_v13 = vpop.eup %11545  ;;  %v9977_v3 = vmul.f32 %v17196_v32, %v9976_v7  ;;  %v9602_v15 = vrot.slane %v9601_v47, 1  ;;  %v9096_v7 = vpop.permute.xlu2 %9095 }
 0x7ac   : > { %v9614_v6 = vrot.slane %v9613_v57, 2  ;;  %v9326_v31 = vadd.f32 %v9325_v35, %v9324_v1  ;;  %v9190_v20 = vmul.f32 %v17037_v18, %v17120_v17  ;;  %v9972_v38 = vsel %vm17235_vm12, %v9971_v29, %v9967_v54 }
 0x7ad   : > { %v10424_v22 = vpack.c.bf16 %v10384_v60, %v10384_v60  ;;  %v8975_v25 = vmul.f32 1.442695, %v8917_v11  ;;  %11547 = vrcp.f32 %v17239_v44  ;;  %v9339_v30 = vrot.slane %v9338_v5, 4 }
 0x7ae   : > { %vm18783_vm13 = vcmask 1045509   ;;  %v10035_v55 = vmul.f32 %v17244_v13, %v17202_v40  ;;  %vm18782_vm14 = vcmask 1046534   ;;  %v9314_v58 = vadd.f32 %v9313_v51, %v9312_v59 }
 0x7af   : > { %v10505_v37 = vunpack.c.l.b16 %v10424_v22  ;;  %11549 = vpow2.f32 %v8975_v25  ;;  %v9978_v0 = vadd.f32 %v17196_v32, %v9977_v3  ;;  %vm9980_vm15 = vweird.f32 %v17196_v32 }
 0x7b0   : > { %v9615_v18 = vadd.f32 %v9614_v6, %v9613_v57  ;;  %v17256_v17 = vadd.f32 %v9602_v15, %v9601_v47  ;;  %v9327_v33 = vrot.slane %v9326_v31, 2  ;;  %v9296_v8 = vsel %vm2698_vm0, %v9190_v20, 0.0  ;;  %v9088_v20 = vpop.permute.xlu0 %9087 }
 0x7b1   : > { %v10549_v56 = vsel %vm18783_vm13, %v10505_v37, %v17175_v63  ;;  %v17264_v52 = vpack.c.bf16 %v10388_v43, %v10388_v43  ;;  %v9309_v59 = vadd.f32 %v9308_v9, %v17154_v26  ;;  %v9340_v28 = vadd.f32 %v9339_v30, %v9338_v5 }
 0x7b2   : > { %v17268_v46 = vsel %vm18782_vm14, %v10506_v62, %v10549_v56  ;;  %vm9979_vm2 = vweird.f32 %v17163_v2  ;;  %v9983_v1 = vand.u32 2147483647, %v17163_v2  ;;  %v9985_v42 = vand.u32 2147483648, %v17163_v2 }
 0x7b3   : > { %v10036_v24 = vsub.f32 1.0, %v10035_v55  ;;  %v17273_v27 = vpop.eup %11547  ;;  %v10389_v61 = vmax.f32 %v17149_v19, 0.0  ;;  %v17276_v63 = vmul.f32 %v9972_v38, %v9309_v59  ;;  %vm17280_vm3 = vmor %vm9979_vm2, %vm9980_vm15  ;;  %v9616_v26 = vrot.slane %v9615_v18, 1  ;;  %v8566_v55 = vpop.f32.mrf.mxu2 }
 0x7b4   : > { %v9297_v14 = vrot.slane %v9296_v8, 4  ;;  %v9315_v47 = vrot.slane %v9314_v58, 1  ;;  %v9982_v2 = vsel %vm17280_vm3, %v17196_v32, %v9978_v0  ;;  %11551 = vrcp.f32 %v17256_v17 }
 0x7b5   : > { %v11550_v41 = vpop.eup %11549  ;;  %v17288_v57 = vadd.f32 %v9327_v33, %v9326_v31  ;;  %v9945_v50 = vmul.f32 %v17177_v36, %v17128_v4  ;;  %v9341_v9 = vrot.slane %v9340_v28, 2  ;;  %vm9984_vm4 = vcmp.eq.f32.partialorder %v9983_v1, 8.507059e+37 }
 0x7b6   : > { %v9197_v23 = vmul.f32 %v11550_v41, %v9096_v7  ;;  %v9625_v35 = vsel %vm2698_vm0, %v11550_v41, 0.0  ;;  %v9986_v34 = vor.u32 1.1754944e-38, %v9985_v42  ;;  %v10037_v39 = vmul.f32 %v17244_v13, %v10036_v24 }
 0x7b7   : > { %v9626_v54 = vrot.slane %v9625_v35, 4  ;;  %v10005_v48 = vmul.f32 %v17273_v27, %v17239_v44  ;;  %v17296_v32 = vadd.f32 %v9616_v26, %v9615_v18  ;;  %v9298_v29 = vadd.f32 %v9297_v14, %v9296_v8 }
 0x7b8   : > { %v9345_v62 = vsel %vm2698_vm0, %v9197_v23, 0.0  ;;  %v17299_v5 = vadd.f32 %v9315_v47, %v9314_v58  ;;  %v17301_v60 = vsel %vm9984_vm4, %v9986_v34, %v9982_v2  ;;  %v9329_v11 = vrot.slane %v17288_v57, 1 }
 0x7b9   : > { %v9627_v51 = vadd.f32 %v9626_v54, %v9625_v35  ;;  %v10013_v3 = vand.u32 2147483647, %v17239_v44  ;;  %v10015_v15 = vand.u32 2147483648, %v17239_v44  ;;  %v9946_v6 = vsub.f32 1.0, %v9945_v50 }
 0x7ba   : > { %v9342_v31 = vadd.f32 %v9341_v9, %v9340_v28  ;;  %v17306_v22 = vpop.eup %11551  ;;  %v10038_v25 = vadd.f32 %v17244_v13, %v10037_v39  ;;  %vm10040_vm8 = vweird.f32 %v17244_v13  ;;  %v9346_v38 = vrot.slane %v9345_v62, 4 }
 0x7bb   : > { %v9628_v30 = vrot.slane %v9627_v51, 2  ;;  %v10006_v37 = vsub.f32 1.0, %v10005_v48  ;;  %11553 = vrcp.f32 %v17296_v32  ;;  %v9299_v58 = vrot.slane %v9298_v29, 2 }
 0x7bc   : > { %v10045_v0 = vand.u32 2147483648, %v17202_v40  ;;  %vm9949_vm9 = vweird.f32 %v17128_v4  ;;  %vm10039_vm10 = vweird.f32 %v17202_v40  ;;  %v10043_v18 = vand.u32 2147483647, %v17202_v40 }
 0x7bd   : > { %v9629_v33 = vadd.f32 %v9628_v30, %v9627_v51  ;;  %v17316_v8 = vadd.f32 %v8566_v55, %v16659_v21  ;;  %vm10009_vm11 = vweird.f32 %v17239_v44  ;;  %v9947_v56 = vmul.f32 %v17177_v36, %v9946_v6  ;;  %vm17322_vm12 = vmor %vm10039_vm10, %vm10040_vm8  ;;  %v9092_v51 = vpop.permute.xlu0 %9091 }
 0x7be   : > { %v9343_v59 = vrot.slane %v9342_v31, 1  ;;  %v9990_v1 = vmul.f32 %v17306_v22, %v17256_v17  ;;  %v9193_v40 = vmul.f32 %v17152_v45, %v9088_v20  ;;  %v10042_v42 = vsel %vm17322_vm12, %v17244_v13, %v10038_v25 }
 0x7bf   : > { %v9347_v24 = vadd.f32 %v9346_v38, %v9345_v62  ;;  %v9630_v43 = vrot.slane %v9629_v33, 1  ;;  %v8752_v26 = vsel %vm2698_vm0, %v17316_v8, -inf  ;;  %v10007_v14 = vmul.f32 %v17273_v27, %v10006_v37 }
 0x7c0   : > { %v9300_v41 = vadd.f32 %v9299_v58, %v9298_v29  ;;  %v10046_v7 = vor.u32 1.1754944e-38, %v10045_v0  ;;  %v8753_v47 = vrot.slane %v8752_v26, 4  ;;  %vm9950_vm15 = vweird.f32 %v17177_v36 }
 0x7c1   : > { %v9955_v2 = vand.u32 2147483648, %v17128_v4  ;;  %vm10044_vm2 = vcmp.eq.f32.partialorder %v10043_v18, 8.507059e+37  ;;  %v17337_v45 = vadd.f32 %v9630_v43, %v9629_v33  ;;  %v17339_v50 = vpop.eup %11553  ;;  %v9991_v9 = vsub.f32 1.0, %v9990_v1  ;;  %vm17360_vm4 = vmor %vm9949_vm9, %vm9950_vm15 }
 0x7c2   : > { %v10047_v13 = vsel %vm10044_vm2, %v10046_v7, %v10042_v42  ;;  %v9317_v23 = vsel %vm2698_vm0, %v9193_v40, 0.0  ;;  %v8754_v35 = vmax.f32 %v8752_v26, %v8753_v47  ;;  %v17343_v34 = vadd.f32 %v17177_v36, %v9947_v56 }
 0x7c3   : > { %v9344_v39 = vadd.f32 %v9343_v59, %v9342_v31  ;;  %v9348_v54 = vrot.slane %v9347_v24, 2  ;;  %11555 = vrcp.f32 %v17337_v45  ;;  %v17347_v48 = vadd.f32 %v17273_v27, %v10007_v14  ;;  %v8569_v31 = vpop.f32.mrf.mxu2 }
 0x7c4   : > { %vm10010_vm3 = vweird.f32 %v17273_v27  ;;  %v9301_v29 = vrot.slane %v9300_v41, 1  ;;  %v8755_v62 = vrot.slane %v8754_v35, 2  ;;  %v17350_v6 = vor.u32 1.1754944e-38, %v10015_v15 }
 0x7c5   : > { %v17352_v20 = vmul.f32 %v10047_v13, %v9344_v39  ;;  %v9318_v25 = vrot.slane %v9317_v23, 4  ;;  %v10020_v38 = vmul.f32 %v17339_v50, %v17296_v32  ;;  %v9953_v55 = vand.u32 2147483647, %v17128_v4  ;;  %vm17368_vm8 = vmor %vm10009_vm11, %vm10010_vm3 }
 0x7c6   : > { %v9956_v37 = vor.u32 1.1754944e-38, %v9955_v2  ;;  %v9992_v15 = vmul.f32 %v17306_v22, %v9991_v9  ;;  %v8756_v58 = vmax.f32 %v8754_v35, %v8755_v62  ;;  %v9952_v18 = vsel %vm17360_vm4, %v17177_v36, %v17343_v34 }
 0x7c7   : > { %v9349_v33 = vadd.f32 %v9348_v54, %v9347_v24  ;;  %v10021_v56 = vsub.f32 1.0, %v10020_v38  ;;  %v9195_v59 = vmul.f32 %v17189_v16, %v9092_v51  ;;  %v10012_v4 = vsel %vm17368_vm8, %v17273_v27, %v17347_v48 }
 0x7c8   : > { %v17381_v28 = vadd.f32 %v9301_v29, %v9300_v41  ;;  %v8757_v1 = vrot.slane %v8756_v58, 1  ;;  %v17384_v40 = vadd.f32 %v8569_v31, %v16659_v21  ;;  %v10396_v43 = vmax.f32 %v17352_v20, 0.0 }
 0x7c9   : > { %v11556_v42 = vpop.eup %11555  ;;  %v9319_v26 = vadd.f32 %v9318_v25, %v9317_v23  ;;  %v10022_v36 = vmul.f32 %v17339_v50, %v10021_v56  ;;  %v9331_v24 = vsel %vm2698_vm0, %v9195_v59, 0.0  ;;  %v17391_v14 = vadd.f32 %v17306_v22, %v9992_v15 }
 0x7ca   : > { %v10050_v16 = vmul.f32 %v11556_v42, %v17337_v45  ;;  %vm9995_vm9 = vweird.f32 %v17306_v22  ;;  %v8758_v41 = vmax.f32 %v8756_v58, %v8757_v1  ;;  %vm17394_vm10 = vcmp.eq.f32.partialorder %v9953_v55, 8.507059e+37 }
 0x7cb   : > { %v9350_v47 = vrot.slane %v9349_v33, 1  ;;  %v10058_v2 = vand.u32 2147483647, %v17337_v45  ;;  %v9332_v13 = vrot.slane %v9331_v24, 4  ;;  %v8759_v9 = vsel %vm2698_vm0, %v17384_v40, -inf }
 0x7cc   : > { %v10051_v23 = vsub.f32 1.0, %v10050_v16  ;;  %v10060_v35 = vand.u32 2147483648, %v17337_v45  ;;  %v8918_v34 = vsub.f32 %v17316_v8, %v8758_v41  ;;  %v8760_v39 = vrot.slane %v8759_v9, 4 }
 0x7cd   : > { %vm17405_vm11 = vcmp.eq.f32.partialorder %v10013_v3, 8.507059e+37  ;;  %v9320_v29 = vrot.slane %v9319_v26, 2  ;;  %v10023_v62 = vadd.f32 %v17339_v50, %v10022_v36  ;;  %vm10025_vm12 = vweird.f32 %v17339_v50 }
 0x7ce   : > { %v9333_v51 = vadd.f32 %v9332_v13, %v9331_v24  ;;  %v10052_v25 = vmul.f32 %v11556_v42, %v10051_v23  ;;  %vm10055_vm15 = vweird.f32 %v11556_v42  ;;  %v8977_v38 = vmul.f32 1.442695, %v8918_v34 }
 0x7cf   : > { %v10030_v31 = vand.u32 2147483648, %v17296_v32  ;;  %vm10024_vm2 = vweird.f32 %v17296_v32  ;;  %v10028_v8 = vand.u32 2147483647, %v17296_v32  ;;  %v8761_v3 = vmax.f32 %v8759_v9, %v8760_v39  ;;  %v17426_v9 = vpop.permute.xlu1 %9099 }
 0x7d0   : > { %v9334_v44 = vrot.slane %v9333_v51, 2  ;;  %v9351_v30 = vadd.f32 %v9350_v47, %v9349_v33  ;;  %v10053_v55 = vadd.f32 %v11556_v42, %v10052_v25  ;;  %vm10054_vm3 = vweird.f32 %v17337_v45  ;;  %vm17415_vm4 = vmor %vm10024_vm2, %vm10025_vm12 }
 0x7d1   : > { %11557 = vpow2.f32 %v8977_v38  ;;  %vm10056_vm14 = vmor %vm10054_vm3, %vm10055_vm15  ;;  %v10061_v58 = vor.u32 1.1754944e-38, %v10060_v35  ;;  %v10027_v56 = vsel %vm17415_vm4, %v17339_v50, %v10023_v62  ;;  %v8762_v1 = vrot.slane %v8761_v3, 2 }
 0x7d2   : > { %v9335_v59 = vadd.f32 %v9334_v44, %v9333_v51  ;;  %v10057_v32 = vsel %vm10056_vm14, %v11556_v42, %v10053_v55  ;;  %vm10059_vm13 = vcmp.eq.f32.partialorder %v10058_v2, 8.507059e+37  ;;  %v9321_v36 = vadd.f32 %v9320_v29, %v9319_v26 }
 0x7d3   : > { %v10031_v33 = vor.u32 1.1754944e-38, %v10030_v31  ;;  %v10062_v24 = vsel %vm10059_vm13, %v10061_v58, %v10057_v32  ;;  %vm10029_vm1 = vcmp.eq.f32.partialorder %v10028_v8, 8.507059e+37  ;;  %v8763_v16 = vmax.f32 %v8761_v3, %v8762_v1  ;;  %v8599_v1 = vpop.f32.mrf.mxu3 }
 0x7d4   : > { %v9336_v45 = vrot.slane %v9335_v59, 1  ;;  %v9957_v41 = vsel %vm17394_vm10, %v9956_v37, %v9952_v18  ;;  %vm9994_vm12 = vweird.f32 %v17256_v17  ;;  %v10000_v47 = vand.u32 2147483648, %v17256_v17 }
 0x7d5   : > { %v10032_v13 = vsel %vm10029_vm1, %v10031_v33, %v10027_v56  ;;  %v10063_v50 = vmul.f32 %v10062_v24, %v9351_v30  ;;  %vm17430_vm14 = vmor %vm9994_vm12, %vm9995_vm9  ;;  %v9998_v26 = vand.u32 2147483647, %v17256_v17  ;;  %v8764_v23 = vrot.slane %v8763_v16, 1 }
 0x7d6   : > { %v9337_v2 = vadd.f32 %v9336_v45, %v9335_v59  ;;  %v10017_v37 = vsel %vm17405_vm11, %v17350_v6, %v10012_v4  ;;  %v9958_v18 = vmul.f32 %v9957_v41, %v17381_v28  ;;  %v9997_v17 = vsel %vm17430_vm14, %v17306_v22, %v17391_v14 }
 0x7d7   : > { %v17435_v7 = vpop.eup %11557  ;;  %v10436_v35 = vpack.c.bf16 %v10396_v43, %v10396_v43  ;;  %v9322_v34 = vrot.slane %v9321_v36, 1  ;;  %v8765_v48 = vmax.f32 %v8763_v16, %v8764_v23  ;;  %v9988_v6 = vmul.f32 %v17301_v60, %v17299_v5  ;;  %v17468_v15 = vpop.permute.xlu1 %9105 }
 0x7d8   : > { %v9632_v0 = vsel %vm2698_vm0, %v17435_v7, 0.0  ;;  %v10033_v27 = vmul.f32 %v10032_v13, %v9337_v2  ;;  %v9330_v4 = vadd.f32 %v9329_v11, %v17288_v57  ;;  %v10001_v28 = vor.u32 1.1754944e-38, %v10000_v47 }
 0x7d9   : > { %v9633_v39 = vrot.slane %v9632_v0, 4  ;;  %v10397_v22 = vmax.f32 %v10063_v50, 0.0  ;;  %vm9999_vm1 = vcmp.eq.f32.partialorder %v9998_v26, 8.507059e+37  ;;  %v8919_v43 = vsub.f32 %v17384_v40, %v8765_v48 }
 0x7da   : > { %v10395_v20 = vmax.f32 %v10033_v27, 0.0  ;;  %v10018_v14 = vmul.f32 %v10017_v37, %v9330_v4  ;;  %v10390_v54 = vmax.f32 %v9958_v18, 0.0  ;;  %v10002_v29 = vsel %vm9999_vm1, %v10001_v28, %v9997_v17  ;;  %v9098_v18 = vpop.permute.xlu0 %9097 }
 0x7db   : > { %v9634_v62 = vadd.f32 %v9633_v39, %v9632_v0  ;;  %v9323_v51 = vadd.f32 %v9322_v34, %v9321_v36  ;;  %v10517_v25 = vunpack.c.l.b16 %v10436_v35  ;;  %v8979_v31 = vmul.f32 1.442695, %v8919_v43 }
 0x7dc   : > { %v10435_v38 = vpack.c.bf16 %v10395_v20, %v10395_v20  ;;  %v10429_v5 = vpack.c.bf16 %v10389_v61, %v10389_v61  ;;  %v10391_v57 = vmax.f32 %v17276_v63, 0.0  ;;  %vm10552_vm13 = vcmask 1047559  }
 0x7dd   : > { %v9635_v60 = vrot.slane %v9634_v62, 2  ;;  %v10437_v11 = vpack.c.bf16 %v10397_v22, %v10397_v22  ;;  %v10003_v8 = vmul.f32 %v10002_v29, %v9323_v51  ;;  %11559 = vpow2.f32 %v8979_v31 }
 0x7de   : > { %v10516_v44 = vunpack.c.l.b16 %v10435_v38  ;;  %v10427_v40 = vpack.c.bf16 %v10387_v49, %v10387_v49  ;;  %v10392_v3 = vmax.f32 %v9988_v6, 0.0  ;;  %v10394_v55 = vmax.f32 %v10018_v14, 0.0  ;;  %v8571_v49 = vpop.f32.mrf.mxu2 }
 0x7df   : > { %v9636_v30 = vadd.f32 %v9635_v60, %v9634_v62  ;;  %v10430_v19 = vpack.c.bf16 %v10390_v54, %v10390_v54  ;;  %v17475_v63 = vsel %vm10552_vm13, %v10507_v12, %v17268_v46  ;;  %v10509_v58 = vunpack.c.l.b16 %v17264_v52  ;;  %v17512_v14 = vpop.permute.xlu1 %9107 }
 0x7e0   : > { %v10561_v61 = vsel %vm10540_vm6, %v10517_v25, %v10516_v44  ;;  %v10510_v56 = vunpack.c.l.b16 %v10429_v5  ;;  %v10431_v10 = vpack.c.bf16 %v10391_v57, %v10391_v57  ;;  %v10518_v32 = vunpack.c.l.b16 %v10437_v11 }
 0x7e1   : > { %v9637_v59 = vrot.slane %v9636_v30, 1  ;;  %v10393_v36 = vmax.f32 %v10003_v8, 0.0  ;;  %v17479_v33 = vadd.f32 %v8571_v49, %v16659_v21  ;;  %v17482_v24 = vadd.f32 %v8599_v1, %v16659_v21  ;;  %v455_v1 = vld [vmem:[%s18312_s5 + $0x50] sm:$0xff] }
 0x7e2   : > { %v10508_v45 = vunpack.c.l.b16 %v10427_v40  ;;  %v17484_v53 = vpack.c.bf16 %v10392_v3, %v10392_v3  ;;  %v17488_v52 = vpack.c.bf16 %v10394_v55, %v10394_v55  ;;  %v10511_v16 = vunpack.c.l.b16 %v10430_v19 }
 0x7e3   : > { %v17486_v12 = vadd.f32 %v9637_v59, %v9636_v30  ;;  %v11560_v46 = vpop.eup %11559  ;;  %v8766_v41 = vsel %vm2698_vm0, %v17479_v33, -inf  ;;  %v8843_v47 = vsel %vm2698_vm0, %v17482_v24, -inf  ;;  %v10512_v50 = vunpack.c.l.b16 %v10431_v10 }
 0x7e4   : > { %v10554_v13 = vsel %vm10540_vm6, %v10509_v58, %v10508_v45  ;;  %v9639_v42 = vsel %vm2698_vm0, %v11560_v46, 0.0  ;;  %v17498_v2 = vpack.c.bf16 %v10393_v36, %v10393_v36  ;;  %v17501_v37 = vsel %vm10542_vm7, %v10518_v32, %v10561_v61 }
 0x7e5   : > { %11561 = vrcp.f32 %v17486_v12  ;;  %v10555_v26 = vsel %vm10542_vm7, %v10510_v56, %v10554_v13  ;;  %v9640_v23 = vrot.slane %v9639_v42, 4  ;;  %v9199_v17 = vmul.f32 %v11560_v46, %v17426_v9  ;;  %v8601_v9 = vpop.f32.mrf.mxu3  ;;  %v456_v46 = vld [vmem:[%s18312_s5 + $0x58] sm:$0xff] }
 0x7e6   : > { %v9198_v35 = vmul.f32 %v17435_v7, %v9098_v18  ;;  %v8767_v34 = vrot.slane %v8766_v41, 4  ;;  %v8844_v0 = vrot.slane %v8843_v47, 4  ;;  %v10513_v27 = vunpack.c.l.b16 %v17484_v53  ;;  %v8574_v43 = vpop.f32.mrf.mxu2 }
 0x7e7   : > { %v10515_v48 = vunpack.c.l.b16 %v17488_v52  ;;  %v10556_v6 = vsel %vm10544_vm5, %v10511_v16, %v10555_v26  ;;  %v9641_v4 = vadd.f32 %v9640_v23, %v9639_v42  ;;  %vm19712_vm8 = vcmask 1044484  }
 0x7e8   : > { %v17509_v28 = vsel %vm19712_vm8, %v10512_v50, %v10556_v6  ;;  %v9352_v39 = vsel %vm2698_vm0, %v9198_v35, 0.0  ;;  %v8768_v22 = vmax.f32 %v8766_v41, %v8767_v34  ;;  %v8845_v20 = vmax.f32 %v8843_v47, %v8844_v0  ;;  %v17544_v34 = vpop.permute.xlu1 %9111 }
 0x7e9   : > { %v10514_v7 = vunpack.c.l.b16 %v17498_v2  ;;  %v9642_v54 = vrot.slane %v9641_v4, 2  ;;  %v9353_v29 = vrot.slane %v9352_v39, 4  ;;  %v17516_v62 = vadd.f32 %v8574_v43, %v16659_v21 }
 0x7ea   : > { %v9359_v25 = vsel %vm2698_vm0, %v9199_v17, 0.0  ;;  %v8769_v38 = vrot.slane %v8768_v22, 2  ;;  %v8846_v31 = vrot.slane %v8845_v20, 2  ;;  %v17520_v5 = vadd.f32 %v8601_v9, %v16659_v21  ;;  %v9102_v9 = vpop.permute.xlu2 %9101 }
 0x7eb   : > { %v11562_v51 = vpop.eup %11561  ;;  %v9643_v57 = vadd.f32 %v9642_v54, %v9641_v4  ;;  %v10073_v11 = vand.u32 2147483647, %v17486_v12  ;;  %v10075_v8 = vand.u32 2147483648, %v17486_v12  ;;  %v9354_v44 = vadd.f32 %v9353_v29, %v9352_v39 }
 0x7ec   : > { %v10065_v60 = vmul.f32 %v11562_v51, %v17486_v12  ;;  %v8770_v40 = vmax.f32 %v8768_v22, %v8769_v38  ;;  %v8847_v3 = vmax.f32 %v8845_v20, %v8846_v31  ;;  %v8773_v30 = vsel %vm2698_vm0, %v17516_v62, -inf }
 0x7ed   : > { %v9360_v55 = vrot.slane %v9359_v25, 4  ;;  %v9644_v19 = vrot.slane %v9643_v57, 1  ;;  %v8774_v58 = vrot.slane %v8773_v30, 4  ;;  %v9355_v56 = vrot.slane %v9354_v44, 2 }
 0x7ee   : > { %v10066_v61 = vsub.f32 1.0, %v10065_v60  ;;  %v8771_v10 = vrot.slane %v8770_v40, 1  ;;  %v8848_v59 = vrot.slane %v8847_v3, 1  ;;  %v8850_v49 = vsel %vm2698_vm0, %v17520_v5, -inf  ;;  %v8576_v50 = vpop.f32.mrf.mxu2 }
 0x7ef   : > { %v17532_v32 = vadd.f32 %v9644_v19, %v9643_v57  ;;  %vm10070_vm9 = vweird.f32 %v11562_v51  ;;  %v8775_v45 = vmax.f32 %v8773_v30, %v8774_v58  ;;  %v9356_v16 = vadd.f32 %v9355_v56, %v9354_v44  ;;  %v454_v44 = vld [vmem:[%s18312_s5 + $0x48] sm:$0xff] }
 0x7f0   : > { %v10067_v36 = vmul.f32 %v11562_v51, %v10066_v61  ;;  %v8772_v41 = vmax.f32 %v8770_v40, %v8771_v10  ;;  %v8849_v47 = vmax.f32 %v8847_v3, %v8848_v59  ;;  %v8851_v13 = vrot.slane %v8850_v49, 4 }
 0x7f1   : > { %11563 = vrcp.f32 %v17532_v32  ;;  %vm10069_vm10 = vweird.f32 %v17486_v12  ;;  %vm17539_vm11 = vcmp.eq.f32.partialorder %v10073_v11, 8.507059e+37  ;;  %v467_v26 = vpack.c.bf16 %v455_v1, %v455_v1 }
 0x7f2   : > { %v10068_v23 = vadd.f32 %v11562_v51, %v10067_v36  ;;  %v9357_v18 = vrot.slane %v9356_v16, 1  ;;  %v8920_v17 = vsub.f32 %v17479_v33, %v8772_v41  ;;  %v468_v35 = vpack.c.bf16 %v456_v46, %v456_v46  ;;  %vm10071_vm15 = vmor %vm10069_vm10, %vm10070_vm9  ;;  %v9124_v42 = vpop.permute.xlu2 %9123 }
 0x7f3   : > { %v10076_v0 = vor.u32 1.1754944e-38, %v10075_v8  ;;  %v8931_v6 = vsub.f32 %v17482_v24, %v8849_v47  ;;  %v8776_v4 = vrot.slane %v8775_v45, 2  ;;  %v8852_v39 = vmax.f32 %v8850_v49, %v8851_v13  ;;  %v453_v24 = vld [vmem:[%s18312_s5 + $0x40] sm:$0xff] }
 0x7f4   : > { %v9361_v12 = vadd.f32 %v9360_v55, %v9359_v25  ;;  %v10072_v22 = vsel %vm10071_vm15, %v11562_v51, %v10068_v23  ;;  %v9358_v20 = vadd.f32 %v9357_v18, %v9356_v16  ;;  %v8981_v43 = vmul.f32 1.442695, %v8920_v17 }
 0x7f5   : > { %v10077_v54 = vsel %vm17539_vm11, %v10076_v0, %v10072_v22  ;;  %v9003_v29 = vmul.f32 1.442695, %v8931_v6  ;;  %v8777_v33 = vmax.f32 %v8775_v45, %v8776_v4  ;;  %v8853_v38 = vrot.slane %v8852_v39, 2 }
 0x7f6   : > { %v10078_v31 = vmul.f32 %v10077_v54, %v9358_v20  ;;  %11565 = vpow2.f32 %v8981_v43  ;;  %v10591_v57 = vunpack.c.l.b16 %v467_v26  ;;  %v10592_v60 = vunpack.c.l.b16 %v468_v35  ;;  %v8579_v19 = vpop.f32.mrf.mxu2  ;;  %v17574_v26 = vpop.permute.xlu1 %9117 }
 0x7f7   : > { %v17553_v11 = vpop.eup %11563  ;;  %11567 = vpow2.f32 %v9003_v29  ;;  %v8778_v51 = vrot.slane %v8777_v33, 1  ;;  %v8854_v25 = vmax.f32 %v8852_v39, %v8853_v38  ;;  %v17556_v8 = vadd.f32 %v8576_v50, %v16659_v21 }
 0x7f8   : > { %vm19715_vm2 = vcmask 1045509   ;;  %v10080_v3 = vmul.f32 %v17553_v11, %v17532_v32  ;;  %v10398_v30 = vmax.f32 %v10078_v31, 0.0  ;;  %v10594_v55 = vpack.c.b16 %v10592_v60, %v10591_v57 }
 0x7f9   : > { %v10558_v40 = vsel %vm19715_vm2, %v10513_v27, %v17509_v28  ;;  %v8779_v61 = vmax.f32 %v8777_v33, %v8778_v51  ;;  %v8855_v58 = vrot.slane %v8854_v25, 1  ;;  %v8780_v56 = vsel %vm2698_vm0, %v17556_v8, -inf }
 0x7fa   : > { %v465_v10 = vpack.c.bf16 %v453_v24, %v453_v24  ;;  %v10081_v59 = vsub.f32 1.0, %v10080_v3  ;;  %v10438_v49 = vpack.c.bf16 %v10398_v30, %v10398_v30  ;;  %10612 = vmatpush.bf16.msra.mxu3 %v10594_v55  ;;  %v8781_v1 = vrot.slane %v8780_v56, 4  ;;  %v9104_v55 = vpop.permute.xlu0 %9103 }
 0x7fb   : > { %v466_v36 = vpack.c.bf16 %v454_v44, %v454_v44  ;;  %vm19716_vm3 = vcmask 1046534   ;;  %v9362_v27 = vrot.slane %v9361_v12, 2  ;;  %v8921_v28 = vsub.f32 %v17516_v62, %v8779_v61 }
 0x7fc   : > { %v10559_v53 = vsel %vm19716_vm3, %v10514_v7, %v10558_v40  ;;  %v8856_v45 = vmax.f32 %v8854_v25, %v8855_v58  ;;  %v11566_v46 = vpop.eup %11565  ;;  %v10082_v16 = vmul.f32 %v17553_v11, %v10081_v59  ;;  %v10519_v41 = vunpack.c.l.b16 %v10438_v49 }
 0x7fd   : > { %v8782_v47 = vmax.f32 %v8780_v56, %v8781_v1  ;;  %v10589_v13 = vunpack.c.l.b16 %v465_v10  ;;  %v11568_v50 = vpop.eup %11567  ;;  %v9200_v23 = vmul.f32 %v11566_v46, %v9102_v9  ;;  %v9646_v18 = vsel %vm2698_vm0, %v11566_v46, 0.0 }
 0x7fe   : > { %v8983_v2 = vmul.f32 1.442695, %v8921_v28  ;;  %v8932_v7 = vsub.f32 %v17520_v5, %v8856_v45  ;;  %v17580_v62 = vsel %vm10544_vm5, %v10519_v41, %v17501_v37  ;;  %v9647_v17 = vrot.slane %v9646_v18, 4  ;;  %v8581_v9 = vpop.f32.mrf.mxu2  ;;  %v9126_v49 = vpop.permute.xlu1 %9125 }
 0x7ff   : > { %v9211_v35 = vmul.f32 %v11568_v50, %v9124_v42  ;;  %v10590_v0 = vunpack.c.l.b16 %v466_v36  ;;  %v9366_v6 = vsel %vm2698_vm0, %v9200_v23, 0.0  ;;  %v9723_v4 = vsel %vm2698_vm0, %v11568_v50, 0.0 }
 0x800   : > { %11569 = vpow2.f32 %v8983_v2  ;;  %v9005_v39 = vmul.f32 1.442695, %v8932_v7  ;;  %v10560_v22 = vsel %vm10552_vm13, %v10515_v48, %v10559_v53  ;;  %v9363_v20 = vadd.f32 %v9362_v27, %v9361_v12 }
 0x801   : > { %v9648_v43 = vadd.f32 %v9647_v17, %v9646_v18  ;;  %v9443_v5 = vsel %vm2698_vm0, %v9211_v35, 0.0  ;;  %v10083_v37 = vadd.f32 %v17553_v11, %v10082_v16  ;;  %vm10085_vm4 = vweird.f32 %v17553_v11 }
 0x802   : > { %v9724_v54 = vrot.slane %v9723_v4, 4  ;;  %11571 = vpow2.f32 %v9005_v39  ;;  %v9367_v29 = vrot.slane %v9366_v6, 4  ;;  %v9444_v38 = vrot.slane %v9443_v5, 4 }
 0x803   : > { %v9649_v33 = vrot.slane %v9648_v43, 2  ;;  %v8783_v31 = vrot.slane %v8782_v47, 2  ;;  %vm10084_vm12 = vweird.f32 %v17532_v32  ;;  %v10090_v52 = vand.u32 2147483648, %v17532_v32 }
 0x804   : > { %v9725_v48 = vadd.f32 %v9724_v54, %v9723_v4  ;;  %v10593_v12 = vpack.c.b16 %v10590_v0, %v10589_v13  ;;  %vm17592_vm14 = vmor %vm10084_vm12, %vm10085_vm4  ;;  %v10088_v60 = vand.u32 2147483647, %v17532_v32  ;;  %v10582_v25 = vpack.c.b16 %v10560_v22, %v17475_v63 }
 0x805   : > { %v9650_v24 = vadd.f32 %v9649_v33, %v9648_v43  ;;  %v8784_v51 = vmax.f32 %v8782_v47, %v8783_v31  ;;  %v9364_v40 = vrot.slane %v9363_v20, 1  ;;  %v10087_v3 = vsel %vm17592_vm14, %v17553_v11, %v10083_v37 }
 0x806   : > { %v11570_v44 = vpop.eup %11569  ;;  %v9726_v30 = vrot.slane %v9725_v48, 2  ;;  %10613 = vmatpush.bf16.msra.mxu3 %v10593_v12  ;;  %v17602_v61 = vadd.f32 %v8579_v19, %v16659_v21  ;;  %v9368_v58 = vadd.f32 %v9367_v29, %v9366_v6  ;;  %v9445_v56 = vadd.f32 %v9444_v38, %v9443_v5  ;;  %v8584_v42 = vpop.f32.mrf.mxu2 }
 0x807   : > { %v9201_v10 = vmul.f32 %v11570_v44, %v9104_v55  ;;  %v9653_v32 = vsel %vm2698_vm0, %v11570_v44, 0.0  ;;  %v10091_v63 = vor.u32 1.1754944e-38, %v10090_v52  ;;  %v9651_v1 = vrot.slane %v9650_v24, 1 }
 0x808   : > { %v11572_v59 = vpop.eup %11571  ;;  %v9727_v36 = vadd.f32 %v9726_v30, %v9725_v48  ;;  %v9654_v53 = vrot.slane %v9653_v32, 4  ;;  %vm10089_vm1 = vcmp.eq.f32.partialorder %v10088_v60, 8.507059e+37  ;;  %v8785_v28 = vrot.slane %v8784_v51, 1 }
 0x809   : > { %v9373_v11 = vsel %vm2698_vm0, %v9201_v10, 0.0  ;;  %v9212_v27 = vmul.f32 %v11572_v59, %v9126_v49  ;;  %11050 = vmatmul.msk.bf16.vlgmr.msra.gmra.mxu3 %vm2698_vm0, %v10582_v25  ;;  %v10092_v19 = vsel %vm10089_vm1, %v10091_v63, %v10087_v3  ;;  %v8787_v16 = vsel %vm2698_vm0, %v17602_v61, -inf }
 0x80a   : > { %v9728_v45 = vrot.slane %v9727_v36, 1  ;;  %v9655_v46 = vadd.f32 %v9654_v53, %v9653_v32  ;;  %v9369_v41 = vrot.slane %v9368_v58, 2  ;;  %v9446_v47 = vrot.slane %v9445_v56, 2 }
 0x80b   : > { %v9450_v13 = vsel %vm2698_vm0, %v9212_v27, 0.0  ;;  %v9730_v50 = vsel %vm2698_vm0, %v11572_v59, 0.0  ;;  %v17611_v23 = vadd.f32 %v9651_v1, %v9650_v24  ;;  %v9374_v2 = vrot.slane %v9373_v11, 4  ;;  %v8604_v59 = vpop.f32.mrf.mxu3 }
 0x80c   : > { %v17613_v18 = vadd.f32 %v9728_v45, %v9727_v36  ;;  %v9656_v7 = vrot.slane %v9655_v46, 2  ;;  %v9451_v17 = vrot.slane %v9450_v13, 4  ;;  %v9731_v35 = vrot.slane %v9730_v50, 4 }
 0x80d   : > { %v8786_v0 = vmax.f32 %v8784_v51, %v8785_v28  ;;  %v8788_v6 = vrot.slane %v8787_v16, 4  ;;  %v9365_v4 = vadd.f32 %v9364_v40, %v9363_v20  ;;  %v17617_v39 = vadd.f32 %v8581_v9, %v16659_v21 }
 0x80e   : > { %11573 = vrcp.f32 %v17613_v18  ;;  %v9370_v22 = vadd.f32 %v9369_v41, %v9368_v58  ;;  %v9447_v43 = vadd.f32 %v9446_v47, %v9445_v56  ;;  %v9732_v5 = vadd.f32 %v9731_v35, %v9730_v50  ;;  %v8586_v55 = vpop.f32.mrf.mxu2 }
 0x80f   : > { %v17619_v37 = vmul.f32 %v10092_v19, %v9365_v4  ;;  %v9375_v54 = vadd.f32 %v9374_v2, %v9373_v11  ;;  %v8922_v29 = vsub.f32 %v17556_v8, %v8786_v0  ;;  %v8789_v33 = vmax.f32 %v8787_v16, %v8788_v6 }
 0x810   : > { %11575 = vrcp.f32 %v17611_v23  ;;  %v9657_v38 = vadd.f32 %v9656_v7, %v9655_v46  ;;  %v9452_v31 = vadd.f32 %v9451_v17, %v9450_v13  ;;  %v9733_v52 = vrot.slane %v9732_v5, 2 }
 0x811   : > { %v8985_v20 = vmul.f32 1.442695, %v8922_v29  ;;  %v8790_v48 = vrot.slane %v8789_v33, 2  ;;  %v8794_v9 = vsel %vm2698_vm0, %v17617_v39, -inf  ;;  %v9371_v12 = vrot.slane %v9370_v22, 1 }
 0x812   : > { %v9448_v57 = vrot.slane %v9447_v43, 1  ;;  %v9734_v60 = vadd.f32 %v9733_v52, %v9732_v5  ;;  %v9376_v51 = vrot.slane %v9375_v54, 2  ;;  %v8795_v8 = vrot.slane %v8794_v9, 4 }
 0x813   : > { %11577 = vpow2.f32 %v8985_v20  ;;  %v8791_v25 = vmax.f32 %v8789_v33, %v8790_v48  ;;  %v10399_v44 = vmax.f32 %v17619_v37, 0.0  ;;  %v10270_v40 = vand.u32 2147483648, %v17613_v18  ;;  %v17675_v33 = vpop.permute.xlu0 %9109 }
 0x814   : > { %v17625_v24 = vpop.eup %11573  ;;  %v9658_v3 = vrot.slane %v9657_v38, 1  ;;  %v9453_v30 = vrot.slane %v9452_v31, 2  ;;  %v9735_v56 = vrot.slane %v9734_v60, 1  ;;  %v8796_v32 = vmax.f32 %v8794_v9, %v8795_v8 }
 0x815   : > { %v10260_v58 = vmul.f32 %v17625_v24, %v17613_v18  ;;  %v8792_v10 = vrot.slane %v8791_v25, 1  ;;  %v17633_v63 = vadd.f32 %v9371_v12, %v9370_v22  ;;  %v17635_v1 = vadd.f32 %v9448_v57, %v9447_v43 }
 0x816   : > { %v17631_v49 = vpop.eup %11575  ;;  %v10268_v36 = vand.u32 2147483647, %v17613_v18  ;;  %v17639_v53 = vadd.f32 %v8584_v42, %v16659_v21  ;;  %v17641_v11 = vadd.f32 %v9376_v51, %v9375_v54  ;;  %v17643_v27 = vadd.f32 %v9735_v56, %v9734_v60 }
 0x817   : > { %v8793_v28 = vmax.f32 %v8791_v25, %v8792_v10  ;;  %v17646_v19 = vadd.f32 %v8586_v55, %v16659_v21  ;;  %v17648_v45 = vor.u32 1.1754944e-38, %v10270_v40  ;;  %v9454_v46 = vadd.f32 %v9453_v30, %v9452_v31 }
 0x818   : > { %v8797_v16 = vrot.slane %v8796_v32, 2  ;;  %v17651_v41 = vadd.f32 %v8604_v59, %v16659_v21  ;;  %v17655_v13 = vmul.f32 %v17631_v49, %v17611_v23  ;;  %v10261_v50 = vsub.f32 1.0, %v10260_v58 }
 0x819   : > { %v11578_v47 = vpop.eup %11577  ;;  %v17657_v42 = vadd.f32 %v9658_v3, %v9657_v38  ;;  %11579 = vrcp.f32 %v17643_v27  ;;  %v8923_v17 = vsub.f32 %v17602_v61, %v8793_v28  ;;  %v8801_v35 = vsel %vm2698_vm0, %v17639_v53, -inf }
 0x81a   : > { %v9202_v2 = vmul.f32 %v11578_v47, %v17468_v15  ;;  %v9660_v7 = vsel %vm2698_vm0, %v11578_v47, 0.0  ;;  %vm10264_vm8 = vweird.f32 %v17613_v18  ;;  %vm10265_vm9 = vweird.f32 %v17625_v24 }
 0x81b   : > { %v9378_v0 = vrot.slane %v17641_v11, 1  ;;  %v9661_v6 = vrot.slane %v9660_v7, 4  ;;  %v8808_v4 = vsel %vm2698_vm0, %v17646_v19, -inf  ;;  %v9455_v22 = vrot.slane %v9454_v46, 1  ;;  %vm17697_vm2 = vmor %vm10264_vm8, %vm10265_vm9 }
 0x81c   : > { %v8987_v43 = vmul.f32 1.442695, %v8923_v17  ;;  %v8798_v15 = vmax.f32 %v8796_v32, %v8797_v16  ;;  %v8857_v5 = vsel %vm2698_vm0, %v17651_v41, -inf  ;;  %v10262_v61 = vmul.f32 %v17625_v24, %v10261_v50 }
 0x81d   : > { %11581 = vrcp.f32 %v17657_v42  ;;  %v10283_v54 = vand.u32 2147483647, %v17643_v27  ;;  %v8802_v29 = vrot.slane %v8801_v35, 4  ;;  %v9380_v38 = vsel %vm2698_vm0, %v9202_v2, 0.0 }
 0x81e   : > { %11583 = vpow2.f32 %v8987_v43  ;;  %v8799_v31 = vrot.slane %v8798_v15, 1  ;;  %v8809_v52 = vrot.slane %v8808_v4, 4  ;;  %v10285_v48 = vand.u32 2147483648, %v17643_v27 }
 0x81f   : > { %v11580_v20 = vpop.eup %11579  ;;  %v9662_v9 = vadd.f32 %v9661_v6, %v9660_v7  ;;  %v8803_v12 = vmax.f32 %v8801_v35, %v8802_v29  ;;  %v8858_v57 = vrot.slane %v8857_v5, 4  ;;  %vm17679_vm10 = vcmp.eq.f32.partialorder %v10268_v36, 8.507059e+37 }
 0x820   : > { %v9456_v51 = vadd.f32 %v9455_v22, %v9454_v46  ;;  %v10275_v25 = vmul.f32 %v11580_v20, %v17643_v27  ;;  %vm10279_vm11 = vweird.f32 %v17643_v27  ;;  %v8800_v8 = vmax.f32 %v8798_v15, %v8799_v31  ;;  %v17709_v31 = vpop.permute.xlu0 %9115 }
 0x821   : > { %v10263_v40 = vadd.f32 %v17625_v24, %v10262_v61  ;;  %v9381_v3 = vrot.slane %v9380_v38, 4  ;;  %v8804_v30 = vrot.slane %v8803_v12, 2  ;;  %v8810_v55 = vmax.f32 %v8808_v4, %v8809_v52  ;;  %v8589_v52 = vpop.f32.mrf.mxu2 }
 0x822   : > { %v10276_v58 = vsub.f32 1.0, %v10275_v25  ;;  %vm17686_vm15 = vcmp.eq.f32.partialorder %v10283_v54, 8.507059e+37  ;;  %v8924_v10 = vsub.f32 %v17617_v39, %v8800_v8  ;;  %v8859_v32 = vmax.f32 %v8857_v5, %v8858_v57 }
 0x823   : > { %v17691_v59 = vpop.eup %11581  ;;  %v10286_v36 = vor.u32 1.1754944e-38, %v10285_v48  ;;  %v9663_v28 = vrot.slane %v9662_v9, 2  ;;  %v8805_v46 = vmax.f32 %v8803_v12, %v8804_v30  ;;  %v8811_v16 = vrot.slane %v8810_v55, 2 }
 0x824   : > { %v11584_v47 = vpop.eup %11583  ;;  %v10277_v2 = vmul.f32 %v11580_v20, %v10276_v58  ;;  %vm10280_vm3 = vweird.f32 %v11580_v20  ;;  %v8989_v7 = vmul.f32 1.442695, %v8924_v10  ;;  %v8860_v39 = vrot.slane %v8859_v32, 2 }
 0x825   : > { %v10267_v17 = vsel %vm17697_vm2, %v17625_v24, %v10263_v40  ;;  %v9382_v35 = vadd.f32 %v9381_v3, %v9380_v38  ;;  %v9203_v6 = vmul.f32 %v11584_v47, %v17512_v14  ;;  %v9667_v4 = vsel %vm2698_vm0, %v11584_v47, 0.0  ;;  %vm10281_vm4 = vmor %vm10279_vm11, %vm10280_vm3 }
 0x826   : > { %v10278_v22 = vadd.f32 %v11580_v20, %v10277_v2  ;;  %v9668_v43 = vrot.slane %v9667_v4, 4  ;;  %11585 = vpow2.f32 %v8989_v7  ;;  %v8806_v18 = vrot.slane %v8805_v46, 1 }
 0x827   : > { %v9664_v15 = vadd.f32 %v9663_v28, %v9662_v9  ;;  %v9387_v5 = vsel %vm2698_vm0, %v9203_v6, 0.0  ;;  %v8812_v61 = vmax.f32 %v8810_v55, %v8811_v16  ;;  %v8861_v54 = vmax.f32 %v8859_v32, %v8860_v39  ;;  %v8606_v39 = vpop.f32.mrf.mxu3 }
 0x828   : > { %v10282_v29 = vsel %vm10281_vm4, %v11580_v20, %v10278_v22  ;;  %v9388_v24 = vrot.slane %v9387_v5, 4  ;;  %v9669_v38 = vadd.f32 %v9668_v43, %v9667_v4  ;;  %v8807_v14 = vmax.f32 %v8805_v46, %v8806_v18  ;;  %v17738_v18 = vpop.permute.xlu0 %9121 }
 0x829   : > { %v10272_v48 = vsel %vm17679_vm10, %v17648_v45, %v10267_v17  ;;  %v10287_v27 = vsel %vm17686_vm15, %v10286_v36, %v10282_v29  ;;  %v8813_v12 = vrot.slane %v8812_v61, 1  ;;  %v8862_v9 = vrot.slane %v8861_v54, 1 }
 0x82a   : > { %v9383_v57 = vrot.slane %v9382_v35, 2  ;;  %v9389_v25 = vadd.f32 %v9388_v24, %v9387_v5  ;;  %v9670_v8 = vrot.slane %v9669_v38, 2  ;;  %v8925_v20 = vsub.f32 %v17639_v53, %v8807_v14 }
 0x82b   : > { %v9665_v40 = vrot.slane %v9664_v15, 1  ;;  %v8814_v3 = vmax.f32 %v8812_v61, %v8813_v12  ;;  %v8863_v30 = vmax.f32 %v8861_v54, %v8862_v9  ;;  %v17718_v55 = vadd.f32 %v8589_v52, %v16659_v21 }
 0x82c   : > { %v11586_v58 = vpop.eup %11585  ;;  %v10288_v10 = vmul.f32 %v10287_v27, %v9456_v51  ;;  %v9390_v60 = vrot.slane %v9389_v25, 2  ;;  %v9671_v45 = vadd.f32 %v9670_v8, %v9669_v38  ;;  %v8991_v32 = vmul.f32 1.442695, %v8925_v20 }
 0x82d   : > { %v9204_v56 = vmul.f32 %v11586_v58, %v17675_v33  ;;  %v9674_v36 = vsel %vm2698_vm0, %v11586_v58, 0.0  ;;  %v8926_v28 = vsub.f32 %v17646_v19, %v8814_v3  ;;  %v8933_v46 = vsub.f32 %v17651_v41, %v8863_v30 }
 0x82e   : > { %v17725_v53 = vmul.f32 %v10272_v48, %v17635_v1  ;;  %v9391_v16 = vadd.f32 %v9390_v60, %v9389_v25  ;;  %v9672_v47 = vrot.slane %v9671_v45, 1  ;;  %v9675_v50 = vrot.slane %v9674_v36, 4  ;;  %v9114_v25 = vpop.permute.xlu2 %9113  ;;  %v8591_v60 = vpop.f32.mrf.mxu2 }
 0x82f   : > { %v17727_v2 = vadd.f32 %v9665_v40, %v9664_v15  ;;  %v9394_v51 = vsel %vm2698_vm0, %v9204_v56, 0.0  ;;  %11587 = vpow2.f32 %v8991_v32  ;;  %v8993_v7 = vmul.f32 1.442695, %v8926_v28 }
 0x830   : > { %v17730_v33 = vadd.f32 %v9383_v57, %v9382_v35  ;;  %v17732_v17 = vadd.f32 %v9672_v47, %v9671_v45  ;;  %v9007_v19 = vmul.f32 1.442695, %v8933_v46  ;;  %v8815_v41 = vsel %vm2698_vm0, %v17718_v55, -inf }
 0x831   : > { %v10412_v1 = vmax.f32 %v10288_v10, 0.0  ;;  %v9395_v6 = vrot.slane %v9394_v51, 4  ;;  %v9676_v4 = vadd.f32 %v9675_v50, %v9674_v36  ;;  %11589 = vpow2.f32 %v8993_v7 }
 0x832   : > { %v10096_v22 = vsub.f32 1.0, %v17655_v13  ;;  %v9392_v43 = vrot.slane %v9391_v16, 1  ;;  %11591 = vrcp.f32 %v17732_v17  ;;  %v17741_v35 = vadd.f32 %v8606_v39, %v16659_v21 }
 0x833   : > { %v17746_v15 = vadd.f32 %v9378_v0, %v17641_v11  ;;  %v17750_v5 = vmul.f32 %v17691_v59, %v17657_v42  ;;  %11593 = vrcp.f32 %v17727_v2  ;;  %v9677_v61 = vrot.slane %v9676_v4, 2 }
 0x834   : > { %v9385_v29 = vrot.slane %v17730_v33, 1  ;;  %11595 = vpow2.f32 %v9007_v19  ;;  %v8816_v24 = vrot.slane %v8815_v41, 4  ;;  %v17755_v14 = vpack.c.bf16 %v10412_v1, %v10412_v1 }
 0x835   : > { %v11588_v38 = vpop.eup %11587  ;;  %v10148_v52 = vand.u32 2147483647, %v17732_v17  ;;  %v9396_v11 = vadd.f32 %v9395_v6, %v9394_v51  ;;  %v9678_v0 = vadd.f32 %v9677_v61, %v9676_v4  ;;  %v17758_v48 = vadd.f32 %v9392_v43, %v9391_v16  ;;  %v8609_v16 = vpop.f32.mrf.mxu3 }
 0x836   : > { %v9205_v27 = vmul.f32 %v11588_v38, %v17544_v34  ;;  %v9681_v12 = vsel %vm2698_vm0, %v11588_v38, 0.0  ;;  %v8864_v9 = vsel %vm2698_vm0, %v17741_v35, -inf  ;;  %vm10144_vm12 = vweird.f32 %v17732_v17  ;;  %v9128_v6 = vpop.permute.xlu0 %9127 }
 0x837   : > { %v11590_v57 = vpop.eup %11589  ;;  %v10150_v8 = vand.u32 2147483648, %v17732_v17  ;;  %v9679_v20 = vrot.slane %v9678_v0, 1  ;;  %v9682_v40 = vrot.slane %v9681_v12, 4  ;;  %v8817_v34 = vmax.f32 %v8815_v41, %v8816_v24 }
 0x838   : > { %v11592_v3 = vpop.eup %11591  ;;  %v9401_v30 = vsel %vm2698_vm0, %v9205_v27, 0.0  ;;  %v9206_v58 = vmul.f32 %v11590_v57, %v9114_v25  ;;  %v9688_v10 = vsel %vm2698_vm0, %v11590_v57, 0.0  ;;  %vm17771_vm14 = vcmp.eq.f32.partialorder %v10148_v52, 8.507059e+37 }
 0x839   : > { %v17768_v45 = vpop.eup %11593  ;;  %v10140_v32 = vmul.f32 %v11592_v3, %v17732_v17  ;;  %v9397_v36 = vrot.slane %v9396_v11, 2  ;;  %v17775_v28 = vadd.f32 %v9679_v20, %v9678_v0  ;;  %v8865_v46 = vrot.slane %v8864_v9, 4 }
 0x83a   : > { %v11596_v47 = vpop.eup %11595  ;;  %v9402_v50 = vrot.slane %v9401_v30, 4  ;;  %v9683_v51 = vadd.f32 %v9682_v40, %v9681_v12  ;;  %v9408_v7 = vsel %vm2698_vm0, %v9206_v58, 0.0  ;;  %v9689_v39 = vrot.slane %v9688_v10, 4 }
 0x83b   : > { %v10141_v19 = vsub.f32 1.0, %v10140_v32  ;;  %v10151_v41 = vor.u32 1.1754944e-38, %v10150_v8  ;;  %11597 = vrcp.f32 %v17775_v28  ;;  %v17780_v1 = vadd.f32 %v8591_v60, %v16659_v21 }
 0x83c   : > { %vm10145_vm1 = vweird.f32 %v11592_v3  ;;  %v9403_v4 = vadd.f32 %v9402_v50, %v9401_v30  ;;  %v9684_v43 = vrot.slane %v9683_v51, 2  ;;  %v17783_v61 = vadd.f32 %v8609_v16, %v16659_v21 }
 0x83d   : > { %v10142_v24 = vmul.f32 %v11592_v3, %v10141_v19  ;;  %v9409_v38 = vrot.slane %v9408_v7, 4  ;;  %v9690_v52 = vadd.f32 %v9689_v39, %v9688_v10  ;;  %v9213_v0 = vmul.f32 %v11596_v47, %v9128_v6  ;;  %vm10146_vm8 = vmor %vm10144_vm12, %vm10145_vm1 }
 0x83e   : > { %v9398_v27 = vadd.f32 %v9397_v36, %v9396_v11  ;;  %v9404_v12 = vrot.slane %v9403_v4, 2  ;;  %v9685_v57 = vadd.f32 %v9684_v43, %v9683_v51  ;;  %v8818_v25 = vrot.slane %v8817_v34, 2 }
 0x83f   : > { %v10143_v8 = vadd.f32 %v11592_v3, %v10142_v24  ;;  %v9410_v20 = vadd.f32 %v9409_v38, %v9408_v7  ;;  %v9691_v40 = vrot.slane %v9690_v52, 2  ;;  %v9457_v58 = vsel %vm2698_vm0, %v9213_v0, 0.0 }
 0x840   : > { %v9405_v30 = vadd.f32 %v9404_v12, %v9403_v4  ;;  %v9686_v60 = vrot.slane %v9685_v57, 1  ;;  %v9737_v32 = vsel %vm2698_vm0, %v11596_v47, 0.0  ;;  %v8866_v16 = vmax.f32 %v8864_v9, %v8865_v46 }
 0x841   : > { %v11598_v10 = vpop.eup %11597  ;;  %v10147_v50 = vsel %vm10146_vm8, %v11592_v3, %v10143_v8  ;;  %v9411_v11 = vrot.slane %v9410_v20, 2  ;;  %v9692_v36 = vadd.f32 %v9691_v40, %v9690_v52  ;;  %v9738_v51 = vrot.slane %v9737_v32, 4 }
 0x842   : > { %v10152_v7 = vsel %vm17771_vm14, %v10151_v41, %v10147_v50  ;;  %v10155_v39 = vmul.f32 %v11598_v10, %v17775_v28  ;;  %v9458_v19 = vrot.slane %v9457_v58, 4  ;;  %v8822_v17 = vsel %vm2698_vm0, %v17780_v1, -inf }
 0x843   : > { %v10153_v6 = vmul.f32 %v10152_v7, %v17758_v48  ;;  %v9399_v4 = vrot.slane %v9398_v27, 1  ;;  %v17796_v43 = vadd.f32 %v9686_v60, %v9685_v57  ;;  %v9693_v9 = vrot.slane %v9692_v36, 1 }
 0x844   : > { %v10156_v46 = vsub.f32 1.0, %v10155_v39  ;;  %v9412_v3 = vadd.f32 %v9411_v11, %v9410_v20  ;;  %v9739_v47 = vadd.f32 %v9738_v51, %v9737_v32  ;;  %v8819_v24 = vmax.f32 %v8817_v34, %v8818_v25 }
 0x845   : > { %v10163_v38 = vand.u32 2147483647, %v17775_v28  ;;  %v10165_v56 = vand.u32 2147483648, %v17775_v28  ;;  %v9406_v41 = vrot.slane %v9405_v30, 1  ;;  %11599 = vrcp.f32 %v17796_v43 }
 0x846   : > { %v10157_v52 = vmul.f32 %v11598_v10, %v10156_v46  ;;  %vm10160_vm9 = vweird.f32 %v11598_v10  ;;  %v17801_v0 = vadd.f32 %v9693_v9, %v9692_v36  ;;  %v9459_v48 = vadd.f32 %v9458_v19, %v9457_v58 }
 0x847   : > { %v10403_v12 = vmax.f32 %v10153_v6, 0.0  ;;  %v9400_v57 = vadd.f32 %v9399_v4, %v9398_v27  ;;  %v10180_v8 = vand.u32 2147483648, %v17796_v43  ;;  %v9740_v40 = vrot.slane %v9739_v47, 2 }
 0x848   : > { %v10158_v20 = vadd.f32 %v11598_v10, %v10157_v52  ;;  %vm10159_vm10 = vweird.f32 %v17775_v28  ;;  %v9413_v34 = vrot.slane %v9412_v3, 1  ;;  %11601 = vrcp.f32 %v17801_v0 }
 0x849   : > { %vm10161_vm11 = vmor %vm10159_vm10, %vm10160_vm9  ;;  %vm10164_vm15 = vcmp.eq.f32.partialorder %v10163_v38, 8.507059e+37  ;;  %v10166_v25 = vor.u32 1.1754944e-38, %v10165_v56  ;;  %v17806_v60 = vadd.f32 %v9406_v41, %v9405_v30  ;;  %v10178_v32 = vand.u32 2147483647, %v17796_v43 }
 0x84a   : > { %v10162_v50 = vsel %vm10161_vm11, %v11598_v10, %v10158_v20  ;;  %v9460_v58 = vrot.slane %v9459_v48, 2  ;;  %v9741_v11 = vadd.f32 %v9740_v40, %v9739_v47  ;;  %v8820_v27 = vrot.slane %v8819_v24, 1 }
 0x84b   : > { %v11600_v36 = vpop.eup %11599  ;;  %v17809_v51 = vpack.c.bf16 %v10403_v12, %v10403_v12  ;;  %vm10174_vm2 = vweird.f32 %v17796_v43  ;;  %v10181_v28 = vor.u32 1.1754944e-38, %v10180_v8  ;;  %v8867_v7 = vrot.slane %v8866_v16, 2 }
 0x84c   : > { %v10167_v39 = vsel %vm10164_vm15, %v10166_v25, %v10162_v50  ;;  %v10170_v19 = vmul.f32 %v11600_v36, %v17796_v43  ;;  %v17813_v6 = vadd.f32 %v9413_v34, %v9412_v3  ;;  %v10193_v30 = vand.u32 2147483647, %v17801_v0 }
 0x84d   : > { %v9742_v4 = vrot.slane %v9741_v11, 1  ;;  %v8821_v9 = vmax.f32 %v8819_v24, %v8820_v27  ;;  %v8868_v10 = vmax.f32 %v8866_v16, %v8867_v7  ;;  %v8823_v46 = vrot.slane %v8822_v17, 4  ;;  %v8594_v7 = vpop.f32.mrf.mxu2 }
 0x84e   : > { %v11602_v47 = vpop.eup %11601  ;;  %v10171_v38 = vsub.f32 1.0, %v10170_v19  ;;  %vm17816_vm3 = vcmp.eq.f32.partialorder %v10178_v32, 8.507059e+37  ;;  %vm10189_vm4 = vweird.f32 %v17801_v0  ;;  %v10195_v41 = vand.u32 2147483648, %v17801_v0 }
 0x84f   : > { %v9461_v52 = vadd.f32 %v9460_v58, %v9459_v48  ;;  %v10168_v12 = vmul.f32 %v10167_v39, %v9400_v57  ;;  %v10185_v3 = vmul.f32 %v11602_v47, %v17801_v0  ;;  %v17823_v8 = vadd.f32 %v9742_v4, %v9741_v11  ;;  %v17841_v4 = vpop.permute.xlu2 %9119 }
 0x850   : > { %v8927_v24 = vsub.f32 %v17718_v55, %v8821_v9  ;;  %v10172_v16 = vmul.f32 %v11600_v36, %v10171_v38  ;;  %vm10175_vm12 = vweird.f32 %v11600_v36  ;;  %v8869_v40 = vrot.slane %v8868_v10, 1 }
 0x851   : > { %v8824_v20 = vmax.f32 %v8822_v17, %v8823_v46  ;;  %v10186_v34 = vsub.f32 1.0, %v10185_v3  ;;  %vm17826_vm14 = vcmp.eq.f32.partialorder %v10193_v30, 8.507059e+37  ;;  %11603 = vrcp.f32 %v17823_v8  ;;  %vm17835_vm1 = vmor %vm10174_vm2, %vm10175_vm12 }
 0x852   : > { %v8871_v48 = vsel %vm2698_vm0, %v17783_v61, -inf  ;;  %v10173_v57 = vadd.f32 %v11600_v36, %v10172_v16  ;;  %v10196_v32 = vor.u32 1.1754944e-38, %v10195_v41  ;;  %v9462_v50 = vrot.slane %v9461_v52, 1 }
 0x853   : > { %v8995_v58 = vmul.f32 1.442695, %v8927_v24  ;;  %v10187_v17 = vmul.f32 %v11602_v47, %v10186_v34  ;;  %vm10190_vm8 = vweird.f32 %v11602_v47  ;;  %v8870_v11 = vmax.f32 %v8868_v10, %v8869_v40 }
 0x854   : > { %v8825_v27 = vrot.slane %v8824_v20, 2  ;;  %v10404_v39 = vmax.f32 %v10168_v12, 0.0  ;;  %v10177_v19 = vsel %vm17835_vm1, %v11600_v36, %v10173_v57  ;;  %v8872_v30 = vrot.slane %v8871_v48, 4  ;;  %vm10191_vm9 = vmor %vm10189_vm4, %vm10190_vm8 }
 0x855   : > { %11605 = vpow2.f32 %v8995_v58  ;;  %v10188_v9 = vadd.f32 %v11602_v47, %v10187_v17  ;;  %v10298_v43 = vand.u32 2147483647, %v17823_v8  ;;  %v8934_v46 = vsub.f32 %v17741_v35, %v8870_v11 }
 0x856   : > { %v8826_v38 = vmax.f32 %v8824_v20, %v8825_v27  ;;  %v17847_v10 = vadd.f32 %v9462_v50, %v9461_v52  ;;  %v10300_v41 = vand.u32 2147483648, %v17823_v8  ;;  %v8873_v12 = vmax.f32 %v8871_v48, %v8872_v30 }
 0x857   : > { %v17851_v36 = vadd.f32 %v8594_v7, %v16659_v21  ;;  %v11604_v3 = vpop.eup %11603  ;;  %v10182_v24 = vsel %vm17816_vm3, %v10181_v28, %v10177_v19  ;;  %v10192_v16 = vsel %vm10191_vm9, %v11602_v47, %v10188_v9  ;;  %v9009_v40 = vmul.f32 1.442695, %v8934_v46 }
 0x858   : > { %v8827_v34 = vrot.slane %v8826_v38, 1  ;;  %v17855_v35 = vpack.c.bf16 %v10404_v39, %v10404_v39  ;;  %v10197_v0 = vsel %vm17826_vm14, %v10196_v32, %v10192_v16  ;;  %v10290_v52 = vmul.f32 %v11604_v3, %v17823_v8  ;;  %v8611_v32 = vpop.f32.mrf.mxu3 }
 0x859   : > { %vm10294_vm10 = vweird.f32 %v17823_v8  ;;  %vm17861_vm11 = vcmp.eq.f32.partialorder %v10298_v43, 8.507059e+37  ;;  %11607 = vpow2.f32 %v9009_v40  ;;  %v8874_v56 = vrot.slane %v8873_v12, 2 }
 0x85a   : > { %v8828_v48 = vmax.f32 %v8826_v38, %v8827_v34  ;;  %v10183_v47 = vmul.f32 %v10182_v24, %v17806_v60  ;;  %v10291_v57 = vsub.f32 1.0, %v10290_v52  ;;  %v10301_v50 = vor.u32 1.1754944e-38, %v10300_v41  ;;  %v9130_v41 = vpop.permute.xlu2 %9129 }
 0x85b   : > { %v11606_v28 = vpop.eup %11605  ;;  %v8829_v25 = vsel %vm2698_vm0, %v17851_v36, -inf  ;;  %v10198_v58 = vmul.f32 %v10197_v0, %v17813_v6  ;;  %vm10295_vm15 = vweird.f32 %v11604_v3  ;;  %v8875_v39 = vmax.f32 %v8873_v12, %v8874_v56 }
 0x85c   : > { %v9207_v55 = vmul.f32 %v11606_v28, %v17709_v31  ;;  %v9695_v17 = vsel %vm2698_vm0, %v11606_v28, 0.0  ;;  %v8928_v11 = vsub.f32 %v17780_v1, %v8828_v48  ;;  %v10292_v27 = vmul.f32 %v11604_v3, %v10291_v57  ;;  %vm10296_vm2 = vmor %vm10294_vm10, %vm10295_vm15 }
 0x85d   : > { %v9696_v7 = vrot.slane %v9695_v17, 4  ;;  %v8830_v30 = vrot.slane %v8829_v25, 4  ;;  %v17874_v9 = vadd.f32 %v8611_v32, %v16659_v21  ;;  %v8876_v38 = vrot.slane %v8875_v39, 1 }
 0x85e   : > { %v9415_v60 = vsel %vm2698_vm0, %v9207_v55, 0.0  ;;  %v8997_v19 = vmul.f32 1.442695, %v8928_v11  ;;  %v10293_v43 = vadd.f32 %v11604_v3, %v10292_v27  ;;  %v10405_v24 = vmax.f32 %v10183_v47, 0.0 }
 0x85f   : > { %v9416_v46 = vrot.slane %v9415_v60, 4  ;;  %v9697_v6 = vadd.f32 %v9696_v7, %v9695_v17  ;;  %v11608_v31 = vpop.eup %11607  ;;  %v10406_v16 = vmax.f32 %v10198_v58, 0.0  ;;  %v8831_v1 = vmax.f32 %v8829_v25, %v8830_v30 }
 0x860   : > { %11609 = vpow2.f32 %v8997_v19  ;;  %v10297_v12 = vsel %vm10296_vm2, %v11604_v3, %v10293_v43  ;;  %v9214_v0 = vmul.f32 %v11608_v31, %v9130_v41  ;;  %v9744_v52 = vsel %vm2698_vm0, %v11608_v31, 0.0 }
 0x861   : > { %v9417_v40 = vadd.f32 %v9416_v46, %v9415_v60  ;;  %v9698_v34 = vrot.slane %v9697_v6, 2  ;;  %v8877_v48 = vmax.f32 %v8875_v39, %v8876_v38  ;;  %v8832_v56 = vrot.slane %v8831_v1, 2 }
 0x862   : > { %v8878_v28 = vsel %vm2698_vm0, %v17874_v9, -inf  ;;  %v10302_v47 = vsel %vm17861_vm11, %v10301_v50, %v10297_v12  ;;  %v9464_v8 = vsel %vm2698_vm0, %v9214_v0, 0.0  ;;  %v9745_v25 = vrot.slane %v9744_v52, 4 }
 0x863   : > { %v9418_v57 = vrot.slane %v9417_v40, 2  ;;  %v9699_v32 = vadd.f32 %v9698_v34, %v9697_v6  ;;  %v9465_v58 = vrot.slane %v9464_v8, 4  ;;  %v8935_v3 = vsub.f32 %v17783_v61, %v8877_v48  ;;  %v8596_v6 = vpop.f32.mrf.mxu2 }
 0x864   : > { %v8833_v55 = vmax.f32 %v8831_v1, %v8832_v56  ;;  %v17886_v17 = vpack.c.bf16 %v10405_v24, %v10405_v24  ;;  %v17888_v11 = vpack.c.bf16 %v10406_v16, %v10406_v16  ;;  %v8879_v7 = vrot.slane %v8878_v28, 4 }
 0x865   : > { %v9700_v27 = vrot.slane %v9699_v32, 1  ;;  %v9419_v60 = vadd.f32 %v9418_v57, %v9417_v40  ;;  %v9466_v19 = vadd.f32 %v9465_v58, %v9464_v8  ;;  %v9746_v20 = vadd.f32 %v9745_v25, %v9744_v52 }
 0x866   : > { %v11610_v39 = vpop.eup %11609  ;;  %v9011_v50 = vmul.f32 1.442695, %v8935_v3  ;;  %v17891_v30 = vmul.f32 %v10302_v47, %v17847_v10  ;;  %v8834_v61 = vrot.slane %v8833_v55, 1  ;;  %v10524_v24 = vunpack.c.l.b16 %v17809_v51 }
 0x867   : > { %v17893_v43 = vadd.f32 %v9700_v27, %v9699_v32  ;;  %v9208_v46 = vmul.f32 %v11610_v39, %v17574_v26  ;;  %v9467_v38 = vrot.slane %v9466_v19, 2  ;;  %v9747_v31 = vrot.slane %v9746_v20, 2  ;;  %v9132_v27 = vpop.permute.xlu1 %9131 }
 0x868   : > { %v9702_v41 = vsel %vm2698_vm0, %v11610_v39, 0.0  ;;  %11611 = vpow2.f32 %v9011_v50  ;;  %v10525_v16 = vunpack.c.l.b16 %v17855_v35  ;;  %v8880_v1 = vmax.f32 %v8878_v28, %v8879_v7 }
 0x869   : > { %11613 = vrcp.f32 %v17893_v43  ;;  %v9420_v10 = vrot.slane %v9419_v60, 1  ;;  %v9468_v12 = vadd.f32 %v9467_v38, %v9466_v19  ;;  %v9748_v40 = vadd.f32 %v9747_v31, %v9746_v20 }
 0x86a   : > { %v17901_v34 = vadd.f32 %v8596_v6, %v16659_v21  ;;  %v9422_v0 = vsel %vm2698_vm0, %v9208_v46, 0.0  ;;  %v9703_v52 = vrot.slane %v9702_v41, 4  ;;  %v8835_v48 = vmax.f32 %v8833_v55, %v8834_v61 }
 0x86b   : > { %v10208_v57 = vand.u32 2147483647, %v17893_v43  ;;  %v9749_v32 = vrot.slane %v9748_v40, 1  ;;  %v10210_v28 = vand.u32 2147483648, %v17893_v43  ;;  %v9423_v8 = vrot.slane %v9422_v0, 4 }
 0x86c   : > { %v9704_v58 = vadd.f32 %v9703_v52, %v9702_v41  ;;  %v8881_v25 = vrot.slane %v8880_v1, 2  ;;  %v9421_v7 = vadd.f32 %v9420_v10, %v9419_v60  ;;  %v9469_v39 = vrot.slane %v9468_v12, 1 }
 0x86d   : > { %v17909_v19 = vadd.f32 %v9749_v32, %v9748_v40  ;;  %v8929_v55 = vsub.f32 %v17851_v36, %v8835_v48  ;;  %v9424_v50 = vadd.f32 %v9423_v8, %v9422_v0  ;;  %vm10204_vm3 = vweird.f32 %v17893_v43 }
 0x86e   : > { %v11612_v3 = vpop.eup %11611  ;;  %v9705_v46 = vrot.slane %v9704_v58, 2  ;;  %vm17915_vm4 = vcmp.eq.f32.partialorder %v10208_v57, 8.507059e+37  ;;  %v10211_v60 = vor.u32 1.1754944e-38, %v10210_v28  ;;  %v8882_v10 = vmax.f32 %v8880_v1, %v8881_v25  ;;  %v8614_v25 = vpop.f32.mrf.mxu3 }
 0x86f   : > { %v11614_v20 = vpop.eup %11613  ;;  %v9215_v61 = vmul.f32 %v11612_v3, %v9132_v27  ;;  %v9751_v6 = vsel %vm2698_vm0, %v11612_v3, 0.0  ;;  %11615 = vrcp.f32 %v17909_v19  ;;  %v8836_v36 = vsel %vm2698_vm0, %v17901_v34, -inf }
 0x870   : > { %v10200_v38 = vmul.f32 %v11614_v20, %v17893_v43  ;;  %v9706_v41 = vadd.f32 %v9705_v46, %v9704_v58  ;;  %v9752_v52 = vrot.slane %v9751_v6, 4  ;;  %v8999_v48 = vmul.f32 1.442695, %v8929_v55 }
 0x871   : > { %v9471_v0 = vsel %vm2698_vm0, %v9215_v61, 0.0  ;;  %vm10205_vm12 = vweird.f32 %v11614_v20  ;;  %v17923_v32 = vadd.f32 %v9469_v39, %v9468_v12  ;;  %v9425_v57 = vrot.slane %v9424_v50, 2 }
 0x872   : > { %v10201_v40 = vsub.f32 1.0, %v10200_v38  ;;  %v9707_v8 = vrot.slane %v9706_v41, 1  ;;  %v9472_v27 = vrot.slane %v9471_v0, 4  ;;  %v9753_v54 = vadd.f32 %v9752_v52, %v9751_v6  ;;  %vm10206_vm14 = vmor %vm10204_vm3, %vm10205_vm12 }
 0x873   : > { %11617 = vpow2.f32 %v8999_v48  ;;  %v8883_v1 = vrot.slane %v8882_v10, 1  ;;  %v8837_v58 = vrot.slane %v8836_v36, 4  ;;  %v17930_v46 = vadd.f32 %v9385_v29, %v17730_v33 }
 0x874   : > { %v10202_v3 = vmul.f32 %v11614_v20, %v10201_v40  ;;  %v17925_v28 = vadd.f32 %v9707_v8, %v9706_v41  ;;  %v10313_v12 = vand.u32 2147483647, %v17909_v19  ;;  %v9473_v39 = vadd.f32 %v9472_v27, %v9471_v0 }
 0x875   : > { %v11616_v55 = vpop.eup %11615  ;;  %v9754_v38 = vrot.slane %v9753_v54, 2  ;;  %v10315_v41 = vand.u32 2147483648, %v17909_v19  ;;  %v9426_v40 = vadd.f32 %v9425_v57, %v9424_v50  ;;  %v8884_v48 = vmax.f32 %v8882_v10, %v8883_v1 }
 0x876   : > { %v10203_v61 = vadd.f32 %v11614_v20, %v10202_v3  ;;  %v10305_v6 = vmul.f32 %v11616_v55, %v17909_v19  ;;  %11619 = vrcp.f32 %v17925_v28  ;;  %v9474_v33 = vrot.slane %v9473_v39, 2 }
 0x877   : > { %v9755_v29 = vadd.f32 %v9754_v38, %v9753_v54  ;;  %v8838_v3 = vmax.f32 %v8836_v36, %v8837_v58  ;;  %v17942_v27 = vadd.f32 %v8614_v25, %v16659_v21  ;;  %vm10310_vm1 = vweird.f32 %v11616_v55 }
 0x878   : > { %v10207_v52 = vsel %vm10206_vm14, %v11614_v20, %v10203_v61  ;;  %v10306_v0 = vsub.f32 1.0, %v10305_v6  ;;  %v9475_v47 = vadd.f32 %v9474_v33, %v9473_v39  ;;  %v8936_v50 = vsub.f32 %v17874_v9, %v8884_v48 }
 0x879   : > { %v10212_v8 = vsel %vm17915_vm4, %v10211_v60, %v10207_v52  ;;  %v11618_v43 = vpop.eup %11617  ;;  %v9756_v56 = vrot.slane %v9755_v29, 1  ;;  %v8839_v10 = vrot.slane %v8838_v3, 2  ;;  %v9427_v31 = vrot.slane %v9426_v40, 1  ;;  %v8616_v52 = vpop.f32.mrf.mxu3 }
 0x87a   : > { %v10307_v57 = vmul.f32 %v11616_v55, %v10306_v0  ;;  %v9209_v20 = vmul.f32 %v11618_v43, %v17841_v4  ;;  %v9709_v54 = vsel %vm2698_vm0, %v11618_v43, 0.0  ;;  %v17947_v1 = vmul.f32 %v10212_v8, %v9421_v7 }
 0x87b   : > { %v17949_v60 = vadd.f32 %v9756_v56, %v9755_v29  ;;  %v9710_v36 = vrot.slane %v9709_v54, 4  ;;  %vm10309_vm8 = vweird.f32 %v17909_v19  ;;  %v9013_v9 = vmul.f32 1.442695, %v8936_v50 }
 0x87c   : > { %v17951_v58 = vpop.eup %11619  ;;  %v10308_v25 = vadd.f32 %v11616_v55, %v10307_v57  ;;  %v9429_v61 = vsel %vm2698_vm0, %v9209_v20, 0.0  ;;  %vm10311_vm9 = vmor %vm10309_vm8, %vm10310_vm1  ;;  %vm10314_vm10 = vcmp.eq.f32.partialorder %v10313_v12, 8.507059e+37  ;;  %v10316_v4 = vor.u32 1.1754944e-38, %v10315_v41 }
 0x87d   : > { %11621 = vrcp.f32 %v17949_v60  ;;  %v8840_v7 = vmax.f32 %v8838_v3, %v8839_v10  ;;  %v9476_v38 = vrot.slane %v9475_v47, 1  ;;  %v9430_v56 = vrot.slane %v9429_v61, 4 }
 0x87e   : > { %v10312_v39 = vsel %vm10311_vm9, %v11616_v55, %v10308_v25  ;;  %v8885_v6 = vsel %vm2698_vm0, %v17942_v27, -inf  ;;  %v10407_v33 = vmax.f32 %v17947_v1, 0.0  ;;  %v17960_v19 = vadd.f32 %v9427_v31, %v9426_v40 }
 0x87f   : > { %v9711_v29 = vadd.f32 %v9710_v36, %v9709_v54  ;;  %11623 = vpow2.f32 %v9013_v9  ;;  %v10317_v48 = vsel %vm10314_vm10, %v10316_v4, %v10312_v39  ;;  %v17964_v12 = vmul.f32 %v17951_v58, %v17925_v28  ;;  %v9134_v4 = vpop.permute.xlu0 %9133 }
 0x880   : > { %v10328_v41 = vand.u32 2147483647, %v17949_v60  ;;  %v9431_v55 = vadd.f32 %v9430_v56, %v9429_v61  ;;  %v8841_v0 = vrot.slane %v8840_v7, 1  ;;  %v8886_v3 = vrot.slane %v8885_v6, 4 }
 0x881   : > { %v9712_v8 = vrot.slane %v9711_v29, 2  ;;  %v17968_v43 = vadd.f32 %v8616_v52, %v16659_v21  ;;  %v17970_v50 = vadd.f32 %v9476_v38, %v9475_v47  ;;  %vm10324_vm11 = vweird.f32 %v17949_v60 }
 0x882   : > { %v10330_v40 = vand.u32 2147483648, %v17949_v60  ;;  %v9432_v57 = vrot.slane %v9431_v55, 2  ;;  %v8842_v10 = vmax.f32 %v8840_v7, %v8841_v0  ;;  %v8887_v31 = vmax.f32 %v8885_v6, %v8886_v3 }
 0x883   : > { %v11622_v20 = vpop.eup %11621  ;;  %v9713_v54 = vadd.f32 %v9712_v8, %v9711_v29  ;;  %v8892_v36 = vsel %vm2698_vm0, %v17968_v43, -inf  ;;  %v17977_v25 = vmul.f32 %v10317_v48, %v17923_v32  ;;  %v10216_v21 = vsub.f32 1.0, %v17964_v12 }
 0x884   : > { %v10320_v47 = vmul.f32 %v11622_v20, %v17949_v60  ;;  %vm17981_vm15 = vcmp.eq.f32.partialorder %v10328_v41, 8.507059e+37  ;;  %v8930_v7 = vsub.f32 %v17901_v34, %v8842_v10  ;;  %v8888_v38 = vrot.slane %v8887_v31, 2 }
 0x885   : > { %v11624_v9 = vpop.eup %11623  ;;  %v9714_v39 = vrot.slane %v9713_v54, 1  ;;  %v8893_v56 = vrot.slane %v8892_v36, 4  ;;  %v9433_v52 = vadd.f32 %v9432_v57, %v9431_v55  ;;  %v10097_v32 = vmul.f32 %v17631_v49, %v10096_v22 }
 0x886   : > { %v10321_v6 = vsub.f32 1.0, %v10320_v47  ;;  %v9216_v29 = vmul.f32 %v11624_v9, %v9134_v4  ;;  %v9758_v41 = vsel %vm2698_vm0, %v11624_v9, 0.0  ;;  %v9001_v8 = vmul.f32 1.442695, %v8930_v7 }
 0x887   : > { %v17989_v48 = vadd.f32 %v9714_v39, %v9713_v54  ;;  %v8889_v0 = vmax.f32 %v8887_v31, %v8888_v38  ;;  %vm10325_vm2 = vweird.f32 %v11622_v20  ;;  %v9759_v34 = vrot.slane %v9758_v41, 4 }
 0x888   : > { %v10322_v3 = vmul.f32 %v11622_v20, %v10321_v6  ;;  %v9478_v26 = vsel %vm2698_vm0, %v9216_v29, 0.0  ;;  %v8894_v57 = vmax.f32 %v8892_v36, %v8893_v56  ;;  %v10331_v13 = vor.u32 1.1754944e-38, %v10330_v40  ;;  %vm10326_vm3 = vmor %vm10324_vm11, %vm10325_vm2 }
 0x889   : > { %11625 = vrcp.f32 %v17989_v48  ;;  %v9479_v10 = vrot.slane %v9478_v26, 4  ;;  %v8890_v55 = vrot.slane %v8889_v0, 1  ;;  %v9760_v4 = vadd.f32 %v9759_v34, %v9758_v41 }
 0x88a   : > { %v10323_v47 = vadd.f32 %v11622_v20, %v10322_v3  ;;  %11627 = vpow2.f32 %v9001_v8  ;;  %v9434_v22 = vrot.slane %v9433_v52, 1  ;;  %v8895_v9 = vrot.slane %v8894_v57, 2 }
 0x88b   : > { %v9480_v54 = vadd.f32 %v9479_v10, %v9478_v26  ;;  %v8891_v31 = vmax.f32 %v8889_v0, %v8890_v55  ;;  %v9761_v7 = vrot.slane %v9760_v4, 2  ;;  %v10098_v38 = vadd.f32 %v17631_v49, %v10097_v32 }
 0x88c   : > { %v10327_v39 = vsel %vm10326_vm3, %v11622_v20, %v10323_v47  ;;  %vm10100_vm4 = vweird.f32 %v17631_v49  ;;  %v8896_v56 = vmax.f32 %v8894_v57, %v8895_v9  ;;  %v10103_v6 = vand.u32 2147483647, %v17611_v23 }
 0x88d   : > { %v10332_v36 = vsel %vm17981_vm15, %v10331_v13, %v10327_v39  ;;  %v8937_v40 = vsub.f32 %v17942_v27, %v8891_v31  ;;  %v10414_v60 = vmax.f32 %v17977_v25, 0.0  ;;  %v9762_v29 = vadd.f32 %v9761_v7, %v9760_v4 }
 0x88e   : > { %vm10099_vm12 = vweird.f32 %v17611_v23  ;;  %v10105_v26 = vand.u32 2147483648, %v17611_v23  ;;  %v18007_v32 = vadd.f32 %v9434_v22, %v9433_v52  ;;  %v9481_v41 = vrot.slane %v9480_v54, 2 }
 0x88f   : > { %v18005_v20 = vpop.eup %11625  ;;  %v9015_v8 = vmul.f32 1.442695, %v8937_v40  ;;  %v8897_v61 = vrot.slane %v8896_v56, 1  ;;  %vm18009_vm14 = vmor %vm10099_vm12, %vm10100_vm4  ;;  %v18014_v3 = vmul.f32 %v10332_v36, %v17970_v50  ;;  %v9763_v34 = vrot.slane %v9762_v29, 1 }
 0x890   : > { %v11628_v27 = vpop.eup %11627  ;;  %v10102_v23 = vsel %vm18009_vm14, %v17631_v49, %v10098_v38  ;;  %v10111_v10 = vsub.f32 1.0, %v17750_v5  ;;  %vm10104_vm1 = vcmp.eq.f32.partialorder %v10103_v6, 8.507059e+37  ;;  %v10106_v4 = vor.u32 1.1754944e-38, %v10105_v26 }
 0x891   : > { %v9210_v52 = vmul.f32 %v11628_v27, %v17738_v18  ;;  %v9716_v55 = vsel %vm2698_vm0, %v11628_v27, 0.0  ;;  %11629 = vpow2.f32 %v9015_v8  ;;  %v18022_v57 = vadd.f32 %v9763_v34, %v9762_v29  ;;  %v9136_v29 = vpop.permute.xlu2 %9135 }
 0x892   : > { %v9717_v47 = vrot.slane %v9716_v55, 4  ;;  %v8898_v13 = vmax.f32 %v8896_v56, %v8897_v61  ;;  %v18026_v50 = vmul.f32 %v18005_v20, %v17989_v48  ;;  %v18028_v22 = vadd.f32 %v9481_v41, %v9480_v54 }
 0x893   : > { %v9436_v49 = vsel %vm2698_vm0, %v9210_v52, 0.0  ;;  %v10112_v5 = vmul.f32 %v17691_v59, %v10111_v10  ;;  %v10107_v39 = vsel %vm10104_vm1, %v10106_v4, %v10102_v23  ;;  %11631 = vrcp.f32 %v18022_v57 }
 0x894   : > { %v9437_v18 = vrot.slane %v9436_v49, 4  ;;  %v9718_v31 = vadd.f32 %v9717_v47, %v9716_v55  ;;  %v8938_v9 = vsub.f32 %v17968_v43, %v8898_v13  ;;  %vm10115_vm8 = vweird.f32 %v17691_v59 }
 0x895   : > { %v10113_v7 = vadd.f32 %v17691_v59, %v10112_v5  ;;  %v10118_v38 = vand.u32 2147483647, %v17657_v42  ;;  %v10125_v56 = vmul.f32 %v17768_v45, %v17727_v2  ;;  %v9483_v26 = vrot.slane %v18028_v22, 1 }
 0x896   : > { %v9438_v36 = vadd.f32 %v9437_v18, %v9436_v49  ;;  %v9719_v54 = vrot.slane %v9718_v31, 2  ;;  %v9017_v40 = vmul.f32 1.442695, %v8938_v9  ;;  %v18041_v43 = vmul.f32 %v10107_v39, %v17633_v63 }
 0x897   : > { %v11630_v6 = vpop.eup %11629  ;;  %vm10114_vm9 = vweird.f32 %v17657_v42  ;;  %v10120_v41 = vand.u32 2147483648, %v17657_v42  ;;  %v10126_v10 = vsub.f32 1.0, %v10125_v56  ;;  %vm10119_vm11 = vcmp.eq.f32.partialorder %v10118_v38, 8.507059e+37  ;;  %v9138_v56 = vpop.permute.xlu1 %9137 }
 0x898   : > { %v9439_v8 = vrot.slane %v9438_v36, 2  ;;  %v9720_v61 = vadd.f32 %v9719_v54, %v9718_v31  ;;  %v9217_v0 = vmul.f32 %v11630_v6, %v9136_v29  ;;  %v9765_v27 = vsel %vm2698_vm0, %v11630_v6, 0.0  ;;  %vm18048_vm10 = vmor %vm10114_vm9, %vm10115_vm8 }
 0x899   : > { %v9766_v23 = vrot.slane %v9765_v27, 4  ;;  %11633 = vpow2.f32 %v9017_v40  ;;  %v10117_v63 = vsel %vm18048_vm10, %v17691_v59, %v10113_v7  ;;  %v18056_v47 = vpop.eup %11631  ;;  %v10121_v49 = vor.u32 1.1754944e-38, %v10120_v41 }
 0x89a   : > { %v9440_v52 = vadd.f32 %v9439_v8, %v9438_v36  ;;  %v9721_v42 = vrot.slane %v9720_v61, 1  ;;  %v9485_v55 = vsel %vm2698_vm0, %v9217_v0, 0.0  ;;  %v10127_v5 = vmul.f32 %v17768_v45, %v10126_v10 }
 0x89b   : > { %v9486_v13 = vrot.slane %v9485_v55, 4  ;;  %v9767_v4 = vadd.f32 %v9766_v23, %v9765_v27  ;;  %vm10129_vm15 = vweird.f32 %v17727_v2  ;;  %vm10130_vm2 = vweird.f32 %v17768_v45 }
 0x89c   : > { %v18059_v18 = vadd.f32 %v9721_v42, %v9720_v61  ;;  %v10133_v59 = vand.u32 2147483647, %v17727_v2  ;;  %v10122_v39 = vsel %vm10119_vm11, %v10121_v49, %v10117_v63  ;;  %v10128_v7 = vadd.f32 %v17768_v45, %v10127_v5  ;;  %vm18073_vm3 = vmor %vm10129_vm15, %vm10130_vm2 }
 0x89d   : > { %v9487_v31 = vadd.f32 %v9486_v13, %v9485_v55  ;;  %v9768_v9 = vrot.slane %v9767_v4, 2  ;;  %v18067_v38 = vmul.f32 %v18056_v47, %v18022_v57  ;;  %v9441_v36 = vrot.slane %v9440_v52, 1 }
 0x89e   : > { %11635 = vrcp.f32 %v18059_v18  ;;  %v10135_v54 = vand.u32 2147483648, %v17727_v2  ;;  %vm18077_vm4 = vcmp.eq.f32.partialorder %v10133_v59, 8.507059e+37  ;;  %v10217_v61 = vmul.f32 %v17951_v58, %v10216_v21 }
 0x89f   : > { %v11634_v40 = vpop.eup %11633  ;;  %v9488_v6 = vrot.slane %v9487_v31, 2  ;;  %v9769_v29 = vadd.f32 %v9768_v9, %v9767_v4  ;;  %v10132_v34 = vsel %vm18073_vm3, %v17768_v45, %v10128_v7  ;;  %vm10219_vm12 = vweird.f32 %v17925_v28 }
 0x8a0   : > { %v9218_v0 = vmul.f32 %v11634_v40, %v9138_v56  ;;  %v9772_v27 = vsel %vm2698_vm0, %v11634_v40, 0.0  ;;  %v10136_v2 = vor.u32 1.1754944e-38, %v10135_v54  ;;  %v10218_v42 = vadd.f32 %v17951_v58, %v10217_v61 }
 0x8a1   : > { %v18088_v23 = vadd.f32 %v9488_v6, %v9487_v31  ;;  %v9770_v63 = vrot.slane %v9769_v29, 1  ;;  %v9773_v10 = vrot.slane %v9772_v27, 4  ;;  %vm10220_vm14 = vweird.f32 %v17951_v58 }
 0x8a2   : > { %v9492_v55 = vsel %vm2698_vm0, %v9218_v0, 0.0  ;;  %v10223_v12 = vand.u32 2147483647, %v17925_v28  ;;  %v10137_v4 = vsel %vm18077_vm4, %v10136_v2, %v10132_v34  ;;  %v10336_v5 = vsub.f32 1.0, %v18067_v38  ;;  %vm18105_vm1 = vmor %vm10219_vm12, %vm10220_vm14  ;;  %v18141_v2 = vpop.f32.mrf.mxu3 }
 0x8a3   : > { %v18095_v21 = vadd.f32 %v9770_v63, %v9769_v29  ;;  %v9493_v13 = vrot.slane %v9492_v55, 4  ;;  %v9774_v45 = vadd.f32 %v9773_v10, %v9772_v27  ;;  %v18102_v59 = vadd.f32 %v9441_v36, %v9440_v52 }
 0x8a4   : > { %v18099_v49 = vpop.eup %11635  ;;  %v10123_v31 = vmul.f32 %v10122_v39, %v17746_v15  ;;  %v10225_v7 = vand.u32 2147483648, %v17925_v28  ;;  %v9490_v54 = vrot.slane %v18088_v23, 1  ;;  %v10222_v52 = vsel %vm18105_vm1, %v17951_v58, %v10218_v42 }
 0x8a5   : > { %v18112_v40 = vadd.f32 %v9493_v13, %v9492_v55  ;;  %v9775_v56 = vrot.slane %v9774_v45, 2  ;;  %v10138_v36 = vmul.f32 %v10137_v4, %v17930_v46  ;;  %vm10224_vm8 = vcmp.eq.f32.partialorder %v10223_v12, 8.507059e+37 }
 0x8a6   : > { %v10226_v15 = vor.u32 1.1754944e-38, %v10225_v7  ;;  %v10231_v39 = vsub.f32 1.0, %v18026_v50  ;;  %11637 = vrcp.f32 %v18095_v21  ;;  %v10238_v6 = vand.u32 2147483647, %v17989_v48 }
 0x8a7   : > { %v9776_v28 = vadd.f32 %v9775_v56, %v9774_v45  ;;  %v10240_v29 = vand.u32 2147483648, %v17989_v48  ;;  %vm10235_vm9 = vweird.f32 %v18005_v20  ;;  %v10245_v58 = vmul.f32 %v18099_v49, %v18059_v18 }
 0x8a8   : > { %v10227_v41 = vsel %vm10224_vm8, %v10226_v15, %v10222_v52  ;;  %v10232_v8 = vmul.f32 %v18005_v20, %v10231_v39  ;;  %v9495_v46 = vrot.slane %v18112_v40, 2  ;;  %vm10234_vm10 = vweird.f32 %v17989_v48 }
 0x8a9   : > { %v9777_v50 = vrot.slane %v9776_v28, 1  ;;  %vm10249_vm11 = vweird.f32 %v18059_v18  ;;  %v10228_v61 = vmul.f32 %v10227_v41, %v17960_v19  ;;  %vm18137_vm15 = vcmp.eq.f32.partialorder %v10238_v6, 8.507059e+37  ;;  %vm10236_vm2 = vmor %vm10234_vm10, %vm10235_vm9 }
 0x8aa   : > { %v10233_v0 = vadd.f32 %v18005_v20, %v10232_v8  ;;  %v10246_v34 = vsub.f32 1.0, %v10245_v58  ;;  %v10241_v10 = vor.u32 1.1754944e-38, %v10240_v29  ;;  %v10253_v48 = vand.u32 2147483647, %v18059_v18 }
 0x8ab   : > { %v18143_v63 = vadd.f32 %v9777_v50, %v9776_v28  ;;  %v10255_v42 = vand.u32 2147483648, %v18059_v18  ;;  %vm10250_vm3 = vweird.f32 %v18099_v49  ;;  %v10400_v12 = vmax.f32 %v18041_v43, 0.0 }
 0x8ac   : > { %v10237_v19 = vsel %vm10236_vm2, %v18005_v20, %v10233_v0  ;;  %v10247_v55 = vmul.f32 %v18099_v49, %v10246_v34  ;;  %v18156_v13 = vpop.eup %11637  ;;  %vm18161_vm4 = vcmp.eq.f32.partialorder %v10253_v48, 8.507059e+37  ;;  %v10401_v43 = vmax.f32 %v10123_v31, 0.0  ;;  %vm10251_vm12 = vmor %vm10249_vm11, %vm10250_vm3 }
 0x8ad   : > { %11639 = vrcp.f32 %v18143_v63  ;;  %v10242_v45 = vsel %vm18137_vm15, %v10241_v10, %v10237_v19  ;;  %v10256_v20 = vor.u32 1.1754944e-38, %v10255_v42  ;;  %v10402_v56 = vmax.f32 %v10138_v36, 0.0  ;;  %v10617_v42 = vpop.f32.mrf.mxu3 }
 0x8ae   : > { %v10243_v9 = vmul.f32 %v10242_v45, %v18007_v32  ;;  %v10248_v7 = vadd.f32 %v18099_v49, %v10247_v55  ;;  %v10408_v52 = vmax.f32 %v10228_v61, 0.0  ;;  %v10439_v15 = vpack.c.bf16 %v10399_v44, %v10399_v44 }
 0x8af   : > { %v10440_v39 = vpack.c.bf16 %v10400_v12, %v10400_v12  ;;  %v10447_v28 = vpack.c.bf16 %v10407_v33, %v10407_v33  ;;  %v10441_v29 = vpack.c.bf16 %v10401_v43, %v10401_v43  ;;  %v10442_v41 = vpack.c.bf16 %v10402_v56, %v10402_v56 }
 0x8b0   : > { %v10252_v6 = vsel %vm10251_vm12, %v18099_v49, %v10248_v7  ;;  %v10409_v32 = vmax.f32 %v10243_v9, 0.0  ;;  %v10448_v31 = vpack.c.bf16 %v10408_v52, %v10408_v52  ;;  %v10520_v37 = vunpack.c.l.b16 %v10439_v15 }
 0x8b1   : > { %v10257_v18 = vsel %vm18161_vm4, %v10256_v20, %v10252_v6  ;;  %v10521_v36 = vunpack.c.l.b16 %v10440_v39  ;;  %v10522_v1 = vunpack.c.l.b16 %v10441_v29  ;;  %v10523_v58 = vunpack.c.l.b16 %v10442_v41 }
 0x8b2   : > { %v10258_v44 = vmul.f32 %v10257_v18, %v18102_v59  ;;  %v10449_v8 = vpack.c.bf16 %v10409_v32, %v10409_v32  ;;  %v10528_v49 = vunpack.c.l.b16 %v10447_v28  ;;  %v10529_v50 = vunpack.c.l.b16 %v10448_v31 }
 0x8b3   : > { %v18181_v33 = vpop.eup %11639  ;;  %vm19754_vm14 = vcmask 1044484   ;;  %v10568_v0 = vsel %vm10540_vm6, %v10525_v16, %v10524_v24  ;;  %v10350_v59 = vmul.f32 %v18156_v13, %v18095_v21  ;;  %vm19755_vm1 = vcmask 1045509   ;;  %v11657_v24 = vld [vmem:[%s18313_s6] sm:$0x1f] }
 0x8b4   : > { %v10564_v61 = vsel %vm19754_vm14, %v10520_v37, %v17580_v62  ;;  %v10410_v27 = vmax.f32 %v10258_v44, 0.0  ;;  %v19756_v10 = vunpack.c.l.b16 %v17886_v17  ;;  %v10530_v19 = vunpack.c.l.b16 %v10449_v8  ;;  %vm19759_vm9 = vmmov %vm19754_vm14 }
 0x8b5   : > { %v10565_v34 = vsel %vm19755_vm1, %v10521_v36, %v10564_v61  ;;  %vm19757_vm8 = vcmask 1046534   ;;  %v19758_v51 = vunpack.c.l.b16 %v17888_v11  ;;  %v18204_v16 = vperm.slane %v11657_v24, 4  ;;  %vm19760_vm10 = vmmov %vm19755_vm1 }
 0x8b6   : > { %v10569_v48 = vsel %vm10542_vm7, %v19756_v10, %v10568_v0  ;;  %v10566_v62 = vsel %vm19757_vm8, %v10522_v1, %v10565_v34  ;;  %v10450_v55 = vpack.c.bf16 %v10410_v27, %v10410_v27  ;;  %v10337_v11 = vmul.f32 %v18056_v47, %v10336_v5  ;;  %vm19761_vm2 = vmmov %vm19757_vm8 }
 0x8b7   : > { %v10570_v35 = vsel %vm10544_vm5, %v19758_v51, %v10569_v48  ;;  %v10567_v12 = vsel %vm10552_vm13, %v10523_v58, %v10566_v62  ;;  %v9496_v45 = vadd.f32 %v9495_v46, %v18112_v40  ;;  %v10616_v20 = vadd.f32 %v18141_v2, %v18204_v16 }
 0x8b8   : > { %v10571_v17 = vsel %vm19759_vm9, %v10528_v49, %v10570_v35  ;;  %v10618_v9 = vadd.f32 %v10617_v42, %v18204_v16  ;;  %v10531_v7 = vunpack.c.l.b16 %v10450_v55  ;;  %v10338_v43 = vadd.f32 %v18056_v47, %v10337_v11 }
 0x8b9   : > { %v10572_v4 = vsel %vm19760_vm10, %v10529_v50, %v10571_v17  ;;  %vm10339_vm11 = vweird.f32 %v18022_v57  ;;  %vm10340_vm15 = vweird.f32 %v18056_v47  ;;  %10629 = vst.msk [vmem:[%s18211_s10] sm:$0xff] %vm2698_vm0, %v10616_v20  ;;  %v10343_v40 = vand.u32 2147483647, %v18022_v57 }
 0x8ba   : > { %v10573_v38 = vsel %vm19761_vm2, %v10530_v19, %v10572_v4  ;;  %vm18229_vm3 = vmor %vm10339_vm11, %vm10340_vm15  ;;  %v10345_v46 = vand.u32 2147483648, %v18022_v57  ;;  %v10351_v2 = vsub.f32 1.0, %v10350_v59  ;;  %v9484_v56 = vadd.f32 %v9483_v26, %v18028_v22  ;;  %10630 = vst.msk [vmem:[%s18211_s10 + $0x8] sm:$0xff] %vm2698_vm0, %v10618_v9 }
 0x8bb   : > { %v10574_v52 = vsel %vm10552_vm13, %v10531_v7, %v10573_v38  ;;  %v10342_v15 = vsel %vm18229_vm3, %v18056_v47, %v10338_v43  ;;  %v10358_v39 = vand.u32 2147483647, %v18095_v21  ;;  %vm10355_vm4 = vweird.f32 %v18156_v13 }
 0x8bc   : > { %v10583_v28 = vpack.c.b16 %v10574_v52, %v10567_v12  ;;  %v10346_v6 = vor.u32 1.1754944e-38, %v10345_v46  ;;  %v10352_v32 = vmul.f32 %v18156_v13, %v10351_v2  ;;  %v9491_v57 = vadd.f32 %v9490_v54, %v18088_v23 }
 0x8bd   : > { %vm10344_vm12 = vcmp.eq.f32.partialorder %v10343_v40, 8.507059e+37  ;;  %v10360_v22 = vand.u32 2147483648, %v18095_v21  ;;  %v10365_v26 = vmul.f32 %v18181_v33, %v18143_v63  ;;  %v9497_v29 = vrot.slane %v9496_v45, 1 }
 0x8be   : > { %11051 = vmatmul.msk.bf16.gmra.mxu3 %vm2698_vm0, %v10583_v28  ;;  %v10347_v47 = vsel %vm10344_vm12, %v10346_v6, %v10342_v15  ;;  %v10353_v41 = vadd.f32 %v18156_v13, %v10352_v32  ;;  %vm10354_vm14 = vweird.f32 %v18095_v21  ;;  %vm10359_vm8 = vcmp.eq.f32.partialorder %v10358_v39, 8.507059e+37 }
 0x8bf   : > { %v10348_v18 = vmul.f32 %v10347_v47, %v9484_v56  ;;  %vm10356_vm1 = vmor %vm10354_vm14, %vm10355_vm4  ;;  %v10361_v31 = vor.u32 1.1754944e-38, %v10360_v22  ;;  %v10366_v37 = vsub.f32 1.0, %v10365_v26  ;;  %vm10370_vm9 = vweird.f32 %v18181_v33 }
 0x8c0   : > { %v10357_v23 = vsel %vm10356_vm1, %v18156_v13, %v10353_v41  ;;  %v10375_v54 = vand.u32 2147483648, %v18143_v63  ;;  %v10415_v36 = vmax.f32 %v18014_v3, 0.0  ;;  %v10373_v1 = vand.u32 2147483647, %v18143_v63 }
 0x8c1   : > { %v10362_v44 = vsel %vm10359_vm8, %v10361_v31, %v10357_v23  ;;  %v10367_v8 = vmul.f32 %v18181_v33, %v10366_v37  ;;  %v10416_v58 = vmax.f32 %v10348_v18, 0.0  ;;  %v19764_v21 = vmax.f32 %v17891_v30, 0.0 }
 0x8c2   : > { %v10363_v50 = vmul.f32 %v10362_v44, %v9491_v57  ;;  %v19765_v61 = vmax.f32 %v17725_v53, 0.0  ;;  %v10454_v0 = vpack.c.bf16 %v10414_v60, %v10414_v60  ;;  %vm10369_vm10 = vweird.f32 %v18143_v63 }
 0x8c3   : > { %v10453_v49 = vpack.c.bf16 %v19764_v21, %v19764_v21  ;;  %v10368_v3 = vadd.f32 %v18181_v33, %v10367_v8  ;;  %v10533_v59 = vunpack.c.l.b16 %v17755_v14  ;;  %vm10371_vm11 = vmor %vm10369_vm10, %vm10370_vm9  ;;  %v10376_v27 = vor.u32 1.1754944e-38, %v10375_v54 }
 0x8c4   : > { %v10451_v13 = vpack.c.bf16 %v19765_v61, %v19765_v61  ;;  %v10417_v30 = vmax.f32 %v10363_v50, 0.0  ;;  %v10455_v34 = vpack.c.bf16 %v10415_v36, %v10415_v36  ;;  %v9498_v10 = vadd.f32 %v9497_v29, %v9496_v45 }
 0x8c5   : > { %v10372_v48 = vsel %vm10371_vm11, %v18181_v33, %v10368_v3  ;;  %vm10374_vm15 = vcmp.eq.f32.partialorder %v10373_v1, 8.507059e+37  ;;  %v10456_v53 = vpack.c.bf16 %v10416_v58, %v10416_v58  ;;  %v10534_v42 = vunpack.c.l.b16 %v10453_v49 }
 0x8c6   : > { %v10377_v19 = vsel %vm10374_vm15, %v10376_v27, %v10372_v48  ;;  %v10457_v25 = vpack.c.bf16 %v10417_v30, %v10417_v30  ;;  %v10532_v62 = vunpack.c.l.b16 %v10451_v13  ;;  %v10535_v60 = vunpack.c.l.b16 %v10454_v0 }
 0x8c7   : > { %v10378_v51 = vmul.f32 %v10377_v19, %v9498_v10  ;;  %v10536_v35 = vunpack.c.l.b16 %v10455_v34  ;;  %v10537_v63 = vunpack.c.l.b16 %v10456_v53  ;;  %vm19766_vm2 = vcmask 1044484  }
 0x8c8   : > { %v10575_v14 = vsel %vm10540_vm6, %v10533_v59, %v10532_v62  ;;  %v10538_v55 = vunpack.c.l.b16 %v10457_v25  ;;  %vm19767_vm3 = vcmask 1045509   ;;  %vm19768_vm4 = vcmask 1046534  }
 0x8c9   : > { %v10418_v24 = vmax.f32 %v10378_v51, 0.0  ;;  %v10576_v12 = vsel %vm10542_vm7, %v10534_v42, %v10575_v14 }
 0x8ca   : > { %v10577_v33 = vsel %vm10544_vm5, %v10535_v60, %v10576_v12 }
 0x8cb   : > { %v10458_v17 = vpack.c.bf16 %v10418_v24, %v10418_v24  ;;  %v10578_v11 = vsel %vm19766_vm2, %v10536_v35, %v10577_v33 }
 0x8cc   : > { %v10579_v4 = vsel %vm19767_vm3, %v10537_v63, %v10578_v11 }
 0x8cd   : > { %v10539_v45 = vunpack.c.l.b16 %v10458_v17  ;;  %v10580_v20 = vsel %vm19768_vm4, %v10538_v55, %v10579_v4 }
 0x8cf   : > { %v10581_v9 = vsel %vm10552_vm13, %v10539_v45, %v10580_v20 }
 0x8d0   : > { %v10584_v7 = vpack.c.b16 %v10581_v9, %v10581_v9 }
 0x8d2   : > { %11052 = vmatmul.msk.bf16.gmra.mxu3 %vm2698_vm0, %v10584_v7 }
 0x941   : > { %v10620_v43 = vpop.f32.mrf.mxu3 }
 0x942   : > { %v10621_v38 = vadd.f32 %v10620_v43, %v18204_v16 }
 0x944   : > { %10631 = vst.msk [vmem:[%s18211_s10 + $0x10] sm:$0xff] %vm2698_vm0, %v10621_v38 }
 0x949   : > { %v10622_v5 = vpop.f32.mrf.mxu3 }
 0x94a   : > { %v10623_v40 = vadd.f32 %v10622_v5, %v18204_v16 }
 0x94c   : > { %10632 = vst.msk [vmem:[%s18211_s10 + $0x18] sm:$0xff] %vm2698_vm0, %v10623_v40 }
 0x955   : > { %v10625_v46 = vpop.f32.mrf.mxu3 }
 0x956   : > { %v10626_v2 = vadd.f32 %v10625_v46, %v18204_v16 }
 0x958   : > { %10633 = vst.msk [vmem:[%s18211_s10 + $0x20] sm:$0xff] %vm2698_vm0, %v10626_v2 }
 0x95d   : > { %v10627_v56 = vpop.f32.mrf.mxu3 }
 0x95e PF: > { %s17_s28 = sadd.s32 1, %s11696_s28   ;;  %s19769_s24 = smov %s11688_s26 }
 0x95f   : > { %p14_p8 = scmp.ge.s32.totalorder %s17_s28, 6   ;;  %s19770_s25 = smov %s11692_s27 }
 0x960   : > { %s19771_s26 = smov %s19774_s29  ;;  %s19772_s27 = smov %s19778_s30 }
 0x961   :  { %16 = sbr.rel (!%p14_p8) target bundleno = 3 (0x3), region = 81 }

</bundles_post_ra>
